<compile_context>
chip_gen: v5e
topology: v5e:2x2
jax: 0.10.0
libtpu: 0.0.40
codegen_flags: <defaults>
</compile_context>

<pallas_src>
import numpy as np

import jax
import jax.numpy as jnp
from jax.experimental import pallas as pl
from jax.experimental.pallas import tpu as pltpu


# ----------------------------------------------------------------------------
# Fused backbone kernel: conv1+relu+pool1 -> conv2+relu+pool2 -> fc1 -> fc2 -> head.
# All matmuls are bf16 x bf16 -> f32; bias/ReLU epilogues in f32.
# ----------------------------------------------------------------------------
def _make_backbone_kernel(B, n1, n2, c1p, c2, use_fsel):
    blk1 = B * n1 * n1          # rows per pool1 2x2-window offset (8-aligned for B=8)
    blk2 = B * n2 * n2          # rows per pool2 2x2-window offset
    nsp = n2 * n2

    def kernel(*refs):
        if use_fsel:
            (p1_ref, w1_ref, b1_ref, t2_ref, w2_ref, b2_ref,
             wf1_ref, bf1_ref, fsel_ref, wf2_ref, bf2_ref,
             wh_ref, bh_ref, head_ref) = refs
        else:
            (p1_ref, w1_ref, b1_ref, t2_ref, w2_ref, b2_ref,
             wf1_ref, bf1_ref, wf2_ref, bf2_ref,
             wh_ref, bh_ref, head_ref) = refs

        w1 = w1_ref[...]
        b1 = b1_ref[...]

        # conv1 + bias + relu fused with maxpool1: the 4 pool-window offsets are
        # contiguous blk1-row blocks of the pre-ordered im2col matrix, so the pool is a
        # running max over 4 aligned ref slices (no reshape, bounded register pressure).
        pool1 = None
        for w in range(4):
            part = jnp.dot(p1_ref[w * blk1:(w + 1) * blk1, :].astype(jnp.bfloat16),
                           w1, preferred_element_type=jnp.float32)
            part = jnp.maximum(part + b1, 0.0)
            pool1 = part if pool1 is None else jnp.maximum(pool1, part)
        pool1 = pool1.astype(jnp.bfloat16)                       # (blk1, c1p)

        # conv2 via 9 taps: the constant 0/1 selection matmul IS the im2col row gather
        # (done on the MXU, no sublane gathers), followed by the per-tap weight matmul.
        acc2 = None
        for t in range(9):
            sel = t2_ref[t * 4 * blk2:(t + 1) * 4 * blk2, :]     # (4*blk2, blk1) bf16
            g = jnp.dot(sel, pool1, preferred_element_type=jnp.float32)
            wt = w2_ref[t * c1p:(t + 1) * c1p, :]                # (c1p, c2) bf16
            c = jnp.dot(g.astype(jnp.bfloat16), wt,
                        preferred_element_type=jnp.float32)
            acc2 = c if acc2 is None else acc2 + c
        h2 = jnp.maximum(acc2 + b2_ref[...], 0.0)                # (4*blk2, c2)

        # maxpool2: again 4 contiguous blk2-row blocks (8-aligned for B=8).
        feat = jnp.maximum(jnp.maximum(h2[0:blk2], h2[blk2:2 * blk2]),
                           jnp.maximum(h2[2 * blk2:3 * blk2], h2[3 * blk2:4 * blk2]))
        feat = feat.astype(jnp.bfloat16)                          # (blk2, c2)

        # fc1.  For the demo patch size the final spatial is 1x1 so feat is already the
        # flattened (B, c2) feature matrix in PyTorch's flatten order.  For larger
        # patches the spatial flatten is done with the same selection-matmul trick.
        if use_fsel:
            h3 = None
            for s in range(nsp):
                sel = fsel_ref[s * B:(s + 1) * B, :].astype(jnp.bfloat16)  # (B, blk2)
                g = jnp.dot(sel, feat, preferred_element_type=jnp.float32)
                ws = wf1_ref[s * c2:(s + 1) * c2, :]
                c = jnp.dot(g.astype(jnp.bfloat16), ws,
                            preferred_element_type=jnp.float32)
                h3 = c if h3 is None else h3 + c
        else:
            h3 = jnp.dot(feat, wf1_ref[...], preferred_element_type=jnp.float32)
        h3 = jnp.maximum(h3 + bf1_ref[...], 0.0)                  # (B, 512)

        h4 = jnp.dot(h3.astype(jnp.bfloat16), wf2_ref[...],
                     preferred_element_type=jnp.float32)
        h4 = jnp.maximum(h4 + bf2_ref[...], 0.0)                  # (B, 512)

        hd = jnp.dot(h4.astype(jnp.bfloat16), wh_ref[...],
                     preferred_element_type=jnp.float32)
        head_ref[...] = hd + bh_ref[...]                          # (B, 128) lane-dense

    return kernel


# ----------------------------------------------------------------------------
# Constant 0/1 gather matrices (built once at init).
# ----------------------------------------------------------------------------
def _build_conv2_select(B, n1, n2):
    """(9*4*B*n2^2, B*n1^2): block t=(di*3+dj) gathers, for each needed conv2 output
    pixel, the pool1 row for tap (di,dj).  Rows inside a block are ordered
    (pool2-window offset, b, ii2, jj2) so maxpool2 becomes a max of 4 contiguous
    row blocks.  pool1 rows are ordered (b, ii, jj)."""
    rows = 4 * B * n2 * n2
    cols = B * n1 * n1
    mats = []
    for di in range(3):
        for dj in range(3):
            m = np.zeros((rows, cols), np.float32)
            r = 0
            for p2 in range(2):
                for q2 in range(2):
                    for b in range(B):
                        for ii2 in range(n2):
                            for jj2 in range(n2):
                                i2 = 2 * ii2 + p2
                                j2 = 2 * jj2 + q2
                                m[r, b * n1 * n1 + (i2 + di) * n1 + (j2 + dj)] = 1.0
                                r += 1
            mats.append(m)
    return jnp.asarray(np.concatenate(mats, axis=0), dtype=jnp.bfloat16)


def _build_fc1_select(B, n2):
    """Only needed when the final spatial size n2 > 1: block s gathers, per sample,
    the pool2 row for spatial position s."""
    nsp = n2 * n2
    m = np.zeros((nsp * B, B * nsp), np.float32)
    for s in range(nsp):
        for b in range(B):
            m[s * B + b, b * nsp + s] = 1.0
    return jnp.asarray(m, jnp.float32)


# ----------------------------------------------------------------------------
# Parameter init (PyTorch-default-like uniform bounds), pre-transposed bf16 weights.
# ----------------------------------------------------------------------------
def _uniform(key, shape, bound):
    return jax.random.uniform(key, shape, jnp.float32, -bound, bound)


def _conv1_params(key, cin, cout, cpad):
    k1, k2 = jax.random.split(key)
    bound = 1.0 / ((cin * 9) ** 0.5)
    w = _uniform(k1, (cout, cin, 3, 3), bound)                 # PyTorch layout
    b = _uniform(k2, (cout,), bound)
    w = w.transpose(2, 3, 1, 0).reshape(9 * cin, cout)         # rows (di, dj, cin)
    w = jnp.pad(w, ((0, 0), (0, cpad - cout)))                 # lane-dense Cout
    b = jnp.pad(b, (0, cpad - cout)).reshape(1, cpad)
    return w.astype(jnp.bfloat16), b.astype(jnp.float32)


def _conv2_params(key, cin, cpad, cout):
    k1, k2 = jax.random.split(key)
    bound = 1.0 / ((cin * 9) ** 0.5)
    w = _uniform(k1, (cout, cin, 3, 3), bound)
    b = _uniform(k2, (cout,), bound)
    w = w.transpose(2, 3, 1, 0)                                # (3,3,cin,cout)
    w = jnp.pad(w, ((0, 0), (0, 0), (0, cpad - cin), (0, 0)))  # zero rows: padded cin
    w = w.reshape(9 * cpad, cout)                              # rows (tap, cin_padded)
    return w.astype(jnp.bfloat16), b.reshape(1, cout).astype(jnp.float32)


def _fc1_params(key, c2, n2, dim):
    nsp = n2 * n2
    in_f = c2 * nsp
    k1, k2 = jax.random.split(key)
    bound = 1.0 / (in_f ** 0.5)
    w = _uniform(k1, (dim, in_f), bound)                       # inputs in (c, i, j) order
    b = _uniform(k2, (dim,), bound).reshape(1, dim)
    if nsp > 1:                                                # reorder inputs to (s, c)
        perm = np.arange(in_f).reshape(c2, nsp).T.reshape(-1)
        w = w[:, perm]
    return w.T.astype(jnp.bfloat16), b.astype(jnp.float32)


def _linear_params(key, in_f, out_f, dtype=jnp.bfloat16):
    k1, k2 = jax.random.split(key)
    bound = 1.0 / (in_f ** 0.5)
    w = _uniform(k1, (out_f, in_f), bound)
    b = _uniform(k2, (out_f,), bound)
    return w.T.astype(dtype), b.reshape(1, out_f).astype(jnp.float32)


def _linear_raw(key, in_f, out_f):
    k1, k2 = jax.random.split(key)
    bound = 1.0 / (in_f ** 0.5)
    w = _uniform(k1, (out_f, in_f), bound).T                   # (in_f, out_f) f32
    b = _uniform(k2, (out_f,), bound).reshape(1, out_f)
    return w, b


def _pad_head(wT, b, pad_to):
    out_f = wT.shape[1]
    wp = jnp.pad(wT, ((0, 0), (0, pad_to - out_f))).astype(jnp.bfloat16)
    bp = jnp.pad(b, ((0, 0), (0, pad_to - out_f))).astype(jnp.float32)
    return wp, bp


# ----------------------------------------------------------------------------
# Discriminator
# ----------------------------------------------------------------------------
class Discriminator:
    DIM = 512
    C1 = 64        # conv1 real output channels
    C1P = 128      # conv1 channels padded to lane width
    C2 = 128       # conv2 output channels
    HEAD_PAD = 128

    def __init__(self, inchannel, outchannel, num_classes, patch_size, batch, key):
        self.inchannel = inchannel
        self.outchannel = outchannel
        self.num_classes = num_classes
        self.patch_size = patch_size
        self.batch = batch
        assert num_classes + outchannel <= self.HEAD_PAD

        hc1 = patch_size - 2          # conv1 output spatial (3x3 valid)
        n1 = hc1 // 2                 # after MaxPool2d(2)
        hc2 = n1 - 2                  # conv2 output spatial
        n2 = hc2 // 2                 # after MaxPool2d(2)
        assert n1 >= 3 and n2 >= 1, "patch_size too small"
        self.n1, self.n2 = n1, n2

        keys = jax.random.split(key, 10)
        self.conv1_w, self.conv1_b = _conv1_params(keys[0], inchannel, self.C1, self.C1P)
        self.conv2_w, self.conv2_b = _conv2_params(keys[1], self.C1, self.C1P, self.C2)
        self.fc1_w, self.fc1_b = _fc1_params(keys[2], self.C2, n2, self.DIM)
        self.fc2_w, self.fc2_b = _linear_params(keys[3], self.DIM, self.DIM)

        cls_w, cls_b = _linear_raw(keys[4], self.DIM, num_classes)
        pro_w, pro_b = _linear_raw(keys[5], self.DIM, outchannel)
        sel_w, sel_b = _linear_raw(keys[6], self.DIM, outchannel)
        # All heads padded to 128 output columns (zero cols / zero bias) so the single
        # HBM store per pass is lane-dense; the wrapper slices the real columns.
        self.cls_head = _pad_head(cls_w, cls_b, self.HEAD_PAD)
        self.train_head = _pad_head(jnp.concatenate([cls_w, pro_w], axis=1),
                                    jnp.concatenate([cls_b, pro_b], axis=1),
                                    self.HEAD_PAD)
        self.fftsel_head = _pad_head(sel_w, sel_b, self.HEAD_PAD)

        # TODO(synk): original code hard-codes fc*_forU to batch_size=64 but pads the
        # score vector to 256 (shape-inconsistent in PyTorch); here the U-head is sized
        # to the actual batch so the forward is well-defined.
        self.fc1u_w, self.fc1u_b = _linear_params(keys[7], batch, max(batch // 2, 1),
                                                  dtype=jnp.float32)
        self.fc2u_w, self.fc2u_b = _linear_params(keys[8], max(batch // 2, 1),
                                                  max(batch // 4, 1), dtype=jnp.float32)
        self.fc3u_w, self.fc3u_b = _linear_params(keys[9], max(batch // 4, 1), 1,
                                                  dtype=jnp.float32)

        # Constant gather matrices for in-kernel conv2 im2col / pool2 / flatten.
        self.t2 = _build_conv2_select(batch, n1, n2)
        self.fsel = _build_fc1_select(batch, n2) if n2 > 1 else None
        self._kernel = _make_backbone_kernel(batch, n1, n2, self.C1P, self.C2,
                                             use_fsel=(n2 > 1))

    # im2col of the raw NHWC input, rows ordered (pool-window offset, b, ii, jj) so the
    # in-kernel maxpool1 is a max over 4 contiguous row blocks; columns (di, dj, cin)
    # match the conv1 weight row order.  Only pool-consumed pixels are emitted.
    def _im2col_pool1_order(self, x):
        B, P, _, C = x.shape
        hc = P - 2
        n1 = self.n1
        cols = [x[:, di:di + hc, dj:dj + hc, :] for di in range(3) for dj in range(3)]
        pat = jnp.concatenate(cols, axis=-1)                  # (B, hc, hc, 9C)
        pat = pat[:, :2 * n1, :2 * n1, :]
        pat = pat.reshape(B, n1, 2, n1, 2, 9 * C)
        pat = pat.transpose(2, 4, 0, 1, 3, 5)                 # (p, q, B, n1, n1, 9C)
        return pat.reshape(4 * B * n1 * n1, 9 * C)            # f32

    def _backbone_call(self, p1, head_w, head_b):
        B = self.batch
        full2 = lambda i: (0, 0)
        inputs = [p1, self.conv1_w, self.conv1_b, self.t2, self.conv2_w, self.conv2_b,
                  self.fc1_w, self.fc1_b]
        if self.fsel is not None:
            inputs.append(self.fsel)
        inputs += [self.fc2_w, self.fc2_b, head_w, head_b]
        in_specs = [pl.BlockSpec(a.shape, full2) for a in inputs]
        return pl.pallas_call(
            self._kernel,
            out_shape=jax.ShapeDtypeStruct((B, self.HEAD_PAD), jnp.float32),
            grid_spec=pltpu.PrefetchScalarGridSpec(
                num_scalar_prefetch=0,
                grid=(1,),
                in_specs=in_specs,
                out_specs=pl.BlockSpec((B, self.HEAD_PAD), full2)),
            compiler_params=pltpu.CompilerParams(
                dimension_semantics=("arbitrary",)),
        )(*inputs)

    def get_top_mask(self, x_nhwc, x_fft):
        p1 = self._im2col_pool1_order(x_fft + x_nhwc)
        out5 = self._backbone_call(p1, *self.fftsel_head)     # (B,128); padded cols = 0
        s = jnp.sum(out5, axis=1)                             # == torch sum over dim=1
        # Tiny U-head chain as plain XLA dots (a Pallas tile would be >95% padding).
        x_u = s.reshape(1, -1)
        x_u = jnp.maximum(x_u @ self.fc1u_w + self.fc1u_b, 0.0)
        x_u = jnp.maximum(x_u @ self.fc2u_w + self.fc2u_b, 0.0)
        x_u = x_u @ self.fc3u_w + self.fc3u_b
        u = jax.nn.sigmoid(x_u[0, 0])
        threshold = s.min() + u * (s.max() - s.min())
        return s >= threshold

    def __call__(self, x, mode="test"):
        # NCHW -> NHWC once; everything downstream stays NHWC.
        x = x.astype(jnp.float32).transpose(0, 2, 3, 1)
        # TODO(synk): FFT has no Pallas primitive; computed ONCE with XLA jnp.fft.fftn
        # and reused by the mask path and the masked-select path.  fftn over the last
        # three axes is axis-order independent, so NHWC matches the NCHW reference.
        x_fft = jnp.real(jnp.fft.fftn(x, axes=(-3, -2, -1)))
        mask = self.get_top_mask(x, x_fft)
        # x[top_indices] = real(fftn(x[top_indices])) is per-sample, so masked select
        # on the full-batch FFT is exactly equivalent.
        x = jnp.where(mask[:, None, None, None], x_fft, x)

        head_w, head_b = self.train_head if mode == "train" else self.cls_head
        p1 = self._im2col_pool1_order(x)
        head = self._backbone_call(p1, head_w, head_b)
        clss = head[:, :self.num_classes]
        if mode == "train":
            proj = head[:, self.num_classes:self.num_classes + self.outchannel]
            norm = jnp.maximum(jnp.linalg.norm(proj, axis=1, keepdims=True), 1e-12)
            return clss, proj / norm
        return clss


if __name__ == "__main__":
    key = jax.random.PRNGKey(0)
    kx, kp = jax.random.split(key)

    batch, inchannel, patch_size = 8, 4, 13
    outchannel, num_classes = 16, 7

    x = jax.random.normal(kx, (batch, inchannel, patch_size, patch_size), jnp.float32)
    model = Discriminator(inchannel, outchannel, num_classes, patch_size, batch, kp)

    fwd = jax.jit(lambda xx: model(xx, mode="test"))
    clss = jax.block_until_ready(fwd(x))
    assert clss.shape == (batch, num_classes)
    assert bool(jnp.all(jnp.isfinite(clss)))
    print("KERNEL_OK")
</pallas_src>

<mosaic_0001>
module attributes {stable_mosaic.version = 11 : i64} {
  func.func @kernel(%arg0: i32, %arg1: memref<800x36xf32, #tpu.memory_space<vmem>>, %arg2: memref<36x128xbf16, #tpu.memory_space<vmem>>, %arg3: memref<1x128xf32, #tpu.memory_space<vmem>>, %arg4: memref<288x200xbf16, #tpu.memory_space<vmem>>, %arg5: memref<1152x128xbf16, #tpu.memory_space<vmem>>, %arg6: memref<1x128xf32, #tpu.memory_space<vmem>>, %arg7: memref<128x512xbf16, #tpu.memory_space<vmem>>, %arg8: memref<1x512xf32, #tpu.memory_space<vmem>>, %arg9: memref<512x512xbf16, #tpu.memory_space<vmem>>, %arg10: memref<1x512xf32, #tpu.memory_space<vmem>>, %arg11: memref<512x128xbf16, #tpu.memory_space<vmem>>, %arg12: memref<1x128xf32, #tpu.memory_space<vmem>>, %arg13: memref<8x128xf32, #tpu.memory_space<vmem>>) attributes {dimension_semantics = [#tpu.dimension_semantics<arbitrary>], iteration_bounds = array<i64: 1>, scalar_prefetch = 0 : i64, scratch_operands = 0 : i64, tpu.core_type = #tpu.core_type<tc>, window_params = [{pipeline_mode = #tpu.pipeline_mode<synchronous>, transform_indices = @transform_0, window_bounds = array<i64: 800, 36>}, {pipeline_mode = #tpu.pipeline_mode<synchronous>, transform_indices = @transform_1, window_bounds = array<i64: 36, 128>}, {pipeline_mode = #tpu.pipeline_mode<synchronous>, transform_indices = @transform_2, window_bounds = array<i64: 1, 128>}, {pipeline_mode = #tpu.pipeline_mode<synchronous>, transform_indices = @transform_3, window_bounds = array<i64: 288, 200>}, {pipeline_mode = #tpu.pipeline_mode<synchronous>, transform_indices = @transform_4, window_bounds = array<i64: 1152, 128>}, {pipeline_mode = #tpu.pipeline_mode<synchronous>, transform_indices = @transform_5, window_bounds = array<i64: 1, 128>}, {pipeline_mode = #tpu.pipeline_mode<synchronous>, transform_indices = @transform_6, window_bounds = array<i64: 128, 512>}, {pipeline_mode = #tpu.pipeline_mode<synchronous>, transform_indices = @transform_7, window_bounds = array<i64: 1, 512>}, {pipeline_mode = #tpu.pipeline_mode<synchronous>, transform_indices = @transform_8, window_bounds = array<i64: 512, 512>}, {pipeline_mode = #tpu.pipeline_mode<synchronous>, transform_indices = @transform_9, window_bounds = array<i64: 1, 512>}, {pipeline_mode = #tpu.pipeline_mode<synchronous>, transform_indices = @transform_10, window_bounds = array<i64: 512, 128>}, {pipeline_mode = #tpu.pipeline_mode<synchronous>, transform_indices = @transform_11, window_bounds = array<i64: 1, 128>}, {pipeline_mode = #tpu.pipeline_mode<synchronous>, transform_indices = @transform_12, window_bounds = array<i64: 8, 128>}]} {
    %c0 = arith.constant 0 : index
    %c0_0 = arith.constant 0 : index
    %0 = vector.load %arg2[%c0, %c0_0] : memref<36x128xbf16, #tpu.memory_space<vmem>>, vector<36x128xbf16>
    %c0_1 = arith.constant 0 : index
    %c0_2 = arith.constant 0 : index
    %1 = vector.load %arg3[%c0_1, %c0_2] : memref<1x128xf32, #tpu.memory_space<vmem>>, vector<1x128xf32>
    %c0_3 = arith.constant 0 : index
    %c0_4 = arith.constant 0 : index
    %2 = vector.load %arg1[%c0_3, %c0_4] : memref<800x36xf32, #tpu.memory_space<vmem>>, vector<200x36xf32>
    %3 = arith.truncf %2 : vector<200x36xf32> to vector<200x36xbf16>
    %cst = arith.constant dense<0.000000e+00> : vector<200x128xf32>
    %4 = tpu.matmul %3, %0, %cst {dimension_numbers = #tpu.dot_dimension_numbers<[1], [0], [0], [1], [0, 0, 1, 1], [], []>} : vector<200x36xbf16>, vector<36x128xbf16>, vector<200x128xf32> -> vector<200x128xf32>
    %5 = vector.broadcast %1 : vector<1x128xf32> to vector<200x128xf32>
    %6 = arith.addf %4, %5 : vector<200x128xf32>
    %cst_5 = arith.constant 0.000000e+00 : f32
    %7 = vector.broadcast %cst_5 : f32 to vector<200x128xf32>
    %8 = arith.maximumf %6, %7 : vector<200x128xf32>
    %c200 = arith.constant 200 : index
    %c0_6 = arith.constant 0 : index
    %9 = vector.load %arg1[%c200, %c0_6] : memref<800x36xf32, #tpu.memory_space<vmem>>, vector<200x36xf32>
    %10 = arith.truncf %9 : vector<200x36xf32> to vector<200x36xbf16>
    %cst_7 = arith.constant dense<0.000000e+00> : vector<200x128xf32>
    %11 = tpu.matmul %10, %0, %cst_7 {dimension_numbers = #tpu.dot_dimension_numbers<[1], [0], [0], [1], [0, 0, 1, 1], [], []>} : vector<200x36xbf16>, vector<36x128xbf16>, vector<200x128xf32> -> vector<200x128xf32>
    %12 = vector.broadcast %1 : vector<1x128xf32> to vector<200x128xf32>
    %13 = arith.addf %11, %12 : vector<200x128xf32>
    %cst_8 = arith.constant 0.000000e+00 : f32
    %14 = vector.broadcast %cst_8 : f32 to vector<200x128xf32>
    %15 = arith.maximumf %13, %14 : vector<200x128xf32>
    %16 = arith.maximumf %8, %15 : vector<200x128xf32>
    %c400 = arith.constant 400 : index
    %c0_9 = arith.constant 0 : index
    %17 = vector.load %arg1[%c400, %c0_9] : memref<800x36xf32, #tpu.memory_space<vmem>>, vector<200x36xf32>
    %18 = arith.truncf %17 : vector<200x36xf32> to vector<200x36xbf16>
    %cst_10 = arith.constant dense<0.000000e+00> : vector<200x128xf32>
    %19 = tpu.matmul %18, %0, %cst_10 {dimension_numbers = #tpu.dot_dimension_numbers<[1], [0], [0], [1], [0, 0, 1, 1], [], []>} : vector<200x36xbf16>, vector<36x128xbf16>, vector<200x128xf32> -> vector<200x128xf32>
    %20 = vector.broadcast %1 : vector<1x128xf32> to vector<200x128xf32>
    %21 = arith.addf %19, %20 : vector<200x128xf32>
    %cst_11 = arith.constant 0.000000e+00 : f32
    %22 = vector.broadcast %cst_11 : f32 to vector<200x128xf32>
    %23 = arith.maximumf %21, %22 : vector<200x128xf32>
    %24 = arith.maximumf %16, %23 : vector<200x128xf32>
    %c600 = arith.constant 600 : index
    %c0_12 = arith.constant 0 : index
    %25 = vector.load %arg1[%c600, %c0_12] : memref<800x36xf32, #tpu.memory_space<vmem>>, vector<200x36xf32>
    %26 = arith.truncf %25 : vector<200x36xf32> to vector<200x36xbf16>
    %cst_13 = arith.constant dense<0.000000e+00> : vector<200x128xf32>
    %27 = tpu.matmul %26, %0, %cst_13 {dimension_numbers = #tpu.dot_dimension_numbers<[1], [0], [0], [1], [0, 0, 1, 1], [], []>} : vector<200x36xbf16>, vector<36x128xbf16>, vector<200x128xf32> -> vector<200x128xf32>
    %28 = vector.broadcast %1 : vector<1x128xf32> to vector<200x128xf32>
    %29 = arith.addf %27, %28 : vector<200x128xf32>
    %cst_14 = arith.constant 0.000000e+00 : f32
    %30 = vector.broadcast %cst_14 : f32 to vector<200x128xf32>
    %31 = arith.maximumf %29, %30 : vector<200x128xf32>
    %32 = arith.maximumf %24, %31 : vector<200x128xf32>
    %33 = arith.truncf %32 : vector<200x128xf32> to vector<200x128xbf16>
    %c0_15 = arith.constant 0 : index
    %c0_16 = arith.constant 0 : index
    %34 = vector.load %arg4[%c0_15, %c0_16] : memref<288x200xbf16, #tpu.memory_space<vmem>>, vector<32x200xbf16>
    %cst_17 = arith.constant dense<0.000000e+00> : vector<32x128xf32>
    %35 = tpu.matmul %34, %33, %cst_17 {dimension_numbers = #tpu.dot_dimension_numbers<[1], [0], [0], [1], [0, 0, 1, 1], [], []>} : vector<32x200xbf16>, vector<200x128xbf16>, vector<32x128xf32> -> vector<32x128xf32>
    %c0_18 = arith.constant 0 : index
    %c0_19 = arith.constant 0 : index
    %36 = vector.load %arg5[%c0_18, %c0_19] : memref<1152x128xbf16, #tpu.memory_space<vmem>>, vector<128x128xbf16>
    %37 = arith.truncf %35 : vector<32x128xf32> to vector<32x128xbf16>
    %cst_20 = arith.constant dense<0.000000e+00> : vector<32x128xf32>
    %38 = tpu.matmul %37, %36, %cst_20 {dimension_numbers = #tpu.dot_dimension_numbers<[1], [0], [0], [1], [0, 0, 1, 1], [], []>} : vector<32x128xbf16>, vector<128x128xbf16>, vector<32x128xf32> -> vector<32x128xf32>
    %c32 = arith.constant 32 : index
    %c0_21 = arith.constant 0 : index
    %39 = vector.load %arg4[%c32, %c0_21] : memref<288x200xbf16, #tpu.memory_space<vmem>>, vector<32x200xbf16>
    %cst_22 = arith.constant dense<0.000000e+00> : vector<32x128xf32>
    %40 = tpu.matmul %39, %33, %cst_22 {dimension_numbers = #tpu.dot_dimension_numbers<[1], [0], [0], [1], [0, 0, 1, 1], [], []>} : vector<32x200xbf16>, vector<200x128xbf16>, vector<32x128xf32> -> vector<32x128xf32>
    %c128 = arith.constant 128 : index
    %c0_23 = arith.constant 0 : index
    %41 = vector.load %arg5[%c128, %c0_23] : memref<1152x128xbf16, #tpu.memory_space<vmem>>, vector<128x128xbf16>
    %42 = arith.truncf %40 : vector<32x128xf32> to vector<32x128xbf16>
    %cst_24 = arith.constant dense<0.000000e+00> : vector<32x128xf32>
    %43 = tpu.matmul %42, %41, %cst_24 {dimension_numbers = #tpu.dot_dimension_numbers<[1], [0], [0], [1], [0, 0, 1, 1], [], []>} : vector<32x128xbf16>, vector<128x128xbf16>, vector<32x128xf32> -> vector<32x128xf32>
    %44 = arith.addf %38, %43 : vector<32x128xf32>
    %c64 = arith.constant 64 : index
    %c0_25 = arith.constant 0 : index
    %45 = vector.load %arg4[%c64, %c0_25] : memref<288x200xbf16, #tpu.memory_space<vmem>>, vector<32x200xbf16>
    %cst_26 = arith.constant dense<0.000000e+00> : vector<32x128xf32>
    %46 = tpu.matmul %45, %33, %cst_26 {dimension_numbers = #tpu.dot_dimension_numbers<[1], [0], [0], [1], [0, 0, 1, 1], [], []>} : vector<32x200xbf16>, vector<200x128xbf16>, vector<32x128xf32> -> vector<32x128xf32>
    %c256 = arith.constant 256 : index
    %c0_27 = arith.constant 0 : index
    %47 = vector.load %arg5[%c256, %c0_27] : memref<1152x128xbf16, #tpu.memory_space<vmem>>, vector<128x128xbf16>
    %48 = arith.truncf %46 : vector<32x128xf32> to vector<32x128xbf16>
    %cst_28 = arith.constant dense<0.000000e+00> : vector<32x128xf32>
    %49 = tpu.matmul %48, %47, %cst_28 {dimension_numbers = #tpu.dot_dimension_numbers<[1], [0], [0], [1], [0, 0, 1, 1], [], []>} : vector<32x128xbf16>, vector<128x128xbf16>, vector<32x128xf32> -> vector<32x128xf32>
    %50 = arith.addf %44, %49 : vector<32x128xf32>
    %c96 = arith.constant 96 : index
    %c0_29 = arith.constant 0 : index
    %51 = vector.load %arg4[%c96, %c0_29] : memref<288x200xbf16, #tpu.memory_space<vmem>>, vector<32x200xbf16>
    %cst_30 = arith.constant dense<0.000000e+00> : vector<32x128xf32>
    %52 = tpu.matmul %51, %33, %cst_30 {dimension_numbers = #tpu.dot_dimension_numbers<[1], [0], [0], [1], [0, 0, 1, 1], [], []>} : vector<32x200xbf16>, vector<200x128xbf16>, vector<32x128xf32> -> vector<32x128xf32>
    %c384 = arith.constant 384 : index
    %c0_31 = arith.constant 0 : index
    %53 = vector.load %arg5[%c384, %c0_31] : memref<1152x128xbf16, #tpu.memory_space<vmem>>, vector<128x128xbf16>
    %54 = arith.truncf %52 : vector<32x128xf32> to vector<32x128xbf16>
    %cst_32 = arith.constant dense<0.000000e+00> : vector<32x128xf32>
    %55 = tpu.matmul %54, %53, %cst_32 {dimension_numbers = #tpu.dot_dimension_numbers<[1], [0], [0], [1], [0, 0, 1, 1], [], []>} : vector<32x128xbf16>, vector<128x128xbf16>, vector<32x128xf32> -> vector<32x128xf32>
    %56 = arith.addf %50, %55 : vector<32x128xf32>
    %c128_33 = arith.constant 128 : index
    %c0_34 = arith.constant 0 : index
    %57 = vector.load %arg4[%c128_33, %c0_34] : memref<288x200xbf16, #tpu.memory_space<vmem>>, vector<32x200xbf16>
    %cst_35 = arith.constant dense<0.000000e+00> : vector<32x128xf32>
    %58 = tpu.matmul %57, %33, %cst_35 {dimension_numbers = #tpu.dot_dimension_numbers<[1], [0], [0], [1], [0, 0, 1, 1], [], []>} : vector<32x200xbf16>, vector<200x128xbf16>, vector<32x128xf32> -> vector<32x128xf32>
    %c512 = arith.constant 512 : index
    %c0_36 = arith.constant 0 : index
    %59 = vector.load %arg5[%c512, %c0_36] : memref<1152x128xbf16, #tpu.memory_space<vmem>>, vector<128x128xbf16>
    %60 = arith.truncf %58 : vector<32x128xf32> to vector<32x128xbf16>
    %cst_37 = arith.constant dense<0.000000e+00> : vector<32x128xf32>
    %61 = tpu.matmul %60, %59, %cst_37 {dimension_numbers = #tpu.dot_dimension_numbers<[1], [0], [0], [1], [0, 0, 1, 1], [], []>} : vector<32x128xbf16>, vector<128x128xbf16>, vector<32x128xf32> -> vector<32x128xf32>
    %62 = arith.addf %56, %61 : vector<32x128xf32>
    %c160 = arith.constant 160 : index
    %c0_38 = arith.constant 0 : index
    %63 = vector.load %arg4[%c160, %c0_38] : memref<288x200xbf16, #tpu.memory_space<vmem>>, vector<32x200xbf16>
    %cst_39 = arith.constant dense<0.000000e+00> : vector<32x128xf32>
    %64 = tpu.matmul %63, %33, %cst_39 {dimension_numbers = #tpu.dot_dimension_numbers<[1], [0], [0], [1], [0, 0, 1, 1], [], []>} : vector<32x200xbf16>, vector<200x128xbf16>, vector<32x128xf32> -> vector<32x128xf32>
    %c640 = arith.constant 640 : index
    %c0_40 = arith.constant 0 : index
    %65 = vector.load %arg5[%c640, %c0_40] : memref<1152x128xbf16, #tpu.memory_space<vmem>>, vector<128x128xbf16>
    %66 = arith.truncf %64 : vector<32x128xf32> to vector<32x128xbf16>
    %cst_41 = arith.constant dense<0.000000e+00> : vector<32x128xf32>
    %67 = tpu.matmul %66, %65, %cst_41 {dimension_numbers = #tpu.dot_dimension_numbers<[1], [0], [0], [1], [0, 0, 1, 1], [], []>} : vector<32x128xbf16>, vector<128x128xbf16>, vector<32x128xf32> -> vector<32x128xf32>
    %68 = arith.addf %62, %67 : vector<32x128xf32>
    %c192 = arith.constant 192 : index
    %c0_42 = arith.constant 0 : index
    %69 = vector.load %arg4[%c192, %c0_42] : memref<288x200xbf16, #tpu.memory_space<vmem>>, vector<32x200xbf16>
    %cst_43 = arith.constant dense<0.000000e+00> : vector<32x128xf32>
    %70 = tpu.matmul %69, %33, %cst_43 {dimension_numbers = #tpu.dot_dimension_numbers<[1], [0], [0], [1], [0, 0, 1, 1], [], []>} : vector<32x200xbf16>, vector<200x128xbf16>, vector<32x128xf32> -> vector<32x128xf32>
    %c768 = arith.constant 768 : index
    %c0_44 = arith.constant 0 : index
    %71 = vector.load %arg5[%c768, %c0_44] : memref<1152x128xbf16, #tpu.memory_space<vmem>>, vector<128x128xbf16>
    %72 = arith.truncf %70 : vector<32x128xf32> to vector<32x128xbf16>
    %cst_45 = arith.constant dense<0.000000e+00> : vector<32x128xf32>
    %73 = tpu.matmul %72, %71, %cst_45 {dimension_numbers = #tpu.dot_dimension_numbers<[1], [0], [0], [1], [0, 0, 1, 1], [], []>} : vector<32x128xbf16>, vector<128x128xbf16>, vector<32x128xf32> -> vector<32x128xf32>
    %74 = arith.addf %68, %73 : vector<32x128xf32>
    %c224 = arith.constant 224 : index
    %c0_46 = arith.constant 0 : index
    %75 = vector.load %arg4[%c224, %c0_46] : memref<288x200xbf16, #tpu.memory_space<vmem>>, vector<32x200xbf16>
    %cst_47 = arith.constant dense<0.000000e+00> : vector<32x128xf32>
    %76 = tpu.matmul %75, %33, %cst_47 {dimension_numbers = #tpu.dot_dimension_numbers<[1], [0], [0], [1], [0, 0, 1, 1], [], []>} : vector<32x200xbf16>, vector<200x128xbf16>, vector<32x128xf32> -> vector<32x128xf32>
    %c896 = arith.constant 896 : index
    %c0_48 = arith.constant 0 : index
    %77 = vector.load %arg5[%c896, %c0_48] : memref<1152x128xbf16, #tpu.memory_space<vmem>>, vector<128x128xbf16>
    %78 = arith.truncf %76 : vector<32x128xf32> to vector<32x128xbf16>
    %cst_49 = arith.constant dense<0.000000e+00> : vector<32x128xf32>
    %79 = tpu.matmul %78, %77, %cst_49 {dimension_numbers = #tpu.dot_dimension_numbers<[1], [0], [0], [1], [0, 0, 1, 1], [], []>} : vector<32x128xbf16>, vector<128x128xbf16>, vector<32x128xf32> -> vector<32x128xf32>
    %80 = arith.addf %74, %79 : vector<32x128xf32>
    %c256_50 = arith.constant 256 : index
    %c0_51 = arith.constant 0 : index
    %81 = vector.load %arg4[%c256_50, %c0_51] : memref<288x200xbf16, #tpu.memory_space<vmem>>, vector<32x200xbf16>
    %cst_52 = arith.constant dense<0.000000e+00> : vector<32x128xf32>
    %82 = tpu.matmul %81, %33, %cst_52 {dimension_numbers = #tpu.dot_dimension_numbers<[1], [0], [0], [1], [0, 0, 1, 1], [], []>} : vector<32x200xbf16>, vector<200x128xbf16>, vector<32x128xf32> -> vector<32x128xf32>
    %c1024 = arith.constant 1024 : index
    %c0_53 = arith.constant 0 : index
    %83 = vector.load %arg5[%c1024, %c0_53] : memref<1152x128xbf16, #tpu.memory_space<vmem>>, vector<128x128xbf16>
    %84 = arith.truncf %82 : vector<32x128xf32> to vector<32x128xbf16>
    %cst_54 = arith.constant dense<0.000000e+00> : vector<32x128xf32>
    %85 = tpu.matmul %84, %83, %cst_54 {dimension_numbers = #tpu.dot_dimension_numbers<[1], [0], [0], [1], [0, 0, 1, 1], [], []>} : vector<32x128xbf16>, vector<128x128xbf16>, vector<32x128xf32> -> vector<32x128xf32>
    %86 = arith.addf %80, %85 : vector<32x128xf32>
    %c0_55 = arith.constant 0 : index
    %c0_56 = arith.constant 0 : index
    %87 = vector.load %arg6[%c0_55, %c0_56] : memref<1x128xf32, #tpu.memory_space<vmem>>, vector<1x128xf32>
    %88 = vector.broadcast %87 : vector<1x128xf32> to vector<32x128xf32>
    %89 = arith.addf %86, %88 : vector<32x128xf32>
    %cst_57 = arith.constant 0.000000e+00 : f32
    %90 = vector.broadcast %cst_57 : f32 to vector<32x128xf32>
    %91 = arith.maximumf %89, %90 : vector<32x128xf32>
    %92 = vector.extract_strided_slice %91 {offsets = [0, 0], sizes = [8, 128], strides = [1, 1]} : vector<32x128xf32> to vector<8x128xf32>
    %93 = vector.extract_strided_slice %91 {offsets = [8, 0], sizes = [8, 128], strides = [1, 1]} : vector<32x128xf32> to vector<8x128xf32>
    %94 = arith.maximumf %92, %93 : vector<8x128xf32>
    %95 = vector.extract_strided_slice %91 {offsets = [16, 0], sizes = [8, 128], strides = [1, 1]} : vector<32x128xf32> to vector<8x128xf32>
    %96 = vector.extract_strided_slice %91 {offsets = [24, 0], sizes = [8, 128], strides = [1, 1]} : vector<32x128xf32> to vector<8x128xf32>
    %97 = arith.maximumf %95, %96 : vector<8x128xf32>
    %98 = arith.maximumf %94, %97 : vector<8x128xf32>
    %99 = arith.truncf %98 : vector<8x128xf32> to vector<8x128xbf16>
    %c0_58 = arith.constant 0 : index
    %c0_59 = arith.constant 0 : index
    %100 = vector.load %arg7[%c0_58, %c0_59] : memref<128x512xbf16, #tpu.memory_space<vmem>>, vector<128x512xbf16>
    %cst_60 = arith.constant dense<0.000000e+00> : vector<8x512xf32>
    %101 = tpu.matmul %99, %100, %cst_60 {dimension_numbers = #tpu.dot_dimension_numbers<[1], [0], [0], [1], [0, 0, 1, 1], [], []>} : vector<8x128xbf16>, vector<128x512xbf16>, vector<8x512xf32> -> vector<8x512xf32>
    %c0_61 = arith.constant 0 : index
    %c0_62 = arith.constant 0 : index
    %102 = vector.load %arg8[%c0_61, %c0_62] : memref<1x512xf32, #tpu.memory_space<vmem>>, vector<1x512xf32>
    %103 = vector.broadcast %102 : vector<1x512xf32> to vector<8x512xf32>
    %104 = arith.addf %101, %103 : vector<8x512xf32>
    %cst_63 = arith.constant 0.000000e+00 : f32
    %105 = vector.broadcast %cst_63 : f32 to vector<8x512xf32>
    %106 = arith.maximumf %104, %105 : vector<8x512xf32>
    %107 = arith.truncf %106 : vector<8x512xf32> to vector<8x512xbf16>
    %c0_64 = arith.constant 0 : index
    %c0_65 = arith.constant 0 : index
    %108 = vector.load %arg9[%c0_64, %c0_65] : memref<512x512xbf16, #tpu.memory_space<vmem>>, vector<512x512xbf16>
    %cst_66 = arith.constant dense<0.000000e+00> : vector<8x512xf32>
    %109 = tpu.matmul %107, %108, %cst_66 {dimension_numbers = #tpu.dot_dimension_numbers<[1], [0], [0], [1], [0, 0, 1, 1], [], []>} : vector<8x512xbf16>, vector<512x512xbf16>, vector<8x512xf32> -> vector<8x512xf32>
    %c0_67 = arith.constant 0 : index
    %c0_68 = arith.constant 0 : index
    %110 = vector.load %arg10[%c0_67, %c0_68] : memref<1x512xf32, #tpu.memory_space<vmem>>, vector<1x512xf32>
    %111 = vector.broadcast %110 : vector<1x512xf32> to vector<8x512xf32>
    %112 = arith.addf %109, %111 : vector<8x512xf32>
    %cst_69 = arith.constant 0.000000e+00 : f32
    %113 = vector.broadcast %cst_69 : f32 to vector<8x512xf32>
    %114 = arith.maximumf %112, %113 : vector<8x512xf32>
    %115 = arith.truncf %114 : vector<8x512xf32> to vector<8x512xbf16>
    %c0_70 = arith.constant 0 : index
    %c0_71 = arith.constant 0 : index
    %116 = vector.load %arg11[%c0_70, %c0_71] : memref<512x128xbf16, #tpu.memory_space<vmem>>, vector<512x128xbf16>
    %cst_72 = arith.constant dense<0.000000e+00> : vector<8x128xf32>
    %117 = tpu.matmul %115, %116, %cst_72 {dimension_numbers = #tpu.dot_dimension_numbers<[1], [0], [0], [1], [0, 0, 1, 1], [], []>} : vector<8x512xbf16>, vector<512x128xbf16>, vector<8x128xf32> -> vector<8x128xf32>
    %c0_73 = arith.constant 0 : index
    %c0_74 = arith.constant 0 : index
    %118 = vector.load %arg12[%c0_73, %c0_74] : memref<1x128xf32, #tpu.memory_space<vmem>>, vector<1x128xf32>
    %119 = vector.broadcast %118 : vector<1x128xf32> to vector<8x128xf32>
    %120 = arith.addf %117, %119 : vector<8x128xf32>
    %c0_75 = arith.constant 0 : index
    %c0_76 = arith.constant 0 : index
    %121 = vector.load %arg13[%c0_75, %c0_76] : memref<8x128xf32, #tpu.memory_space<vmem>>, vector<8x128xf32>
    tpu.vector_store %arg13[%c0_75, %c0_76], %120 {strides = array<i32>} : memref<8x128xf32, #tpu.memory_space<vmem>>, vector<8x128xf32>,
    return
  }
  func.func @transform_0(%arg0: i32) -> (i32, i32) {
    %c0_i32 = arith.constant 0 : i32
    %c0_i32_0 = arith.constant 0 : i32
    %c0_i32_1 = arith.constant 0 : i32
    return %c0_i32, %c0_i32_0 : i32, i32
  }
  func.func @transform_1(%arg0: i32) -> (i32, i32) {
    %c0_i32 = arith.constant 0 : i32
    %c0_i32_0 = arith.constant 0 : i32
    %c0_i32_1 = arith.constant 0 : i32
    return %c0_i32, %c0_i32_0 : i32, i32
  }
  func.func @transform_2(%arg0: i32) -> (i32, i32) {
    %c0_i32 = arith.constant 0 : i32
    %c0_i32_0 = arith.constant 0 : i32
    %c0_i32_1 = arith.constant 0 : i32
    return %c0_i32, %c0_i32_0 : i32, i32
  }
  func.func @transform_3(%arg0: i32) -> (i32, i32) {
    %c0_i32 = arith.constant 0 : i32
    %c0_i32_0 = arith.constant 0 : i32
    %c0_i32_1 = arith.constant 0 : i32
    return %c0_i32, %c0_i32_0 : i32, i32
  }
  func.func @transform_4(%arg0: i32) -> (i32, i32) {
    %c0_i32 = arith.constant 0 : i32
    %c0_i32_0 = arith.constant 0 : i32
    %c0_i32_1 = arith.constant 0 : i32
    return %c0_i32, %c0_i32_0 : i32, i32
  }
  func.func @transform_5(%arg0: i32) -> (i32, i32) {
    %c0_i32 = arith.constant 0 : i32
    %c0_i32_0 = arith.constant 0 : i32
    %c0_i32_1 = arith.constant 0 : i32
    return %c0_i32, %c0_i32_0 : i32, i32
  }
  func.func @transform_6(%arg0: i32) -> (i32, i32) {
    %c0_i32 = arith.constant 0 : i32
    %c0_i32_0 = arith.constant 0 : i32
    %c0_i32_1 = arith.constant 0 : i32
    return %c0_i32, %c0_i32_0 : i32, i32
  }
  func.func @transform_7(%arg0: i32) -> (i32, i32) {
    %c0_i32 = arith.constant 0 : i32
    %c0_i32_0 = arith.constant 0 : i32
    %c0_i32_1 = arith.constant 0 : i32
    return %c0_i32, %c0_i32_0 : i32, i32
  }
  func.func @transform_8(%arg0: i32) -> (i32, i32) {
    %c0_i32 = arith.constant 0 : i32
    %c0_i32_0 = arith.constant 0 : i32
    %c0_i32_1 = arith.constant 0 : i32
    return %c0_i32, %c0_i32_0 : i32, i32
  }
  func.func @transform_9(%arg0: i32) -> (i32, i32) {
    %c0_i32 = arith.constant 0 : i32
    %c0_i32_0 = arith.constant 0 : i32
    %c0_i32_1 = arith.constant 0 : i32
    return %c0_i32, %c0_i32_0 : i32, i32
  }
  func.func @transform_10(%arg0: i32) -> (i32, i32) {
    %c0_i32 = arith.constant 0 : i32
    %c0_i32_0 = arith.constant 0 : i32
    %c0_i32_1 = arith.constant 0 : i32
    return %c0_i32, %c0_i32_0 : i32, i32
  }
  func.func @transform_11(%arg0: i32) -> (i32, i32) {
    %c0_i32 = arith.constant 0 : i32
    %c0_i32_0 = arith.constant 0 : i32
    %c0_i32_1 = arith.constant 0 : i32
    return %c0_i32, %c0_i32_0 : i32, i32
  }
  func.func @transform_12(%arg0: i32) -> (i32, i32) {
    %c0_i32 = arith.constant 0 : i32
    %c0_i32_0 = arith.constant 0 : i32
    %c0_i32_1 = arith.constant 0 : i32
    return %c0_i32, %c0_i32_0 : i32, i32
  }
}

module attributes {stable_mosaic.version = 11 : i64} {
  func.func @kernel(%arg0: i32, %arg1: memref<800x36xf32, #tpu.memory_space<vmem>>, %arg2: memref<36x128xbf16, #tpu.memory_space<vmem>>, %arg3: memref<1x128xf32, #tpu.memory_space<vmem>>, %arg4: memref<288x200xbf16, #tpu.memory_space<vmem>>, %arg5: memref<1152x128xbf16, #tpu.memory_space<vmem>>, %arg6: memref<1x128xf32, #tpu.memory_space<vmem>>, %arg7: memref<128x512xbf16, #tpu.memory_space<vmem>>, %arg8: memref<1x512xf32, #tpu.memory_space<vmem>>, %arg9: memref<512x512xbf16, #tpu.memory_space<vmem>>, %arg10: memref<1x512xf32, #tpu.memory_space<vmem>>, %arg11: memref<512x128xbf16, #tpu.memory_space<vmem>>, %arg12: memref<1x128xf32, #tpu.memory_space<vmem>>, %arg13: memref<8x128xf32, #tpu.memory_space<vmem>>) attributes {dimension_semantics = [#tpu.dimension_semantics<arbitrary>], iteration_bounds = array<i64: 1>, scalar_prefetch = 0 : i64, scratch_operands = 0 : i64, tpu.core_type = #tpu.core_type<tc>, window_params = [{pipeline_mode = #tpu.pipeline_mode<synchronous>, transform_indices = @transform_0, window_bounds = array<i64: 800, 36>}, {pipeline_mode = #tpu.pipeline_mode<synchronous>, transform_indices = @transform_1, window_bounds = array<i64: 36, 128>}, {pipeline_mode = #tpu.pipeline_mode<synchronous>, transform_indices = @transform_2, window_bounds = array<i64: 1, 128>}, {pipeline_mode = #tpu.pipeline_mode<synchronous>, transform_indices = @transform_3, window_bounds = array<i64: 288, 200>}, {pipeline_mode = #tpu.pipeline_mode<synchronous>, transform_indices = @transform_4, window_bounds = array<i64: 1152, 128>}, {pipeline_mode = #tpu.pipeline_mode<synchronous>, transform_indices = @transform_5, window_bounds = array<i64: 1, 128>}, {pipeline_mode = #tpu.pipeline_mode<synchronous>, transform_indices = @transform_6, window_bounds = array<i64: 128, 512>}, {pipeline_mode = #tpu.pipeline_mode<synchronous>, transform_indices = @transform_7, window_bounds = array<i64: 1, 512>}, {pipeline_mode = #tpu.pipeline_mode<synchronous>, transform_indices = @transform_8, window_bounds = array<i64: 512, 512>}, {pipeline_mode = #tpu.pipeline_mode<synchronous>, transform_indices = @transform_9, window_bounds = array<i64: 1, 512>}, {pipeline_mode = #tpu.pipeline_mode<synchronous>, transform_indices = @transform_10, window_bounds = array<i64: 512, 128>}, {pipeline_mode = #tpu.pipeline_mode<synchronous>, transform_indices = @transform_11, window_bounds = array<i64: 1, 128>}, {pipeline_mode = #tpu.pipeline_mode<synchronous>, transform_indices = @transform_12, window_bounds = array<i64: 8, 128>}]} {
    %c0 = arith.constant 0 : index
    %c0_0 = arith.constant 0 : index
    %0 = vector.load %arg2[%c0, %c0_0] : memref<36x128xbf16, #tpu.memory_space<vmem>>, vector<36x128xbf16>
    %c0_1 = arith.constant 0 : index
    %c0_2 = arith.constant 0 : index
    %1 = vector.load %arg3[%c0_1, %c0_2] : memref<1x128xf32, #tpu.memory_space<vmem>>, vector<1x128xf32>
    %c0_3 = arith.constant 0 : index
    %c0_4 = arith.constant 0 : index
    %2 = vector.load %arg1[%c0_3, %c0_4] : memref<800x36xf32, #tpu.memory_space<vmem>>, vector<200x36xf32>
    %3 = arith.truncf %2 : vector<200x36xf32> to vector<200x36xbf16>
    %cst = arith.constant dense<0.000000e+00> : vector<200x128xf32>
    %4 = tpu.matmul %3, %0, %cst {dimension_numbers = #tpu.dot_dimension_numbers<[1], [0], [0], [1], [0, 0, 1, 1], [], []>} : vector<200x36xbf16>, vector<36x128xbf16>, vector<200x128xf32> -> vector<200x128xf32>
    %5 = vector.broadcast %1 : vector<1x128xf32> to vector<200x128xf32>
    %6 = arith.addf %4, %5 : vector<200x128xf32>
    %cst_5 = arith.constant 0.000000e+00 : f32
    %7 = vector.broadcast %cst_5 : f32 to vector<200x128xf32>
    %8 = arith.maximumf %6, %7 : vector<200x128xf32>
    %c200 = arith.constant 200 : index
    %c0_6 = arith.constant 0 : index
    %9 = vector.load %arg1[%c200, %c0_6] : memref<800x36xf32, #tpu.memory_space<vmem>>, vector<200x36xf32>
    %10 = arith.truncf %9 : vector<200x36xf32> to vector<200x36xbf16>
    %cst_7 = arith.constant dense<0.000000e+00> : vector<200x128xf32>
    %11 = tpu.matmul %10, %0, %cst_7 {dimension_numbers = #tpu.dot_dimension_numbers<[1], [0], [0], [1], [0, 0, 1, 1], [], []>} : vector<200x36xbf16>, vector<36x128xbf16>, vector<200x128xf32> -> vector<200x128xf32>
    %12 = vector.broadcast %1 : vector<1x128xf32> to vector<200x128xf32>
    %13 = arith.addf %11, %12 : vector<200x128xf32>
    %cst_8 = arith.constant 0.000000e+00 : f32
    %14 = vector.broadcast %cst_8 : f32 to vector<200x128xf32>
    %15 = arith.maximumf %13, %14 : vector<200x128xf32>
    %16 = arith.maximumf %8, %15 : vector<200x128xf32>
    %c400 = arith.constant 400 : index
    %c0_9 = arith.constant 0 : index
    %17 = vector.load %arg1[%c400, %c0_9] : memref<800x36xf32, #tpu.memory_space<vmem>>, vector<200x36xf32>
    %18 = arith.truncf %17 : vector<200x36xf32> to vector<200x36xbf16>
    %cst_10 = arith.constant dense<0.000000e+00> : vector<200x128xf32>
    %19 = tpu.matmul %18, %0, %cst_10 {dimension_numbers = #tpu.dot_dimension_numbers<[1], [0], [0], [1], [0, 0, 1, 1], [], []>} : vector<200x36xbf16>, vector<36x128xbf16>, vector<200x128xf32> -> vector<200x128xf32>
    %20 = vector.broadcast %1 : vector<1x128xf32> to vector<200x128xf32>
    %21 = arith.addf %19, %20 : vector<200x128xf32>
    %cst_11 = arith.constant 0.000000e+00 : f32
    %22 = vector.broadcast %cst_11 : f32 to vector<200x128xf32>
    %23 = arith.maximumf %21, %22 : vector<200x128xf32>
    %24 = arith.maximumf %16, %23 : vector<200x128xf32>
    %c600 = arith.constant 600 : index
    %c0_12 = arith.constant 0 : index
    %25 = vector.load %arg1[%c600, %c0_12] : memref<800x36xf32, #tpu.memory_space<vmem>>, vector<200x36xf32>
    %26 = arith.truncf %25 : vector<200x36xf32> to vector<200x36xbf16>
    %cst_13 = arith.constant dense<0.000000e+00> : vector<200x128xf32>
    %27 = tpu.matmul %26, %0, %cst_13 {dimension_numbers = #tpu.dot_dimension_numbers<[1], [0], [0], [1], [0, 0, 1, 1], [], []>} : vector<200x36xbf16>, vector<36x128xbf16>, vector<200x128xf32> -> vector<200x128xf32>
    %28 = vector.broadcast %1 : vector<1x128xf32> to vector<200x128xf32>
    %29 = arith.addf %27, %28 : vector<200x128xf32>
    %cst_14 = arith.constant 0.000000e+00 : f32
    %30 = vector.broadcast %cst_14 : f32 to vector<200x128xf32>
    %31 = arith.maximumf %29, %30 : vector<200x128xf32>
    %32 = arith.maximumf %24, %31 : vector<200x128xf32>
    %33 = arith.truncf %32 : vector<200x128xf32> to vector<200x128xbf16>
    %c0_15 = arith.constant 0 : index
    %c0_16 = arith.constant 0 : index
    %34 = vector.load %arg4[%c0_15, %c0_16] : memref<288x200xbf16, #tpu.memory_space<vmem>>, vector<32x200xbf16>
    %cst_17 = arith.constant dense<0.000000e+00> : vector<32x128xf32>
    %35 = tpu.matmul %34, %33, %cst_17 {dimension_numbers = #tpu.dot_dimension_numbers<[1], [0], [0], [1], [0, 0, 1, 1], [], []>} : vector<32x200xbf16>, vector<200x128xbf16>, vector<32x128xf32> -> vector<32x128xf32>
    %c0_18 = arith.constant 0 : index
    %c0_19 = arith.constant 0 : index
    %36 = vector.load %arg5[%c0_18, %c0_19] : memref<1152x128xbf16, #tpu.memory_space<vmem>>, vector<128x128xbf16>
    %37 = arith.truncf %35 : vector<32x128xf32> to vector<32x128xbf16>
    %cst_20 = arith.constant dense<0.000000e+00> : vector<32x128xf32>
    %38 = tpu.matmul %37, %36, %cst_20 {dimension_numbers = #tpu.dot_dimension_numbers<[1], [0], [0], [1], [0, 0, 1, 1], [], []>} : vector<32x128xbf16>, vector<128x128xbf16>, vector<32x128xf32> -> vector<32x128xf32>
    %c32 = arith.constant 32 : index
    %c0_21 = arith.constant 0 : index
    %39 = vector.load %arg4[%c32, %c0_21] : memref<288x200xbf16, #tpu.memory_space<vmem>>, vector<32x200xbf16>
    %cst_22 = arith.constant dense<0.000000e+00> : vector<32x128xf32>
    %40 = tpu.matmul %39, %33, %cst_22 {dimension_numbers = #tpu.dot_dimension_numbers<[1], [0], [0], [1], [0, 0, 1, 1], [], []>} : vector<32x200xbf16>, vector<200x128xbf16>, vector<32x128xf32> -> vector<32x128xf32>
    %c128 = arith.constant 128 : index
    %c0_23 = arith.constant 0 : index
    %41 = vector.load %arg5[%c128, %c0_23] : memref<1152x128xbf16, #tpu.memory_space<vmem>>, vector<128x128xbf16>
    %42 = arith.truncf %40 : vector<32x128xf32> to vector<32x128xbf16>
    %cst_24 = arith.constant dense<0.000000e+00> : vector<32x128xf32>
    %43 = tpu.matmul %42, %41, %cst_24 {dimension_numbers = #tpu.dot_dimension_numbers<[1], [0], [0], [1], [0, 0, 1, 1], [], []>} : vector<32x128xbf16>, vector<128x128xbf16>, vector<32x128xf32> -> vector<32x128xf32>
    %44 = arith.addf %38, %43 : vector<32x128xf32>
    %c64 = arith.constant 64 : index
    %c0_25 = arith.constant 0 : index
    %45 = vector.load %arg4[%c64, %c0_25] : memref<288x200xbf16, #tpu.memory_space<vmem>>, vector<32x200xbf16>
    %cst_26 = arith.constant dense<0.000000e+00> : vector<32x128xf32>
    %46 = tpu.matmul %45, %33, %cst_26 {dimension_numbers = #tpu.dot_dimension_numbers<[1], [0], [0], [1], [0, 0, 1, 1], [], []>} : vector<32x200xbf16>, vector<200x128xbf16>, vector<32x128xf32> -> vector<32x128xf32>
    %c256 = arith.constant 256 : index
    %c0_27 = arith.constant 0 : index
    %47 = vector.load %arg5[%c256, %c0_27] : memref<1152x128xbf16, #tpu.memory_space<vmem>>, vector<128x128xbf16>
    %48 = arith.truncf %46 : vector<32x128xf32> to vector<32x128xbf16>
    %cst_28 = arith.constant dense<0.000000e+00> : vector<32x128xf32>
    %49 = tpu.matmul %48, %47, %cst_28 {dimension_numbers = #tpu.dot_dimension_numbers<[1], [0], [0], [1], [0, 0, 1, 1], [], []>} : vector<32x128xbf16>, vector<128x128xbf16>, vector<32x128xf32> -> vector<32x128xf32>
    %50 = arith.addf %44, %49 : vector<32x128xf32>
    %c96 = arith.constant 96 : index
    %c0_29 = arith.constant 0 : index
    %51 = vector.load %arg4[%c96, %c0_29] : memref<288x200xbf16, #tpu.memory_space<vmem>>, vector<32x200xbf16>
    %cst_30 = arith.constant dense<0.000000e+00> : vector<32x128xf32>
    %52 = tpu.matmul %51, %33, %cst_30 {dimension_numbers = #tpu.dot_dimension_numbers<[1], [0], [0], [1], [0, 0, 1, 1], [], []>} : vector<32x200xbf16>, vector<200x128xbf16>, vector<32x128xf32> -> vector<32x128xf32>
    %c384 = arith.constant 384 : index
    %c0_31 = arith.constant 0 : index
    %53 = vector.load %arg5[%c384, %c0_31] : memref<1152x128xbf16, #tpu.memory_space<vmem>>, vector<128x128xbf16>
    %54 = arith.truncf %52 : vector<32x128xf32> to vector<32x128xbf16>
    %cst_32 = arith.constant dense<0.000000e+00> : vector<32x128xf32>
    %55 = tpu.matmul %54, %53, %cst_32 {dimension_numbers = #tpu.dot_dimension_numbers<[1], [0], [0], [1], [0, 0, 1, 1], [], []>} : vector<32x128xbf16>, vector<128x128xbf16>, vector<32x128xf32> -> vector<32x128xf32>
    %56 = arith.addf %50, %55 : vector<32x128xf32>
    %c128_33 = arith.constant 128 : index
    %c0_34 = arith.constant 0 : index
    %57 = vector.load %arg4[%c128_33, %c0_34] : memref<288x200xbf16, #tpu.memory_space<vmem>>, vector<32x200xbf16>
    %cst_35 = arith.constant dense<0.000000e+00> : vector<32x128xf32>
    %58 = tpu.matmul %57, %33, %cst_35 {dimension_numbers = #tpu.dot_dimension_numbers<[1], [0], [0], [1], [0, 0, 1, 1], [], []>} : vector<32x200xbf16>, vector<200x128xbf16>, vector<32x128xf32> -> vector<32x128xf32>
    %c512 = arith.constant 512 : index
    %c0_36 = arith.constant 0 : index
    %59 = vector.load %arg5[%c512, %c0_36] : memref<1152x128xbf16, #tpu.memory_space<vmem>>, vector<128x128xbf16>
    %60 = arith.truncf %58 : vector<32x128xf32> to vector<32x128xbf16>
    %cst_37 = arith.constant dense<0.000000e+00> : vector<32x128xf32>
    %61 = tpu.matmul %60, %59, %cst_37 {dimension_numbers = #tpu.dot_dimension_numbers<[1], [0], [0], [1], [0, 0, 1, 1], [], []>} : vector<32x128xbf16>, vector<128x128xbf16>, vector<32x128xf32> -> vector<32x128xf32>
    %62 = arith.addf %56, %61 : vector<32x128xf32>
    %c160 = arith.constant 160 : index
    %c0_38 = arith.constant 0 : index
    %63 = vector.load %arg4[%c160, %c0_38] : memref<288x200xbf16, #tpu.memory_space<vmem>>, vector<32x200xbf16>
    %cst_39 = arith.constant dense<0.000000e+00> : vector<32x128xf32>
    %64 = tpu.matmul %63, %33, %cst_39 {dimension_numbers = #tpu.dot_dimension_numbers<[1], [0], [0], [1], [0, 0, 1, 1], [], []>} : vector<32x200xbf16>, vector<200x128xbf16>, vector<32x128xf32> -> vector<32x128xf32>
    %c640 = arith.constant 640 : index
    %c0_40 = arith.constant 0 : index
    %65 = vector.load %arg5[%c640, %c0_40] : memref<1152x128xbf16, #tpu.memory_space<vmem>>, vector<128x128xbf16>
    %66 = arith.truncf %64 : vector<32x128xf32> to vector<32x128xbf16>
    %cst_41 = arith.constant dense<0.000000e+00> : vector<32x128xf32>
    %67 = tpu.matmul %66, %65, %cst_41 {dimension_numbers = #tpu.dot_dimension_numbers<[1], [0], [0], [1], [0, 0, 1, 1], [], []>} : vector<32x128xbf16>, vector<128x128xbf16>, vector<32x128xf32> -> vector<32x128xf32>
    %68 = arith.addf %62, %67 : vector<32x128xf32>
    %c192 = arith.constant 192 : index
    %c0_42 = arith.constant 0 : index
    %69 = vector.load %arg4[%c192, %c0_42] : memref<288x200xbf16, #tpu.memory_space<vmem>>, vector<32x200xbf16>
    %cst_43 = arith.constant dense<0.000000e+00> : vector<32x128xf32>
    %70 = tpu.matmul %69, %33, %cst_43 {dimension_numbers = #tpu.dot_dimension_numbers<[1], [0], [0], [1], [0, 0, 1, 1], [], []>} : vector<32x200xbf16>, vector<200x128xbf16>, vector<32x128xf32> -> vector<32x128xf32>
    %c768 = arith.constant 768 : index
    %c0_44 = arith.constant 0 : index
    %71 = vector.load %arg5[%c768, %c0_44] : memref<1152x128xbf16, #tpu.memory_space<vmem>>, vector<128x128xbf16>
    %72 = arith.truncf %70 : vector<32x128xf32> to vector<32x128xbf16>
    %cst_45 = arith.constant dense<0.000000e+00> : vector<32x128xf32>
    %73 = tpu.matmul %72, %71, %cst_45 {dimension_numbers = #tpu.dot_dimension_numbers<[1], [0], [0], [1], [0, 0, 1, 1], [], []>} : vector<32x128xbf16>, vector<128x128xbf16>, vector<32x128xf32> -> vector<32x128xf32>
    %74 = arith.addf %68, %73 : vector<32x128xf32>
    %c224 = arith.constant 224 : index
    %c0_46 = arith.constant 0 : index
    %75 = vector.load %arg4[%c224, %c0_46] : memref<288x200xbf16, #tpu.memory_space<vmem>>, vector<32x200xbf16>
    %cst_47 = arith.constant dense<0.000000e+00> : vector<32x128xf32>
    %76 = tpu.matmul %75, %33, %cst_47 {dimension_numbers = #tpu.dot_dimension_numbers<[1], [0], [0], [1], [0, 0, 1, 1], [], []>} : vector<32x200xbf16>, vector<200x128xbf16>, vector<32x128xf32> -> vector<32x128xf32>
    %c896 = arith.constant 896 : index
    %c0_48 = arith.constant 0 : index
    %77 = vector.load %arg5[%c896, %c0_48] : memref<1152x128xbf16, #tpu.memory_space<vmem>>, vector<128x128xbf16>
    %78 = arith.truncf %76 : vector<32x128xf32> to vector<32x128xbf16>
    %cst_49 = arith.constant dense<0.000000e+00> : vector<32x128xf32>
    %79 = tpu.matmul %78, %77, %cst_49 {dimension_numbers = #tpu.dot_dimension_numbers<[1], [0], [0], [1], [0, 0, 1, 1], [], []>} : vector<32x128xbf16>, vector<128x128xbf16>, vector<32x128xf32> -> vector<32x128xf32>
    %80 = arith.addf %74, %79 : vector<32x128xf32>
    %c256_50 = arith.constant 256 : index
    %c0_51 = arith.constant 0 : index
    %81 = vector.load %arg4[%c256_50, %c0_51] : memref<288x200xbf16, #tpu.memory_space<vmem>>, vector<32x200xbf16>
    %cst_52 = arith.constant dense<0.000000e+00> : vector<32x128xf32>
    %82 = tpu.matmul %81, %33, %cst_52 {dimension_numbers = #tpu.dot_dimension_numbers<[1], [0], [0], [1], [0, 0, 1, 1], [], []>} : vector<32x200xbf16>, vector<200x128xbf16>, vector<32x128xf32> -> vector<32x128xf32>
    %c1024 = arith.constant 1024 : index
    %c0_53 = arith.constant 0 : index
    %83 = vector.load %arg5[%c1024, %c0_53] : memref<1152x128xbf16, #tpu.memory_space<vmem>>, vector<128x128xbf16>
    %84 = arith.truncf %82 : vector<32x128xf32> to vector<32x128xbf16>
    %cst_54 = arith.constant dense<0.000000e+00> : vector<32x128xf32>
    %85 = tpu.matmul %84, %83, %cst_54 {dimension_numbers = #tpu.dot_dimension_numbers<[1], [0], [0], [1], [0, 0, 1, 1], [], []>} : vector<32x128xbf16>, vector<128x128xbf16>, vector<32x128xf32> -> vector<32x128xf32>
    %86 = arith.addf %80, %85 : vector<32x128xf32>
    %c0_55 = arith.constant 0 : index
    %c0_56 = arith.constant 0 : index
    %87 = vector.load %arg6[%c0_55, %c0_56] : memref<1x128xf32, #tpu.memory_space<vmem>>, vector<1x128xf32>
    %88 = vector.broadcast %87 : vector<1x128xf32> to vector<32x128xf32>
    %89 = arith.addf %86, %88 : vector<32x128xf32>
    %cst_57 = arith.constant 0.000000e+00 : f32
    %90 = vector.broadcast %cst_57 : f32 to vector<32x128xf32>
    %91 = arith.maximumf %89, %90 : vector<32x128xf32>
    %92 = vector.extract_strided_slice %91 {offsets = [0, 0], sizes = [8, 128], strides = [1, 1]} : vector<32x128xf32> to vector<8x128xf32>
    %93 = vector.extract_strided_slice %91 {offsets = [8, 0], sizes = [8, 128], strides = [1, 1]} : vector<32x128xf32> to vector<8x128xf32>
    %94 = arith.maximumf %92, %93 : vector<8x128xf32>
    %95 = vector.extract_strided_slice %91 {offsets = [16, 0], sizes = [8, 128], strides = [1, 1]} : vector<32x128xf32> to vector<8x128xf32>
    %96 = vector.extract_strided_slice %91 {offsets = [24, 0], sizes = [8, 128], strides = [1, 1]} : vector<32x128xf32> to vector<8x128xf32>
    %97 = arith.maximumf %95, %96 : vector<8x128xf32>
    %98 = arith.maximumf %94, %97 : vector<8x128xf32>
    %99 = arith.truncf %98 : vector<8x128xf32> to vector<8x128xbf16>
    %c0_58 = arith.constant 0 : index
    %c0_59 = arith.constant 0 : index
    %100 = vector.load %arg7[%c0_58, %c0_59] : memref<128x512xbf16, #tpu.memory_space<vmem>>, vector<128x512xbf16>
    %cst_60 = arith.constant dense<0.000000e+00> : vector<8x512xf32>
    %101 = tpu.matmul %99, %100, %cst_60 {dimension_numbers = #tpu.dot_dimension_numbers<[1], [0], [0], [1], [0, 0, 1, 1], [], []>} : vector<8x128xbf16>, vector<128x512xbf16>, vector<8x512xf32> -> vector<8x512xf32>
    %c0_61 = arith.constant 0 : index
    %c0_62 = arith.constant 0 : index
    %102 = vector.load %arg8[%c0_61, %c0_62] : memref<1x512xf32, #tpu.memory_space<vmem>>, vector<1x512xf32>
    %103 = vector.broadcast %102 : vector<1x512xf32> to vector<8x512xf32>
    %104 = arith.addf %101, %103 : vector<8x512xf32>
    %cst_63 = arith.constant 0.000000e+00 : f32
    %105 = vector.broadcast %cst_63 : f32 to vector<8x512xf32>
    %106 = arith.maximumf %104, %105 : vector<8x512xf32>
    %107 = arith.truncf %106 : vector<8x512xf32> to vector<8x512xbf16>
    %c0_64 = arith.constant 0 : index
    %c0_65 = arith.constant 0 : index
    %108 = vector.load %arg9[%c0_64, %c0_65] : memref<512x512xbf16, #tpu.memory_space<vmem>>, vector<512x512xbf16>
    %cst_66 = arith.constant dense<0.000000e+00> : vector<8x512xf32>
    %109 = tpu.matmul %107, %108, %cst_66 {dimension_numbers = #tpu.dot_dimension_numbers<[1], [0], [0], [1], [0, 0, 1, 1], [], []>} : vector<8x512xbf16>, vector<512x512xbf16>, vector<8x512xf32> -> vector<8x512xf32>
    %c0_67 = arith.constant 0 : index
    %c0_68 = arith.constant 0 : index
    %110 = vector.load %arg10[%c0_67, %c0_68] : memref<1x512xf32, #tpu.memory_space<vmem>>, vector<1x512xf32>
    %111 = vector.broadcast %110 : vector<1x512xf32> to vector<8x512xf32>
    %112 = arith.addf %109, %111 : vector<8x512xf32>
    %cst_69 = arith.constant 0.000000e+00 : f32
    %113 = vector.broadcast %cst_69 : f32 to vector<8x512xf32>
    %114 = arith.maximumf %112, %113 : vector<8x512xf32>
    %115 = arith.truncf %114 : vector<8x512xf32> to vector<8x512xbf16>
    %c0_70 = arith.constant 0 : index
    %c0_71 = arith.constant 0 : index
    %116 = vector.load %arg11[%c0_70, %c0_71] : memref<512x128xbf16, #tpu.memory_space<vmem>>, vector<512x128xbf16>
    %cst_72 = arith.constant dense<0.000000e+00> : vector<8x128xf32>
    %117 = tpu.matmul %115, %116, %cst_72 {dimension_numbers = #tpu.dot_dimension_numbers<[1], [0], [0], [1], [0, 0, 1, 1], [], []>} : vector<8x512xbf16>, vector<512x128xbf16>, vector<8x128xf32> -> vector<8x128xf32>
    %c0_73 = arith.constant 0 : index
    %c0_74 = arith.constant 0 : index
    %118 = vector.load %arg12[%c0_73, %c0_74] : memref<1x128xf32, #tpu.memory_space<vmem>>, vector<1x128xf32>
    %119 = vector.broadcast %118 : vector<1x128xf32> to vector<8x128xf32>
    %120 = arith.addf %117, %119 : vector<8x128xf32>
    %c0_75 = arith.constant 0 : index
    %c0_76 = arith.constant 0 : index
    %121 = vector.load %arg13[%c0_75, %c0_76] : memref<8x128xf32, #tpu.memory_space<vmem>>, vector<8x128xf32>
    tpu.vector_store %arg13[%c0_75, %c0_76], %120 {strides = array<i32>} : memref<8x128xf32, #tpu.memory_space<vmem>>, vector<8x128xf32>,
    return
  }
  func.func @transform_0(%arg0: i32) -> (i32, i32) {
    %c0_i32 = arith.constant 0 : i32
    %c0_i32_0 = arith.constant 0 : i32
    %c0_i32_1 = arith.constant 0 : i32
    return %c0_i32, %c0_i32_0 : i32, i32
  }
  func.func @transform_1(%arg0: i32) -> (i32, i32) {
    %c0_i32 = arith.constant 0 : i32
    %c0_i32_0 = arith.constant 0 : i32
    %c0_i32_1 = arith.constant 0 : i32
    return %c0_i32, %c0_i32_0 : i32, i32
  }
  func.func @transform_2(%arg0: i32) -> (i32, i32) {
    %c0_i32 = arith.constant 0 : i32
    %c0_i32_0 = arith.constant 0 : i32
    %c0_i32_1 = arith.constant 0 : i32
    return %c0_i32, %c0_i32_0 : i32, i32
  }
  func.func @transform_3(%arg0: i32) -> (i32, i32) {
    %c0_i32 = arith.constant 0 : i32
    %c0_i32_0 = arith.constant 0 : i32
    %c0_i32_1 = arith.constant 0 : i32
    return %c0_i32, %c0_i32_0 : i32, i32
  }
  func.func @transform_4(%arg0: i32) -> (i32, i32) {
    %c0_i32 = arith.constant 0 : i32
    %c0_i32_0 = arith.constant 0 : i32
    %c0_i32_1 = arith.constant 0 : i32
    return %c0_i32, %c0_i32_0 : i32, i32
  }
  func.func @transform_5(%arg0: i32) -> (i32, i32) {
    %c0_i32 = arith.constant 0 : i32
    %c0_i32_0 = arith.constant 0 : i32
    %c0_i32_1 = arith.constant 0 : i32
    return %c0_i32, %c0_i32_0 : i32, i32
  }
  func.func @transform_6(%arg0: i32) -> (i32, i32) {
    %c0_i32 = arith.constant 0 : i32
    %c0_i32_0 = arith.constant 0 : i32
    %c0_i32_1 = arith.constant 0 : i32
    return %c0_i32, %c0_i32_0 : i32, i32
  }
  func.func @transform_7(%arg0: i32) -> (i32, i32) {
    %c0_i32 = arith.constant 0 : i32
    %c0_i32_0 = arith.constant 0 : i32
    %c0_i32_1 = arith.constant 0 : i32
    return %c0_i32, %c0_i32_0 : i32, i32
  }
  func.func @transform_8(%arg0: i32) -> (i32, i32) {
    %c0_i32 = arith.constant 0 : i32
    %c0_i32_0 = arith.constant 0 : i32
    %c0_i32_1 = arith.constant 0 : i32
    return %c0_i32, %c0_i32_0 : i32, i32
  }
  func.func @transform_9(%arg0: i32) -> (i32, i32) {
    %c0_i32 = arith.constant 0 : i32
    %c0_i32_0 = arith.constant 0 : i32
    %c0_i32_1 = arith.constant 0 : i32
    return %c0_i32, %c0_i32_0 : i32, i32
  }
  func.func @transform_10(%arg0: i32) -> (i32, i32) {
    %c0_i32 = arith.constant 0 : i32
    %c0_i32_0 = arith.constant 0 : i32
    %c0_i32_1 = arith.constant 0 : i32
    return %c0_i32, %c0_i32_0 : i32, i32
  }
  func.func @transform_11(%arg0: i32) -> (i32, i32) {
    %c0_i32 = arith.constant 0 : i32
    %c0_i32_0 = arith.constant 0 : i32
    %c0_i32_1 = arith.constant 0 : i32
    return %c0_i32, %c0_i32_0 : i32, i32
  }
  func.func @transform_12(%arg0: i32) -> (i32, i32) {
    %c0_i32 = arith.constant 0 : i32
    %c0_i32_0 = arith.constant 0 : i32
    %c0_i32_1 = arith.constant 0 : i32
    return %c0_i32, %c0_i32_0 : i32, i32
  }
}

</mosaic_0001>

<bundles_post_ra>
// kernel: _lambda_.2
= control target key start
LH: loop header
LB: loop body
LE: loop exit
PB: predicated region body
PF: predicated region fallthrough
CT: control target
= control target key end

     0   :  { %vm144_vm0 = vcmask 1041408   ;;  %vm104_vm1 = vcmask 293888   ;;  %vm888_vm2 = vcmask 1043456   ;;  %vm881_vm3 = vcmask 588800   ;;  %s7855_s1 = inlined_call_operand.vmem [shape: bf16[36,128], index: 1, kind: input, shape index: {}]   ;;  %s7856_s0 = inlined_call_operand.vmem [shape: f32[800,36], index: 0, kind: input, shape index: {}]   ;;  %s7857_s2 = inlined_call_operand.vmem [shape: f32[1,128], index: 2, kind: input, shape index: {}]   ;;  %s7858_s3 = inlined_call_operand.vmem [shape: bf16[288,200], index: 3, kind: input, shape index: {}]   ;;  %s7859_s4 = inlined_call_operand.vmem [shape: bf16[1152,128], index: 4, kind: input, shape index: {}]   ;;  %s7860_s5 = inlined_call_operand.vmem [shape: f32[1,128], index: 5, kind: input, shape index: {}]   ;;  %s7861_s6 = inlined_call_operand.vmem [shape: bf16[128,512], index: 6, kind: input, shape index: {}]   ;;  %s7862_s8 = inlined_call_operand.vmem [shape: bf16[512,512], index: 8, kind: input, shape index: {}]   ;;  %s7863_s7 = inlined_call_operand.vmem [shape: f32[1,512], index: 7, kind: input, shape index: {}]   ;;  %s7864_s10 = inlined_call_operand.vmem [shape: bf16[512,128], index: 10, kind: input, shape index: {}]   ;;  %s7865_s11 = inlined_call_operand.vmem [shape: f32[1,128], index: 11, kind: input, shape index: {}]   ;;  %s7866_s9 = inlined_call_operand.vmem [shape: f32[1,512], index: 9, kind: input, shape index: {}]   ;;  %s7867_s12 = inlined_call_operand.vmem [shape: f32[8,128], index: 12, kind: output, shape index: {}]  }
   0x1   :  { %v46_v0 = vld [vmem:[%s7855_s1 + $0x10] sm:$0x3]  ;;  %v5119_v4 = vld [vmem:[%s7855_s1 + $0x8] sm:$0xff]  ;;  %v5118_v5 = vld [vmem:[%s7855_s1] sm:$0xff] }
   0x2   :  { %v98_v1 = vunpack.c.l.b16 %v46_v0  ;;  %v48_v6 = vld [vmem:[%s7856_s0] sm:$0xff]  ;;  %v49_v7 = vld [vmem:[%s7856_s0 + $0x8] sm:$0xff]  ;;  %v247_v9 = vld [vmem:[%s7856_s0 + $0xd0] sm:$0xff] }
   0x3   :  { %v246_v8 = vld [vmem:[%s7856_s0 + $0xc8] sm:$0xff]  ;;  %v446_v10 = vld [vmem:[%s7856_s0 + $0x190] sm:$0xff]  ;;  %v447_v11 = vld [vmem:[%s7856_s0 + $0x198] sm:$0xff]  ;;  %v73_v14 = vpack.c.bf16 %v49_v7, %v48_v6 }
   0x4   :  { %v101_v2 = vpack.c.b16 %v98_v1, %v98_v1  ;;  %v646_v12 = vld [vmem:[%s7856_s0 + $0x258] sm:$0xff]  ;;  %v647_v13 = vld [vmem:[%s7856_s0 + $0x260] sm:$0xff]  ;;  %v271_v15 = vpack.c.bf16 %v247_v9, %v246_v8  ;;  %v471_v16 = vpack.c.bf16 %v447_v11, %v446_v10  ;;  %v50_v18 = vld [vmem:[%s7856_s0 + $0x10] sm:$0xff] }
   0x5   :  { %v671_v17 = vpack.c.bf16 %v647_v13, %v646_v12  ;;  %v51_v19 = vld [vmem:[%s7856_s0 + $0x18] sm:$0xff]  ;;  %v249_v21 = vld [vmem:[%s7856_s0 + $0xe0] sm:$0xff]  ;;  %v449_v23 = vld [vmem:[%s7856_s0 + $0x1a8] sm:$0xff] }
   0x6   :  { %v146_v3 = vsel %vm144_vm0, %v101_v2, 0  ;;  %v248_v20 = vld [vmem:[%s7856_s0 + $0xd8] sm:$0xff]  ;;  %v448_v22 = vld [vmem:[%s7856_s0 + $0x1a0] sm:$0xff]  ;;  %v648_v24 = vld [vmem:[%s7856_s0 + $0x268] sm:$0xff]  ;;  %v74_v26 = vpack.c.bf16 %v51_v19, %v50_v18 }
   0x7   :  { %153 = vmatpush.bf16.msra.mxu0 %v146_v3  ;;  %328 = vmatpush.bf16.msra.mxu1 %v146_v3  ;;  %v649_v25 = vld [vmem:[%s7856_s0 + $0x270] sm:$0xff]  ;;  %v272_v27 = vpack.c.bf16 %v249_v21, %v248_v20  ;;  %v472_v28 = vpack.c.bf16 %v449_v23, %v448_v22  ;;  %v52_v30 = vld [vmem:[%s7856_s0 + $0x20] sm:$0xff]  ;;  %v53_v31 = vld [vmem:[%s7856_s0 + $0x28] sm:$0xff] }
   0x8   :  { %528 = vmatpush.bf16.msra.mxu2 %v146_v3  ;;  %728 = vmatpush.bf16.msra.mxu3 %v146_v3  ;;  %v672_v29 = vpack.c.bf16 %v649_v25, %v648_v24  ;;  %v250_v32 = vld [vmem:[%s7856_s0 + $0xe8] sm:$0xff]  ;;  %v251_v33 = vld [vmem:[%s7856_s0 + $0xf0] sm:$0xff]  ;;  %v451_v35 = vld [vmem:[%s7856_s0 + $0x1b8] sm:$0xff]  ;;  %v75_v38 = vpack.c.bf16 %v53_v31, %v52_v30 }
   0x9   :  { %v450_v34 = vld [vmem:[%s7856_s0 + $0x1b0] sm:$0xff]  ;;  %v650_v36 = vld [vmem:[%s7856_s0 + $0x278] sm:$0xff]  ;;  %v651_v37 = vld [vmem:[%s7856_s0 + $0x280] sm:$0xff]  ;;  %v273_v39 = vpack.c.bf16 %v251_v33, %v250_v32 }
   0xa   :  { %v473_v40 = vpack.c.bf16 %v451_v35, %v450_v34  ;;  %v673_v41 = vpack.c.bf16 %v651_v37, %v650_v36  ;;  %v54_v42 = vld [vmem:[%s7856_s0 + $0x30] sm:$0xff]  ;;  %v55_v43 = vld [vmem:[%s7856_s0 + $0x38] sm:$0xff]  ;;  %v253_v45 = vld [vmem:[%s7856_s0 + $0x100] sm:$0xff] }
   0xb   :  { %154 = vmatpush.bf16.msra.mxu0 %v5119_v4  ;;  %329 = vmatpush.bf16.msra.mxu1 %v5119_v4  ;;  %v252_v44 = vld [vmem:[%s7856_s0 + $0xf8] sm:$0xff]  ;;  %v452_v46 = vld [vmem:[%s7856_s0 + $0x1c0] sm:$0xff]  ;;  %v453_v47 = vld [vmem:[%s7856_s0 + $0x1c8] sm:$0xff]  ;;  %v76_v50 = vpack.c.bf16 %v55_v43, %v54_v42 }
   0xc   :  { %529 = vmatpush.bf16.msra.mxu2 %v5119_v4  ;;  %729 = vmatpush.bf16.msra.mxu3 %v5119_v4  ;;  %v652_v48 = vld [vmem:[%s7856_s0 + $0x288] sm:$0xff]  ;;  %v653_v49 = vld [vmem:[%s7856_s0 + $0x290] sm:$0xff]  ;;  %v274_v51 = vpack.c.bf16 %v253_v45, %v252_v44  ;;  %v474_v52 = vpack.c.bf16 %v453_v47, %v452_v46  ;;  %v56_v54 = vld [vmem:[%s7856_s0 + $0x40] sm:$0xff] }
   0xd   :  { %v674_v53 = vpack.c.bf16 %v653_v49, %v652_v48  ;;  %v57_v55 = vld [vmem:[%s7856_s0 + $0x48] sm:$0xff]  ;;  %v255_v57 = vld [vmem:[%s7856_s0 + $0x110] sm:$0xff]  ;;  %v455_v59 = vld [vmem:[%s7856_s0 + $0x1d8] sm:$0xff] }
   0xe   :  { %v254_v56 = vld [vmem:[%s7856_s0 + $0x108] sm:$0xff]  ;;  %v454_v58 = vld [vmem:[%s7856_s0 + $0x1d0] sm:$0xff]  ;;  %v654_v60 = vld [vmem:[%s7856_s0 + $0x298] sm:$0xff]  ;;  %v77_v62 = vpack.c.bf16 %v57_v55, %v56_v54 }
   0xf   :  { %155 = vmatpush.bf16.msra.mxu0 %v5118_v5  ;;  %330 = vmatpush.bf16.msra.mxu1 %v5118_v5  ;;  %v655_v61 = vld [vmem:[%s7856_s0 + $0x2a0] sm:$0xff]  ;;  %v275_v63 = vpack.c.bf16 %v255_v57, %v254_v56  ;;  %v475_v0 = vpack.c.bf16 %v455_v59, %v454_v58  ;;  %v58_v2 = vld [vmem:[%s7856_s0 + $0x50] sm:$0xff]  ;;  %v59_v3 = vld [vmem:[%s7856_s0 + $0x58] sm:$0xff] }
  0x10   :  { %530 = vmatpush.bf16.msra.mxu2 %v5118_v5  ;;  %730 = vmatpush.bf16.msra.mxu3 %v5118_v5  ;;  %v675_v1 = vpack.c.bf16 %v655_v61, %v654_v60  ;;  %v256_v4 = vld [vmem:[%s7856_s0 + $0x118] sm:$0xff]  ;;  %v257_v5 = vld [vmem:[%s7856_s0 + $0x120] sm:$0xff]  ;;  %v457_v7 = vld [vmem:[%s7856_s0 + $0x1e8] sm:$0xff]  ;;  %v78_v10 = vpack.c.bf16 %v59_v3, %v58_v2 }
  0x11   :  { %v456_v6 = vld [vmem:[%s7856_s0 + $0x1e0] sm:$0xff]  ;;  %v656_v8 = vld [vmem:[%s7856_s0 + $0x2a8] sm:$0xff]  ;;  %v657_v9 = vld [vmem:[%s7856_s0 + $0x2b0] sm:$0xff]  ;;  %v276_v11 = vpack.c.bf16 %v257_v5, %v256_v4 }
  0x12   :  { %3848 = vmatmul.msk.bf16.vlgmr.msra.gmra.mxu0 %vm104_vm1, %v73_v14  ;;  %3861 = vmatmul.msk.bf16.vlgmr.msra.gmra.mxu1 %vm104_vm1, %v271_v15  ;;  %v476_v12 = vpack.c.bf16 %v457_v7, %v456_v6  ;;  %v676_v13 = vpack.c.bf16 %v657_v9, %v656_v8  ;;  %v60_v14 = vld [vmem:[%s7856_s0 + $0x60] sm:$0xff]  ;;  %v61_v15 = vld [vmem:[%s7856_s0 + $0x68] sm:$0xff]  ;;  %v458_v18 = vld [vmem:[%s7856_s0 + $0x1f0] sm:$0xff] }
  0x13   :  { %3874 = vmatmul.msk.bf16.vlgmr.msra.gmra.mxu2 %vm104_vm1, %v471_v16  ;;  %3887 = vmatmul.msk.bf16.vlgmr.msra.gmra.mxu3 %vm104_vm1, %v671_v17  ;;  %v258_v16 = vld [vmem:[%s7856_s0 + $0x128] sm:$0xff]  ;;  %v259_v17 = vld [vmem:[%s7856_s0 + $0x130] sm:$0xff]  ;;  %v459_v19 = vld [vmem:[%s7856_s0 + $0x1f8] sm:$0xff]  ;;  %v79_v22 = vpack.c.bf16 %v61_v15, %v60_v14 }
  0x14   :  { %v658_v20 = vld [vmem:[%s7856_s0 + $0x2b8] sm:$0xff]  ;;  %v659_v21 = vld [vmem:[%s7856_s0 + $0x2c0] sm:$0xff]  ;;  %v277_v23 = vpack.c.bf16 %v259_v17, %v258_v16  ;;  %v477_v24 = vpack.c.bf16 %v459_v19, %v458_v18  ;;  %v461_v31 = vld [vmem:[%s7856_s0 + $0x208] sm:$0xff] }
  0x15   :  { %v677_v25 = vpack.c.bf16 %v659_v21, %v658_v20  ;;  %v460_v30 = vld [vmem:[%s7856_s0 + $0x200] sm:$0xff]  ;;  %v660_v32 = vld [vmem:[%s7856_s0 + $0x2c8] sm:$0xff]  ;;  %v661_v33 = vld [vmem:[%s7856_s0 + $0x2d0] sm:$0xff] }
  0x16   :  { %v478_v36 = vpack.c.bf16 %v461_v31, %v460_v30  ;;  %v678_v37 = vpack.c.bf16 %v661_v33, %v660_v32  ;;  %v263_v42 = vld [vmem:[%s7856_s0 + $0x150] sm:$0xff]  ;;  %v463_v44 = vld [vmem:[%s7856_s0 + $0x218] sm:$0xff]  ;;  %v663_v46 = vld [vmem:[%s7856_s0 + $0x2e0] sm:$0xff] }
  0x17   :  { %v462_v43 = vld [vmem:[%s7856_s0 + $0x210] sm:$0xff]  ;;  %v662_v45 = vld [vmem:[%s7856_s0 + $0x2d8] sm:$0xff]  ;;  %v664_v14 = vld [vmem:[%s7856_s0 + $0x2e8] sm:$0xff] }
  0x18   :  { %v66_v6 = vld [vmem:[%s7856_s0 + $0x90] sm:$0xff]  ;;  %v67_v7 = vld [vmem:[%s7856_s0 + $0x98] sm:$0xff] }
  0x19   :  { %v264_v9 = vld [vmem:[%s7856_s0 + $0x158] sm:$0xff]  ;;  %v665_v15 = vld [vmem:[%s7856_s0 + $0x2f0] sm:$0xff]  ;;  %v82_v19 = vpack.c.bf16 %v67_v7, %v66_v6 }
  0x22   :  { %3849 = vmatmul.msk.bf16.gmra.mxu0 %vm104_vm1, %v74_v26  ;;  %3862 = vmatmul.msk.bf16.gmra.mxu1 %vm104_vm1, %v272_v27  ;;  %v62_v26 = vld [vmem:[%s7856_s0 + $0x70] sm:$0xff]  ;;  %v63_v27 = vld [vmem:[%s7856_s0 + $0x78] sm:$0xff] }
  0x23   :  { %3875 = vmatmul.msk.bf16.gmra.mxu2 %vm104_vm1, %v472_v28  ;;  %3888 = vmatmul.msk.bf16.gmra.mxu3 %vm104_vm1, %v672_v29  ;;  %v260_v28 = vld [vmem:[%s7856_s0 + $0x138] sm:$0xff]  ;;  %v261_v29 = vld [vmem:[%s7856_s0 + $0x140] sm:$0xff]  ;;  %v80_v34 = vpack.c.bf16 %v63_v27, %v62_v26  ;;  %v680_v26 = vpack.c.bf16 %v665_v15, %v664_v14 }
  0x24   :  { %v278_v35 = vpack.c.bf16 %v261_v29, %v260_v28  ;;  %v71_v14 = vld [vmem:[%s7856_s0 + $0xb8] sm:$0xff] }
  0x32   :  { %3850 = vmatmul.msk.bf16.gmra.mxu0 %vm104_vm1, %v75_v38  ;;  %3863 = vmatmul.msk.bf16.gmra.mxu1 %vm104_vm1, %v273_v39  ;;  %v5724_v38 = vld [vmem:[%s7857_s2] ss:$0 sm:$0xff] }
  0x33   :  { %3876 = vmatmul.msk.bf16.gmra.mxu2 %vm104_vm1, %v473_v40  ;;  %3889 = vmatmul.msk.bf16.gmra.mxu3 %vm104_vm1, %v673_v41  ;;  %v64_v39 = vld [vmem:[%s7856_s0 + $0x80] sm:$0xff]  ;;  %v65_v40 = vld [vmem:[%s7856_s0 + $0x88] sm:$0xff] }
  0x34   :  { %v262_v41 = vld [vmem:[%s7856_s0 + $0x148] sm:$0xff]  ;;  %v81_v47 = vpack.c.bf16 %v65_v40, %v64_v39 }
  0x35   :  { %v279_v48 = vpack.c.bf16 %v263_v42, %v262_v41 }
  0x42   :  { %3851 = vmatmul.msk.bf16.gmra.mxu0 %vm104_vm1, %v76_v50  ;;  %3864 = vmatmul.msk.bf16.gmra.mxu1 %vm104_vm1, %v274_v51  ;;  %v479_v51 = vpack.c.bf16 %v463_v44, %v462_v43 }
  0x43   :  { %3877 = vmatmul.msk.bf16.gmra.mxu2 %vm104_vm1, %v474_v52  ;;  %3890 = vmatmul.msk.bf16.gmra.mxu3 %vm104_vm1, %v674_v53  ;;  %v679_v52 = vpack.c.bf16 %v663_v46, %v662_v45  ;;  %v68_v46 = vld [vmem:[%s7856_s0 + $0xa0] sm:$0xff] }
  0x52   :  { %3852 = vmatmul.msk.bf16.gmra.mxu0 %vm104_vm1, %v77_v62  ;;  %3865 = vmatmul.msk.bf16.gmra.mxu1 %vm104_vm1, %v275_v63 }
  0x53   :  { %3878 = vmatmul.msk.bf16.gmra.mxu2 %vm104_vm1, %v475_v0  ;;  %3891 = vmatmul.msk.bf16.gmra.mxu3 %vm104_vm1, %v675_v1 }
  0x62   :  { %3853 = vmatmul.msk.bf16.gmra.mxu0 %vm104_vm1, %v78_v10  ;;  %3866 = vmatmul.msk.bf16.gmra.mxu1 %vm104_vm1, %v276_v11  ;;  %v265_v10 = vld [vmem:[%s7856_s0 + $0x160] sm:$0xff] }
  0x63   :  { %3879 = vmatmul.msk.bf16.gmra.mxu2 %vm104_vm1, %v476_v12  ;;  %3892 = vmatmul.msk.bf16.gmra.mxu3 %vm104_vm1, %v676_v13  ;;  %v464_v11 = vld [vmem:[%s7856_s0 + $0x220] sm:$0xff]  ;;  %v465_v13 = vld [vmem:[%s7856_s0 + $0x228] sm:$0xff]  ;;  %v280_v20 = vpack.c.bf16 %v265_v10, %v264_v9 }
  0x72   :  { %3854 = vmatmul.msk.bf16.gmra.mxu0 %vm104_vm1, %v79_v22  ;;  %3867 = vmatmul.msk.bf16.gmra.mxu1 %vm104_vm1, %v277_v23 }
  0x73   :  { %3880 = vmatmul.msk.bf16.gmra.mxu2 %vm104_vm1, %v477_v24  ;;  %3893 = vmatmul.msk.bf16.gmra.mxu3 %vm104_vm1, %v677_v25  ;;  %v480_v25 = vpack.c.bf16 %v465_v13, %v464_v11  ;;  %v70_v13 = vld [vmem:[%s7856_s0 + $0xb0] sm:$0xff] }
  0x82   :  { %3855 = vmatmul.msk.bf16.gmra.mxu0 %vm104_vm1, %v80_v34  ;;  %3868 = vmatmul.msk.bf16.gmra.mxu1 %vm104_vm1, %v278_v35 }
  0x83   :  { %3881 = vmatmul.msk.bf16.gmra.mxu2 %vm104_vm1, %v478_v36  ;;  %3894 = vmatmul.msk.bf16.gmra.mxu3 %vm104_vm1, %v678_v37 }
  0x8f   :  { %v157_v49 = vpop.f32.mrf.mxu0  ;;  %v332_v50 = vpop.f32.mrf.mxu1 }
  0x90   :  { %v158_v53 = vadd.f32 %v5724_v38, %v157_v49  ;;  %v333_v54 = vadd.f32 %v5724_v38, %v332_v50  ;;  %v266_v49 = vld [vmem:[%s7856_s0 + $0x168] sm:$0xff]  ;;  %v267_v50 = vld [vmem:[%s7856_s0 + $0x170] sm:$0xff] }
  0x92   :  { %v221_v55 = vmax.f32 %v158_v53, 0.0  ;;  %v396_v56 = vmax.f32 %v333_v54, 0.0  ;;  %3856 = vmatmul.msk.bf16.gmra.mxu0 %vm104_vm1, %v81_v47  ;;  %3869 = vmatmul.msk.bf16.gmra.mxu1 %vm104_vm1, %v279_v48  ;;  %v69_v47 = vld [vmem:[%s7856_s0 + $0xa8] sm:$0xff]  ;;  %v666_v53 = vld [vmem:[%s7856_s0 + $0x2f8] sm:$0xff]  ;;  %v667_v54 = vld [vmem:[%s7856_s0 + $0x300] sm:$0xff] }
  0x93   :  { %3882 = vmatmul.msk.bf16.gmra.mxu2 %vm104_vm1, %v479_v51  ;;  %3895 = vmatmul.msk.bf16.gmra.mxu3 %vm104_vm1, %v679_v52  ;;  %v466_v51 = vld [vmem:[%s7856_s0 + $0x230] sm:$0xff]  ;;  %v467_v52 = vld [vmem:[%s7856_s0 + $0x238] sm:$0xff] }
  0x94   :  { %v421_v57 = vmax.f32 %v221_v55, %v396_v56 }
  0x96   :  { %v532_v58 = vpop.f32.mrf.mxu2  ;;  %v732_v59 = vpop.f32.mrf.mxu3 }
  0x97   :  { %v533_v60 = vadd.f32 %v5724_v38, %v532_v58  ;;  %v733_v61 = vadd.f32 %v5724_v38, %v732_v59  ;;  %v159_v62 = vpop.f32.mrf.mxu0  ;;  %v334_v63 = vpop.f32.mrf.mxu1  ;;  %v83_v58 = vpack.c.bf16 %v69_v47, %v68_v46  ;;  %v281_v59 = vpack.c.bf16 %v267_v50, %v266_v49  ;;  %v72_v49 = vld [vmem:[%s7856_s0 + $0xc0] sm:$0xff]  ;;  %v270_v50 = vld [vmem:[%s7856_s0 + $0x188] sm:$0xff] }
  0x98   :  { %v160_v0 = vadd.f32 %v5724_v38, %v159_v62  ;;  %v335_v1 = vadd.f32 %v5724_v38, %v334_v63  ;;  %v481_v62 = vpack.c.bf16 %v467_v52, %v466_v51  ;;  %v681_v63 = vpack.c.bf16 %v667_v54, %v666_v53  ;;  %v470_v51 = vld [vmem:[%s7856_s0 + $0x250] sm:$0xff]  ;;  %v670_v52 = vld [vmem:[%s7856_s0 + $0x318] sm:$0xff] }
  0x99   :  { %v596_v2 = vmax.f32 %v533_v60, 0.0  ;;  %v796_v3 = vmax.f32 %v733_v61, 0.0 }
  0x9a   :  { %v222_v4 = vmax.f32 %v160_v0, 0.0  ;;  %v397_v5 = vmax.f32 %v335_v1, 0.0 }
  0x9b   :  { %v621_v8 = vmax.f32 %v421_v57, %v596_v2 }
  0x9c   :  { %v422_v12 = vmax.f32 %v222_v4, %v397_v5 }
  0x9d   :  { %v821_v16 = vmax.f32 %v621_v8, %v796_v3 }
  0x9e   :  { %v534_v17 = vpop.f32.mrf.mxu2  ;;  %v734_v18 = vpop.f32.mrf.mxu3 }
  0x9f   :  { %v535_v21 = vadd.f32 %v5724_v38, %v534_v17  ;;  %v735_v22 = vadd.f32 %v5724_v38, %v734_v18  ;;  %v162_v23 = vpop.f32.mrf.mxu0  ;;  %v337_v24 = vpop.f32.mrf.mxu1  ;;  %v269_v17 = vld [vmem:[%s7856_s0 + $0x180] sm:$0xff] }
  0xa0   :  { %v163_v27 = vadd.f32 %v5724_v38, %v162_v23  ;;  %v338_v28 = vadd.f32 %v5724_v38, %v337_v24  ;;  %v468_v18 = vld [vmem:[%s7856_s0 + $0x240] sm:$0xff] }
  0xa1   :  { %v597_v29 = vmax.f32 %v535_v21, 0.0  ;;  %v797_v33 = vmax.f32 %v735_v22, 0.0  ;;  %v669_v21 = vld [vmem:[%s7856_s0 + $0x310] sm:$0xff] }
  0xa2   :  { %v223_v30 = vmax.f32 %v163_v27, 0.0  ;;  %v398_v31 = vmax.f32 %v338_v28, 0.0  ;;  %3857 = vmatmul.msk.bf16.gmra.mxu0 %vm104_vm1, %v82_v19  ;;  %3870 = vmatmul.msk.bf16.gmra.mxu1 %vm104_vm1, %v280_v20  ;;  %v469_v19 = vld [vmem:[%s7856_s0 + $0x248] sm:$0xff] }
  0xa3   :  { %v622_v32 = vmax.f32 %v422_v12, %v597_v29  ;;  %3883 = vmatmul.msk.bf16.gmra.mxu2 %vm104_vm1, %v480_v25  ;;  %3896 = vmatmul.msk.bf16.gmra.mxu3 %vm104_vm1, %v680_v26  ;;  %v668_v20 = vld [vmem:[%s7856_s0 + $0x308] sm:$0xff]  ;;  %v84_v25 = vpack.c.bf16 %v71_v14, %v70_v13  ;;  %v482_v29 = vpack.c.bf16 %v469_v19, %v468_v18 }
  0xa4   :  { %v423_v34 = vmax.f32 %v223_v30, %v398_v31  ;;  %v682_v30 = vpack.c.bf16 %v669_v21, %v668_v20 }
  0xa5   :  { %v822_v35 = vmax.f32 %v622_v32, %v797_v33 }
  0xa6   :  { %v537_v36 = vpop.f32.mrf.mxu2  ;;  %v737_v37 = vpop.f32.mrf.mxu3 }
  0xa7   :  { %v5792_v39 = vpack.c.bf16 %v822_v35, %v821_v16  ;;  %v538_v40 = vadd.f32 %v5724_v38, %v537_v36  ;;  %v738_v41 = vadd.f32 %v5724_v38, %v737_v37  ;;  %v5796_v42 = vpop.f32.mrf.mxu0  ;;  %v5798_v43 = vpop.f32.mrf.mxu1  ;;  %v268_v16 = vld [vmem:[%s7856_s0 + $0x178] sm:$0xff] }
  0xa8   :  { %v282_v26 = vpack.c.bf16 %v269_v17, %v268_v16 }
  0xa9   :  { %v598_v44 = vmax.f32 %v538_v40, 0.0  ;;  %v798_v45 = vmax.f32 %v738_v41, 0.0 }
  0xab   :  { %v623_v48 = vmax.f32 %v423_v34, %v598_v44 }
  0xad   :  { %v5824_v55 = vmax.f32 %v623_v48, %v798_v45 }
  0xae   :  { %v5826_v56 = vpop.f32.mrf.mxu2  ;;  %v5828_v57 = vpop.f32.mrf.mxu3 }
  0xaf   :  { %v167_v60 = vpop.f32.mrf.mxu0  ;;  %v342_v61 = vpop.f32.mrf.mxu1 }
  0xb0   :  { %v168_v0 = vadd.f32 %v5724_v38, %v167_v60  ;;  %v343_v1 = vadd.f32 %v5724_v38, %v342_v61  ;;  %v283_v60 = vpack.c.bf16 %v270_v50, %v270_v50 }
  0xb2   :  { %v225_v2 = vmax.f32 %v168_v0, 0.0  ;;  %v400_v3 = vmax.f32 %v343_v1, 0.0  ;;  %3858 = vmatmul.msk.bf16.gmra.mxu0 %vm104_vm1, %v83_v58  ;;  %3871 = vmatmul.msk.bf16.gmra.mxu1 %vm104_vm1, %v281_v59  ;;  %v85_v59 = vpack.c.bf16 %v72_v49, %v72_v49  ;;  %v683_v0 = vpack.c.bf16 %v670_v52, %v670_v52 }
  0xb3   :  { %3884 = vmatmul.msk.bf16.gmra.mxu2 %vm104_vm1, %v481_v62  ;;  %3897 = vmatmul.msk.bf16.gmra.mxu3 %vm104_vm1, %v681_v63  ;;  %v483_v63 = vpack.c.bf16 %v470_v51, %v470_v51 }
  0xb4   :  { %v425_v4 = vmax.f32 %v225_v2, %v400_v3 }
  0xb6   :  { %v542_v5 = vpop.f32.mrf.mxu2  ;;  %v742_v6 = vpop.f32.mrf.mxu3 }
  0xb7   :  { %v543_v7 = vadd.f32 %v5724_v38, %v542_v5  ;;  %v743_v8 = vadd.f32 %v5724_v38, %v742_v6  ;;  %v5838_v9 = vpop.f32.mrf.mxu0  ;;  %v5840_v10 = vpop.f32.mrf.mxu1 }
  0xb9   :  { %v600_v11 = vmax.f32 %v543_v7, 0.0  ;;  %v800_v12 = vmax.f32 %v743_v8, 0.0 }
  0xbb   :  { %v625_v15 = vmax.f32 %v425_v4, %v600_v11 }
  0xbd   :  { %v5866_v22 = vmax.f32 %v625_v15, %v800_v12 }
  0xbe   :  { %v5868_v23 = vpop.f32.mrf.mxu2  ;;  %v5870_v24 = vpop.f32.mrf.mxu3 }
  0xbf   :  { %v172_v27 = vpop.f32.mrf.mxu0  ;;  %v347_v28 = vpop.f32.mrf.mxu1 }
  0xc0   :  { %v173_v31 = vadd.f32 %v5724_v38, %v172_v27  ;;  %v348_v32 = vadd.f32 %v5724_v38, %v347_v28 }
  0xc2   :  { %v227_v33 = vmax.f32 %v173_v31, 0.0  ;;  %v402_v34 = vmax.f32 %v348_v32, 0.0  ;;  %3859 = vmatmul.msk.bf16.gmra.mxu0 %vm104_vm1, %v84_v25  ;;  %3872 = vmatmul.msk.bf16.gmra.mxu1 %vm104_vm1, %v282_v26 }
  0xc3   :  { %3885 = vmatmul.msk.bf16.gmra.mxu2 %vm104_vm1, %v482_v29  ;;  %3898 = vmatmul.msk.bf16.gmra.mxu3 %vm104_vm1, %v682_v30 }
  0xc4   :  { %v427_v35 = vmax.f32 %v227_v33, %v402_v34 }
  0xc6   :  { %v547_v36 = vpop.f32.mrf.mxu2  ;;  %v747_v37 = vpop.f32.mrf.mxu3 }
  0xc7   :  { %v548_v40 = vadd.f32 %v5724_v38, %v547_v36  ;;  %v748_v41 = vadd.f32 %v5724_v38, %v747_v37  ;;  %v174_v44 = vpop.f32.mrf.mxu0  ;;  %v5880_v45 = vpop.f32.mrf.mxu1 }
  0xc9   :  { %v602_v46 = vmax.f32 %v548_v40, 0.0  ;;  %v802_v47 = vmax.f32 %v748_v41, 0.0 }
  0xcb   :  { %v627_v48 = vmax.f32 %v427_v35, %v602_v46 }
  0xcd   :  { %v5894_v53 = vmax.f32 %v627_v48, %v802_v47  ;;  %v5917_v47 = vadd.f32 %v5724_v38, %v174_v44 }
  0xce   :  { %v5896_v54 = vpop.f32.mrf.mxu2  ;;  %v5898_v58 = vpop.f32.mrf.mxu3 }
  0xcf   :  { %v177_v61 = vpop.f32.mrf.mxu0  ;;  %v352_v62 = vpop.f32.mrf.mxu1 }
  0xd0   :  { %v178_v1 = vadd.f32 %v5724_v38, %v177_v61  ;;  %v353_v2 = vadd.f32 %v5724_v38, %v352_v62  ;;  %v228_v61 = vmax.f32 %v5917_v47, 0.0  ;;  %v5940_v62 = vadd.f32 %v5724_v38, %v5880_v45 }
  0xd2   :  { %v229_v3 = vmax.f32 %v178_v1, 0.0  ;;  %v404_v4 = vmax.f32 %v353_v2, 0.0  ;;  %3860 = vmatmul.msk.bf16.gmra.mxu0 %vm104_vm1, %v85_v59  ;;  %3873 = vmatmul.msk.bf16.gmra.mxu1 %vm104_vm1, %v283_v60  ;;  %v5928_v59 = vadd.f32 %v5724_v38, %v5838_v9  ;;  %v5932_v60 = vadd.f32 %v5724_v38, %v5840_v10 }
  0xd3   :  { %3886 = vmatmul.msk.bf16.gmra.mxu2 %vm104_vm1, %v483_v63  ;;  %3899 = vmatmul.msk.bf16.gmra.mxu3 %vm104_vm1, %v683_v0 }
  0xd4   :  { %v429_v5 = vmax.f32 %v229_v3, %v404_v4 }
  0xd6   :  { %v552_v6 = vpop.f32.mrf.mxu2  ;;  %v752_v7 = vpop.f32.mrf.mxu3 }
  0xd7   :  { %v553_v8 = vadd.f32 %v5724_v38, %v552_v6  ;;  %v753_v11 = vadd.f32 %v5724_v38, %v752_v7  ;;  %v179_v12 = vpop.f32.mrf.mxu0  ;;  %v354_v13 = vpop.f32.mrf.mxu1 }
  0xd8   :  { %v5920_v48 = vadd.f32 %v5724_v38, %v179_v12  ;;  %v5935_v44 = vadd.f32 %v5724_v38, %v354_v13 }
  0xd9   :  { %v604_v14 = vmax.f32 %v553_v8, 0.0  ;;  %v804_v15 = vmax.f32 %v753_v11, 0.0 }
  0xda   :  { %v230_v2 = vmax.f32 %v5920_v48, 0.0  ;;  %v405_v12 = vmax.f32 %v5935_v44, 0.0  ;;  %v545_v48 = vadd.f32 %v5724_v38, %v5868_v23 }
  0xdb   :  { %v629_v16 = vmax.f32 %v429_v5, %v604_v14 }
  0xdc   :  { %v601_v47 = vmax.f32 %v545_v48, 0.0 }
  0xdd   :  { %v5908_v17 = vmax.f32 %v629_v16, %v804_v15 }
  0xde   :  { %v554_v18 = vpop.f32.mrf.mxu2  ;;  %v5910_v19 = vpop.f32.mrf.mxu3 }
  0xdf   :  { %v182_v20 = vpop.f32.mrf.mxu0  ;;  %v357_v21 = vpop.f32.mrf.mxu1  ;;  %v5953_v16 = vadd.f32 %v5724_v38, %v554_v18 }
  0xe0   :  { %v183_v49 = vadd.f32 %v5724_v38, %v182_v20  ;;  %v358_v50 = vadd.f32 %v5724_v38, %v357_v21 }
  0xe2   :  { %v231_v3 = vmax.f32 %v183_v49, 0.0  ;;  %v406_v10 = vmax.f32 %v358_v50, 0.0 }
  0xe6   :  { %v557_v25 = vpop.f32.mrf.mxu2  ;;  %v5912_v26 = vpop.f32.mrf.mxu3 }
  0xe7   :  { %v184_v27 = vpop.f32.mrf.mxu0  ;;  %v359_v28 = vpop.f32.mrf.mxu1 }
  0xe8   :  { %v185_v4 = vadd.f32 %v5724_v38, %v184_v27  ;;  %v360_v20 = vadd.f32 %v5724_v38, %v359_v28 }
  0xee   :  { %v559_v29 = vpop.f32.mrf.mxu2  ;;  %v5914_v30 = vpop.f32.mrf.mxu3 }
  0xef   :  { %v187_v31 = vpop.f32.mrf.mxu0  ;;  %v362_v32 = vpop.f32.mrf.mxu1  ;;  %v560_v28 = vadd.f32 %v5724_v38, %v559_v29 }
  0xf0   :  { %v188_v63 = vadd.f32 %v5724_v38, %v187_v31  ;;  %v363_v0 = vadd.f32 %v5724_v38, %v362_v32  ;;  %v431_v31 = vmax.f32 %v231_v3, %v406_v10  ;;  %v558_v32 = vadd.f32 %v5724_v38, %v557_v25 }
  0xf2   :  { %v233_v21 = vmax.f32 %v188_v63, 0.0  ;;  %v408_v27 = vmax.f32 %v363_v0, 0.0 }
  0xf4   :  { %v433_v63 = vmax.f32 %v233_v21, %v408_v27 }
  0xf6   :  { %v562_v33 = vpop.f32.mrf.mxu2  ;;  %v762_v34 = vpop.f32.mrf.mxu3 }
  0xf7   :  { %v189_v35 = vpop.f32.mrf.mxu0  ;;  %v364_v36 = vpop.f32.mrf.mxu1  ;;  %v763_v0 = vadd.f32 %v5724_v38, %v762_v34 }
  0xf8   :  { %v190_v7 = vadd.f32 %v5724_v38, %v189_v35  ;;  %v365_v8 = vadd.f32 %v5724_v38, %v364_v36  ;;  %v563_v35 = vadd.f32 %v5724_v38, %v562_v33 }
  0xfa   :  { %v409_v49 = vmax.f32 %v365_v8, 0.0  ;;  %v608_v33 = vmax.f32 %v563_v35, 0.0  ;;  %v606_v35 = vmax.f32 %v558_v32, 0.0  ;;  %v605_v32 = vmax.f32 %v5953_v16, 0.0 }
  0xfc   :  { %v631_v16 = vmax.f32 %v431_v31, %v606_v35 }
  0xfe   :  { %v564_v37 = vpop.f32.mrf.mxu2  ;;  %v764_v40 = vpop.f32.mrf.mxu3 }
  0xff   :  { %v192_v41 = vpop.f32.mrf.mxu0  ;;  %v367_v46 = vpop.f32.mrf.mxu1  ;;  %v565_v36 = vadd.f32 %v5724_v38, %v564_v37 }
 0x100   :  { %v193_v51 = vadd.f32 %v5724_v38, %v192_v41  ;;  %v368_v52 = vadd.f32 %v5724_v38, %v367_v46  ;;  %v232_v41 = vmax.f32 %v185_v4, 0.0  ;;  %v234_v46 = vmax.f32 %v190_v7, 0.0 }
 0x101   :  { %v609_v10 = vmax.f32 %v565_v36, 0.0 }
 0x102   :  { %v235_v45 = vmax.f32 %v193_v51, 0.0  ;;  %v410_v11 = vmax.f32 %v368_v52, 0.0  ;;  %v434_v8 = vmax.f32 %v234_v46, %v409_v49 }
 0x104   :  { %v435_v50 = vmax.f32 %v235_v45, %v410_v11  ;;  %v634_v36 = vmax.f32 %v434_v8, %v609_v10 }
 0x106   :  { %v567_v1 = vpop.f32.mrf.mxu2  ;;  %v767_v9 = vpop.f32.mrf.mxu3 }
 0x107   :  { %v194_v5 = vpop.f32.mrf.mxu0  ;;  %v369_v6 = vpop.f32.mrf.mxu1  ;;  %v568_v13 = vadd.f32 %v5724_v38, %v567_v1  ;;  %v768_v52 = vadd.f32 %v5724_v38, %v767_v9  ;;  %v765_v9 = vadd.f32 %v5724_v38, %v764_v40  ;;  %v760_v40 = vadd.f32 %v5724_v38, %v5914_v30 }
 0x108   :  { %v195_v14 = vadd.f32 %v5724_v38, %v194_v5  ;;  %v370_v15 = vadd.f32 %v5724_v38, %v369_v6  ;;  %v407_v5 = vmax.f32 %v360_v20, 0.0  ;;  %v607_v20 = vmax.f32 %v560_v28, 0.0 }
 0x109   :  { %v610_v51 = vmax.f32 %v568_v13, 0.0  ;;  %v810_v13 = vmax.f32 %v768_v52, 0.0 }
 0x10a   :  { %v236_v18 = vmax.f32 %v195_v14, 0.0  ;;  %v411_v1 = vmax.f32 %v370_v15, 0.0  ;;  %v758_v15 = vadd.f32 %v5724_v38, %v5912_v26  ;;  %v432_v49 = vmax.f32 %v232_v41, %v407_v5 }
 0x10b   :  { %v635_v11 = vmax.f32 %v435_v50, %v610_v51  ;;  %v633_v50 = vmax.f32 %v433_v63, %v608_v33  ;;  %v809_v51 = vmax.f32 %v765_v9, 0.0  ;;  %v550_v26 = vadd.f32 %v5724_v38, %v5896_v54 }
 0x10c   :  { %v436_v34 = vmax.f32 %v236_v18, %v411_v1  ;;  %v403_v1 = vmax.f32 %v5940_v62, 0.0  ;;  %v632_v28 = vmax.f32 %v432_v49, %v607_v20  ;;  %v430_v54 = vmax.f32 %v230_v2, %v405_v12 }
 0x10d   :  { %v835_v52 = vmax.f32 %v635_v11, %v810_v13  ;;  %v834_v41 = vmax.f32 %v634_v36, %v809_v51  ;;  %v755_v62 = vadd.f32 %v5724_v38, %v5910_v19  ;;  %v603_v44 = vmax.f32 %v550_v26, 0.0 }
 0x10e   :  { %v569_v25 = vpop.f32.mrf.mxu2  ;;  %v769_v3 = vpop.f32.mrf.mxu3  ;;  %v630_v2 = vmax.f32 %v430_v54, %v605_v32  ;;  %v340_v11 = vadd.f32 %v5724_v38, %v5798_v43  ;;  %v226_v13 = vmax.f32 %v5928_v59, 0.0  ;;  %v540_v43 = vadd.f32 %v5724_v38, %v5826_v56 }
 0x10f   :  { %v570_v37 = vadd.f32 %v5724_v38, %v569_v25  ;;  %v770_v4 = vadd.f32 %v5724_v38, %v769_v3  ;;  %v197_v6 = vpop.f32.mrf.mxu0  ;;  %v372_v7 = vpop.f32.mrf.mxu1  ;;  %v808_v3 = vmax.f32 %v763_v0, 0.0  ;;  %v805_v23 = vmax.f32 %v755_v62, 0.0 }
 0x110   :  { %v198_v45 = vadd.f32 %v5724_v38, %v197_v6  ;;  %v373_v29 = vadd.f32 %v5724_v38, %v372_v7  ;;  %v807_v7 = vmax.f32 %v760_v40, 0.0  ;;  %v399_v49 = vmax.f32 %v340_v11, 0.0 }
 0x111   :  { %v611_v14 = vmax.f32 %v570_v37, 0.0  ;;  %v811_v46 = vmax.f32 %v770_v4, 0.0  ;;  %v806_v4 = vmax.f32 %v758_v15, 0.0  ;;  %v833_v8 = vmax.f32 %v633_v50, %v808_v3 }
 0x112   :  { %v237_v21 = vmax.f32 %v198_v45, 0.0  ;;  %v412_v27 = vmax.f32 %v373_v29, 0.0  ;;  %v165_v29 = vadd.f32 %v5724_v38, %v5796_v42  ;;  %v832_v12 = vmax.f32 %v632_v28, %v807_v7 }
 0x113   :  { %v636_v25 = vmax.f32 %v436_v34, %v611_v14  ;;  %v5995_v19 = vpack.c.bf16 %v834_v41, %v833_v8  ;;  %v401_v34 = vmax.f32 %v5932_v60, 0.0  ;;  %v428_v14 = vmax.f32 %v228_v61, %v403_v1 }
 0x114   :  { %v437_v6 = vmax.f32 %v237_v21, %v412_v27  ;;  %v750_v42 = vadd.f32 %v5724_v38, %v5898_v58  ;;  %v831_v15 = vmax.f32 %v631_v16, %v806_v4  ;;  %v830_v21 = vmax.f32 %v630_v2, %v805_v23 }
 0x115   :  { %v836_v18 = vmax.f32 %v636_v25, %v811_v46  ;;  %v628_v61 = vmax.f32 %v428_v14, %v603_v44  ;;  %v224_v36 = vmax.f32 %v165_v29, 0.0  ;;  %v426_v40 = vmax.f32 %v226_v13, %v401_v34  ;;  %v3928_v34 = vld [vmem:[%s7858_s3 + $0x30] sm:$0xf]  ;;  %v5135_v14 = vld [vmem:[%s7858_s3 + $0x34] sm:$0xf0] }
 0x116   :  { %v572_v10 = vpop.f32.mrf.mxu2  ;;  %v772_v37 = vpop.f32.mrf.mxu3  ;;  %v6015_v27 = vpack.c.bf16 %v832_v12, %v831_v15  ;;  %v745_v56 = vadd.f32 %v5724_v38, %v5870_v24  ;;  %v803_v3 = vmax.f32 %v750_v42, 0.0  ;;  %v599_v51 = vmax.f32 %v540_v43, 0.0 }
 0x117   :  { %v5975_v5 = vpack.c.bf16 %v836_v18, %v835_v52  ;;  %v573_v30 = vadd.f32 %v5724_v38, %v572_v10  ;;  %v773_v63 = vadd.f32 %v5724_v38, %v772_v37  ;;  %v5979_v0 = vpop.f32.mrf.mxu0  ;;  %v5981_v33 = vpop.f32.mrf.mxu1  ;;  %v626_v52 = vmax.f32 %v426_v40, %v601_v47  ;;  %v4002_v40 = vld [vmem:[%s7858_s3 + $0x40] sm:$0xf] }
 0x118   :  { %v828_v18 = vmax.f32 %v628_v61, %v803_v3  ;;  %v6024_v1 = vpack.c.bf16 %v830_v21, %v5908_v17  ;;  %v424_v32 = vmax.f32 %v224_v36, %v399_v49  ;;  %v740_v28 = vadd.f32 %v5724_v38, %v5828_v57 }
 0x119   :  { %v612_v9 = vmax.f32 %v573_v30, 0.0  ;;  %v812_v45 = vmax.f32 %v773_v63, 0.0  ;;  %892 = vmatpush.bf16.msrb.mxu0 %v5975_v5  ;;  %976 = vmatpush.bf16.msrb.mxu2 %v5975_v5  ;;  %v801_v24 = vmax.f32 %v745_v56, 0.0  ;;  %v3929_v42 = vor.u32 %v5135_v14, %v3928_v34 }
 0x11a   :  { %v624_v41 = vmax.f32 %v424_v32, %v599_v51  ;;  %v6037_v17 = vpack.c.bf16 %v828_v18, %v5894_v53  ;;  %v799_v62 = vmax.f32 %v740_v28, 0.0  ;;  %v6089_v61 = vadd.f32 %v5724_v38, %v5979_v0  ;;  %v5121_v51 = vld [vmem:[%s7858_s3 + $0x4] sm:$0xf0] }
 0x11b   :  { %v637_v31 = vmax.f32 %v437_v6, %v612_v9  ;;  %v826_v30 = vmax.f32 %v626_v52, %v801_v24  ;;  %v6100_v0 = vadd.f32 %v5724_v38, %v5981_v33 }
 0x11c   :  { %v824_v57 = vmax.f32 %v624_v41, %v799_v62 }
 0x11d   :  { %v6005_v20 = vmax.f32 %v637_v31, %v812_v45  ;;  %893 = vmatpush.bf16.msrb.mxu0 %v5995_v19  ;;  %977 = vmatpush.bf16.msrb.mxu2 %v5995_v19  ;;  %v6046_v16 = vpack.c.bf16 %v826_v30, %v5866_v22  ;;  %v3920_v22 = vld [vmem:[%s7858_s3 + $0x20] sm:$0xf]  ;;  %v5133_v45 = vld [vmem:[%s7858_s3 + $0x24] sm:$0xf0] }
 0x11e   :  { %v6011_v59 = vpop.f32.mrf.mxu2  ;;  %v6013_v60 = vpop.f32.mrf.mxu3  ;;  %v6055_v7 = vpack.c.bf16 %v824_v57, %v5824_v55  ;;  %v3921_v29 = vor.u32 %v5133_v45, %v3920_v22 }
 0x11f   :  { %v202_v58 = vpop.f32.mrf.mxu0  ;;  %v377_v35 = vpop.f32.mrf.mxu1 }
 0x120   :  { %v203_v25 = vadd.f32 %v5724_v38, %v202_v58  ;;  %v378_v46 = vadd.f32 %v5724_v38, %v377_v35 }
 0x121   :  { %894 = vmatpush.bf16.msrb.mxu0 %v6015_v27  ;;  %978 = vmatpush.bf16.msrb.mxu2 %v6015_v27 }
 0x122   :  { %v239_v6 = vmax.f32 %v203_v25, 0.0  ;;  %v414_v50 = vmax.f32 %v378_v46, 0.0  ;;  %v238_v25 = vmax.f32 %v6089_v61, 0.0 }
 0x124   :  { %v6026_v26 = vmax.f32 %v239_v6, %v414_v50  ;;  %v5145_v6 = vld [vmem:[%s7858_s3 + $0x44] sm:$0xf0]  ;;  %v3902_v50 = vld [vmem:[%s7858_s3] sm:$0xf] }
 0x125   :  { %895 = vmatpush.bf16.msrb.mxu0 %v6024_v1  ;;  %979 = vmatpush.bf16.msrb.mxu2 %v6024_v1  ;;  %v3903_v32 = vor.u32 %v5121_v51, %v3902_v50  ;;  %v4003_v22 = vor.u32 %v5145_v6, %v4002_v40 }
 0x126   :  { %v6032_v10 = vpop.f32.mrf.mxu2  ;;  %v6034_v37 = vpop.f32.mrf.mxu3 }
 0x127   :  { %v6039_v63 = vpop.f32.mrf.mxu0  ;;  %v6041_v54 = vpop.f32.mrf.mxu1  ;;  %v6119_v28 = vadd.f32 %v5724_v38, %v6032_v10 }
 0x128   :  { %v6124_v62 = vadd.f32 %v5724_v38, %v6039_v63  ;;  %v380_v45 = vadd.f32 %v5724_v38, %v6041_v54 }
 0x129   :  { %896 = vmatpush.bf16.msrb.mxu0 %v6037_v17  ;;  %980 = vmatpush.bf16.msrb.mxu2 %v6037_v17 }
 0x12d   :  { %897 = vmatpush.bf16.msrb.mxu0 %v6046_v16  ;;  %981 = vmatpush.bf16.msrb.mxu2 %v6046_v16 }
 0x12e   :  { %v6050_v4 = vpop.f32.mrf.mxu2  ;;  %v6052_v53 = vpop.f32.mrf.mxu3 }
 0x12f   :  { %v207_v8 = vpop.f32.mrf.mxu0  ;;  %v382_v9 = vpop.f32.mrf.mxu1 }
 0x130   :  { %v208_v52 = vadd.f32 %v5724_v38, %v207_v8  ;;  %v383_v24 = vadd.f32 %v5724_v38, %v382_v9 }
 0x131   :  { %898 = vmatpush.bf16.msrb.mxu0 %v6055_v7  ;;  %982 = vmatpush.bf16.msrb.mxu2 %v6055_v7 }
 0x132   :  { %v241_v9 = vmax.f32 %v208_v52, 0.0 }
 0x135   :  { %899 = vmatpush.bf16.msrb.mxu0 %v5792_v39  ;;  %983 = vmatpush.bf16.msrb.mxu2 %v5792_v39 }
 0x136   :  { %v6067_v55 = vpop.f32.mrf.mxu2  ;;  %v6069_v48 = vpop.f32.mrf.mxu3 }
 0x137   :  { %v209_v44 = vpop.f32.mrf.mxu0  ;;  %v384_v2 = vpop.f32.mrf.mxu1  ;;  %v583_v54 = vadd.f32 %v5724_v38, %v6067_v55  ;;  %v580_v55 = vadd.f32 %v5724_v38, %v6050_v4  ;;  %v413_v4 = vmax.f32 %v6100_v0, 0.0  ;;  %v5147_v0 = vld [vmem:[%s7858_s3 + $0x54] sm:$0xf0] }
 0x138   :  { %984 = vmatmul.bf16.vlgmr.msrb.gmra.mxu2 %v3921_v29  ;;  %v210_v57 = vadd.f32 %v5724_v38, %v209_v44  ;;  %900 = vmatmul.bf16.vlgmr.msrb.gmra.mxu0 %v3903_v32  ;;  %v385_v10 = vadd.f32 %v5724_v38, %v384_v2 }
 0x139   :  { %1194 = vmatpush.bf16.msra.mxu2 %v5975_v5 }
 0x13a   :  { %v242_v2 = vmax.f32 %v210_v57, 0.0  ;;  %v616_v57 = vmax.f32 %v583_v54, 0.0 }
 0x13d   :  { %1195 = vmatpush.bf16.msra.mxu2 %v5995_v19 }
 0x13e   :  { %v6073_v12 = vpop.f32.mrf.mxu2  ;;  %v6075_v31 = vpop.f32.mrf.mxu3 }
 0x13f   :  { %v212_v11 = vpop.f32.mrf.mxu0  ;;  %v387_v13 = vpop.f32.mrf.mxu1 }
 0x140   :  { %v213_v56 = vadd.f32 %v5724_v38, %v212_v11  ;;  %v388_v3 = vadd.f32 %v5724_v38, %v387_v13 }
 0x141   :  { %1196 = vmatpush.bf16.msra.mxu2 %v6015_v27 }
 0x142   :  { %v243_v29 = vmax.f32 %v213_v56, 0.0  ;;  %v418_v11 = vmax.f32 %v388_v3, 0.0 }
 0x144   :  { %v443_v40 = vmax.f32 %v243_v29, %v418_v11  ;;  %v575_v11 = vadd.f32 %v5724_v38, %v6011_v59  ;;  %v780_v59 = vadd.f32 %v5724_v38, %v6052_v53 }
 0x145   :  { %1197 = vmatpush.bf16.msra.mxu2 %v6024_v1 }
 0x146   :  { %v587_v23 = vpop.f32.mrf.mxu2  ;;  %v787_v15 = vpop.f32.mrf.mxu3 }
 0x147   :  { %v214_v43 = vpop.f32.mrf.mxu0  ;;  %v389_v47 = vpop.f32.mrf.mxu1  ;;  %v588_v13 = vadd.f32 %v5724_v38, %v587_v23  ;;  %v788_v50 = vadd.f32 %v5724_v38, %v787_v15  ;;  %v785_v15 = vadd.f32 %v5724_v38, %v6075_v31 }
 0x148   :  { %989 = vmatmul.bf16.gmra.mxu2 %v3929_v42  ;;  %v215_v33 = vadd.f32 %v5724_v38, %v214_v43  ;;  %v390_v18 = vadd.f32 %v5724_v38, %v389_v47  ;;  %v416_v43 = vmax.f32 %v383_v24, 0.0  ;;  %v783_v24 = vadd.f32 %v5724_v38, %v6069_v48 }
 0x149   :  { %1198 = vmatpush.bf16.msra.mxu2 %v6037_v17  ;;  %v618_v6 = vmax.f32 %v588_v13, 0.0  ;;  %v778_v48 = vadd.f32 %v5724_v38, %v6034_v37  ;;  %v614_v13 = vmax.f32 %v6119_v28, 0.0  ;;  %v3910_v28 = vld [vmem:[%s7858_s3 + $0x10] sm:$0xf] }
 0x14a   :  { %v244_v34 = vmax.f32 %v215_v33, 0.0  ;;  %v419_v14 = vmax.f32 %v390_v18, 0.0  ;;  %v240_v33 = vmax.f32 %v6124_v62, 0.0  ;;  %v415_v18 = vmax.f32 %v380_v45, 0.0 }
 0x14c   :  { %v444_v51 = vmax.f32 %v244_v34, %v419_v14  ;;  %v615_v34 = vmax.f32 %v580_v55, 0.0  ;;  %v5132_v55 = vld [vmem:[%s7858_s3 + $0x24] sm:$0xf] }
 0x14d   :  { %1199 = vmatpush.bf16.msra.mxu2 %v6046_v16 }
 0x14e   :  { %v589_v21 = vpop.f32.mrf.mxu2  ;;  %v789_v58 = vpop.f32.mrf.mxu3 }
 0x14f   :  { %v217_v35 = vpop.f32.mrf.mxu0  ;;  %v392_v36 = vpop.f32.mrf.mxu1  ;;  %v590_v8 = vadd.f32 %v5724_v38, %v589_v21  ;;  %v790_v52 = vadd.f32 %v5724_v38, %v789_v58  ;;  %v643_v58 = vmax.f32 %v443_v40, %v618_v6  ;;  %v775_v40 = vadd.f32 %v5724_v38, %v6013_v60 }
 0x150   :  { %v218_v46 = vadd.f32 %v5724_v38, %v217_v35  ;;  %v393_v49 = vadd.f32 %v5724_v38, %v392_v36  ;;  %v815_v6 = vmax.f32 %v780_v59, 0.0  ;;  %v5166_v59 = vld [vmem:[%s7859_s4 + $0xf0] sm:$0xff] }
 0x151   :  { %1200 = vmatpush.bf16.msra.mxu2 %v6055_v7  ;;  %v619_v23 = vmax.f32 %v590_v8, 0.0  ;;  %v819_v62 = vmax.f32 %v790_v52, 0.0  ;;  %v813_v61 = vmax.f32 %v775_v40, 0.0  ;;  %v5160_v40 = vld [vmem:[%s7859_s4 + $0xc0] sm:$0xff] }
 0x152   :  { %v245_v41 = vmax.f32 %v218_v46, 0.0  ;;  %v420_v30 = vmax.f32 %v393_v49, 0.0  ;;  %v585_v46 = vadd.f32 %v5724_v38, %v6073_v12  ;;  %v417_v49 = vmax.f32 %v385_v10, 0.0 }
 0x153   :  { %v441_v12 = vmax.f32 %v241_v9, %v416_v43  ;;  %v818_v10 = vmax.f32 %v788_v50, 0.0  ;;  %v816_v43 = vmax.f32 %v783_v24, 0.0 }
 0x154   :  { %v445_v44 = vmax.f32 %v245_v41, %v420_v30  ;;  %v617_v41 = vmax.f32 %v585_v46, 0.0  ;;  %v644_v30 = vmax.f32 %v444_v51, %v619_v23  ;;  %v442_v8 = vmax.f32 %v242_v2, %v417_v49 }
 0x155   :  { %1201 = vmatpush.bf16.msra.mxu2 %v5792_v39  ;;  %v438_v49 = vmax.f32 %v238_v25, %v413_v4  ;;  %v5122_v4 = vld [vmem:[%s7858_s3 + $0x14] sm:$0xf] }
 0x156   :  { %v592_v63 = vpop.f32.mrf.mxu2  ;;  %v792_v42 = vpop.f32.mrf.mxu3  ;;  %v642_v31 = vmax.f32 %v442_v8, %v617_v41  ;;  %v844_v14 = vmax.f32 %v644_v30, %v819_v62  ;;  %v5179_v41 = vld [vmem:[%s7859_s4 + $0x138] sm:$0xff]  ;;  %v5156_v8 = vld [vmem:[%s7858_s3 + $0x64] sm:$0xf]  ;;  %v5177_v62 = vld [vmem:[%s7859_s4 + $0x128] sm:$0xff] }
 0x157   :  { %v593_v47 = vadd.f32 %v5724_v38, %v592_v63  ;;  %v793_v21 = vadd.f32 %v5724_v38, %v792_v42  ;;  %v219_v35 = vpop.f32.mrf.mxu0  ;;  %v394_v36 = vpop.f32.mrf.mxu1  ;;  %v4010_v63 = vld [vmem:[%s7858_s3 + $0x50] sm:$0xf]  ;;  %v440_v42 = vmax.f32 %v240_v33, %v415_v18  ;;  %v3904_v18 = vld [vmem:[%s7858_s3 + $0x8] sm:$0xf0] }
 0x158   :  { %1202 = vmatmul.bf16.vlgmr.msra.gmra.mxu2 %v4003_v22  ;;  %v843_v35 = vmax.f32 %v643_v58, %v818_v10  ;;  %v613_v36 = vmax.f32 %v575_v11, 0.0  ;;  %v4011_v23 = vor.u32 %v5147_v0, %v4010_v63  ;;  %v5129_v10 = vld [vmem:[%s7859_s4 + $0x28] sm:$0xff]  ;;  %v3912_v11 = vld [vmem:[%s7858_s3 + $0x18] sm:$0xf0]  ;;  %v5126_v0 = vld [vmem:[%s7859_s4 + $0x10] sm:$0xff] }
 0x159   :  { %v620_v56 = vmax.f32 %v593_v47, 0.0  ;;  %v820_v3 = vmax.f32 %v793_v21, 0.0  ;;  %v641_v47 = vmax.f32 %v441_v12, %v616_v57  ;;  %v817_v21 = vmax.f32 %v785_v15, 0.0  ;;  %v5131_v12 = vld [vmem:[%s7859_s4 + $0x38] sm:$0xff]  ;;  %v5130_v15 = vld [vmem:[%s7859_s4 + $0x30] sm:$0xff] }
 0x15a   :  { %v640_v54 = vmax.f32 %v440_v42, %v615_v34  ;;  %v6173_v46 = vpack.c.bf16 %v844_v14, %v843_v35  ;;  %v638_v51 = vmax.f32 %v438_v49, %v613_v36  ;;  %v5175_v34 = vld [vmem:[%s7859_s4 + $0x118] sm:$0xff]  ;;  %v3915_v14 = vor.u32 %v5122_v4, %v3912_v11  ;;  %v5174_v42 = vld [vmem:[%s7859_s4 + $0x110] sm:$0xff]  ;;  %v5164_v35 = vld [vmem:[%s7859_s4 + $0xe0] sm:$0xff] }
 0x15b   :  { %v645_v32 = vmax.f32 %v445_v44, %v620_v56  ;;  %v5123_v44 = vld [vmem:[%s7858_s3 + $0x14] sm:$0xf0]  ;;  %v842_v2 = vmax.f32 %v642_v31, %v817_v21  ;;  %v639_v56 = vmax.f32 %v6026_v26, %v614_v13  ;;  %v841_v50 = vmax.f32 %v641_v47, %v816_v43  ;;  %v5120_v26 = vld [vmem:[%s7858_s3 + $0x4] sm:$0xf]  ;;  %v3930_v13 = vld [vmem:[%s7858_s3 + $0x38] sm:$0xf0] }
 0x15c   :  { %v3911_v53 = vor.u32 %v5123_v44, %v3910_v28  ;;  %v840_v52 = vmax.f32 %v640_v54, %v815_v6  ;;  %v838_v38 = vmax.f32 %v638_v51, %v813_v61  ;;  %v3907_v30 = vor.u32 %v5120_v26, %v3904_v18  ;;  %v5167_v31 = vld [vmem:[%s7859_s4 + $0xf8] sm:$0xff]  ;;  %v5125_v43 = vld [vmem:[%s7859_s4 + $0x8] sm:$0xff]  ;;  %v5124_v47 = vld [vmem:[%s7859_s4] sm:$0xff] }
 0x15d   :  { %v845_v22 = vmax.f32 %v645_v32, %v820_v3  ;;  %v814_v3 = vmax.f32 %v778_v48, 0.0  ;;  %v6183_v33 = vpack.c.bf16 %v842_v2, %v841_v50  ;;  %v3922_v32 = vld [vmem:[%s7858_s3 + $0x28] sm:$0xf0]  ;;  %v5127_v48 = vld [vmem:[%s7859_s4 + $0x18] sm:$0xff]  ;;  %v5172_v21 = vld [vmem:[%s7859_s4 + $0x100] sm:$0xff] }
 0x15e   :  { %v594_v45 = vpop.f32.mrf.mxu2  ;;  %v794_v29 = vpop.f32.mrf.mxu3  ;;  %905 = vmatmul.bf16.gmra.mxu0 %v3911_v53  ;;  %v6209_v24 = vpack.c.bf16 %v838_v38, %v6005_v20  ;;  %v3925_v57 = vor.u32 %v5132_v55, %v3922_v32  ;;  %v4054_v20 = vld [vmem:[%s7858_s3 + $0x68] sm:$0xf0]  ;;  %v5144_v53 = vld [vmem:[%s7858_s3 + $0x44] sm:$0xf]  ;;  %v5163_v54 = vld [vmem:[%s7859_s4 + $0xd8] sm:$0xff] }
 0x15f   :  { %v858_v9 = vpack.c.bf16 %v845_v22, %v845_v22  ;;  %v839_v25 = vmax.f32 %v639_v56, %v814_v3  ;;  %v5178_v22 = vld [vmem:[%s7859_s4 + $0x130] sm:$0xff]  ;;  %v4057_v58 = vor.u32 %v5156_v8, %v4054_v20  ;;  %v5128_v45 = vld [vmem:[%s7859_s4 + $0x20] sm:$0xff]  ;;  %v5173_v28 = vld [vmem:[%s7859_s4 + $0x108] sm:$0xff] }
 0x160   :  { %v5176_v29 = vld [vmem:[%s7859_s4 + $0x120] sm:$0xff]  ;;  %v5165_v44 = vld [vmem:[%s7859_s4 + $0xe8] sm:$0xff]  ;;  %v5146_v56 = vld [vmem:[%s7858_s3 + $0x54] sm:$0xf] }
 0x161   :  { %v6162_v37 = vsel %vm888_vm2, %v858_v9, 0  ;;  %v6188_v60 = vpack.c.bf16 %v840_v52, %v839_v25  ;;  %v5134_v9 = vld [vmem:[%s7858_s3 + $0x34] sm:$0xf]  ;;  %v4004_v36 = vld [vmem:[%s7858_s3 + $0x48] sm:$0xf0]  ;;  %v5143_v6 = vld [vmem:[%s7859_s4 + $0x78] sm:$0xff] }
 0x162   :  { %914 = vmatpush.bf16.msrb.mxu1 %v6162_v37  ;;  %998 = vmatpush.bf16.msrb.mxu3 %v6162_v37  ;;  %v3933_v63 = vor.u32 %v5134_v9, %v3930_v13  ;;  %v4007_v2 = vor.u32 %v5144_v53, %v4004_v36  ;;  %v5161_v49 = vld [vmem:[%s7859_s4 + $0xc8] sm:$0xff]  ;;  %v4012_v3 = vld [vmem:[%s7858_s3 + $0x58] sm:$0xf0]  ;;  %v5142_v51 = vld [vmem:[%s7859_s4 + $0x70] sm:$0xff] }
 0x163   :  { %1371 = vmatpush.bf16.msrb.mxu2 %v6162_v37  ;;  %v4015_v50 = vor.u32 %v5146_v56, %v4012_v3  ;;  %1080 = vmatpush.bf16.msra.mxu0 %v5143_v6  ;;  %v5141_v52 = vld [vmem:[%s7859_s4 + $0x68] sm:$0xff]  ;;  %v5140_v61 = vld [vmem:[%s7859_s4 + $0x60] sm:$0xff]  ;;  %v5139_v25 = vld [vmem:[%s7859_s4 + $0x58] sm:$0xff] }
 0x164   :  { %v5138_v38 = vld [vmem:[%s7859_s4 + $0x50] sm:$0xff]  ;;  %v5137_v26 = vld [vmem:[%s7859_s4 + $0x48] sm:$0xff]  ;;  %v5136_v18 = vld [vmem:[%s7859_s4 + $0x40] sm:$0xff] }
 0x165   :  { %v5155_v55 = vld [vmem:[%s7859_s4 + $0xb8] sm:$0xff]  ;;  %v5154_v32 = vld [vmem:[%s7859_s4 + $0xb0] sm:$0xff]  ;;  %v5149_v8 = vld [vmem:[%s7859_s4 + $0x88] sm:$0xff] }
 0x166   :  { %915 = vmatpush.bf16.msrb.mxu1 %v6173_v46  ;;  %999 = vmatpush.bf16.msrb.mxu3 %v6173_v46  ;;  %v5148_v20 = vld [vmem:[%s7859_s4 + $0x80] sm:$0xff]  ;;  %v5157_v3 = vld [vmem:[%s7858_s3 + $0x64] sm:$0xf0] }
 0x167   :  { %1372 = vmatpush.bf16.msrb.mxu2 %v6173_v46  ;;  %1081 = vmatpush.bf16.msra.mxu0 %v5142_v51  ;;  %v4052_v56 = vld [vmem:[%s7858_s3 + $0x60] sm:$0xf]  ;;  %v5191_v51 = vld [vmem:[%s7859_s4 + $0x178] sm:$0xff] }
 0x168   :  { %1207 = vmatmul.bf16.gmra.mxu2 %v4011_v23  ;;  %v5162_v23 = vld [vmem:[%s7859_s4 + $0xd0] sm:$0xff] }
 0x16a   :  { %916 = vmatpush.bf16.msrb.mxu1 %v6183_v33  ;;  %1000 = vmatpush.bf16.msrb.mxu3 %v6183_v33 }
 0x16b   :  { %1373 = vmatpush.bf16.msrb.mxu2 %v6183_v33  ;;  %1082 = vmatpush.bf16.msra.mxu0 %v5141_v52 }
 0x16e   :  { %917 = vmatpush.bf16.msrb.mxu1 %v6188_v60  ;;  %1001 = vmatpush.bf16.msrb.mxu3 %v6188_v60 }
 0x16f   :  { %1374 = vmatpush.bf16.msrb.mxu2 %v6188_v60  ;;  %1083 = vmatpush.bf16.msra.mxu0 %v5140_v61  ;;  %v5190_v61 = vld [vmem:[%s7859_s4 + $0x170] sm:$0xff] }
 0x172   :  { %918 = vmatpush.bf16.msrb.mxu1 %v6209_v24  ;;  %1002 = vmatpush.bf16.msrb.mxu3 %v6209_v24 }
 0x173   :  { %1375 = vmatpush.bf16.msrb.mxu2 %v6209_v24  ;;  %1084 = vmatpush.bf16.msra.mxu0 %v5139_v25 }
 0x175   :  { %3916 = vmatmul.msk.bf16.vlgmr.msrb.gmra.mxu1 %vm881_vm3, %v3907_v30  ;;  %3934 = vmatmul.msk.bf16.vlgmr.msrb.gmra.mxu3 %vm881_vm3, %v3925_v57  ;;  %v5151_v30 = vld [vmem:[%s7859_s4 + $0x98] sm:$0xff]  ;;  %v5150_v57 = vld [vmem:[%s7859_s4 + $0x90] sm:$0xff] }
 0x176   :  { %1147 = vmatpush.bf16.msra.mxu1 %v5131_v12  ;;  %1216 = vmatpush.bf16.msra.mxu3 %v6162_v37  ;;  %v5153_v12 = vld [vmem:[%s7859_s4 + $0xa8] sm:$0xff] }
 0x177   :  { %1608 = vmatpush.bf16.msra.mxu2 %v5179_v41  ;;  %1085 = vmatpush.bf16.msra.mxu0 %v5138_v38  ;;  %v5152_v41 = vld [vmem:[%s7859_s4 + $0xa0] sm:$0xff] }
 0x178   :  { %4066 = vmatmul.msk.bf16.vlgmr.msrb.gmra.mxu2 %vm881_vm3, %v4057_v58 }
 0x17a   :  { %1148 = vmatpush.bf16.msra.mxu1 %v5130_v15  ;;  %1217 = vmatpush.bf16.msra.mxu3 %v6173_v46 }
 0x17b   :  { %1609 = vmatpush.bf16.msra.mxu2 %v5178_v22  ;;  %1086 = vmatpush.bf16.msra.mxu0 %v5137_v26 }
 0x17e   :  { %1149 = vmatpush.bf16.msra.mxu1 %v5129_v10  ;;  %1218 = vmatpush.bf16.msra.mxu3 %v6183_v33 }
 0x17f   :  { %1610 = vmatpush.bf16.msra.mxu2 %v5177_v62  ;;  %1087 = vmatpush.bf16.msra.mxu0 %v5136_v18 }
 0x182   :  { %1150 = vmatpush.bf16.msra.mxu1 %v5128_v45  ;;  %1219 = vmatpush.bf16.msra.mxu3 %v6188_v60 }
 0x183   :  { %1611 = vmatpush.bf16.msra.mxu2 %v5176_v29  ;;  %1298 = vmatpush.bf16.msrb.mxu0 %v5155_v55  ;;  %v5189_v55 = vld [vmem:[%s7859_s4 + $0x168] sm:$0xff] }
 0x185   :  { %3917 = vmatmul.msk.bf16.gmra.mxu1 %vm881_vm3, %v3915_v14  ;;  %3935 = vmatmul.msk.bf16.gmra.mxu3 %vm881_vm3, %v3933_v63 }
 0x186   :  { %1151 = vmatpush.bf16.msra.mxu1 %v5127_v48  ;;  %1220 = vmatpush.bf16.msra.mxu3 %v6209_v24 }
 0x187   :  { %1612 = vmatpush.bf16.msra.mxu2 %v5175_v34  ;;  %1299 = vmatpush.bf16.msrb.mxu0 %v5154_v32 }
 0x18a   :  { %1453 = vmatpush.bf16.msrb.mxu3 %v5167_v31  ;;  %1152 = vmatpush.bf16.msra.mxu1 %v5126_v0 }
 0x18b   :  { %1613 = vmatpush.bf16.msra.mxu2 %v5174_v42  ;;  %1300 = vmatpush.bf16.msrb.mxu0 %v5153_v12  ;;  %v5158_v42 = vld [vmem:[%s7858_s3 + $0x74] sm:$0xf]  ;;  %v5188_v12 = vld [vmem:[%s7859_s4 + $0x160] sm:$0xff] }
 0x18e   :  { %1454 = vmatpush.bf16.msrb.mxu3 %v5166_v59  ;;  %1153 = vmatpush.bf16.msra.mxu1 %v5125_v43  ;;  %v4062_v59 = vld [vmem:[%s7858_s3 + $0x78] sm:$0xf0] }
 0x18f   :  { %1614 = vmatpush.bf16.msra.mxu2 %v5173_v28  ;;  %1301 = vmatpush.bf16.msrb.mxu0 %v5152_v41  ;;  %v4065_v43 = vor.u32 %v5158_v42, %v4062_v59  ;;  %v4060_v41 = vld [vmem:[%s7858_s3 + $0x70] sm:$0xf]  ;;  %v4112_v42 = vld [vmem:[%s7858_s3 + $0x98] sm:$0xf0]  ;;  %v5201_v59 = vld [vmem:[%s7859_s4 + $0x1a8] sm:$0xff] }
 0x191   :  { %4067 = vmatmul.msk.bf16.gmra.mxu2 %vm881_vm3, %v4065_v43 }
 0x192   :  { %1455 = vmatpush.bf16.msrb.mxu3 %v5165_v44  ;;  %1154 = vmatpush.bf16.msra.mxu1 %v5124_v47 }
 0x193   :  { %1615 = vmatpush.bf16.msra.mxu2 %v5172_v21  ;;  %1302 = vmatpush.bf16.msrb.mxu0 %v5151_v30  ;;  %v5159_v30 = vld [vmem:[%s7858_s3 + $0x74] sm:$0xf0] }
 0x195   :  { %4016 = vmatmul.msk.bf16.vlgmr.msra.gmra.mxu3 %vm881_vm3, %v4007_v2 }
 0x196   :  { %1349 = vmatpush.bf16.msrb.mxu1 %v5975_v5  ;;  %1456 = vmatpush.bf16.msrb.mxu3 %v5164_v35 }
 0x197   :  { %1814 = vmatpush.bf16.msrb.mxu2 %v5975_v5  ;;  %1303 = vmatpush.bf16.msrb.mxu0 %v5150_v57 }
 0x19a   :  { %1350 = vmatpush.bf16.msrb.mxu1 %v5995_v19  ;;  %1457 = vmatpush.bf16.msrb.mxu3 %v5163_v54 }
 0x19b   :  { %1815 = vmatpush.bf16.msrb.mxu2 %v5995_v19  ;;  %1304 = vmatpush.bf16.msrb.mxu0 %v5149_v8  ;;  %v4061_v8 = vor.u32 %v5159_v30, %v4060_v41 }
 0x19e   :  { %1351 = vmatpush.bf16.msrb.mxu1 %v6015_v27  ;;  %1458 = vmatpush.bf16.msrb.mxu3 %v5162_v23 }
 0x19f   :  { %1816 = vmatpush.bf16.msrb.mxu2 %v6015_v27  ;;  %1305 = vmatpush.bf16.msrb.mxu0 %v5148_v20  ;;  %v5187_v20 = vld [vmem:[%s7859_s4 + $0x158] sm:$0xff] }
 0x1a2   :  { %1352 = vmatpush.bf16.msrb.mxu1 %v6024_v1  ;;  %1459 = vmatpush.bf16.msrb.mxu3 %v5161_v49 }
 0x1a3   :  { %1817 = vmatpush.bf16.msrb.mxu2 %v6024_v1 }
 0x1a5   :  { %4017 = vmatmul.msk.bf16.gmra.mxu3 %vm881_vm3, %v4015_v50  ;;  %v4053_v50 = vor.u32 %v5157_v3, %v4052_v56 }
 0x1a6   :  { %1353 = vmatpush.bf16.msrb.mxu1 %v6037_v17  ;;  %1460 = vmatpush.bf16.msrb.mxu3 %v5160_v40 }
 0x1a7   :  { %1818 = vmatpush.bf16.msrb.mxu2 %v6037_v17 }
 0x1aa   :  { %1659 = vmatpush.bf16.msra.mxu3 %v5975_v5  ;;  %1354 = vmatpush.bf16.msrb.mxu1 %v6046_v16 }
 0x1ab   :  { %1819 = vmatpush.bf16.msrb.mxu2 %v6046_v16 }
 0x1ae   :  { %1660 = vmatpush.bf16.msra.mxu3 %v5995_v19  ;;  %1355 = vmatpush.bf16.msrb.mxu1 %v6055_v7 }
 0x1af   :  { %1820 = vmatpush.bf16.msrb.mxu2 %v6055_v7 }
 0x1b2   :  { %1661 = vmatpush.bf16.msra.mxu3 %v6015_v27  ;;  %1356 = vmatpush.bf16.msrb.mxu1 %v5792_v39 }
 0x1b3   :  { %1821 = vmatpush.bf16.msrb.mxu2 %v5792_v39 }
 0x1b5   :  { %v901_v22 = vpop.f32.mrf.mxu0 }
 0x1b6   :  { %1662 = vmatpush.bf16.msra.mxu3 %v6024_v1 }
 0x1ba   :  { %1663 = vmatpush.bf16.msra.mxu3 %v6037_v17 }
 0x1bb   :  { %v985_v15 = vpop.f32.mrf.mxu2 }
 0x1bd   :  { %v903_v62 = vpop.f32.mrf.mxu0 }
 0x1be   :  { %1664 = vmatpush.bf16.msra.mxu3 %v6046_v16 }
 0x1c2   :  { %1665 = vmatpush.bf16.msra.mxu3 %v6055_v7 }
 0x1c3   :  { %v987_v10 = vpop.f32.mrf.mxu2 }
 0x1c6   :  { %1666 = vmatpush.bf16.msra.mxu3 %v5792_v39 }
 0x1cb   :  { %v990_v9 = vpop.f32.mrf.mxu2 }
 0x1d3   :  { %v992_v44 = vpop.f32.mrf.mxu2 }
 0x1db   :  { %v906_v34 = vpop.f32.mrf.mxu0  ;;  %v1203_v49 = vpop.f32.mrf.mxu2 }
 0x1e3   :  { %v908_v47 = vpop.f32.mrf.mxu0  ;;  %v1205_v52 = vpop.f32.mrf.mxu2 }
 0x1eb   :  { %v1208_v32 = vpop.f32.mrf.mxu2 }
 0x1f2   :  { %v920_v58 = vpop.f32.mrf.mxu1 }
 0x1f3   :  { %v921_v4 = vadd.f32 %v920_v58, %v901_v22  ;;  %v1210_v22 = vpop.f32.mrf.mxu2 }
 0x1f8   :  { %v1004_v45 = vpop.f32.mrf.mxu3 }
 0x1f9   :  { %v1005_v31 = vadd.f32 %v1004_v45, %v985_v15  ;;  %v5186_v15 = vld [vmem:[%s7859_s4 + $0x150] sm:$0xff] }
 0x1fa   :  { %v922_v29 = vpop.f32.mrf.mxu1 }
 0x1fb   :  { %v923_v11 = vadd.f32 %v922_v29, %v903_v62  ;;  %v5185_v29 = vld [vmem:[%s7859_s4 + $0x148] sm:$0xff] }
 0x1fd   :  { %v946_v48 = vpack.c.bf16 %v923_v11, %v921_v4  ;;  %v5184_v4 = vld [vmem:[%s7859_s4 + $0x140] sm:$0xff] }
 0x1fe   :  { %v5168_v11 = vld [vmem:[%s7858_s3 + $0x84] sm:$0xf] }
 0x1ff   :  { %1155 = vmatmul.bf16.vlgmr.msra.gmra.mxu1 %v946_v48  ;;  %v4104_v48 = vld [vmem:[%s7858_s3 + $0x88] sm:$0xf0] }
 0x200   :  { %1526 = vmatpush.bf16.msra.mxu1 %v6162_v37  ;;  %v1006_v13 = vpop.f32.mrf.mxu3 }
 0x201   :  { %v1007_v14 = vadd.f32 %v1006_v13, %v987_v10  ;;  %v4102_v13 = vld [vmem:[%s7858_s3 + $0x80] sm:$0xf] }
 0x202   :  { %v925_v63 = vpop.f32.mrf.mxu1 }
 0x203   :  { %v1030_v0 = vpack.c.bf16 %v1007_v14, %v1005_v31  ;;  %v926_v35 = vadd.f32 %v925_v63, %v906_v34  ;;  %v5169_v34 = vld [vmem:[%s7858_s3 + $0x84] sm:$0xf0]  ;;  %v5203_v14 = vld [vmem:[%s7859_s4 + $0x1b8] sm:$0xff]  ;;  %v5202_v63 = vld [vmem:[%s7859_s4 + $0x1b0] sm:$0xff] }
 0x204   :  { %1527 = vmatpush.bf16.msra.mxu1 %v6173_v46  ;;  %v4103_v31 = vor.u32 %v5169_v34, %v4102_v13 }
 0x205   :  { %1088 = vmatmul.bf16.vlgmr.msra.gmra.mxu0 %v1030_v0  ;;  %v5170_v0 = vld [vmem:[%s7858_s3 + $0x94] sm:$0xf] }
 0x206   :  { %1504 = vmatpush.bf16.msra.mxu0 %v5975_v5  ;;  %v4115_v43 = vor.u32 %v5170_v0, %v4112_v42  ;;  %v4160_v0 = vld [vmem:[%s7858_s3 + $0xb0] sm:$0xf]  ;;  %v5183_v42 = vld [vmem:[%s7858_s3 + $0xb4] sm:$0xf0] }
 0x208   :  { %1528 = vmatpush.bf16.msra.mxu1 %v6183_v33  ;;  %v1009_v28 = vpop.f32.mrf.mxu3 }
 0x209   :  { %v1010_v2 = vadd.f32 %v1009_v28, %v990_v9  ;;  %v4107_v9 = vor.u32 %v5168_v11, %v4104_v48  ;;  %v5200_v28 = vld [vmem:[%s7859_s4 + $0x1a0] sm:$0xff] }
 0x20a   :  { %1505 = vmatpush.bf16.msra.mxu0 %v5995_v19  ;;  %v927_v21 = vpop.f32.mrf.mxu1 }
 0x20b   :  { %v928_v53 = vadd.f32 %v927_v21, %v908_v47  ;;  %v5171_v47 = vld [vmem:[%s7858_s3 + $0x94] sm:$0xf0] }
 0x20c   :  { %1529 = vmatpush.bf16.msra.mxu1 %v6188_v60 }
 0x20d   :  { %v947_v36 = vpack.c.bf16 %v928_v53, %v926_v35  ;;  %v5199_v35 = vld [vmem:[%s7859_s4 + $0x198] sm:$0xff]  ;;  %v5198_v53 = vld [vmem:[%s7859_s4 + $0x190] sm:$0xff] }
 0x20e   :  { %1506 = vmatpush.bf16.msra.mxu0 %v6015_v27 }
 0x20f   :  { %1160 = vmatmul.bf16.gmra.mxu1 %v947_v36  ;;  %v5197_v36 = vld [vmem:[%s7859_s4 + $0x188] sm:$0xff] }
 0x210   :  { %1530 = vmatpush.bf16.msra.mxu1 %v6209_v24  ;;  %v1011_v54 = vpop.f32.mrf.mxu3 }
 0x211   :  { %v1012_v23 = vadd.f32 %v1011_v54, %v992_v44  ;;  %v4110_v44 = vld [vmem:[%s7858_s3 + $0x90] sm:$0xf]  ;;  %v5196_v54 = vld [vmem:[%s7859_s4 + $0x180] sm:$0xff] }
 0x212   :  { %1507 = vmatpush.bf16.msra.mxu0 %v6024_v1  ;;  %v4111_v21 = vor.u32 %v5171_v47, %v4110_v44 }
 0x213   :  { %v1031_v40 = vpack.c.bf16 %v1012_v23, %v1010_v2  ;;  %v5180_v2 = vld [vmem:[%s7858_s3 + $0xa4] sm:$0xf]  ;;  %v4154_v23 = vld [vmem:[%s7858_s3 + $0xa8] sm:$0xf0] }
 0x215   :  { %1093 = vmatmul.bf16.gmra.mxu0 %v1031_v40 }
 0x216   :  { %1508 = vmatpush.bf16.msra.mxu0 %v6037_v17 }
 0x218   :  { %v1222_v6 = vpop.f32.mrf.mxu3 }
 0x219   :  { %v1223_v38 = vadd.f32 %v1222_v6, %v1203_v49  ;;  %v4157_v49 = vor.u32 %v5180_v2, %v4154_v23  ;;  %v4202_v2 = vld [vmem:[%s7858_s3 + $0xc0] sm:$0xf]  ;;  %v5193_v23 = vld [vmem:[%s7858_s3 + $0xc4] sm:$0xf0] }
 0x21a   :  { %1509 = vmatpush.bf16.msra.mxu0 %v6046_v16 }
 0x21e   :  { %1510 = vmatpush.bf16.msra.mxu0 %v6055_v7 }
 0x21f   :  { %1357 = vmatmul.bf16.vlgmr.msrb.gmra.mxu1 %v4053_v50 }
 0x220   :  { %1763 = vmatpush.bf16.msrb.mxu1 %v5191_v51  ;;  %v1224_v25 = vpop.f32.mrf.mxu3 }
 0x221   :  { %v1225_v26 = vadd.f32 %v1224_v25, %v1205_v52 }
 0x222   :  { %1511 = vmatpush.bf16.msra.mxu0 %v5792_v39 }
 0x223   :  { %v1248_v18 = vpack.c.bf16 %v1225_v26, %v1223_v38 }
 0x224   :  { %1764 = vmatpush.bf16.msrb.mxu1 %v5190_v61 }
 0x225   :  { %1306 = vmatmul.bf16.vlgmr.msrb.gmra.mxu0 %v1248_v18 }
 0x226   :  { %1681 = vmatpush.bf16.msrb.mxu0 %v6162_v37 }
 0x228   :  { %1765 = vmatpush.bf16.msrb.mxu1 %v5189_v55  ;;  %v1227_v57 = vpop.f32.mrf.mxu3 }
 0x229   :  { %v1228_v10 = vadd.f32 %v1227_v57, %v1208_v32 }
 0x22a   :  { %1682 = vmatpush.bf16.msrb.mxu0 %v6173_v46 }
 0x22c   :  { %1766 = vmatpush.bf16.msrb.mxu1 %v5188_v12 }
 0x22e   :  { %1683 = vmatpush.bf16.msrb.mxu0 %v6183_v33 }
 0x22f   :  { %1362 = vmatmul.bf16.gmra.mxu1 %v4061_v8 }
 0x230   :  { %1767 = vmatpush.bf16.msrb.mxu1 %v5187_v20  ;;  %v1229_v58 = vpop.f32.mrf.mxu3 }
 0x231   :  { %v1230_v62 = vadd.f32 %v1229_v58, %v1210_v22  ;;  %v5182_v58 = vld [vmem:[%s7858_s3 + $0xb4] sm:$0xf] }
 0x232   :  { %1684 = vmatpush.bf16.msrb.mxu0 %v6188_v60 }
 0x233   :  { %v1249_v45 = vpack.c.bf16 %v1230_v62, %v1228_v10  ;;  %v4162_v10 = vld [vmem:[%s7858_s3 + $0xb8] sm:$0xf0] }
 0x234   :  { %1768 = vmatpush.bf16.msrb.mxu1 %v5186_v15 }
 0x235   :  { %1311 = vmatmul.bf16.gmra.mxu0 %v1249_v45  ;;  %v4165_v45 = vor.u32 %v5182_v58, %v4162_v10 }
 0x236   :  { %1685 = vmatpush.bf16.msrb.mxu0 %v6209_v24 }
 0x238   :  { %1769 = vmatpush.bf16.msrb.mxu1 %v5185_v29  ;;  %v4152_v29 = vld [vmem:[%s7858_s3 + $0xa0] sm:$0xf] }
 0x23c   :  { %1770 = vmatpush.bf16.msrb.mxu1 %v5184_v4  ;;  %v5181_v4 = vld [vmem:[%s7858_s3 + $0xa4] sm:$0xf0] }
 0x23d   :  { %v4153_v48 = vor.u32 %v5181_v4, %v4152_v29  ;;  %v4262_v29 = vld [vmem:[%s7858_s3 + $0xf8] sm:$0xf0] }
 0x23f   :  { %4116 = vmatmul.msk.bf16.vlgmr.msra.gmra.mxu1 %vm881_vm3, %v4107_v9 }
 0x240   :  { %1969 = vmatpush.bf16.msra.mxu1 %v5975_v5 }
 0x244   :  { %1970 = vmatpush.bf16.msra.mxu1 %v5995_v19 }
 0x245   :  { %1512 = vmatmul.bf16.vlgmr.msra.gmra.mxu0 %v4103_v31 }
 0x246   :  { %1918 = vmatpush.bf16.msra.mxu0 %v5203_v14 }
 0x248   :  { %1971 = vmatpush.bf16.msra.mxu1 %v6015_v27 }
 0x24a   :  { %1919 = vmatpush.bf16.msra.mxu0 %v5202_v63 }
 0x24c   :  { %1972 = vmatpush.bf16.msra.mxu1 %v6024_v1 }
 0x24e   :  { %1920 = vmatpush.bf16.msra.mxu0 %v5201_v59 }
 0x24f   :  { %4117 = vmatmul.msk.bf16.gmra.mxu1 %vm881_vm3, %v4115_v43  ;;  %v4161_v43 = vor.u32 %v5183_v42, %v4160_v0 }
 0x250   :  { %1973 = vmatpush.bf16.msra.mxu1 %v6037_v17 }
 0x252   :  { %1921 = vmatpush.bf16.msra.mxu0 %v5200_v28 }
 0x254   :  { %1974 = vmatpush.bf16.msra.mxu1 %v6046_v16 }
 0x255   :  { %1517 = vmatmul.bf16.gmra.mxu0 %v4111_v21 }
 0x256   :  { %1922 = vmatpush.bf16.msra.mxu0 %v5199_v35 }
 0x258   :  { %1975 = vmatpush.bf16.msra.mxu1 %v6055_v7 }
 0x25a   :  { %1923 = vmatpush.bf16.msra.mxu0 %v5198_v53  ;;  %v5192_v53 = vld [vmem:[%s7858_s3 + $0xc4] sm:$0xf] }
 0x25c   :  { %1976 = vmatpush.bf16.msra.mxu1 %v5792_v39 }
 0x25e   :  { %1924 = vmatpush.bf16.msra.mxu0 %v5197_v36  ;;  %v4204_v36 = vld [vmem:[%s7858_s3 + $0xc8] sm:$0xf0] }
 0x262   :  { %1925 = vmatpush.bf16.msra.mxu0 %v5196_v54  ;;  %v4207_v54 = vor.u32 %v5192_v53, %v4204_v36 }
 0x265   :  { %4166 = vmatmul.msk.bf16.vlgmr.msrb.gmra.mxu0 %vm881_vm3, %v4157_v49  ;;  %v4203_v49 = vor.u32 %v5193_v23, %v4202_v2 }
 0x266   :  { %2124 = vmatpush.bf16.msrb.mxu0 %v5975_v5 }
 0x26a   :  { %2125 = vmatpush.bf16.msrb.mxu0 %v5995_v19 }
 0x26e   :  { %2126 = vmatpush.bf16.msrb.mxu0 %v6015_v27 }
 0x272   :  { %2127 = vmatpush.bf16.msrb.mxu0 %v6024_v1  ;;  %v1377_v1 = vpop.f32.mrf.mxu2 }
 0x275   :  { %4167 = vmatmul.msk.bf16.gmra.mxu0 %vm881_vm3, %v4165_v45  ;;  %v5206_v45 = vld [vmem:[%s7858_s3 + $0xf4] sm:$0xf] }
 0x276   :  { %2128 = vmatpush.bf16.msrb.mxu0 %v6037_v17 }
 0x27a   :  { %2129 = vmatpush.bf16.msrb.mxu0 %v6046_v16  ;;  %v1379_v52 = vpop.f32.mrf.mxu2 }
 0x27c   :  { %v1156_v40 = vpop.f32.mrf.mxu1 }
 0x27e   :  { %2130 = vmatpush.bf16.msrb.mxu0 %v6055_v7 }
 0x282   :  { %v1089_v56 = vpop.f32.mrf.mxu0  ;;  %2131 = vmatpush.bf16.msrb.mxu0 %v5792_v39  ;;  %v1382_v18 = vpop.f32.mrf.mxu2 }
 0x283   :  { %v1157_v3 = vadd.f32 %v1156_v40, %v1089_v56  ;;  %v5194_v40 = vld [vmem:[%s7858_s3 + $0xd4] sm:$0xf]  ;;  %v4212_v56 = vld [vmem:[%s7858_s3 + $0xd8] sm:$0xf0] }
 0x284   :  { %v6531_v6 = vpop.f32.mrf.mxu1 }
 0x28a   :  { %v6533_v5 = vpop.f32.mrf.mxu0  ;;  %v1384_v57 = vpop.f32.mrf.mxu2 }
 0x28c   :  { %v1161_v19 = vpop.f32.mrf.mxu1 }
 0x292   :  { %v1094_v50 = vpop.f32.mrf.mxu0 }
 0x293   :  { %v1162_v27 = vadd.f32 %v1161_v19, %v1094_v50  ;;  %v4210_v19 = vld [vmem:[%s7858_s3 + $0xd0] sm:$0xf]  ;;  %v5195_v50 = vld [vmem:[%s7858_s3 + $0xd4] sm:$0xf0] }
 0x294   :  { %v6535_v51 = vpop.f32.mrf.mxu1 }
 0x29a   :  { %v6537_v17 = vpop.f32.mrf.mxu0 }
 0x29c   :  { %v1358_v16 = vpop.f32.mrf.mxu1 }
 0x29d   :  { %v1378_v39 = vadd.f32 %v1377_v1, %v1358_v16 }
 0x2a2   :  { %v1307_v61 = vpop.f32.mrf.mxu0 }
 0x2a3   :  { %v6539_v7 = vadd.f32 %v1307_v61, %v1157_v3  ;;  %v4215_v3 = vor.u32 %v5194_v40, %v4212_v56  ;;  %v5216_v40 = vld [vmem:[%s7858_s3 + $0x104] sm:$0xf]  ;;  %v4304_v56 = vld [vmem:[%s7858_s3 + $0x108] sm:$0xf0] }
 0x2a4   :  { %v1360_v25 = vpop.f32.mrf.mxu1 }
 0x2a5   :  { %v1380_v38 = vadd.f32 %v1379_v52, %v1360_v25 }
 0x2a7   :  { %v1403_v26 = vpack.c.bf16 %v1380_v38, %v1378_v39 }
 0x2a9   :  { %1461 = vmatmul.bf16.vlgmr.msrb.gmra.mxu3 %v1403_v26 }
 0x2aa   :  { %1836 = vmatpush.bf16.msrb.mxu3 %v6162_v37  ;;  %v6542_v55 = vpop.f32.mrf.mxu0 }
 0x2ac   :  { %v1363_v32 = vpop.f32.mrf.mxu1 }
 0x2ad   :  { %v1383_v8 = vadd.f32 %v1382_v18, %v1363_v32  ;;  %v5204_v32 = vld [vmem:[%s7858_s3 + $0xe4] sm:$0xf] }
 0x2ae   :  { %1837 = vmatpush.bf16.msrb.mxu3 %v6173_v46 }
 0x2b2   :  { %1838 = vmatpush.bf16.msrb.mxu3 %v6183_v33  ;;  %v1312_v12 = vpop.f32.mrf.mxu0 }
 0x2b3   :  { %v6546_v41 = vadd.f32 %v1312_v12, %v1162_v27  ;;  %v4211_v27 = vor.u32 %v5195_v50, %v4210_v19  ;;  %v4254_v12 = vld [vmem:[%s7858_s3 + $0xe8] sm:$0xf0]  ;;  %v4302_v19 = vld [vmem:[%s7858_s3 + $0x100] sm:$0xf]  ;;  %v5217_v50 = vld [vmem:[%s7858_s3 + $0x104] sm:$0xf0] }
 0x2b4   :  { %v1365_v30 = vpop.f32.mrf.mxu1 }
 0x2b5   :  { %v1385_v20 = vadd.f32 %v1384_v57, %v1365_v30 }
 0x2b6   :  { %1839 = vmatpush.bf16.msrb.mxu3 %v6188_v60 }
 0x2b7   :  { %v1404_v15 = vpack.c.bf16 %v1385_v20, %v1383_v8 }
 0x2b9   :  { %1466 = vmatmul.bf16.gmra.mxu3 %v1404_v15 }
 0x2ba   :  { %1840 = vmatpush.bf16.msrb.mxu3 %v6209_v24  ;;  %v6550_v22 = vpop.f32.mrf.mxu0 }
 0x2bc   :  { %v1532_v62 = vpop.f32.mrf.mxu1 }
 0x2c2   :  { %v1513_v11 = vpop.f32.mrf.mxu0 }
 0x2c3   :  { %v1533_v34 = vadd.f32 %v1532_v62, %v1513_v11  ;;  %v4265_v11 = vor.u32 %v5206_v45, %v4262_v29 }
 0x2c4   :  { %v1534_v9 = vpop.f32.mrf.mxu1 }
 0x2c9   :  { %1667 = vmatmul.bf16.vlgmr.msra.gmra.mxu3 %v4153_v48 }
 0x2ca   :  { %v1515_v13 = vpop.f32.mrf.mxu0 }
 0x2cb   :  { %v1535_v31 = vadd.f32 %v1534_v9, %v1515_v13 }
 0x2cc   :  { %v1537_v63 = vpop.f32.mrf.mxu1 }
 0x2cd   :  { %v1558_v14 = vpack.c.bf16 %v1535_v31, %v1533_v34 }
 0x2cf   :  { %1616 = vmatmul.bf16.vlgmr.msra.gmra.mxu2 %v1558_v14  ;;  %v4252_v14 = vld [vmem:[%s7858_s3 + $0xe0] sm:$0xf] }
 0x2d0   :  { %1991 = vmatpush.bf16.msra.mxu2 %v6162_v37 }
 0x2d2   :  { %v1518_v59 = vpop.f32.mrf.mxu0 }
 0x2d3   :  { %v1538_v47 = vadd.f32 %v1537_v63, %v1518_v59  ;;  %v5205_v63 = vld [vmem:[%s7858_s3 + $0xe4] sm:$0xf0] }
 0x2d4   :  { %1992 = vmatpush.bf16.msra.mxu2 %v6173_v46  ;;  %v1539_v44 = vpop.f32.mrf.mxu1  ;;  %v4253_v42 = vor.u32 %v5205_v63, %v4252_v14 }
 0x2d8   :  { %1993 = vmatpush.bf16.msra.mxu2 %v6183_v33 }
 0x2d9   :  { %1672 = vmatmul.bf16.gmra.mxu3 %v4161_v43 }
 0x2da   :  { %v1520_v28 = vpop.f32.mrf.mxu0 }
 0x2db   :  { %v1540_v21 = vadd.f32 %v1539_v44, %v1520_v28 }
 0x2dc   :  { %1994 = vmatpush.bf16.msra.mxu2 %v6188_v60 }
 0x2dd   :  { %v1559_v35 = vpack.c.bf16 %v1540_v21, %v1538_v47  ;;  %v4260_v47 = vld [vmem:[%s7858_s3 + $0xf0] sm:$0xf]  ;;  %v5207_v21 = vld [vmem:[%s7858_s3 + $0xf4] sm:$0xf0] }
 0x2de   :  { %v4261_v53 = vor.u32 %v5207_v21, %v4260_v47 }
 0x2df   :  { %1621 = vmatmul.bf16.gmra.mxu2 %v1559_v35 }
 0x2e0   :  { %1995 = vmatpush.bf16.msra.mxu2 %v6209_v24 }
 0x2e2   :  { %v1687_v38 = vpop.f32.mrf.mxu0 }
 0x2e9   :  { %4216 = vmatmul.msk.bf16.vlgmr.msrb.gmra.mxu3 %vm881_vm3, %v4207_v54 }
 0x2ea   :  { %v1689_v18 = vpop.f32.mrf.mxu0 }
 0x2ef   :  { %1822 = vmatmul.bf16.vlgmr.msrb.gmra.mxu2 %v4203_v49 }
 0x2f2   :  { %v1692_v58 = vpop.f32.mrf.mxu0 }
 0x2f9   :  { %4217 = vmatmul.msk.bf16.gmra.mxu3 %vm881_vm3, %v4215_v3  ;;  %v4307_v3 = vor.u32 %v5216_v40, %v4304_v56 }
 0x2fa   :  { %v1694_v9 = vpop.f32.mrf.mxu0 }
 0x2ff   :  { %1827 = vmatmul.bf16.gmra.mxu2 %v4211_v27  ;;  %v4303_v27 = vor.u32 %v5217_v50, %v4302_v19 }
 0x32c   :  { %v1462_v1 = vpop.f32.mrf.mxu3 }
 0x32d   :  { %v1472_v16 = vadd.f32 %v1462_v1, %v6539_v7  ;;  %v4257_v7 = vor.u32 %v5204_v32, %v4254_v12  ;;  %v5218_v1 = vld [vmem:[%s7858_s3 + $0x114] sm:$0xf]  ;;  %v5213_v12 = vld [vmem:[%s7859_s4 + $0x1e8] sm:$0xff] }
 0x32e   :  { %v5214_v32 = vld [vmem:[%s7859_s4 + $0x1f0] sm:$0xff] }
 0x32f   :  { %4266 = vmatmul.msk.bf16.vlgmr.msra.gmra.mxu2 %vm881_vm3, %v4257_v7  ;;  %v5211_v7 = vld [vmem:[%s7859_s4 + $0x1d8] sm:$0xff] }
 0x334   :  { %v6603_v52 = vpop.f32.mrf.mxu3 }
 0x33c   :  { %v1467_v61 = vpop.f32.mrf.mxu3 }
 0x33d   :  { %v1474_v25 = vadd.f32 %v1467_v61, %v6546_v41 }
 0x33f   :  { %4267 = vmatmul.msk.bf16.gmra.mxu2 %vm881_vm3, %v4265_v11 }
 0x344   :  { %v6606_v39 = vpop.f32.mrf.mxu3 }
 0x34c   :  { %v1668_v26 = vpop.f32.mrf.mxu3 }
 0x34d   :  { %v1688_v20 = vadd.f32 %v1687_v38, %v1668_v26  ;;  %v5219_v38 = vld [vmem:[%s7858_s3 + $0x114] sm:$0xf0] }
 0x352   :  { %v1617_v30 = vpop.f32.mrf.mxu2 }
 0x353   :  { %v6614_v57 = vadd.f32 %v1617_v30, %v1472_v16  ;;  %v4312_v16 = vld [vmem:[%s7858_s3 + $0x118] sm:$0xf0]  ;;  %v5212_v30 = vld [vmem:[%s7859_s4 + $0x1e0] sm:$0xff] }
 0x354   :  { %v1670_v8 = vpop.f32.mrf.mxu3  ;;  %v4315_v61 = vor.u32 %v5218_v1, %v4312_v16 }
 0x355   :  { %v1690_v41 = vadd.f32 %v1689_v18, %v1670_v8  ;;  %v5215_v18 = vld [vmem:[%s7859_s4 + $0x1f8] sm:$0xff] }
 0x356   :  { %2073 = vmatpush.bf16.msra.mxu3 %v5215_v18 }
 0x357   :  { %v1713_v15 = vpack.c.bf16 %v1690_v41, %v1688_v20  ;;  %v5210_v41 = vld [vmem:[%s7859_s4 + $0x1d0] sm:$0xff] }
 0x359   :  { %1771 = vmatmul.bf16.vlgmr.msrb.gmra.mxu1 %v1713_v15  ;;  %v5209_v15 = vld [vmem:[%s7859_s4 + $0x1c8] sm:$0xff] }
 0x35a   :  { %2146 = vmatpush.bf16.msrb.mxu1 %v6162_v37  ;;  %v6618_v10 = vpop.f32.mrf.mxu2  ;;  %2074 = vmatpush.bf16.msra.mxu3 %v5214_v32 }
 0x35c   :  { %v1673_v62 = vpop.f32.mrf.mxu3 }
 0x35d   :  { %v1693_v13 = vadd.f32 %v1692_v58, %v1673_v62  ;;  %v5208_v62 = vld [vmem:[%s7859_s4 + $0x1c0] sm:$0xff] }
 0x35e   :  { %2147 = vmatpush.bf16.msrb.mxu1 %v6173_v46  ;;  %2075 = vmatpush.bf16.msra.mxu3 %v5213_v12 }
 0x362   :  { %2148 = vmatpush.bf16.msrb.mxu1 %v6183_v33  ;;  %v1622_v4 = vpop.f32.mrf.mxu2  ;;  %2076 = vmatpush.bf16.msra.mxu3 %v5212_v30 }
 0x363   :  { %v6628_v48 = vadd.f32 %v1622_v4, %v1474_v25  ;;  %v4310_v25 = vld [vmem:[%s7858_s3 + $0x110] sm:$0xf] }
 0x364   :  { %v1675_v37 = vpop.f32.mrf.mxu3  ;;  %v4311_v26 = vor.u32 %v5219_v38, %v4310_v25 }
 0x365   :  { %v1695_v34 = vadd.f32 %v1694_v9, %v1675_v37  ;;  %v5226_v37 = vld [vmem:[%s7859_s4 + $0x230] sm:$0xff]  ;;  %v5225_v9 = vld [vmem:[%s7859_s4 + $0x228] sm:$0xff] }
 0x366   :  { %2149 = vmatpush.bf16.msrb.mxu1 %v6188_v60  ;;  %2077 = vmatpush.bf16.msra.mxu3 %v5211_v7  ;;  %v4464_v7 = vld [vmem:[%s7861_s6 + $0xe0] sm:$0xf] }
 0x367   :  { %v1714_v46 = vpack.c.bf16 %v1695_v34, %v1693_v13 }
 0x369   :  { %1776 = vmatmul.bf16.gmra.mxu1 %v1714_v46  ;;  %v5223_v46 = vld [vmem:[%s7859_s4 + $0x218] sm:$0xff] }
 0x36a   :  { %2150 = vmatpush.bf16.msrb.mxu1 %v6209_v24  ;;  %v6633_v33 = vpop.f32.mrf.mxu2  ;;  %2078 = vmatpush.bf16.msra.mxu3 %v5210_v41 }
 0x36c   :  { %v1842_v31 = vpop.f32.mrf.mxu3 }
 0x36e   :  { %2079 = vmatpush.bf16.msra.mxu3 %v5209_v15  ;;  %v4466_v15 = vld [vmem:[%s7861_s6 + $0xf0] sm:$0xf0] }
 0x372   :  { %v1823_v0 = vpop.f32.mrf.mxu2  ;;  %2080 = vmatpush.bf16.msra.mxu3 %v5208_v62  ;;  %v5259_v62 = vld [vmem:[%s7861_s6 + $0xf4] sm:$0xf0] }
 0x373   :  { %v1843_v43 = vadd.f32 %v1842_v31, %v1823_v0  ;;  %v1159_v31 = vadd.f32 %v6531_v6, %v6533_v5  ;;  %v5221_v6 = vld [vmem:[%s7859_s4 + $0x208] sm:$0xff] }
 0x374   :  { %v1844_v59 = vpop.f32.mrf.mxu3 }
 0x375   :  { %v1318_v63 = vadd.f32 %v6542_v55, %v1159_v31  ;;  %v5255_v31 = vld [vmem:[%s7861_s6 + $0xd4] sm:$0xf0] }
 0x379   :  { %1977 = vmatmul.bf16.vlgmr.msra.gmra.mxu1 %v4253_v42 }
 0x37a   :  { %v1825_v60 = vpop.f32.mrf.mxu2 }
 0x37b   :  { %v1845_v28 = vadd.f32 %v1844_v59, %v1825_v60  ;;  %v5222_v59 = vld [vmem:[%s7859_s4 + $0x210] sm:$0xff] }
 0x37c   :  { %v1847_v24 = vpop.f32.mrf.mxu3 }
 0x37d   :  { %v1868_v44 = vpack.c.bf16 %v1845_v28, %v1843_v43  ;;  %v1473_v28 = vadd.f32 %v6603_v52, %v1318_v63  ;;  %v5220_v52 = vld [vmem:[%s7859_s4 + $0x200] sm:$0xff] }
 0x37f   :  { %1926 = vmatmul.bf16.vlgmr.msra.gmra.mxu0 %v1868_v44  ;;  %v1628_v44 = vadd.f32 %v6618_v10, %v1473_v28  ;;  %v5250_v28 = vld [vmem:[%s7861_s6 + $0xac] sm:$0xf0] }
 0x382   :  { %v1828_v35 = vpop.f32.mrf.mxu2 }
 0x383   :  { %v1848_v2 = vadd.f32 %v1847_v24, %v1828_v35 }
 0x384   :  { %v1849_v54 = vpop.f32.mrf.mxu3 }
 0x389   :  { %1982 = vmatmul.bf16.gmra.mxu1 %v4261_v53  ;;  %v1164_v53 = vadd.f32 %v6535_v51, %v6537_v17 }
 0x38a   :  { %v1830_v36 = vpop.f32.mrf.mxu2 }
 0x38b   :  { %v1850_v23 = vadd.f32 %v1849_v54, %v1830_v36  ;;  %v1320_v10 = vadd.f32 %v6550_v22, %v1164_v53  ;;  %v4442_v53 = vld [vmem:[%s7861_s6 + $0xb8] sm:$0xf0] }
 0x38d   :  { %v1869_v49 = vpack.c.bf16 %v1850_v23, %v1848_v2  ;;  %v1475_v56 = vadd.f32 %v6606_v39, %v1320_v10  ;;  %v5246_v10 = vld [vmem:[%s7861_s6 + $0x8c] sm:$0xf0] }
 0x38f   :  { %1931 = vmatmul.bf16.gmra.mxu0 %v1869_v49  ;;  %v1630_v19 = vadd.f32 %v6633_v33, %v1475_v56  ;;  %v4424_v56 = vld [vmem:[%s7861_s6 + $0x88] sm:$0xf] }
 0x399   :  { %4316 = vmatmul.msk.bf16.vlgmr.msrb.gmra.mxu1 %vm881_vm3, %v4307_v3 }
 0x39f   :  { %2132 = vmatmul.bf16.vlgmr.msrb.gmra.mxu0 %v4303_v27 }
 0x3a9   :  { %4317 = vmatmul.msk.bf16.gmra.mxu1 %vm881_vm3, %v4315_v61 }
 0x3af   :  { %2137 = vmatmul.bf16.gmra.mxu0 %v4311_v26 }
 0x3b2   :  { %v1997_v11 = vpop.f32.mrf.mxu2 }
 0x3ba   :  { %v1999_v34 = vpop.f32.mrf.mxu2 }
 0x3c2   :  { %v2002_v55 = vpop.f32.mrf.mxu2 }
 0x3ca   :  { %v2004_v36 = vpop.f32.mrf.mxu2 }
 0x3d6   :  { %v1772_v8 = vpop.f32.mrf.mxu1 }
 0x3d7   :  { %v1782_v20 = vadd.f32 %v1772_v8, %v6614_v57  ;;  %v5227_v57 = vld [vmem:[%s7859_s4 + $0x238] sm:$0xff]  ;;  %v5258_v8 = vld [vmem:[%s7861_s6 + $0xec] sm:$0xf0] }
 0x3d8   :  { %2228 = vmatpush.bf16.msrb.mxu2 %v5227_v57  ;;  %v4465_v41 = vor.u32 %v5258_v8, %v4464_v7  ;;  %v5257_v57 = vld [vmem:[%s7861_s6 + $0xec] sm:$0xf]  ;;  %v4384_v8 = vld [vmem:[%s7861_s6 + $0x40] sm:$0xf] }
 0x3da   :  { %2469 = vmatpush.bf16.msrb.mxu3 %v4465_v41  ;;  %v5236_v41 = vld [vmem:[%s7861_s6 + $0x44] sm:$0xf] }
 0x3dc   :  { %2229 = vmatpush.bf16.msrb.mxu2 %v5226_v37  ;;  %v4448_v37 = vld [vmem:[%s7861_s6 + $0xc0] sm:$0xf] }
 0x3de   :  { %v1774_v58 = vpop.f32.mrf.mxu1 }
 0x3df   :  { %v1783_v24 = vadd.f32 %v1774_v58, %v1628_v44  ;;  %v4472_v58 = vld [vmem:[%s7861_s6 + $0xe8] sm:$0xf]  ;;  %v4434_v44 = vld [vmem:[%s7861_s6 + $0xb0] sm:$0xf0] }
 0x3e0   :  { %2230 = vmatpush.bf16.msrb.mxu2 %v5225_v9  ;;  %v5254_v9 = vld [vmem:[%s7861_s6 + $0xcc] sm:$0xf0] }
 0x3e6   :  { %v1777_v45 = vpop.f32.mrf.mxu1 }
 0x3e7   :  { %v1784_v29 = vadd.f32 %v1777_v45, %v6628_v48  ;;  %v5224_v48 = vld [vmem:[%s7859_s4 + $0x220] sm:$0xff] }
 0x3e8   :  { %2231 = vmatpush.bf16.msrb.mxu2 %v5224_v48  ;;  %v4449_v48 = vor.u32 %v5254_v9, %v4448_v37  ;;  %v4368_v9 = vld [vmem:[%s7861_s6 + $0x20] sm:$0xf] }
 0x3ea   :  { %2470 = vmatpush.bf16.msrb.mxu3 %v4449_v48  ;;  %v5232_v48 = vld [vmem:[%s7861_s6 + $0x24] sm:$0xf] }
 0x3ec   :  { %2232 = vmatpush.bf16.msrb.mxu2 %v5223_v46  ;;  %v4456_v46 = vld [vmem:[%s7861_s6 + $0xc8] sm:$0xf] }
 0x3ed   :  { %v4457_v63 = vor.u32 %v5255_v31, %v4456_v46  ;;  %v4370_v46 = vld [vmem:[%s7861_s6 + $0x30] sm:$0xf0]  ;;  %v4376_v31 = vld [vmem:[%s7861_s6 + $0x28] sm:$0xf] }
 0x3ee   :  { %v1779_v4 = vpop.f32.mrf.mxu1 }
 0x3ef   :  { %v1785_v50 = vadd.f32 %v1779_v4, %v1630_v19  ;;  %v4474_v4 = vld [vmem:[%s7861_s6 + $0xf8] sm:$0xf0] }
 0x3f0   :  { %2233 = vmatpush.bf16.msrb.mxu2 %v5222_v59  ;;  %v4458_v59 = vld [vmem:[%s7861_s6 + $0xd8] sm:$0xf0] }
 0x3f4   :  { %2234 = vmatpush.bf16.msrb.mxu2 %v5221_v6  ;;  %v5248_v6 = vld [vmem:[%s7861_s6 + $0xa4] sm:$0xf] }
 0x3f6   :  { %v1978_v13 = vpop.f32.mrf.mxu1 }
 0x3f7   :  { %v1998_v60 = vadd.f32 %v1997_v11, %v1978_v13  ;;  %v4477_v11 = vor.u32 %v5257_v57, %v4474_v4  ;;  %v5252_v13 = vld [vmem:[%s7861_s6 + $0xc4] sm:$0xf]  ;;  %v5237_v4 = vld [vmem:[%s7861_s6 + $0x4c] sm:$0xf] }
 0x3f8   :  { %2235 = vmatpush.bf16.msrb.mxu2 %v5220_v52  ;;  %v5249_v52 = vld [vmem:[%s7861_s6 + $0xac] sm:$0xf] }
 0x3fc   :  { %v1927_v14 = vpop.f32.mrf.mxu0  ;;  %2508 = vmatpush.bf16.msra.mxu2 %v4477_v11  ;;  %v4394_v11 = vld [vmem:[%s7861_s6 + $0x58] sm:$0xf0] }
 0x3fd   :  { %v6717_v0 = vadd.f32 %v1927_v14, %v1782_v20  ;;  %v5256_v20 = vld [vmem:[%s7861_s6 + $0xe4] sm:$0xf]  ;;  %v4397_v37 = vor.u32 %v5237_v4, %v4394_v11  ;;  %v4960_v11 = vld [vmem:[%s7862_s8 + $0x3c0] sm:$0xf] }
 0x3fe   :  { %v1980_v42 = vpop.f32.mrf.mxu1  ;;  %v4469_v45 = vor.u32 %v5256_v20, %v4466_v15  ;;  %v5238_v20 = vld [vmem:[%s7861_s6 + $0x4c] sm:$0xf0] }
 0x3ff   :  { %v2000_v43 = vadd.f32 %v1999_v34, %v1980_v42  ;;  %v4450_v34 = vld [vmem:[%s7861_s6 + $0xd0] sm:$0xf0]  ;;  %v5253_v42 = vld [vmem:[%s7861_s6 + $0xcc] sm:$0xf]  ;;  %v4385_v15 = vor.u32 %v5238_v20, %v4384_v8 }
 0x400   :  { %2482 = vmatpush.bf16.msra.mxu0 %v4469_v45  ;;  %v4453_v14 = vor.u32 %v5252_v13, %v4450_v34  ;;  %v5239_v45 = vld [vmem:[%s7861_s6 + $0x54] sm:$0xf0]  ;;  %v5234_v13 = vld [vmem:[%s7861_s6 + $0x2c] sm:$0xf0] }
 0x401   :  { %v2023_v5 = vpack.c.bf16 %v2000_v43, %v1998_v60  ;;  %v4461_v60 = vor.u32 %v5253_v42, %v4458_v59  ;;  %v4432_v43 = vld [vmem:[%s7861_s6 + $0xa0] sm:$0xf]  ;;  %v4369_v34 = vor.u32 %v5234_v13, %v4368_v9  ;;  %v5233_v59 = vld [vmem:[%s7861_s6 + $0x2c] sm:$0xf] }
 0x403   :  { %2081 = vmatmul.bf16.vlgmr.msra.gmra.mxu3 %v2023_v5  ;;  %2509 = vmatpush.bf16.msra.mxu2 %v4461_v60  ;;  %v4433_v5 = vor.u32 %v5250_v28, %v4432_v43  ;;  %v4378_v60 = vld [vmem:[%s7861_s6 + $0x38] sm:$0xf0] }
 0x404   :  { %v1929_v47 = vpop.f32.mrf.mxu0  ;;  %2483 = vmatpush.bf16.msra.mxu0 %v4453_v14  ;;  %v5235_v14 = vld [vmem:[%s7861_s6 + $0x34] sm:$0xf0]  ;;  %v4381_v43 = vor.u32 %v5233_v59, %v4378_v60  ;;  %v5282_v59 = vld [vmem:[%s7862_s8 + $0xac] sm:$0xf0] }
 0x405   :  { %v6727_v21 = vadd.f32 %v1929_v47, %v1783_v24  ;;  %v5251_v24 = vld [vmem:[%s7861_s6 + $0xb4] sm:$0xf0]  ;;  %v4437_v47 = vor.u32 %v5248_v6, %v4434_v44  ;;  %2471 = vmatpush.bf16.msrb.mxu3 %v4433_v5  ;;  %v4377_v42 = vor.u32 %v5235_v14, %v4376_v31  ;;  %v4352_v5 = vld [vmem:[%s7861_s6] sm:$0xf]  ;;  %v5230_v44 = vld [vmem:[%s7861_s6 + $0xc] sm:$0xf0] }
 0x406   :  { %v1983_v35 = vpop.f32.mrf.mxu1  ;;  %v5310_v31 = vld [vmem:[%s7862_s8 + $0x18c] sm:$0xf0] }
 0x407   :  { %v2003_v49 = vadd.f32 %v2002_v55, %v1983_v35  ;;  %v4440_v55 = vld [vmem:[%s7861_s6 + $0xa8] sm:$0xf] }
 0x408   :  { %v4441_v35 = vor.u32 %v5251_v24, %v4440_v55  ;;  %2484 = vmatpush.bf16.msra.mxu0 %v4437_v47  ;;  %v5228_v55 = vld [vmem:[%s7861_s6 + $0x4] sm:$0xf]  ;;  %v4353_v24 = vor.u32 %v5230_v44, %v4352_v5  ;;  %v4354_v47 = vld [vmem:[%s7861_s6 + $0x10] sm:$0xf0] }
 0x40c   :  { %v1932_v54 = vpop.f32.mrf.mxu0 }
 0x40d   :  { %v6735_v2 = vadd.f32 %v1932_v54, %v1784_v29  ;;  %v4473_v29 = vor.u32 %v5259_v62, %v4472_v58  ;;  %v4416_v54 = vld [vmem:[%s7861_s6 + $0x80] sm:$0xf]  ;;  %v4386_v58 = vld [vmem:[%s7861_s6 + $0x50] sm:$0xf0]  ;;  %v4392_v62 = vld [vmem:[%s7861_s6 + $0x48] sm:$0xf] }
 0x40e   :  { %v1985_v23 = vpop.f32.mrf.mxu1  ;;  %v4393_v57 = vor.u32 %v5239_v45, %v4392_v62  ;;  %v5346_v45 = vld [vmem:[%s7862_s8 + $0x2ac] sm:$0xf0] }
 0x40f   :  { %v2005_v40 = vadd.f32 %v2004_v36, %v1985_v23  ;;  %2495 = vmatpush.bf16.msra.mxu1 %v4473_v29  ;;  %v4445_v36 = vor.u32 %v5249_v52, %v4442_v53  ;;  %v5244_v23 = vld [vmem:[%s7861_s6 + $0x84] sm:$0xf]  ;;  %v4389_v29 = vor.u32 %v5236_v41, %v4386_v58  ;;  %v5231_v52 = vld [vmem:[%s7861_s6 + $0x14] sm:$0xf0]  ;;  %v4357_v53 = vor.u32 %v5228_v55, %v4354_v47  ;;  %v4688_v41 = vld [vmem:[%s7862_s8 + $0x1a0] sm:$0xf] }
 0x410   :  { %v4816_v58 = vld [vmem:[%s7862_s8 + $0x2a0] sm:$0xf] }
 0x411   :  { %v2024_v3 = vpack.c.bf16 %v2005_v40, %v2003_v49  ;;  %2510 = vmatpush.bf16.msra.mxu2 %v4445_v36  ;;  %v4417_v49 = vor.u32 %v5246_v10, %v4416_v54  ;;  %v4418_v40 = vld [vmem:[%s7861_s6 + $0x90] sm:$0xf0]  ;;  %v5229_v54 = vld [vmem:[%s7861_s6 + $0xc] sm:$0xf]  ;;  %v4362_v10 = vld [vmem:[%s7861_s6 + $0x18] sm:$0xf0]  ;;  %v4817_v14 = vor.u32 %v5346_v45, %v4816_v58 }
 0x412   :  { %v4421_v19 = vor.u32 %v5244_v23, %v4418_v40  ;;  %v4544_v47 = vld [vmem:[%s7862_s8 + $0x80] sm:$0xf]  ;;  %v5298_v58 = vld [vmem:[%s7862_s8 + $0x12c] sm:$0xf0] }
 0x413   :  { %2086 = vmatmul.bf16.gmra.mxu3 %v2024_v3  ;;  %2496 = vmatpush.bf16.msra.mxu1 %v4457_v63  ;;  %v5247_v3 = vld [vmem:[%s7861_s6 + $0x94] sm:$0xf0]  ;;  %v4373_v63 = vor.u32 %v5232_v48, %v4370_v46  ;;  %v4672_v46 = vld [vmem:[%s7862_s8 + $0x180] sm:$0xf] }
 0x414   :  { %v1934_v27 = vpop.f32.mrf.mxu0  ;;  %2472 = vmatpush.bf16.msrb.mxu3 %v4417_v49  ;;  %2485 = vmatpush.bf16.msra.mxu0 %v4421_v19  ;;  %v4365_v49 = vor.u32 %v5229_v54, %v4362_v10  ;;  %v5322_v19 = vld [vmem:[%s7862_s8 + $0x1ec] sm:$0xf0]  ;;  %v4752_v45 = vld [vmem:[%s7862_s8 + $0x220] sm:$0xf] }
 0x415   :  { %v6739_v1 = vadd.f32 %v1934_v27, %v1785_v50  ;;  %v4425_v50 = vor.u32 %v5247_v3, %v4424_v56  ;;  %v5245_v27 = vld [vmem:[%s7861_s6 + $0x8c] sm:$0xf]  ;;  %v6937_v56 = vld [vmem:[%s7860_s5] ss:$0 sm:$0xff]  ;;  %v5306_v54 = vld [vmem:[%s7862_s8 + $0x16c] sm:$0xf0] }
 0x416   :  { %v2152_v51 = vpop.f32.mrf.mxu1  ;;  %v4720_v3 = vld [vmem:[%s7862_s8 + $0x1e0] sm:$0xf]  ;;  %v5374_v10 = vld [vmem:[%s7862_s8 + $0x38c] sm:$0xf0] }
 0x417   :  { %2497 = vmatpush.bf16.msra.mxu1 %v4441_v35  ;;  %v4360_v35 = vld [vmem:[%s7861_s6 + $0x8] sm:$0xf] }
 0x418   :  { %v4361_v36 = vor.u32 %v5231_v52, %v4360_v35  ;;  %v5278_v35 = vld [vmem:[%s7862_s8 + $0x8c] sm:$0xf0]  ;;  %v4928_v52 = vld [vmem:[%s7862_s8 + $0x380] sm:$0xf] }
 0x41b   :  { %2498 = vmatpush.bf16.msra.mxu1 %v4425_v50 }
 0x41c   :  { %v2133_v17 = vpop.f32.mrf.mxu0 }
 0x41d   :  { %v2153_v22 = vadd.f32 %v2152_v51, %v2133_v17  ;;  %v4426_v51 = vld [vmem:[%s7861_s6 + $0x98] sm:$0xf0] }
 0x41e   :  { %v2154_v16 = vpop.f32.mrf.mxu1  ;;  %v4429_v17 = vor.u32 %v5245_v27, %v4426_v51  ;;  %v4721_v27 = vor.u32 %v5322_v19, %v4720_v3  ;;  %v5354_v51 = vld [vmem:[%s7862_s8 + $0x2ec] sm:$0xf0]  ;;  %v4545_v19 = vor.u32 %v5278_v35, %v4544_v47  ;;  %v4480_v47 = vld [vmem:[%s7862_s8] sm:$0xf] }
 0x41f   :  { %v5262_v35 = vld [vmem:[%s7862_s8 + $0xc] sm:$0xf0] }
 0x420   :  { %2511 = vmatpush.bf16.msra.mxu2 %v4429_v17  ;;  %v4704_v17 = vld [vmem:[%s7862_s8 + $0x1c0] sm:$0xf] }
 0x424   :  { %v2135_v61 = vpop.f32.mrf.mxu0 }
 0x425   :  { %v2155_v25 = vadd.f32 %v2154_v16, %v2135_v61  ;;  %v4400_v16 = vld [vmem:[%s7861_s6 + $0x60] sm:$0xf]  ;;  %v5242_v61 = vld [vmem:[%s7861_s6 + $0x6c] sm:$0xf0] }
 0x426   :  { %v2157_v26 = vpop.f32.mrf.mxu1 }
 0x427   :  { %v2178_v38 = vpack.c.bf16 %v2155_v25, %v2153_v22  ;;  %v5240_v22 = vld [vmem:[%s7861_s6 + $0x64] sm:$0xf]  ;;  %v4401_v25 = vor.u32 %v5242_v61, %v4400_v16  ;;  %v5318_v16 = vld [vmem:[%s7862_s8 + $0x1cc] sm:$0xf0] }
 0x429   :  { %2236 = vmatmul.bf16.vlgmr.msrb.gmra.mxu2 %v2178_v38  ;;  %v4402_v38 = vld [vmem:[%s7861_s6 + $0x70] sm:$0xf0]  ;;  %2473 = vmatpush.bf16.msrb.mxu3 %v4401_v25  ;;  %v4832_v25 = vld [vmem:[%s7862_s8 + $0x2c0] sm:$0xf] }
 0x42c   :  { %v2138_v18 = vpop.f32.mrf.mxu0 }
 0x42d   :  { %v2158_v12 = vadd.f32 %v2157_v26, %v2138_v18  ;;  %v4408_v26 = vld [vmem:[%s7861_s6 + $0x68] sm:$0xf]  ;;  %v5243_v18 = vld [vmem:[%s7861_s6 + $0x74] sm:$0xf0]  ;;  %2474 = vmatpush.bf16.msrb.mxu3 %v4385_v15  ;;  %v5314_v15 = vld [vmem:[%s7862_s8 + $0x1ac] sm:$0xf0] }
 0x42e   :  { %v2159_v39 = vpop.f32.mrf.mxu1  ;;  %v4689_v48 = vor.u32 %v5314_v15, %v4688_v41  ;;  %v4624_v15 = vld [vmem:[%s7862_s8 + $0x120] sm:$0xf] }
 0x431   :  { %2475 = vmatpush.bf16.msrb.mxu3 %v4369_v34 }
 0x434   :  { %v2140_v32 = vpop.f32.mrf.mxu0 }
 0x435   :  { %v2160_v30 = vadd.f32 %v2159_v39, %v2140_v32  ;;  %v4405_v39 = vor.u32 %v5240_v22, %v4402_v38  ;;  %2476 = vmatpush.bf16.msrb.mxu3 %v4353_v24  ;;  %v4592_v38 = vld [vmem:[%s7862_s8 + $0xe0] sm:$0xf]  ;;  %v4673_v24 = vor.u32 %v5310_v31, %v4672_v46 }
 0x436   :  { %v4608_v31 = vld [vmem:[%s7862_s8 + $0x100] sm:$0xf] }
 0x437   :  { %v2179_v33 = vpack.c.bf16 %v2160_v30, %v2158_v12  ;;  %v4409_v12 = vor.u32 %v5243_v18, %v4408_v26  ;;  %v5241_v30 = vld [vmem:[%s7861_s6 + $0x6c] sm:$0xf]  ;;  %2486 = vmatpush.bf16.msra.mxu0 %v4405_v39  ;;  %v5290_v39 = vld [vmem:[%s7862_s8 + $0xec] sm:$0xf0] }
 0x438   :  { %v4593_v8 = vor.u32 %v5290_v39, %v4592_v38  ;;  %v4768_v38 = vld [vmem:[%s7862_s8 + $0x240] sm:$0xf] }
 0x439   :  { %2241 = vmatmul.bf16.gmra.mxu2 %v2179_v33  ;;  %v4410_v33 = vld [vmem:[%s7861_s6 + $0x78] sm:$0xf0]  ;;  %2499 = vmatpush.bf16.msra.mxu1 %v4409_v12  ;;  %v4976_v12 = vld [vmem:[%s7862_s8 + $0x3e0] sm:$0xf] }
 0x43a   :  { %v4413_v7 = vor.u32 %v5241_v30, %v4410_v33  ;;  %v5386_v30 = vld [vmem:[%s7862_s8 + $0x3ec] sm:$0xf0]  ;;  %3307 = vmatpush.bf16.msra.mxu3 %v4593_v8  ;;  %v4896_v8 = vld [vmem:[%s7862_s8 + $0x340] sm:$0xf] }
 0x43b   :  { %2487 = vmatpush.bf16.msra.mxu0 %v4389_v29  ;;  %v4977_v20 = vor.u32 %v5386_v30, %v4976_v12  ;;  %v4576_v29 = vld [vmem:[%s7862_s8 + $0xc0] sm:$0xf] }
 0x43c   :  { %2512 = vmatpush.bf16.msra.mxu2 %v4413_v7  ;;  %v4512_v12 = vld [vmem:[%s7862_s8 + $0x40] sm:$0xf] }
 0x43d   :  { %2500 = vmatpush.bf16.msra.mxu1 %v4393_v57  ;;  %v5286_v57 = vld [vmem:[%s7862_s8 + $0xcc] sm:$0xf0] }
 0x43e   :  { %v4577_v4 = vor.u32 %v5286_v57, %v4576_v29  ;;  %v5330_v29 = vld [vmem:[%s7862_s8 + $0x22c] sm:$0xf0] }
 0x43f   :  { %2488 = vmatpush.bf16.msra.mxu0 %v4373_v63  ;;  %v4800_v63 = vld [vmem:[%s7862_s8 + $0x280] sm:$0xf]  ;;  %v4753_v46 = vor.u32 %v5330_v29, %v4752_v45  ;;  %v4674_v45 = vld [vmem:[%s7862_s8 + $0x190] sm:$0xf0]  ;;  %v5340_v29 = vld [vmem:[%s7862_s8 + $0x284] sm:$0xf] }
 0x440   :  { %2513 = vmatpush.bf16.msra.mxu2 %v4397_v37  ;;  %v5382_v37 = vld [vmem:[%s7862_s8 + $0x3cc] sm:$0xf0]  ;;  %3308 = vmatpush.bf16.msra.mxu3 %v4577_v4 }
 0x441   :  { %2501 = vmatpush.bf16.msra.mxu1 %v4377_v42  ;;  %v4961_v34 = vor.u32 %v5382_v37, %v4960_v11  ;;  %v4560_v42 = vld [vmem:[%s7862_s8 + $0xa0] sm:$0xf] }
 0x442   :  { %v4561_v44 = vor.u32 %v5282_v59, %v4560_v42  ;;  %v4496_v11 = vld [vmem:[%s7862_s8 + $0x20] sm:$0xf]  ;;  %v5326_v59 = vld [vmem:[%s7862_s8 + $0x20c] sm:$0xf0] }
 0x443   :  { %2489 = vmatpush.bf16.msra.mxu0 %v4357_v53  ;;  %v4736_v42 = vld [vmem:[%s7862_s8 + $0x200] sm:$0xf] }
 0x444   :  { %2514 = vmatpush.bf16.msra.mxu2 %v4381_v43  ;;  %v5342_v43 = vld [vmem:[%s7862_s8 + $0x28c] sm:$0xf0]  ;;  %3309 = vmatpush.bf16.msra.mxu3 %v4561_v44 }
 0x445   :  { %2502 = vmatpush.bf16.msra.mxu1 %v4361_v36  ;;  %v4801_v53 = vor.u32 %v5342_v43, %v4800_v63  ;;  %v4656_v36 = vld [vmem:[%s7862_s8 + $0x160] sm:$0xf]  ;;  %v5294_v63 = vld [vmem:[%s7862_s8 + $0x10c] sm:$0xf0]  ;;  %v5320_v43 = vld [vmem:[%s7862_s8 + $0x1e4] sm:$0xf] }
 0x447   :  { %3320 = vmatpush.bf16.msrb.mxu0 %v4721_v27 }
 0x448   :  { %2515 = vmatpush.bf16.msra.mxu2 %v4365_v49  ;;  %v4784_v49 = vld [vmem:[%s7862_s8 + $0x260] sm:$0xf]  ;;  %3310 = vmatpush.bf16.msra.mxu3 %v4545_v19 }
 0x44c   :  { %3346 = vmatpush.bf16.msrb.mxu2 %v4977_v20  ;;  %v5366_v20 = vld [vmem:[%s7862_s8 + $0x34c] sm:$0xf0] }
 0x44d   :  { %v4897_v4 = vor.u32 %v5366_v20, %v4896_v8  ;;  %v4562_v8 = vld [vmem:[%s7862_s8 + $0xb0] sm:$0xf0]  ;;  %v5376_v20 = vld [vmem:[%s7862_s8 + $0x3a4] sm:$0xf] }
 0x450   :  { %3347 = vmatpush.bf16.msrb.mxu2 %v4961_v34  ;;  %v5362_v34 = vld [vmem:[%s7862_s8 + $0x32c] sm:$0xf0] }
 0x486   :  { %v2082_v32 = vpop.f32.mrf.mxu3 }
 0x487   :  { %v2092_v23 = vadd.f32 %v2082_v32, %v6717_v0  ;;  %v4848_v0 = vld [vmem:[%s7862_s8 + $0x2e0] sm:$0xf]  ;;  %v4705_v32 = vor.u32 %v5318_v16, %v4704_v17  ;;  %v5370_v16 = vld [vmem:[%s7862_s8 + $0x36c] sm:$0xf0] }
 0x488   :  { %v4849_v22 = vor.u32 %v5354_v51, %v4848_v0  ;;  %v4929_v0 = vor.u32 %v5374_v10, %v4928_v52  ;;  %v5274_v51 = vld [vmem:[%s7862_s8 + $0x6c] sm:$0xf0]  ;;  %v4912_v17 = vld [vmem:[%s7862_s8 + $0x360] sm:$0xf]  ;;  %v4737_v10 = vor.u32 %v5326_v59, %v4736_v42 }
 0x489   :  { %3321 = vmatpush.bf16.msrb.mxu0 %v4705_v32  ;;  %v4913_v39 = vor.u32 %v5370_v16, %v4912_v17  ;;  %v4864_v52 = vld [vmem:[%s7862_s8 + $0x300] sm:$0xf] }
 0x48a   :  { %3333 = vmatpush.bf16.msrb.mxu1 %v4849_v22  ;;  %v4640_v22 = vld [vmem:[%s7862_s8 + $0x140] sm:$0xf] }
 0x48d   :  { %3322 = vmatpush.bf16.msrb.mxu0 %v4689_v48  ;;  %v4880_v48 = vld [vmem:[%s7862_s8 + $0x320] sm:$0xf] }
 0x48e   :  { %v2084_v28 = vpop.f32.mrf.mxu3  ;;  %v4881_v44 = vor.u32 %v5362_v34, %v4880_v48 }
 0x48f   :  { %v2093_v50 = vadd.f32 %v2084_v28, %v6727_v21  ;;  %v5350_v21 = vld [vmem:[%s7862_s8 + $0x2cc] sm:$0xf0]  ;;  %v4944_v28 = vld [vmem:[%s7862_s8 + $0x3a0] sm:$0xf] }
 0x490   :  { %v4833_v7 = vor.u32 %v5350_v21, %v4832_v25  ;;  %v5302_v25 = vld [vmem:[%s7862_s8 + $0x14c] sm:$0xf0] }
 0x491   :  { %3323 = vmatpush.bf16.msrb.mxu0 %v4673_v24  ;;  %v4850_v24 = vld [vmem:[%s7862_s8 + $0x2f0] sm:$0xf0] }
 0x492   :  { %3334 = vmatpush.bf16.msrb.mxu1 %v4833_v7  ;;  %v5270_v7 = vld [vmem:[%s7862_s8 + $0x4c] sm:$0xf0] }
 0x493   :  { %v4513_v57 = vor.u32 %v5270_v7, %v4512_v12  ;;  %v5344_v12 = vld [vmem:[%s7862_s8 + $0x2a4] sm:$0xf] }
 0x494   :  { %v5280_v7 = vld [vmem:[%s7862_s8 + $0xa4] sm:$0xf] }
 0x496   :  { %v2087_v33 = vpop.f32.mrf.mxu3  ;;  %3335 = vmatpush.bf16.msrb.mxu1 %v4817_v14 }
 0x49a   :  { %3336 = vmatpush.bf16.msrb.mxu1 %v4801_v53  ;;  %v5288_v53 = vld [vmem:[%s7862_s8 + $0xe4] sm:$0xf] }
 0x49e   :  { %v2089_v3 = vpop.f32.mrf.mxu3 }
 0x49f   :  { %v2095_v21 = vadd.f32 %v2089_v3, %v6739_v1 }
 0x4ac   :  { %v2237_v6 = vpop.f32.mrf.mxu2 }
 0x4ad   :  { %v2247_v40 = vadd.f32 %v2237_v6, %v2092_v23  ;;  %v5378_v6 = vld [vmem:[%s7862_s8 + $0x3ac] sm:$0xf0]  ;;  %v2094_v23 = vadd.f32 %v2087_v33, %v6735_v2  ;;  %v4657_v2 = vor.u32 %v5306_v54, %v4656_v36  ;;  %v4641_v33 = vor.u32 %v5302_v25, %v4640_v22  ;;  %v5284_v22 = vld [vmem:[%s7862_s8 + $0xc4] sm:$0xf]  ;;  %v4578_v25 = vld [vmem:[%s7862_s8 + $0xd0] sm:$0xf0] }
 0x4ae   :  { %v4945_v55 = vor.u32 %v5378_v6, %v4944_v28  ;;  %v4722_v28 = vld [vmem:[%s7862_s8 + $0x1f0] sm:$0xf0]  ;;  %v5352_v6 = vld [vmem:[%s7862_s8 + $0x2e4] sm:$0xf]  ;;  %v4609_v54 = vor.u32 %v5294_v63, %v4608_v31 }
 0x4af   :  { %v2255_v26 = vadd.f32 %v6937_v56, %v2247_v40  ;;  %v5338_v40 = vld [vmem:[%s7862_s8 + $0x26c] sm:$0xf0]  ;;  %3324 = vmatpush.bf16.msrb.mxu0 %v4657_v2  ;;  %v4725_v3 = vor.u32 %v5320_v43, %v4722_v28  ;;  %v4853_v19 = vor.u32 %v5352_v6, %v4850_v24  ;;  %v4834_v2 = vld [vmem:[%s7862_s8 + $0x2d0] sm:$0xf0]  ;;  %v5300_v6 = vld [vmem:[%s7862_s8 + $0x144] sm:$0xf] }
 0x4b0   :  { %3348 = vmatpush.bf16.msrb.mxu2 %v4945_v55  ;;  %v4658_v31 = vld [vmem:[%s7862_s8 + $0x170] sm:$0xf0] }
 0x4b1   :  { %v2259_v9 = vmax.f32 %v2255_v26, 0.0  ;;  %v5334_v26 = vld [vmem:[%s7862_s8 + $0x24c] sm:$0xf0]  ;;  %v4786_v63 = vld [vmem:[%s7862_s8 + $0x270] sm:$0xf0] }
 0x4b2   :  { %v4769_v41 = vor.u32 %v5334_v26, %v4768_v38  ;;  %v4962_v38 = vld [vmem:[%s7862_s8 + $0x3d0] sm:$0xf0] }
 0x4b3   :  { %3325 = vmatpush.bf16.msrb.mxu0 %v4641_v33 }
 0x4b4   :  { %v2239_v61 = vpop.f32.mrf.mxu2  ;;  %3349 = vmatpush.bf16.msrb.mxu2 %v4929_v0  ;;  %v5316_v0 = vld [vmem:[%s7862_s8 + $0x1c4] sm:$0xf] }
 0x4b5   :  { %v2248_v18 = vadd.f32 %v2239_v61, %v2093_v50  ;;  %v4528_v50 = vld [vmem:[%s7862_s8 + $0x60] sm:$0xf]  ;;  %v4785_v61 = vor.u32 %v5338_v40, %v4784_v49  ;;  %v5384_v49 = vld [vmem:[%s7862_s8 + $0x3e4] sm:$0xf]  ;;  %v4978_v40 = vld [vmem:[%s7862_s8 + $0x3f0] sm:$0xf0] }
 0x4b6   :  { %v4529_v32 = vor.u32 %v5274_v51, %v4528_v50  ;;  %v4706_v50 = vld [vmem:[%s7862_s8 + $0x1d0] sm:$0xf0]  ;;  %v4481_v51 = vor.u32 %v5262_v35, %v4480_v47  ;;  %v5272_v35 = vld [vmem:[%s7862_s8 + $0x64] sm:$0xf] }
 0x4b7   :  { %v2256_v62 = vadd.f32 %v6937_v56, %v2248_v18  ;;  %3337 = vmatpush.bf16.msrb.mxu1 %v4785_v61  ;;  %v4981_v61 = vor.u32 %v5384_v49, %v4978_v40  ;;  %v4709_v26 = vor.u32 %v5316_v0, %v4706_v50  ;;  %v5328_v40 = vld [vmem:[%s7862_s8 + $0x224] sm:$0xf]  ;;  %v4514_v50 = vld [vmem:[%s7862_s8 + $0x50] sm:$0xf0] }
 0x4b8   :  { %3311 = vmatpush.bf16.msra.mxu3 %v4529_v32  ;;  %3350 = vmatpush.bf16.msrb.mxu2 %v4913_v39  ;;  %v5312_v32 = vld [vmem:[%s7862_s8 + $0x1a4] sm:$0xf]  ;;  %v4690_v39 = vld [vmem:[%s7862_s8 + $0x1b0] sm:$0xf0] }
 0x4b9   :  { %v2260_v13 = vmax.f32 %v2256_v62, 0.0  ;;  %v5268_v0 = vld [vmem:[%s7862_s8 + $0x44] sm:$0xf] }
 0x4bb   :  { %v7017_v60 = vmax.f32 %v2259_v9, %v2260_v13  ;;  %v4625_v13 = vor.u32 %v5298_v58, %v4624_v15  ;;  %3338 = vmatpush.bf16.msrb.mxu1 %v4769_v41  ;;  %v4946_v41 = vld [vmem:[%s7862_s8 + $0x3b0] sm:$0xf0]  ;;  %v4693_v15 = vor.u32 %v5312_v32, %v4690_v39  ;;  %v5360_v32 = vld [vmem:[%s7862_s8 + $0x324] sm:$0xf] }
 0x4bc   :  { %v2242_v5 = vpop.f32.mrf.mxu2  ;;  %3312 = vmatpush.bf16.msra.mxu3 %v4513_v57  ;;  %3351 = vmatpush.bf16.msrb.mxu2 %v4897_v4  ;;  %v4802_v57 = vld [vmem:[%s7862_s8 + $0x290] sm:$0xf0]  ;;  %v4565_v4 = vor.u32 %v5280_v7, %v4562_v8  ;;  %v5356_v8 = vld [vmem:[%s7862_s8 + $0x304] sm:$0xf] }
 0x4bd   :  { %v2249_v27 = vadd.f32 %v2242_v5, %v2094_v23  ;;  %3326 = vmatpush.bf16.msrb.mxu0 %v4625_v13  ;;  %v4594_v23 = vld [vmem:[%s7862_s8 + $0xf0] sm:$0xf0]  ;;  %v4805_v34 = vor.u32 %v5340_v29, %v4802_v57 }
 0x4be   :  { %v4597_v16 = vor.u32 %v5288_v53, %v4594_v23  ;;  %v4930_v13 = vld [vmem:[%s7862_s8 + $0x390] sm:$0xf0] }
 0x4bf   :  { %v2257_v30 = vadd.f32 %v6937_v56, %v2249_v27  ;;  %3339 = vmatpush.bf16.msrb.mxu1 %v4753_v46  ;;  %v5348_v27 = vld [vmem:[%s7862_s8 + $0x2c4] sm:$0xf]  ;;  %v4626_v23 = vld [vmem:[%s7862_s8 + $0x130] sm:$0xf0] }
 0x4c0   :  { %3352 = vmatpush.bf16.msrb.mxu2 %v4881_v44  ;;  %v5304_v46 = vld [vmem:[%s7862_s8 + $0x164] sm:$0xf] }
 0x4c1   :  { %v2261_v37 = vmax.f32 %v2257_v30, 0.0  ;;  %3327 = vmatpush.bf16.msrb.mxu0 %v4609_v54  ;;  %v4818_v30 = vld [vmem:[%s7862_s8 + $0x2b0] sm:$0xf0]  ;;  %v4661_v43 = vor.u32 %v5304_v46, %v4658_v31  ;;  %v5332_v44 = vld [vmem:[%s7862_s8 + $0x244] sm:$0xf] }
 0x4c2   :  { %v4821_v58 = vor.u32 %v5344_v12, %v4818_v30  ;;  %v4882_v12 = vld [vmem:[%s7862_s8 + $0x330] sm:$0xf0] }
 0x4c3   :  { %3340 = vmatpush.bf16.msrb.mxu1 %v4737_v10  ;;  %v5296_v10 = vld [vmem:[%s7862_s8 + $0x124] sm:$0xf]  ;;  %v4885_v30 = vor.u32 %v5360_v32, %v4882_v12  ;;  %v5343_v12 = vld [vmem:[%s7862_s8 + $0x294] sm:$0xf0] }
 0x4c4   :  { %v2244_v18 = vpop.f32.mrf.mxu2  ;;  %v4629_v49 = vor.u32 %v5296_v10, %v4626_v23 }
 0x4c5   :  { %v2250_v1 = vadd.f32 %v2244_v18, %v2095_v21  ;;  %v5380_v21 = vld [vmem:[%s7862_s8 + $0x3c4] sm:$0xf]  ;;  %v4837_v18 = vor.u32 %v5348_v27, %v4834_v2  ;;  %v4517_v2 = vor.u32 %v5268_v0, %v4514_v50  ;;  %v4824_v0 = vld [vmem:[%s7862_s8 + $0x2a8] sm:$0xf]  ;;  %v5347_v50 = vld [vmem:[%s7862_s8 + $0x2b4] sm:$0xf0] }
 0x4c6   :  { %v4965_v33 = vor.u32 %v5380_v21, %v4962_v38  ;;  %v5364_v27 = vld [vmem:[%s7862_s8 + $0x344] sm:$0xf]  ;;  %v4738_v21 = vld [vmem:[%s7862_s8 + $0x210] sm:$0xf0] }
 0x4c7   :  { %v2258_v62 = vadd.f32 %v6937_v56, %v2250_v1  ;;  %v5266_v56 = vld [vmem:[%s7862_s8 + $0x2c] sm:$0xf0]  ;;  %v4581_v1 = vor.u32 %v5284_v22, %v4578_v25  ;;  %v5324_v22 = vld [vmem:[%s7862_s8 + $0x204] sm:$0xf] }
 0x4c8   :  { %v4497_v5 = vor.u32 %v5266_v56, %v4496_v11  ;;  %v4949_v11 = vor.u32 %v5376_v20, %v4946_v41  ;;  %v5276_v56 = vld [vmem:[%s7862_s8 + $0x84] sm:$0xf]  ;;  %v4741_v38 = vor.u32 %v5324_v22, %v4738_v21  ;;  %v4866_v20 = vld [vmem:[%s7862_s8 + $0x310] sm:$0xf0]  ;;  %v4968_v22 = vld [vmem:[%s7862_s8 + $0x3c8] sm:$0xf]  ;;  %v4825_v21 = vor.u32 %v5347_v50, %v4824_v0 }
 0x4c9   :  { %v2262_v9 = vmax.f32 %v2258_v62, 0.0  ;;  %v5308_v62 = vld [vmem:[%s7862_s8 + $0x184] sm:$0xf]  ;;  %v4869_v41 = vor.u32 %v5356_v8, %v4866_v20  ;;  %v4952_v20 = vld [vmem:[%s7862_s8 + $0x3a8] sm:$0xf] }
 0x4ca   :  { %3313 = vmatpush.bf16.msra.mxu3 %v4497_v5  ;;  %v4677_v48 = vor.u32 %v5308_v62, %v4674_v45  ;;  %v4642_v5 = vld [vmem:[%s7862_s8 + $0x150] sm:$0xf0]  ;;  %v5295_v0 = vld [vmem:[%s7862_s8 + $0x114] sm:$0xf0]  ;;  %v4744_v50 = vld [vmem:[%s7862_s8 + $0x208] sm:$0xf] }
 0x4cb   :  { %v2264_v14 = vmax.f32 %v2261_v37, %v2262_v9  ;;  %v4546_v37 = vld [vmem:[%s7862_s8 + $0x90] sm:$0xf0]  ;;  %v5372_v9 = vld [vmem:[%s7862_s8 + $0x384] sm:$0xf]  ;;  %v4645_v24 = vor.u32 %v5300_v6, %v4642_v5  ;;  %v4840_v6 = vld [vmem:[%s7862_s8 + $0x2c8] sm:$0xf] }
 0x4cc   :  { %v4549_v42 = vor.u32 %v5276_v56, %v4546_v37  ;;  %v4933_v59 = vor.u32 %v5372_v9, %v4930_v13  ;;  %v4856_v37 = vld [vmem:[%s7862_s8 + $0x2e8] sm:$0xf]  ;;  %v5355_v9 = vld [vmem:[%s7862_s8 + $0x2f4] sm:$0xf0] }
 0x4cd   :  { %v2265_v55 = vmax.f32 %v7017_v60, %v2264_v14  ;;  %v5358_v60 = vld [vmem:[%s7862_s8 + $0x30c] sm:$0xf0]  ;;  %v5336_v14 = vld [vmem:[%s7862_s8 + $0x264] sm:$0xf]  ;;  %v5351_v5 = vld [vmem:[%s7862_s8 + $0x2d4] sm:$0xf0] }
 0x4ce   :  { %v4865_v17 = vor.u32 %v5358_v60, %v4864_v52  ;;  %3314 = vmatpush.bf16.msra.mxu3 %v4481_v51  ;;  %v4789_v28 = vor.u32 %v5336_v14, %v4786_v63  ;;  %v4530_v52 = vld [vmem:[%s7862_s8 + $0x70] sm:$0xf0]  ;;  %v5368_v60 = vld [vmem:[%s7862_s8 + $0x364] sm:$0xf]  ;;  %v4857_v63 = vor.u32 %v5355_v9, %v4856_v37  ;;  %v4841_v23 = vor.u32 %v5351_v5, %v4840_v6  ;;  %v4936_v9 = vld [vmem:[%s7862_s8 + $0x388] sm:$0xf] }
 0x4cf   :  { %v2266_v36 = vpack.c.bf16 %v2265_v55, %v2265_v55  ;;  %v4770_v55 = vld [vmem:[%s7862_s8 + $0x250] sm:$0xf0]  ;;  %v4533_v53 = vor.u32 %v5272_v35, %v4530_v52  ;;  %v5275_v6 = vld [vmem:[%s7862_s8 + $0x74] sm:$0xf0] }
 0x4d0   :  { %3353 = vmatpush.bf16.msrb.mxu2 %v4865_v17  ;;  %v4773_v47 = vor.u32 %v5332_v44, %v4770_v55  ;;  %v4898_v51 = vld [vmem:[%s7862_s8 + $0x350] sm:$0xf0] }
 0x4d1   :  { %2477 = vmatmul.bf16.vlgmr.msrb.gmra.mxu3 %v2266_v36  ;;  %2490 = vmatmul.bf16.vlgmr.msra.gmra.mxu0 %v2266_v36  ;;  %v4901_v17 = vor.u32 %v5364_v27, %v4898_v51  ;;  %v4584_v51 = vld [vmem:[%s7862_s8 + $0xc8] sm:$0xf] }
 0x4d2   :  { %2503 = vmatmul.bf16.vlgmr.msra.gmra.mxu1 %v2266_v36  ;;  %2516 = vmatmul.bf16.vlgmr.msra.gmra.mxu2 %v2266_v36  ;;  %v4914_v36 = vld [vmem:[%s7862_s8 + $0x370] sm:$0xf0] }
 0x4d3   :  { %3372 = vmatpush.bf16.msra.mxu0 %v4725_v3  ;;  %3385 = vmatpush.bf16.msra.mxu1 %v4853_v19  ;;  %v4917_v54 = vor.u32 %v5368_v60, %v4914_v36  ;;  %v4754_v3 = vld [vmem:[%s7862_s8 + $0x230] sm:$0xf0]  ;;  %v5387_v36 = vld [vmem:[%s7862_s8 + $0x3f4] sm:$0xf0] }
 0x4d4   :  { %3359 = vmatpush.bf16.msrb.mxu3 %v4597_v16  ;;  %3398 = vmatpush.bf16.msra.mxu2 %v4981_v61  ;;  %v4757_v19 = vor.u32 %v5328_v40, %v4754_v3  ;;  %v5292_v16 = vld [vmem:[%s7862_s8 + $0x104] sm:$0xf]  ;;  %v4610_v61 = vld [vmem:[%s7862_s8 + $0x110] sm:$0xf0]  ;;  %v5315_v40 = vld [vmem:[%s7862_s8 + $0x1b4] sm:$0xf0] }
 0x4d5   :  { %v4613_v25 = vor.u32 %v5292_v16, %v4610_v61 }
 0x4d7   :  { %3373 = vmatpush.bf16.msra.mxu0 %v4709_v26  ;;  %3386 = vmatpush.bf16.msra.mxu1 %v4837_v18  ;;  %v5264_v26 = vld [vmem:[%s7862_s8 + $0x24] sm:$0xf]  ;;  %v4498_v18 = vld [vmem:[%s7862_s8 + $0x30] sm:$0xf0] }
 0x4d8   :  { %3360 = vmatpush.bf16.msrb.mxu3 %v4581_v1  ;;  %3399 = vmatpush.bf16.msra.mxu2 %v4965_v33  ;;  %v4501_v39 = vor.u32 %v5264_v26, %v4498_v18  ;;  %v5260_v1 = vld [vmem:[%s7862_s8 + $0x4] sm:$0xf]  ;;  %v4482_v33 = vld [vmem:[%s7862_s8 + $0x10] sm:$0xf0]  ;;  %v5311_v26 = vld [vmem:[%s7862_s8 + $0x194] sm:$0xf0] }
 0x4d9   :  { %v4485_v7 = vor.u32 %v5260_v1, %v4482_v33  ;;  %v4568_v33 = vld [vmem:[%s7862_s8 + $0xa8] sm:$0xf] }
 0x4db   :  { %3374 = vmatpush.bf16.msra.mxu0 %v4693_v15  ;;  %3387 = vmatpush.bf16.msra.mxu1 %v4821_v58  ;;  %v2299_v15 = vld [vmem:[%s7863_s7] sm:$0xf] }
 0x4dc   :  { %3361 = vmatpush.bf16.msrb.mxu3 %v4565_v4  ;;  %3400 = vmatpush.bf16.msra.mxu2 %v4949_v11  ;;  %v2302_v58 = vperm.slane %v2299_v15, 1  ;;  %v2303_v62 = vperm.slane %v2299_v15, 2  ;;  %v4728_v4 = vld [vmem:[%s7862_s8 + $0x1e8] sm:$0xf]  ;;  %v5323_v11 = vld [vmem:[%s7862_s8 + $0x1f4] sm:$0xf0] }
 0x4dd   :  { %v2304_v46 = vperm.slane %v2299_v15, 3  ;;  %v4729_v31 = vor.u32 %v5323_v11, %v4728_v4  ;;  %v4552_v11 = vld [vmem:[%s7862_s8 + $0x88] sm:$0xf] }
 0x4df   :  { %3375 = vmatpush.bf16.msra.mxu0 %v4677_v48  ;;  %3388 = vmatpush.bf16.msra.mxu1 %v4805_v34  ;;  %v2301_v48 = vperm.slane %v2299_v15, 0 }
 0x4e0   :  { %3362 = vmatpush.bf16.msrb.mxu3 %v4549_v42  ;;  %3401 = vmatpush.bf16.msra.mxu2 %v4933_v59  ;;  %v4712_v42 = vld [vmem:[%s7862_s8 + $0x1c8] sm:$0xf]  ;;  %v5319_v59 = vld [vmem:[%s7862_s8 + $0x1d4] sm:$0xf0] }
 0x4e1   :  { %v4713_v60 = vor.u32 %v5319_v59, %v4712_v42  ;;  %v5335_v42 = vld [vmem:[%s7862_s8 + $0x254] sm:$0xf0] }
 0x4e3   :  { %3376 = vmatpush.bf16.msra.mxu0 %v4661_v43  ;;  %3389 = vmatpush.bf16.msra.mxu1 %v4789_v28 }
 0x4e4   :  { %3363 = vmatpush.bf16.msrb.mxu3 %v4533_v53  ;;  %3402 = vmatpush.bf16.msra.mxu2 %v4917_v54  ;;  %v4984_v53 = vld [vmem:[%s7862_s8 + $0x3e8] sm:$0xf] }
 0x4e7   :  { %3377 = vmatpush.bf16.msra.mxu0 %v4645_v24  ;;  %3390 = vmatpush.bf16.msra.mxu1 %v4773_v47  ;;  %v4600_v24 = vld [vmem:[%s7862_s8 + $0xe8] sm:$0xf]  ;;  %v5291_v47 = vld [vmem:[%s7862_s8 + $0xf4] sm:$0xf0] }
 0x4e8   :  { %3364 = vmatpush.bf16.msrb.mxu3 %v4517_v2  ;;  %3403 = vmatpush.bf16.msra.mxu2 %v4901_v17  ;;  %v4985_v2 = vor.u32 %v5387_v36, %v4984_v53  ;;  %v5287_v17 = vld [vmem:[%s7862_s8 + $0xd4] sm:$0xf0] }
 0x4e9   :  { %v4585_v32 = vor.u32 %v5287_v17, %v4584_v51  ;;  %v5331_v53 = vld [vmem:[%s7862_s8 + $0x234] sm:$0xf0]  ;;  %v5321_v17 = vld [vmem:[%s7862_s8 + $0x1ec] sm:$0xf] }
 0x4eb   :  { %3378 = vmatpush.bf16.msra.mxu0 %v4629_v49  ;;  %3391 = vmatpush.bf16.msra.mxu1 %v4757_v19  ;;  %v4696_v49 = vld [vmem:[%s7862_s8 + $0x1a8] sm:$0xf]  ;;  %v4601_v19 = vor.u32 %v5291_v47, %v4600_v24 }
 0x4ec   :  { %3365 = vmatpush.bf16.msrb.mxu3 %v4501_v39  ;;  %3404 = vmatpush.bf16.msra.mxu2 %v4885_v30  ;;  %v4697_v61 = vor.u32 %v5315_v40, %v4696_v49  ;;  %v4808_v39 = vld [vmem:[%s7862_s8 + $0x288] sm:$0xf]  ;;  %v5367_v40 = vld [vmem:[%s7862_s8 + $0x354] sm:$0xf0] }
 0x4ed   :  { %v4809_v15 = vor.u32 %v5343_v12, %v4808_v39  ;;  %v4632_v47 = vld [vmem:[%s7862_s8 + $0x128] sm:$0xf]  ;;  %v5363_v39 = vld [vmem:[%s7862_s8 + $0x334] sm:$0xf0] }
 0x4ee   :  { %v4904_v49 = vld [vmem:[%s7862_s8 + $0x348] sm:$0xf] }
 0x4ef   :  { %3379 = vmatpush.bf16.msra.mxu0 %v4613_v25  ;;  %3392 = vmatpush.bf16.msra.mxu1 %v4741_v38  ;;  %v5383_v25 = vld [vmem:[%s7862_s8 + $0x3d4] sm:$0xf0]  ;;  %v4680_v38 = vld [vmem:[%s7862_s8 + $0x188] sm:$0xf] }
 0x4f0   :  { %3366 = vmatpush.bf16.msrb.mxu3 %v4485_v7  ;;  %3405 = vmatpush.bf16.msra.mxu2 %v4869_v41  ;;  %v4969_v1 = vor.u32 %v5383_v25, %v4968_v22  ;;  %v5283_v7 = vld [vmem:[%s7862_s8 + $0xb4] sm:$0xf0]  ;;  %v4681_v8 = vor.u32 %v5311_v26, %v4680_v38  ;;  %v5353_v22 = vld [vmem:[%s7862_s8 + $0x2ec] sm:$0xf]  ;;  %v4905_v25 = vor.u32 %v5367_v40, %v4904_v49  ;;  %v4504_v38 = vld [vmem:[%s7862_s8 + $0x28] sm:$0xf] }
 0x4f1   :  { %v5379_v41 = vld [vmem:[%s7862_s8 + $0x3b4] sm:$0xf0]  ;;  %v5377_v49 = vld [vmem:[%s7862_s8 + $0x3ac] sm:$0xf]  ;;  %v4954_v40 = vld [vmem:[%s7862_s8 + $0x3b8] sm:$0xf0] }
 0x4f2   :  { %v4953_v4 = vor.u32 %v5379_v41, %v4952_v20  ;;  %v5267_v26 = vld [vmem:[%s7862_s8 + $0x34] sm:$0xf0]  ;;  %v5349_v20 = vld [vmem:[%s7862_s8 + $0x2cc] sm:$0xf]  ;;  %v4842_v41 = vld [vmem:[%s7862_s8 + $0x2d8] sm:$0xf0] }
 0x54e   :  { %v2491_v45 = vpop.f32.mrf.mxu0 }
 0x54f   :  { %v2492_v29 = vadd.f32 %v2491_v45, %v2302_v58  ;;  %v2504_v57 = vpop.f32.mrf.mxu1  ;;  %v4664_v58 = vld [vmem:[%s7862_s8 + $0x168] sm:$0xf]  ;;  %v4569_v45 = vor.u32 %v5283_v7, %v4568_v33  ;;  %v4505_v7 = vor.u32 %v5267_v26, %v4504_v38  ;;  %v4938_v38 = vld [vmem:[%s7862_s8 + $0x398] sm:$0xf0] }
 0x550   :  { %v2505_v56 = vadd.f32 %v2504_v57, %v2303_v62  ;;  %v5307_v62 = vld [vmem:[%s7862_s8 + $0x174] sm:$0xf0] }
 0x551   :  { %v2522_v13 = vmax.f32 %v2492_v29, 0.0  ;;  %v4792_v29 = vld [vmem:[%s7862_s8 + $0x268] sm:$0xf]  ;;  %v5339_v57 = vld [vmem:[%s7862_s8 + $0x274] sm:$0xf0]  ;;  %v4665_v37 = vor.u32 %v5307_v62, %v4664_v58 }
 0x552   :  { %v2523_v34 = vmax.f32 %v2505_v56, 0.0  ;;  %v5279_v56 = vld [vmem:[%s7862_s8 + $0x94] sm:$0xf0]  ;;  %v4488_v58 = vld [vmem:[%s7862_s8 + $0x8] sm:$0xf] }
 0x553   :  { %v7348_v14 = vpack.c.bf16 %v2522_v13, %v2522_v13  ;;  %v5375_v13 = vld [vmem:[%s7862_s8 + $0x394] sm:$0xf0] }
 0x554   :  { %v7356_v43 = vpack.c.bf16 %v2523_v34, %v2523_v34  ;;  %v2478_v28 = vpop.f32.mrf.mxu3  ;;  %v4648_v34 = vld [vmem:[%s7862_s8 + $0x148] sm:$0xf]  ;;  %v4937_v59 = vor.u32 %v5375_v13, %v4936_v9  ;;  %v5263_v62 = vld [vmem:[%s7862_s8 + $0x14] sm:$0xf0]  ;;  %v4845_v9 = vor.u32 %v5349_v20, %v4842_v41  ;;  %v5369_v20 = vld [vmem:[%s7862_s8 + $0x36c] sm:$0xf] }
 0x555   :  { %v2479_v44 = vadd.f32 %v2478_v28, %v2301_v48  ;;  %v2517_v55 = vpop.f32.mrf.mxu2  ;;  %3328 = vmatmul.bf16.vlgmr.msrb.gmra.mxu0 %v7348_v14  ;;  %v4793_v48 = vor.u32 %v5339_v57, %v4792_v29  ;;  %v4536_v28 = vld [vmem:[%s7862_s8 + $0x68] sm:$0xf]  ;;  %v5359_v29 = vld [vmem:[%s7862_s8 + $0x314] sm:$0xf0]  ;;  %v5289_v57 = vld [vmem:[%s7862_s8 + $0xec] sm:$0xf]  ;;  %v4489_v13 = vor.u32 %v5263_v62, %v4488_v58 }
 0x556   :  { %v2518_v35 = vadd.f32 %v2517_v55, %v2304_v46  ;;  %3341 = vmatmul.bf16.vlgmr.msrb.gmra.mxu1 %v7356_v43  ;;  %3424 = vmatpush.bf16.msrb.mxu0 %v4729_v31  ;;  %v2493_v52 = vpop.f32.mrf.mxu0  ;;  %v5303_v46 = vld [vmem:[%s7862_s8 + $0x154] sm:$0xf0]  ;;  %v4553_v31 = vor.u32 %v5279_v56, %v4552_v11  ;;  %v5385_v56 = vld [vmem:[%s7862_s8 + $0x3ec] sm:$0xf]  ;;  %v4922_v41 = vld [vmem:[%s7862_s8 + $0x378] sm:$0xf0] }
 0x557   :  { %v2521_v54 = vmax.f32 %v2479_v44, 0.0  ;;  %3437 = vmatpush.bf16.msrb.mxu1 %v4857_v63  ;;  %v2506_v10 = vpop.f32.mrf.mxu1  ;;  %v4776_v63 = vld [vmem:[%s7862_s8 + $0x248] sm:$0xf]  ;;  %v4649_v5 = vor.u32 %v5303_v46, %v4648_v34  ;;  %v5371_v55 = vld [vmem:[%s7862_s8 + $0x374] sm:$0xf0]  ;;  %v4537_v52 = vor.u32 %v5275_v6, %v4536_v28 }
 0x558   :  { %v2524_v3 = vmax.f32 %v2518_v35, 0.0  ;;  %v4920_v44 = vld [vmem:[%s7862_s8 + $0x368] sm:$0xf]  ;;  %v4777_v24 = vor.u32 %v5335_v42, %v4776_v63  ;;  %v5299_v35 = vld [vmem:[%s7862_s8 + $0x134] sm:$0xf0] }
 0x559   :  { %v7390_v27 = vpack.c.bf16 %v2521_v54, %v2521_v54  ;;  %v4921_v36 = vor.u32 %v5371_v55, %v4920_v44  ;;  %v4520_v54 = vld [vmem:[%s7862_s8 + $0x48] sm:$0xf]  ;;  %v5271_v10 = vld [vmem:[%s7862_s8 + $0x54] sm:$0xf0]  ;;  %v4698_v34 = vld [vmem:[%s7862_s8 + $0x1b8] sm:$0xf0] }
 0x55a   :  { %v7398_v16 = vpack.c.bf16 %v2524_v3, %v2524_v3  ;;  %3425 = vmatpush.bf16.msrb.mxu0 %v4713_v60  ;;  %v4760_v60 = vld [vmem:[%s7862_s8 + $0x228] sm:$0xf]  ;;  %v4521_v51 = vor.u32 %v5271_v10, %v4520_v54  ;;  %v5345_v63 = vld [vmem:[%s7862_s8 + $0x2ac] sm:$0xf]  ;;  %v4826_v42 = vld [vmem:[%s7862_s8 + $0x2b8] sm:$0xf0] }
 0x55b   :  { %3438 = vmatpush.bf16.msrb.mxu1 %v4841_v23  ;;  %3315 = vmatmul.bf16.vlgmr.msra.gmra.mxu3 %v7390_v27  ;;  %v4633_v23 = vor.u32 %v5299_v35, %v4632_v47  ;;  %v4616_v3 = vld [vmem:[%s7862_s8 + $0x108] sm:$0xf]  ;;  %v5285_v28 = vld [vmem:[%s7862_s8 + $0xcc] sm:$0xf]  ;;  %v4586_v6 = vld [vmem:[%s7862_s8 + $0xd8] sm:$0xf0] }
 0x55c   :  { %3354 = vmatmul.bf16.vlgmr.msrb.gmra.mxu2 %v7398_v16  ;;  %3411 = vmatpush.bf16.msra.mxu3 %v4601_v19  ;;  %v2480_v18 = vpop.f32.mrf.mxu3  ;;  %v4761_v19 = vor.u32 %v5331_v53, %v4760_v60  ;;  %v5381_v44 = vld [vmem:[%s7862_s8 + $0x3cc] sm:$0xf]  ;;  %v4970_v55 = vld [vmem:[%s7862_s8 + $0x3d8] sm:$0xf0] }
 0x55d   :  { %3450 = vmatpush.bf16.msrb.mxu2 %v4985_v2  ;;  %v2519_v30 = vpop.f32.mrf.mxu2  ;;  %v5327_v2 = vld [vmem:[%s7862_s8 + $0x214] sm:$0xf0]  ;;  %v4617_v18 = vor.u32 %v5295_v0, %v4616_v3  ;;  %v5309_v47 = vld [vmem:[%s7862_s8 + $0x18c] sm:$0xf]  ;;  %v4682_v35 = vld [vmem:[%s7862_s8 + $0x198] sm:$0xf0] }
 0x55e   :  { %3426 = vmatpush.bf16.msrb.mxu0 %v4697_v61  ;;  %v4730_v61 = vld [vmem:[%s7862_s8 + $0x1f8] sm:$0xf0]  ;;  %v4745_v12 = vor.u32 %v5327_v2, %v4744_v50  ;;  %v5341_v60 = vld [vmem:[%s7862_s8 + $0x28c] sm:$0xf] }
 0x55f   :  { %3439 = vmatpush.bf16.msrb.mxu1 %v4825_v21  ;;  %v4858_v21 = vld [vmem:[%s7862_s8 + $0x2f8] sm:$0xf0]  ;;  %v4733_v30 = vor.u32 %v5321_v17, %v4730_v61  ;;  %v5281_v54 = vld [vmem:[%s7862_s8 + $0xac] sm:$0xf]  ;;  %v4957_v17 = vor.u32 %v5377_v49, %v4954_v40  ;;  %v5394_v49 = vld [vmem:[%s7864_s10 + $0x30] sm:$0xff] }
 0x560   :  { %3412 = vmatpush.bf16.msra.mxu3 %v4585_v32  ;;  %v4888_v32 = vld [vmem:[%s7862_s8 + $0x328] sm:$0xf]  ;;  %v4861_v33 = vor.u32 %v5353_v22, %v4858_v21  ;;  %v4810_v53 = vld [vmem:[%s7862_s8 + $0x298] sm:$0xf0]  ;;  %v5337_v2 = vld [vmem:[%s7862_s8 + $0x26c] sm:$0xf] }
 0x561   :  { %3451 = vmatpush.bf16.msrb.mxu2 %v4969_v1  ;;  %v5317_v1 = vld [vmem:[%s7862_s8 + $0x1cc] sm:$0xf]  ;;  %v4570_v10 = vld [vmem:[%s7862_s8 + $0xb8] sm:$0xf0]  ;;  %v4813_v3 = vor.u32 %v5341_v60, %v4810_v53 }
 0x562   :  { %3427 = vmatpush.bf16.msrb.mxu0 %v4681_v8  ;;  %v4714_v8 = vld [vmem:[%s7862_s8 + $0x1d8] sm:$0xf0]  ;;  %v4573_v50 = vor.u32 %v5281_v54, %v4570_v10  ;;  %v5277_v61 = vld [vmem:[%s7862_s8 + $0x8c] sm:$0xf] }
 0x563   :  { %3440 = vmatpush.bf16.msrb.mxu1 %v4809_v15  ;;  %v4889_v15 = vor.u32 %v5363_v39, %v4888_v32  ;;  %v4717_v11 = vor.u32 %v5317_v1, %v4714_v8  ;;  %v4666_v0 = vld [vmem:[%s7862_s8 + $0x178] sm:$0xf0]  ;;  %v5373_v21 = vld [vmem:[%s7862_s8 + $0x38c] sm:$0xf] }
 0x564   :  { %3413 = vmatpush.bf16.msra.mxu3 %v4569_v45  ;;  %v4872_v45 = vld [vmem:[%s7862_s8 + $0x308] sm:$0xf]  ;;  %v4554_v22 = vld [vmem:[%s7862_s8 + $0x98] sm:$0xf0]  ;;  %v4941_v1 = vor.u32 %v5373_v21, %v4938_v38  ;;  %v5297_v58 = vld [vmem:[%s7862_s8 + $0x12c] sm:$0xf] }
 0x565   :  { %3452 = vmatpush.bf16.msrb.mxu2 %v4953_v4  ;;  %3380 = vmatmul.bf16.vlgmr.msra.gmra.mxu0 %v7348_v14  ;;  %v4602_v4 = vld [vmem:[%s7862_s8 + $0xf8] sm:$0xf0]  ;;  %v4873_v46 = vor.u32 %v5359_v29, %v4872_v45  ;;  %v4557_v39 = vor.u32 %v5277_v61, %v4554_v22  ;;  %v5329_v29 = vld [vmem:[%s7862_s8 + $0x22c] sm:$0xf]  ;;  %v5398_v61 = vld [vmem:[%s7864_s10 + $0x50] sm:$0xff] }
 0x566   :  { %3393 = vmatmul.bf16.vlgmr.msra.gmra.mxu1 %v7356_v43  ;;  %3428 = vmatpush.bf16.msrb.mxu0 %v4665_v37  ;;  %v4986_v37 = vld [vmem:[%s7862_s8 + $0x3f8] sm:$0xf0]  ;;  %v5357_v53 = vld [vmem:[%s7862_s8 + $0x30c] sm:$0xf]  ;;  %v5410_v22 = vld [vmem:[%s7864_s10 + $0xb0] sm:$0xff] }
 0x567   :  { %3441 = vmatpush.bf16.msrb.mxu1 %v4793_v48  ;;  %v5313_v48 = vld [vmem:[%s7862_s8 + $0x1ac] sm:$0xf]  ;;  %v4650_v32 = vld [vmem:[%s7862_s8 + $0x158] sm:$0xf0] }
 0x568   :  { %3414 = vmatpush.bf16.msra.mxu3 %v4553_v31  ;;  %v4605_v31 = vor.u32 %v5289_v57, %v4602_v4  ;;  %v4634_v62 = vld [vmem:[%s7862_s8 + $0x138] sm:$0xf0]  ;;  %v4925_v4 = vor.u32 %v5369_v20, %v4922_v41  ;;  %v5397_v38 = vld [vmem:[%s7864_s10 + $0x48] sm:$0xff]  ;;  %v5406_v41 = vld [vmem:[%s7864_s10 + $0x90] sm:$0xff] }
 0x569   :  { %3453 = vmatpush.bf16.msrb.mxu2 %v4937_v59  ;;  %v4989_v59 = vor.u32 %v5385_v56, %v4986_v37  ;;  %v4762_v57 = vld [vmem:[%s7862_s8 + $0x238] sm:$0xf0]  ;;  %v4637_v37 = vor.u32 %v5297_v58, %v4634_v62 }
 0x56a   :  { %3429 = vmatpush.bf16.msrb.mxu0 %v4649_v5  ;;  %v4701_v5 = vor.u32 %v5313_v48, %v4698_v34  ;;  %v4522_v56 = vld [vmem:[%s7862_s8 + $0x58] sm:$0xf0]  ;;  %v4765_v48 = vor.u32 %v5329_v29, %v4762_v57  ;;  %v5293_v34 = vld [vmem:[%s7862_s8 + $0x10c] sm:$0xf] }
 0x56b   :  { %3442 = vmatpush.bf16.msrb.mxu1 %v4777_v24  ;;  %3367 = vmatmul.bf16.vlgmr.msrb.gmra.mxu3 %v7390_v27  ;;  %v4829_v24 = vor.u32 %v5345_v63, %v4826_v42  ;;  %v5325_v63 = vld [vmem:[%s7862_s8 + $0x20c] sm:$0xf]  ;;  %v4746_v42 = vld [vmem:[%s7862_s8 + $0x218] sm:$0xf0] }
 0x56c   :  { %3406 = vmatmul.bf16.vlgmr.msra.gmra.mxu2 %v7398_v16  ;;  %3415 = vmatpush.bf16.msra.mxu3 %v4537_v52  ;;  %v4589_v52 = vor.u32 %v5285_v28, %v4586_v6  ;;  %v5265_v28 = vld [vmem:[%s7862_s8 + $0x2c] sm:$0xf]  ;;  %v4506_v6 = vld [vmem:[%s7862_s8 + $0x38] sm:$0xf0] }
 0x56d   :  { %3454 = vmatpush.bf16.msrb.mxu2 %v4921_v36  ;;  %v4973_v36 = vor.u32 %v5381_v44, %v4970_v55  ;;  %v5361_v44 = vld [vmem:[%s7862_s8 + $0x32c] sm:$0xf]  ;;  %v4890_v55 = vld [vmem:[%s7862_s8 + $0x338] sm:$0xf0] }
 0x56e   :  { %3430 = vmatpush.bf16.msrb.mxu0 %v4633_v23  ;;  %v4685_v23 = vor.u32 %v5309_v47, %v4682_v35  ;;  %v4509_v47 = vor.u32 %v5265_v28, %v4506_v6  ;;  %v4893_v35 = vor.u32 %v5361_v44, %v4890_v55  ;;  %v4490_v60 = vld [vmem:[%s7862_s8 + $0x18] sm:$0xf0]  ;;  %v5405_v29 = vld [vmem:[%s7864_s10 + $0x88] sm:$0xff]  ;;  %v5416_v44 = vld [vmem:[%s7864_s10 + $0xe0] sm:$0xff] }
 0x56f   :  { %3443 = vmatpush.bf16.msrb.mxu1 %v4761_v19  ;;  %v5305_v19 = vld [vmem:[%s7862_s8 + $0x16c] sm:$0xf]  ;;  %v5391_v40 = vld [vmem:[%s7864_s10 + $0x18] sm:$0xff] }
 0x570   :  { %3416 = vmatpush.bf16.msra.mxu3 %v4521_v51  ;;  %v4794_v51 = vld [vmem:[%s7862_s8 + $0x278] sm:$0xf0]  ;;  %v5417_v28 = vld [vmem:[%s7864_s10 + $0xe8] sm:$0xff] }
 0x571   :  { %3455 = vmatpush.bf16.msrb.mxu2 %v4905_v25  ;;  %v4669_v25 = vor.u32 %v5305_v19, %v4666_v0  ;;  %v4797_v26 = vor.u32 %v5337_v2, %v4794_v51  ;;  %v5389_v19 = vld [vmem:[%s7864_s10 + $0x8] sm:$0xff]  ;;  %v5400_v2 = vld [vmem:[%s7864_s10 + $0x60] sm:$0xff]  ;;  %v5399_v51 = vld [vmem:[%s7864_s10 + $0x58] sm:$0xff] }
 0x572   :  { %3431 = vmatpush.bf16.msrb.mxu0 %v4617_v18  ;;  %v5301_v18 = vld [vmem:[%s7862_s8 + $0x14c] sm:$0xf] }
 0x573   :  { %3444 = vmatpush.bf16.msrb.mxu1 %v4745_v12  ;;  %v5333_v12 = vld [vmem:[%s7862_s8 + $0x24c] sm:$0xf]  ;;  %v4653_v8 = vor.u32 %v5301_v18, %v4650_v32  ;;  %v7801_v18 = vld [vmem:[%s7866_s9] sm:$0xf] }
 0x574   :  { %3417 = vmatpush.bf16.msra.mxu3 %v4505_v7  ;;  %v4538_v7 = vld [vmem:[%s7862_s8 + $0x78] sm:$0xf0]  ;;  %v5401_v0 = vld [vmem:[%s7864_s10 + $0x68] sm:$0xff]  ;;  %v5396_v32 = vld [vmem:[%s7864_s10 + $0x40] sm:$0xff] }
 0x575   :  { %3456 = vmatpush.bf16.msrb.mxu2 %v4889_v15  ;;  %3432 = vmatmul.bf16.vlgmr.msrb.gmra.mxu0 %v7348_v14 }
 0x576   :  { %3476 = vmatpush.bf16.msra.mxu0 %v4733_v30  ;;  %3445 = vmatmul.bf16.vlgmr.msrb.gmra.mxu1 %v7356_v43  ;;  %v4778_v30 = vld [vmem:[%s7862_s8 + $0x258] sm:$0xf0] }
 0x577   :  { %3489 = vmatpush.bf16.msra.mxu1 %v4861_v33  ;;  %v5273_v33 = vld [vmem:[%s7862_s8 + $0x6c] sm:$0xf]  ;;  %v4781_v15 = vor.u32 %v5333_v12, %v4778_v30 }
 0x578   :  { %3418 = vmatpush.bf16.msra.mxu3 %v4489_v13  ;;  %v4541_v45 = vor.u32 %v5273_v33, %v4538_v7  ;;  %v4906_v13 = vld [vmem:[%s7862_s8 + $0x358] sm:$0xf0] }
 0x579   :  { %3457 = vmatpush.bf16.msrb.mxu2 %v4873_v46  ;;  %v4618_v46 = vld [vmem:[%s7862_s8 + $0x118] sm:$0xf0] }
 0x57a   :  { %3477 = vmatpush.bf16.msra.mxu0 %v4717_v11  ;;  %v5269_v11 = vld [vmem:[%s7862_s8 + $0x4c] sm:$0xf]  ;;  %v5407_v33 = vld [vmem:[%s7864_s10 + $0x98] sm:$0xff] }
 0x57b   :  { %3490 = vmatpush.bf16.msra.mxu1 %v4845_v9  ;;  %3419 = vmatmul.bf16.vlgmr.msra.gmra.mxu3 %v7390_v27  ;;  %v5365_v9 = vld [vmem:[%s7862_s8 + $0x34c] sm:$0xf] }
 0x57c   :  { %3463 = vmatpush.bf16.msrb.mxu3 %v4605_v31  ;;  %3458 = vmatmul.bf16.vlgmr.msrb.gmra.mxu2 %v7398_v16  ;;  %v4525_v31 = vor.u32 %v5269_v11, %v4522_v56 }
 0x57d   :  { %3502 = vmatpush.bf16.msra.mxu2 %v4989_v59  ;;  %v4909_v59 = vor.u32 %v5365_v9, %v4906_v13  ;;  %v5419_v9 = vld [vmem:[%s7864_s10 + $0xf8] sm:$0xff] }
 0x57e   :  { %3478 = vmatpush.bf16.msra.mxu0 %v4701_v5  ;;  %v4621_v5 = vor.u32 %v5293_v34, %v4618_v46  ;;  %v2660_v46 = vperm.slane %v7801_v18, 1 }
 0x57f   :  { %3491 = vmatpush.bf16.msra.mxu1 %v4829_v24  ;;  %v4749_v24 = vor.u32 %v5325_v63, %v4746_v42 }
 0x580   :  { %3464 = vmatpush.bf16.msrb.mxu3 %v4589_v52  ;;  %v5261_v52 = vld [vmem:[%s7862_s8 + $0xc] sm:$0xf] }
 0x581   :  { %3503 = vmatpush.bf16.msra.mxu2 %v4973_v36  ;;  %v4874_v36 = vld [vmem:[%s7862_s8 + $0x318] sm:$0xf0]  ;;  %v4493_v54 = vor.u32 %v5261_v52, %v4490_v60 }
 0x582   :  { %3479 = vmatpush.bf16.msra.mxu0 %v4685_v23  ;;  %v4877_v10 = vor.u32 %v5357_v53, %v4874_v36  ;;  %v5395_v23 = vld [vmem:[%s7864_s10 + $0x38] sm:$0xff] }
 0x583   :  { %3492 = vmatpush.bf16.msra.mxu1 %v4813_v3  ;;  %v5402_v3 = vld [vmem:[%s7864_s10 + $0x70] sm:$0xff]  ;;  %v5415_v53 = vld [vmem:[%s7864_s10 + $0xd8] sm:$0xff] }
 0x584   :  { %3465 = vmatpush.bf16.msrb.mxu3 %v4573_v50  ;;  %v5388_v50 = vld [vmem:[%s7864_s10] sm:$0xff] }
 0x585   :  { %3504 = vmatpush.bf16.msra.mxu2 %v4957_v17  ;;  %v5411_v17 = vld [vmem:[%s7864_s10 + $0xb8] sm:$0xff] }
 0x586   :  { %3480 = vmatpush.bf16.msra.mxu0 %v4669_v25 }
 0x587   :  { %3493 = vmatpush.bf16.msra.mxu1 %v4797_v26  ;;  %v5409_v26 = vld [vmem:[%s7864_s10 + $0xa8] sm:$0xff] }
 0x588   :  { %3466 = vmatpush.bf16.msrb.mxu3 %v4557_v39  ;;  %v5408_v39 = vld [vmem:[%s7864_s10 + $0xa0] sm:$0xff] }
 0x589   :  { %3505 = vmatpush.bf16.msra.mxu2 %v4941_v1  ;;  %v2659_v1 = vperm.slane %v7801_v18, 0 }
 0x58a   :  { %3481 = vmatpush.bf16.msra.mxu0 %v4653_v8 }
 0x58b   :  { %3494 = vmatpush.bf16.msra.mxu1 %v4781_v15 }
 0x58c   :  { %3467 = vmatpush.bf16.msrb.mxu3 %v4541_v45 }
 0x58d   :  { %3506 = vmatpush.bf16.msra.mxu2 %v4925_v4 }
 0x58e   :  { %3482 = vmatpush.bf16.msra.mxu0 %v4637_v37  ;;  %v5404_v37 = vld [vmem:[%s7864_s10 + $0x80] sm:$0xff] }
 0x58f   :  { %3495 = vmatpush.bf16.msra.mxu1 %v4765_v48 }
 0x590   :  { %3468 = vmatpush.bf16.msrb.mxu3 %v4525_v31  ;;  %v5418_v31 = vld [vmem:[%s7864_s10 + $0xf0] sm:$0xff] }
 0x591   :  { %3507 = vmatpush.bf16.msra.mxu2 %v4909_v59 }
 0x592   :  { %3483 = vmatpush.bf16.msra.mxu0 %v4621_v5 }
 0x593   :  { %3496 = vmatpush.bf16.msra.mxu1 %v4749_v24 }
 0x594   :  { %3469 = vmatpush.bf16.msrb.mxu3 %v4509_v47 }
 0x595   :  { %3508 = vmatpush.bf16.msra.mxu2 %v4893_v35  ;;  %3484 = vmatmul.bf16.vlgmr.msra.gmra.mxu0 %v7348_v14  ;;  %v5393_v14 = vld [vmem:[%s7864_s10 + $0x28] sm:$0xff] }
 0x596   :  { %3497 = vmatmul.bf16.vlgmr.msra.gmra.mxu1 %v7356_v43  ;;  %v5392_v43 = vld [vmem:[%s7864_s10 + $0x20] sm:$0xff] }
 0x597   :  { %3809 = vmatpush.bf16.msrb.mxu1 %v5411_v17 }
 0x598   :  { %3470 = vmatpush.bf16.msrb.mxu3 %v4493_v54 }
 0x599   :  { %3509 = vmatpush.bf16.msra.mxu2 %v4877_v10 }
 0x59b   :  { %3471 = vmatmul.bf16.vlgmr.msrb.gmra.mxu3 %v7390_v27  ;;  %v5403_v27 = vld [vmem:[%s7864_s10 + $0x78] sm:$0xff]  ;;  %3810 = vmatpush.bf16.msrb.mxu1 %v5410_v22 }
 0x59c   :  { %3783 = vmatpush.bf16.msra.mxu3 %v5395_v23  ;;  %3510 = vmatmul.bf16.vlgmr.msra.gmra.mxu2 %v7398_v16  ;;  %v5390_v16 = vld [vmem:[%s7864_s10 + $0x10] sm:$0xff]  ;;  %v2661_v23 = vperm.slane %v7801_v18, 2 }
 0x59d   :  { %3796 = vmatpush.bf16.msrb.mxu0 %v5403_v27  ;;  %3822 = vmatpush.bf16.msrb.mxu2 %v5419_v9  ;;  %v5413_v27 = vld [vmem:[%s7864_s10 + $0xc8] sm:$0xff] }
 0x59f   :  { %3811 = vmatpush.bf16.msrb.mxu1 %v5409_v26 }
 0x5a0   :  { %3784 = vmatpush.bf16.msra.mxu3 %v5394_v49  ;;  %v5414_v49 = vld [vmem:[%s7864_s10 + $0xd0] sm:$0xff] }
 0x5a1   :  { %3797 = vmatpush.bf16.msrb.mxu0 %v5402_v3  ;;  %3823 = vmatpush.bf16.msrb.mxu2 %v5418_v31 }
 0x5a3   :  { %3812 = vmatpush.bf16.msrb.mxu1 %v5408_v39 }
 0x5a4   :  { %3785 = vmatpush.bf16.msra.mxu3 %v5393_v14 }
 0x5a5   :  { %3798 = vmatpush.bf16.msrb.mxu0 %v5401_v0  ;;  %3824 = vmatpush.bf16.msrb.mxu2 %v5417_v28 }
 0x5a7   :  { %3813 = vmatpush.bf16.msrb.mxu1 %v5407_v33 }
 0x5a8   :  { %3786 = vmatpush.bf16.msra.mxu3 %v5392_v43 }
 0x5a9   :  { %3799 = vmatpush.bf16.msrb.mxu0 %v5400_v2  ;;  %3825 = vmatpush.bf16.msrb.mxu2 %v5416_v44 }
 0x5ab   :  { %3814 = vmatpush.bf16.msrb.mxu1 %v5406_v41 }
 0x5ac   :  { %3787 = vmatpush.bf16.msra.mxu3 %v5391_v40 }
 0x5ad   :  { %3800 = vmatpush.bf16.msrb.mxu0 %v5399_v51  ;;  %3826 = vmatpush.bf16.msrb.mxu2 %v5415_v53 }
 0x5af   :  { %3815 = vmatpush.bf16.msrb.mxu1 %v5405_v29 }
 0x5b0   :  { %3788 = vmatpush.bf16.msra.mxu3 %v5390_v16 }
 0x5b1   :  { %3801 = vmatpush.bf16.msrb.mxu0 %v5398_v61  ;;  %3827 = vmatpush.bf16.msrb.mxu2 %v5414_v49 }
 0x5b3   :  { %3816 = vmatpush.bf16.msrb.mxu1 %v5404_v37 }
 0x5b4   :  { %3789 = vmatpush.bf16.msra.mxu3 %v5389_v19  ;;  %v5412_v19 = vld [vmem:[%s7864_s10 + $0xc0] sm:$0xff] }
 0x5b5   :  { %3802 = vmatpush.bf16.msrb.mxu0 %v5397_v38  ;;  %3828 = vmatpush.bf16.msrb.mxu2 %v5413_v27  ;;  %v2662_v38 = vperm.slane %v7801_v18, 3  ;;  %v5422_v18 = vld [vmem:[%s7865_s11] ss:$0 sm:$0xff] }
 0x5b8   :  { %3790 = vmatpush.bf16.msra.mxu3 %v5388_v50 }
 0x5b9   :  { %3803 = vmatpush.bf16.msrb.mxu0 %v5396_v32  ;;  %3829 = vmatpush.bf16.msrb.mxu2 %v5412_v19 }
 0x5d2   :  { %v3329_v25 = vpop.f32.mrf.mxu0 }
 0x5d3   :  { %v3342_v21 = vpop.f32.mrf.mxu1 }
 0x5da   :  { %v3331_v12 = vpop.f32.mrf.mxu0 }
 0x5db   :  { %v3344_v30 = vpop.f32.mrf.mxu1 }
 0x5de   :  { %v3316_v7 = vpop.f32.mrf.mxu3 }
 0x5df   :  { %v3317_v8 = vadd.f32 %v3316_v7, %v2659_v1  ;;  %v3355_v20 = vpop.f32.mrf.mxu2 }
 0x5e1   :  { %v3330_v15 = vadd.f32 %v3329_v25, %v3317_v8 }
 0x5e2   :  { %v3381_v58 = vpop.f32.mrf.mxu0 }
 0x5e3   :  { %v3343_v62 = vadd.f32 %v3342_v21, %v3330_v15  ;;  %v3394_v45 = vpop.f32.mrf.mxu1 }
 0x5e5   :  { %v3356_v57 = vadd.f32 %v3355_v20, %v3343_v62 }
 0x5e6   :  { %v3318_v4 = vpop.f32.mrf.mxu3 }
 0x5e7   :  { %v3515_v11 = vmax.f32 %v3356_v57, 0.0  ;;  %v3357_v56 = vpop.f32.mrf.mxu2 }
 0x5e9   :  { %v3519_v13 = vpack.c.bf16 %v3515_v11, %v3515_v11 }
 0x5ea   :  { %v3383_v48 = vpop.f32.mrf.mxu0 }
 0x5eb   :  { %v3396_v34 = vpop.f32.mrf.mxu1  ;;  %3791 = vmatmul.bf16.vlgmr.msra.gmra.mxu3 %v3519_v13 }
 0x5ee   :  { %v3368_v63 = vpop.f32.mrf.mxu3 }
 0x5ef   :  { %v3369_v42 = vadd.f32 %v3368_v63, %v2660_v46  ;;  %v3407_v59 = vpop.f32.mrf.mxu2 }
 0x5f1   :  { %v3382_v6 = vadd.f32 %v3381_v58, %v3369_v42 }
 0x5f2   :  { %v3433_v5 = vpop.f32.mrf.mxu0 }
 0x5f3   :  { %v3395_v55 = vadd.f32 %v3394_v45, %v3382_v6  ;;  %v3446_v24 = vpop.f32.mrf.mxu1 }
 0x5f5   :  { %v3408_v47 = vadd.f32 %v3407_v59, %v3395_v55 }
 0x5f6   :  { %v3370_v35 = vpop.f32.mrf.mxu3 }
 0x5f7   :  { %v3516_v52 = vmax.f32 %v3408_v47, 0.0  ;;  %v3409_v60 = vpop.f32.mrf.mxu2 }
 0x5f9   :  { %v3520_v36 = vpack.c.bf16 %v3516_v52, %v3516_v52 }
 0x5fa   :  { %v3435_v54 = vpop.f32.mrf.mxu0 }
 0x5fb   :  { %v3448_v10 = vpop.f32.mrf.mxu1  ;;  %3804 = vmatmul.bf16.vlgmr.msrb.gmra.mxu0 %v3520_v36 }
 0x5fe   :  { %v3420_v14 = vpop.f32.mrf.mxu3 }
 0x5ff   :  { %v3421_v43 = vadd.f32 %v3420_v14, %v2661_v23  ;;  %v3459_v40 = vpop.f32.mrf.mxu2 }
 0x601   :  { %v3434_v16 = vadd.f32 %v3433_v5, %v3421_v43 }
 0x603   :  { %v3447_v3 = vadd.f32 %v3446_v24, %v3434_v16 }
 0x605   :  { %v3460_v0 = vadd.f32 %v3459_v40, %v3447_v3 }
 0x606   :  { %v3422_v50 = vpop.f32.mrf.mxu3 }
 0x607   :  { %v3517_v2 = vmax.f32 %v3460_v0, 0.0  ;;  %v3461_v51 = vpop.f32.mrf.mxu2 }
 0x609   :  { %v3521_v17 = vpack.c.bf16 %v3517_v2, %v3517_v2 }
 0x60b   :  { %3817 = vmatmul.bf16.vlgmr.msrb.gmra.mxu1 %v3521_v17 }
 0x612   :  { %v3485_v61 = vpop.f32.mrf.mxu0 }
 0x613   :  { %v3498_v22 = vpop.f32.mrf.mxu1 }
 0x61a   :  { %v3487_v25 = vpop.f32.mrf.mxu0 }
 0x61b   :  { %v3500_v21 = vpop.f32.mrf.mxu1 }
 0x61e   :  { %v3472_v26 = vpop.f32.mrf.mxu3 }
 0x61f   :  { %v3473_v32 = vadd.f32 %v3472_v26, %v2662_v38  ;;  %v3511_v39 = vpop.f32.mrf.mxu2 }
 0x621   :  { %v3486_v12 = vadd.f32 %v3485_v61, %v3473_v32 }
 0x623   :  { %v3499_v30 = vadd.f32 %v3498_v22, %v3486_v12 }
 0x625   :  { %v3512_v1 = vadd.f32 %v3511_v39, %v3499_v30 }
 0x626   :  { %v3474_v33 = vpop.f32.mrf.mxu3 }
 0x627   :  { %v3518_v7 = vmax.f32 %v3512_v1, 0.0  ;;  %v3513_v8 = vpop.f32.mrf.mxu2 }
 0x629   :  { %v3522_v20 = vpack.c.bf16 %v3518_v7, %v3518_v7 }
 0x62b   :  { %3830 = vmatmul.bf16.vlgmr.msrb.gmra.mxu2 %v3522_v20 }
 0x66e   :  { %v3792_v41 = vpop.f32.mrf.mxu3 }
 0x66f   :  { %v3793_v57 = vadd.f32 %v5422_v18, %v3792_v41 }
 0x676   :  { %v3794_v15 = vpop.f32.mrf.mxu3 }
 0x678   :  { %v3805_v58 = vpop.f32.mrf.mxu0 }
 0x679   :  { %v3806_v4 = vadd.f32 %v3805_v58, %v3793_v57 }
 0x680   :  { %v3807_v62 = vpop.f32.mrf.mxu0 }
 0x688   :  { %v3818_v45 = vpop.f32.mrf.mxu1 }
 0x689   :  { %v3819_v11 = vadd.f32 %v3818_v45, %v3806_v4 }
 0x690   :  { %v3820_v29 = vpop.f32.mrf.mxu1 }
 0x6ae   :  { %v3831_v56 = vpop.f32.mrf.mxu2 }
 0x6af   :  { %v3832_v37 = vadd.f32 %v3831_v56, %v3819_v11 }
 0x6b1   :  { %3835 = vst [vmem:[%s7867_s12] sm:$0xff] %v3832_v37 }
 0x6b6   :  { %v3833_v9 = vpop.f32.mrf.mxu2 }

// kernel: _lambda_.3
= control target key start
LH: loop header
LB: loop body
LE: loop exit
PB: predicated region body
PF: predicated region fallthrough
CT: control target
= control target key end

     0   :  { %vm145_vm0 = vcmask 1041408   ;;  %s7896_s0 = inlined_call_operand.vmem [shape: f32[800,36], index: 0, kind: input, shape index: {}]   ;;  %s7897_s1 = inlined_call_operand.vmem [shape: bf16[36,128], index: 1, kind: input, shape index: {}]   ;;  %s7898_s2 = inlined_call_operand.vmem [shape: f32[1,128], index: 2, kind: input, shape index: {}]   ;;  %s7899_s3 = inlined_call_operand.vmem [shape: bf16[288,200], index: 3, kind: input, shape index: {}]   ;;  %s7900_s4 = inlined_call_operand.vmem [shape: bf16[1152,128], index: 4, kind: input, shape index: {}]   ;;  %s7901_s5 = inlined_call_operand.vmem [shape: f32[1,128], index: 5, kind: input, shape index: {}]   ;;  %s7902_s6 = inlined_call_operand.vmem [shape: bf16[128,512], index: 6, kind: input, shape index: {}]   ;;  %s7903_s7 = inlined_call_operand.vmem [shape: f32[1,512], index: 7, kind: input, shape index: {}]   ;;  %s7904_s8 = inlined_call_operand.vmem [shape: bf16[512,512], index: 8, kind: input, shape index: {}]   ;;  %s7905_s9 = inlined_call_operand.vmem [shape: f32[1,512], index: 9, kind: input, shape index: {}]   ;;  %s7906_s10 = inlined_call_operand.vmem [shape: bf16[512,128], index: 10, kind: input, shape index: {}]   ;;  %s7907_s11 = inlined_call_operand.vmem [shape: f32[1,128], index: 11, kind: input, shape index: {}]   ;;  %s7908_s12 = inlined_call_operand.hbm [shape: f32[8,128], index: 12, kind: output, shape index: {}]  }
   0x1   :  { %v47_v0 = vld [vmem:[%s7897_s1 + $0x10] sm:$0x3]  ;;  %v5132_v4 = vld [vmem:[%s7897_s1 + $0x8] sm:$0xff] }
   0x2   :  { %v99_v1 = vunpack.c.l.b16 %v47_v0 }
   0x4   :  { %v102_v2 = vpack.c.b16 %v99_v1, %v99_v1 }
   0x6   :  { %v147_v3 = vsel %vm145_vm0, %v102_v2, 0 }
   0x7   :  { %154 = vmatpush.bf16.msra.mxu0 %v147_v3  ;;  %329 = vmatpush.bf16.msra.mxu1 %v147_v3 }
   0x8   :  { %529 = vmatpush.bf16.msra.mxu2 %v147_v3  ;;  %729 = vmatpush.bf16.msra.mxu3 %v147_v3 }
   0x9   :  { %17 = vsyncpa [#allocation3], 0  ;;  %v5131_v5 = vld [vmem:[%s7897_s1] sm:$0xff]  ;;  %v50_v7 = vld [vmem:[%s7896_s0 + $0x8] sm:$0xff]  ;;  %vm105_vm1 = vcmask 293888   ;;  %vm889_vm2 = vcmask 1043456  }
   0xa   :  { %v49_v6 = vld [vmem:[%s7896_s0] sm:$0xff]  ;;  %v247_v8 = vld [vmem:[%s7896_s0 + $0xc8] sm:$0xff]  ;;  %v248_v9 = vld [vmem:[%s7896_s0 + $0xd0] sm:$0xff]  ;;  %vm882_vm3 = vcmask 588800   ;;  %s3844_s16 = sshll.u32 %s7908_s12, 4  ;;  %s3845_s16 = int_to_ptr.hbm [resolvable:$true] %s3844_s16 }
   0xb   :  { %155 = vmatpush.bf16.msra.mxu0 %v5132_v4  ;;  %330 = vmatpush.bf16.msra.mxu1 %v5132_v4  ;;  %v447_v10 = vld [vmem:[%s7896_s0 + $0x190] sm:$0xff]  ;;  %v448_v11 = vld [vmem:[%s7896_s0 + $0x198] sm:$0xff]  ;;  %v648_v13 = vld [vmem:[%s7896_s0 + $0x260] sm:$0xff]  ;;  %v74_v14 = vpack.c.bf16 %v50_v7, %v49_v6  ;;  %v272_v15 = vpack.c.bf16 %v248_v9, %v247_v8 }
   0xc   :  { %530 = vmatpush.bf16.msra.mxu2 %v5132_v4  ;;  %730 = vmatpush.bf16.msra.mxu3 %v5132_v4  ;;  %v647_v12 = vld [vmem:[%s7896_s0 + $0x258] sm:$0xff]  ;;  %v472_v16 = vpack.c.bf16 %v448_v11, %v447_v10  ;;  %v51_v18 = vld [vmem:[%s7896_s0 + $0x10] sm:$0xff]  ;;  %v250_v21 = vld [vmem:[%s7896_s0 + $0xe0] sm:$0xff] }
   0xd   :  { %v672_v17 = vpack.c.bf16 %v648_v13, %v647_v12  ;;  %v52_v19 = vld [vmem:[%s7896_s0 + $0x18] sm:$0xff]  ;;  %v449_v22 = vld [vmem:[%s7896_s0 + $0x1a0] sm:$0xff]  ;;  %v450_v23 = vld [vmem:[%s7896_s0 + $0x1a8] sm:$0xff] }
   0xe   :  { %v249_v20 = vld [vmem:[%s7896_s0 + $0xd8] sm:$0xff]  ;;  %v649_v24 = vld [vmem:[%s7896_s0 + $0x268] sm:$0xff]  ;;  %v650_v25 = vld [vmem:[%s7896_s0 + $0x270] sm:$0xff]  ;;  %v75_v26 = vpack.c.bf16 %v52_v19, %v51_v18  ;;  %v473_v28 = vpack.c.bf16 %v450_v23, %v449_v22 }
   0xf   :  { %156 = vmatpush.bf16.msra.mxu0 %v5131_v5  ;;  %331 = vmatpush.bf16.msra.mxu1 %v5131_v5  ;;  %v273_v27 = vpack.c.bf16 %v250_v21, %v249_v20  ;;  %v673_v29 = vpack.c.bf16 %v650_v25, %v649_v24  ;;  %v53_v30 = vld [vmem:[%s7896_s0 + $0x20] sm:$0xff]  ;;  %v54_v31 = vld [vmem:[%s7896_s0 + $0x28] sm:$0xff]  ;;  %v252_v33 = vld [vmem:[%s7896_s0 + $0xf0] sm:$0xff] }
  0x10   :  { %531 = vmatpush.bf16.msra.mxu2 %v5131_v5  ;;  %731 = vmatpush.bf16.msra.mxu3 %v5131_v5  ;;  %v251_v32 = vld [vmem:[%s7896_s0 + $0xe8] sm:$0xff]  ;;  %v451_v34 = vld [vmem:[%s7896_s0 + $0x1b0] sm:$0xff]  ;;  %v452_v35 = vld [vmem:[%s7896_s0 + $0x1b8] sm:$0xff]  ;;  %v76_v38 = vpack.c.bf16 %v54_v31, %v53_v30 }
  0x11   :  { %v651_v36 = vld [vmem:[%s7896_s0 + $0x278] sm:$0xff]  ;;  %v652_v37 = vld [vmem:[%s7896_s0 + $0x280] sm:$0xff]  ;;  %v274_v39 = vpack.c.bf16 %v252_v33, %v251_v32  ;;  %v474_v40 = vpack.c.bf16 %v452_v35, %v451_v34  ;;  %v55_v42 = vld [vmem:[%s7896_s0 + $0x30] sm:$0xff] }
  0x12   :  { %3861 = vmatmul.msk.bf16.vlgmr.msra.gmra.mxu0 %vm105_vm1, %v74_v14  ;;  %3874 = vmatmul.msk.bf16.vlgmr.msra.gmra.mxu1 %vm105_vm1, %v272_v15  ;;  %v674_v41 = vpack.c.bf16 %v652_v37, %v651_v36  ;;  %v56_v43 = vld [vmem:[%s7896_s0 + $0x38] sm:$0xff]  ;;  %v254_v45 = vld [vmem:[%s7896_s0 + $0x100] sm:$0xff]  ;;  %v454_v47 = vld [vmem:[%s7896_s0 + $0x1c8] sm:$0xff] }
  0x13   :  { %3887 = vmatmul.msk.bf16.vlgmr.msra.gmra.mxu2 %vm105_vm1, %v472_v16  ;;  %3900 = vmatmul.msk.bf16.vlgmr.msra.gmra.mxu3 %vm105_vm1, %v672_v17  ;;  %v253_v44 = vld [vmem:[%s7896_s0 + $0xf8] sm:$0xff]  ;;  %v453_v46 = vld [vmem:[%s7896_s0 + $0x1c0] sm:$0xff]  ;;  %v653_v48 = vld [vmem:[%s7896_s0 + $0x288] sm:$0xff]  ;;  %v77_v50 = vpack.c.bf16 %v56_v43, %v55_v42 }
  0x14   :  { %v654_v49 = vld [vmem:[%s7896_s0 + $0x290] sm:$0xff]  ;;  %v275_v51 = vpack.c.bf16 %v254_v45, %v253_v44  ;;  %v475_v52 = vpack.c.bf16 %v454_v47, %v453_v46  ;;  %v57_v54 = vld [vmem:[%s7896_s0 + $0x40] sm:$0xff]  ;;  %v58_v55 = vld [vmem:[%s7896_s0 + $0x48] sm:$0xff] }
  0x15   :  { %v675_v53 = vpack.c.bf16 %v654_v49, %v653_v48  ;;  %v255_v56 = vld [vmem:[%s7896_s0 + $0x108] sm:$0xff]  ;;  %v256_v57 = vld [vmem:[%s7896_s0 + $0x110] sm:$0xff]  ;;  %v456_v59 = vld [vmem:[%s7896_s0 + $0x1d8] sm:$0xff]  ;;  %v78_v62 = vpack.c.bf16 %v58_v55, %v57_v54 }
  0x16   :  { %v455_v58 = vld [vmem:[%s7896_s0 + $0x1d0] sm:$0xff]  ;;  %v655_v60 = vld [vmem:[%s7896_s0 + $0x298] sm:$0xff]  ;;  %v656_v61 = vld [vmem:[%s7896_s0 + $0x2a0] sm:$0xff]  ;;  %v276_v63 = vpack.c.bf16 %v256_v57, %v255_v56 }
  0x17   :  { %v476_v0 = vpack.c.bf16 %v456_v59, %v455_v58  ;;  %v676_v1 = vpack.c.bf16 %v656_v61, %v655_v60  ;;  %v59_v2 = vld [vmem:[%s7896_s0 + $0x50] sm:$0xff]  ;;  %v60_v3 = vld [vmem:[%s7896_s0 + $0x58] sm:$0xff]  ;;  %v258_v5 = vld [vmem:[%s7896_s0 + $0x120] sm:$0xff] }
  0x18   :  { %v257_v4 = vld [vmem:[%s7896_s0 + $0x118] sm:$0xff]  ;;  %v457_v6 = vld [vmem:[%s7896_s0 + $0x1e0] sm:$0xff]  ;;  %v458_v7 = vld [vmem:[%s7896_s0 + $0x1e8] sm:$0xff]  ;;  %v79_v10 = vpack.c.bf16 %v60_v3, %v59_v2 }
  0x19   :  { %v657_v8 = vld [vmem:[%s7896_s0 + $0x2a8] sm:$0xff]  ;;  %v658_v9 = vld [vmem:[%s7896_s0 + $0x2b0] sm:$0xff]  ;;  %v277_v11 = vpack.c.bf16 %v258_v5, %v257_v4  ;;  %v477_v12 = vpack.c.bf16 %v458_v7, %v457_v6  ;;  %v61_v14 = vld [vmem:[%s7896_s0 + $0x60] sm:$0xff] }
  0x1a   :  { %v677_v13 = vpack.c.bf16 %v658_v9, %v657_v8  ;;  %v62_v15 = vld [vmem:[%s7896_s0 + $0x68] sm:$0xff]  ;;  %v260_v17 = vld [vmem:[%s7896_s0 + $0x130] sm:$0xff]  ;;  %v460_v19 = vld [vmem:[%s7896_s0 + $0x1f8] sm:$0xff] }
  0x1b   :  { %v259_v16 = vld [vmem:[%s7896_s0 + $0x128] sm:$0xff]  ;;  %v459_v18 = vld [vmem:[%s7896_s0 + $0x1f0] sm:$0xff]  ;;  %v659_v20 = vld [vmem:[%s7896_s0 + $0x2b8] sm:$0xff]  ;;  %v80_v22 = vpack.c.bf16 %v62_v15, %v61_v14 }
  0x1c   :  { %v660_v21 = vld [vmem:[%s7896_s0 + $0x2c0] sm:$0xff]  ;;  %v278_v23 = vpack.c.bf16 %v260_v17, %v259_v16  ;;  %v478_v24 = vpack.c.bf16 %v460_v19, %v459_v18  ;;  %v462_v31 = vld [vmem:[%s7896_s0 + $0x208] sm:$0xff]  ;;  %v662_v33 = vld [vmem:[%s7896_s0 + $0x2d0] sm:$0xff] }
  0x1d   :  { %v678_v25 = vpack.c.bf16 %v660_v21, %v659_v20  ;;  %v461_v30 = vld [vmem:[%s7896_s0 + $0x200] sm:$0xff]  ;;  %v661_v32 = vld [vmem:[%s7896_s0 + $0x2c8] sm:$0xff]  ;;  %v264_v42 = vld [vmem:[%s7896_s0 + $0x150] sm:$0xff] }
  0x1e   :  { %v479_v36 = vpack.c.bf16 %v462_v31, %v461_v30  ;;  %v679_v37 = vpack.c.bf16 %v662_v33, %v661_v32  ;;  %v463_v43 = vld [vmem:[%s7896_s0 + $0x210] sm:$0xff]  ;;  %v464_v44 = vld [vmem:[%s7896_s0 + $0x218] sm:$0xff]  ;;  %v664_v46 = vld [vmem:[%s7896_s0 + $0x2e0] sm:$0xff] }
  0x1f   :  { %v663_v45 = vld [vmem:[%s7896_s0 + $0x2d8] sm:$0xff]  ;;  %v67_v6 = vld [vmem:[%s7896_s0 + $0x90] sm:$0xff]  ;;  %v665_v14 = vld [vmem:[%s7896_s0 + $0x2e8] sm:$0xff] }
  0x20   :  { %v68_v7 = vld [vmem:[%s7896_s0 + $0x98] sm:$0xff]  ;;  %v666_v15 = vld [vmem:[%s7896_s0 + $0x2f0] sm:$0xff] }
  0x21   :  { %v265_v9 = vld [vmem:[%s7896_s0 + $0x158] sm:$0xff]  ;;  %v83_v19 = vpack.c.bf16 %v68_v7, %v67_v6 }
  0x22   :  { %3862 = vmatmul.msk.bf16.gmra.mxu0 %vm105_vm1, %v75_v26  ;;  %3875 = vmatmul.msk.bf16.gmra.mxu1 %vm105_vm1, %v273_v27  ;;  %v63_v26 = vld [vmem:[%s7896_s0 + $0x70] sm:$0xff]  ;;  %v64_v27 = vld [vmem:[%s7896_s0 + $0x78] sm:$0xff] }
  0x23   :  { %3888 = vmatmul.msk.bf16.gmra.mxu2 %vm105_vm1, %v473_v28  ;;  %3901 = vmatmul.msk.bf16.gmra.mxu3 %vm105_vm1, %v673_v29  ;;  %v261_v28 = vld [vmem:[%s7896_s0 + $0x138] sm:$0xff]  ;;  %v262_v29 = vld [vmem:[%s7896_s0 + $0x140] sm:$0xff]  ;;  %v81_v34 = vpack.c.bf16 %v64_v27, %v63_v26  ;;  %v681_v26 = vpack.c.bf16 %v666_v15, %v665_v14 }
  0x24   :  { %v279_v35 = vpack.c.bf16 %v262_v29, %v261_v28  ;;  %v72_v14 = vld [vmem:[%s7896_s0 + $0xb8] sm:$0xff] }
  0x32   :  { %3863 = vmatmul.msk.bf16.gmra.mxu0 %vm105_vm1, %v76_v38  ;;  %3876 = vmatmul.msk.bf16.gmra.mxu1 %vm105_vm1, %v274_v39  ;;  %v5765_v38 = vld [vmem:[%s7898_s2] ss:$0 sm:$0xff] }
  0x33   :  { %3889 = vmatmul.msk.bf16.gmra.mxu2 %vm105_vm1, %v474_v40  ;;  %3902 = vmatmul.msk.bf16.gmra.mxu3 %vm105_vm1, %v674_v41  ;;  %v65_v39 = vld [vmem:[%s7896_s0 + $0x80] sm:$0xff]  ;;  %v66_v40 = vld [vmem:[%s7896_s0 + $0x88] sm:$0xff] }
  0x34   :  { %v263_v41 = vld [vmem:[%s7896_s0 + $0x148] sm:$0xff]  ;;  %v82_v47 = vpack.c.bf16 %v66_v40, %v65_v39 }
  0x35   :  { %v280_v48 = vpack.c.bf16 %v264_v42, %v263_v41 }
  0x42   :  { %3864 = vmatmul.msk.bf16.gmra.mxu0 %vm105_vm1, %v77_v50  ;;  %3877 = vmatmul.msk.bf16.gmra.mxu1 %vm105_vm1, %v275_v51  ;;  %v480_v51 = vpack.c.bf16 %v464_v44, %v463_v43 }
  0x43   :  { %3890 = vmatmul.msk.bf16.gmra.mxu2 %vm105_vm1, %v475_v52  ;;  %3903 = vmatmul.msk.bf16.gmra.mxu3 %vm105_vm1, %v675_v53  ;;  %v680_v52 = vpack.c.bf16 %v664_v46, %v663_v45  ;;  %v69_v46 = vld [vmem:[%s7896_s0 + $0xa0] sm:$0xff] }
  0x52   :  { %3865 = vmatmul.msk.bf16.gmra.mxu0 %vm105_vm1, %v78_v62  ;;  %3878 = vmatmul.msk.bf16.gmra.mxu1 %vm105_vm1, %v276_v63 }
  0x53   :  { %3891 = vmatmul.msk.bf16.gmra.mxu2 %vm105_vm1, %v476_v0  ;;  %3904 = vmatmul.msk.bf16.gmra.mxu3 %vm105_vm1, %v676_v1 }
  0x62   :  { %3866 = vmatmul.msk.bf16.gmra.mxu0 %vm105_vm1, %v79_v10  ;;  %3879 = vmatmul.msk.bf16.gmra.mxu1 %vm105_vm1, %v277_v11  ;;  %v266_v10 = vld [vmem:[%s7896_s0 + $0x160] sm:$0xff] }
  0x63   :  { %3892 = vmatmul.msk.bf16.gmra.mxu2 %vm105_vm1, %v477_v12  ;;  %3905 = vmatmul.msk.bf16.gmra.mxu3 %vm105_vm1, %v677_v13  ;;  %v465_v11 = vld [vmem:[%s7896_s0 + $0x220] sm:$0xff]  ;;  %v466_v13 = vld [vmem:[%s7896_s0 + $0x228] sm:$0xff]  ;;  %v281_v20 = vpack.c.bf16 %v266_v10, %v265_v9 }
  0x72   :  { %3867 = vmatmul.msk.bf16.gmra.mxu0 %vm105_vm1, %v80_v22  ;;  %3880 = vmatmul.msk.bf16.gmra.mxu1 %vm105_vm1, %v278_v23 }
  0x73   :  { %3893 = vmatmul.msk.bf16.gmra.mxu2 %vm105_vm1, %v478_v24  ;;  %3906 = vmatmul.msk.bf16.gmra.mxu3 %vm105_vm1, %v678_v25  ;;  %v481_v25 = vpack.c.bf16 %v466_v13, %v465_v11  ;;  %v71_v13 = vld [vmem:[%s7896_s0 + $0xb0] sm:$0xff] }
  0x82   :  { %3868 = vmatmul.msk.bf16.gmra.mxu0 %vm105_vm1, %v81_v34  ;;  %3881 = vmatmul.msk.bf16.gmra.mxu1 %vm105_vm1, %v279_v35 }
  0x83   :  { %3894 = vmatmul.msk.bf16.gmra.mxu2 %vm105_vm1, %v479_v36  ;;  %3907 = vmatmul.msk.bf16.gmra.mxu3 %vm105_vm1, %v679_v37 }
  0x8f   :  { %v158_v49 = vpop.f32.mrf.mxu0  ;;  %v333_v50 = vpop.f32.mrf.mxu1 }
  0x90   :  { %v159_v53 = vadd.f32 %v5765_v38, %v158_v49  ;;  %v334_v54 = vadd.f32 %v5765_v38, %v333_v50  ;;  %v267_v49 = vld [vmem:[%s7896_s0 + $0x168] sm:$0xff]  ;;  %v268_v50 = vld [vmem:[%s7896_s0 + $0x170] sm:$0xff] }
  0x92   :  { %v222_v55 = vmax.f32 %v159_v53, 0.0  ;;  %v397_v56 = vmax.f32 %v334_v54, 0.0  ;;  %3869 = vmatmul.msk.bf16.gmra.mxu0 %vm105_vm1, %v82_v47  ;;  %3882 = vmatmul.msk.bf16.gmra.mxu1 %vm105_vm1, %v280_v48  ;;  %v70_v47 = vld [vmem:[%s7896_s0 + $0xa8] sm:$0xff]  ;;  %v667_v53 = vld [vmem:[%s7896_s0 + $0x2f8] sm:$0xff]  ;;  %v668_v54 = vld [vmem:[%s7896_s0 + $0x300] sm:$0xff] }
  0x93   :  { %3895 = vmatmul.msk.bf16.gmra.mxu2 %vm105_vm1, %v480_v51  ;;  %3908 = vmatmul.msk.bf16.gmra.mxu3 %vm105_vm1, %v680_v52  ;;  %v467_v51 = vld [vmem:[%s7896_s0 + $0x230] sm:$0xff]  ;;  %v468_v52 = vld [vmem:[%s7896_s0 + $0x238] sm:$0xff] }
  0x94   :  { %v422_v57 = vmax.f32 %v222_v55, %v397_v56 }
  0x96   :  { %v533_v58 = vpop.f32.mrf.mxu2  ;;  %v733_v59 = vpop.f32.mrf.mxu3 }
  0x97   :  { %v534_v60 = vadd.f32 %v5765_v38, %v533_v58  ;;  %v734_v61 = vadd.f32 %v5765_v38, %v733_v59  ;;  %v160_v62 = vpop.f32.mrf.mxu0  ;;  %v335_v63 = vpop.f32.mrf.mxu1  ;;  %v84_v58 = vpack.c.bf16 %v70_v47, %v69_v46  ;;  %v282_v59 = vpack.c.bf16 %v268_v50, %v267_v49  ;;  %v73_v49 = vld [vmem:[%s7896_s0 + $0xc0] sm:$0xff]  ;;  %v271_v50 = vld [vmem:[%s7896_s0 + $0x188] sm:$0xff] }
  0x98   :  { %v161_v0 = vadd.f32 %v5765_v38, %v160_v62  ;;  %v336_v1 = vadd.f32 %v5765_v38, %v335_v63  ;;  %v482_v62 = vpack.c.bf16 %v468_v52, %v467_v51  ;;  %v682_v63 = vpack.c.bf16 %v668_v54, %v667_v53  ;;  %v471_v51 = vld [vmem:[%s7896_s0 + $0x250] sm:$0xff]  ;;  %v671_v52 = vld [vmem:[%s7896_s0 + $0x318] sm:$0xff] }
  0x99   :  { %v597_v2 = vmax.f32 %v534_v60, 0.0  ;;  %v797_v3 = vmax.f32 %v734_v61, 0.0 }
  0x9a   :  { %v223_v4 = vmax.f32 %v161_v0, 0.0  ;;  %v398_v5 = vmax.f32 %v336_v1, 0.0 }
  0x9b   :  { %v622_v8 = vmax.f32 %v422_v57, %v597_v2 }
  0x9c   :  { %v423_v12 = vmax.f32 %v223_v4, %v398_v5 }
  0x9d   :  { %v822_v16 = vmax.f32 %v622_v8, %v797_v3 }
  0x9e   :  { %v535_v17 = vpop.f32.mrf.mxu2  ;;  %v735_v18 = vpop.f32.mrf.mxu3 }
  0x9f   :  { %v536_v21 = vadd.f32 %v5765_v38, %v535_v17  ;;  %v736_v22 = vadd.f32 %v5765_v38, %v735_v18  ;;  %v163_v23 = vpop.f32.mrf.mxu0  ;;  %v338_v24 = vpop.f32.mrf.mxu1  ;;  %v270_v17 = vld [vmem:[%s7896_s0 + $0x180] sm:$0xff] }
  0xa0   :  { %v164_v27 = vadd.f32 %v5765_v38, %v163_v23  ;;  %v339_v28 = vadd.f32 %v5765_v38, %v338_v24  ;;  %v469_v18 = vld [vmem:[%s7896_s0 + $0x240] sm:$0xff] }
  0xa1   :  { %v598_v29 = vmax.f32 %v536_v21, 0.0  ;;  %v798_v33 = vmax.f32 %v736_v22, 0.0  ;;  %v670_v21 = vld [vmem:[%s7896_s0 + $0x310] sm:$0xff] }
  0xa2   :  { %v224_v30 = vmax.f32 %v164_v27, 0.0  ;;  %v399_v31 = vmax.f32 %v339_v28, 0.0  ;;  %3870 = vmatmul.msk.bf16.gmra.mxu0 %vm105_vm1, %v83_v19  ;;  %3883 = vmatmul.msk.bf16.gmra.mxu1 %vm105_vm1, %v281_v20  ;;  %v470_v19 = vld [vmem:[%s7896_s0 + $0x248] sm:$0xff] }
  0xa3   :  { %v623_v32 = vmax.f32 %v423_v12, %v598_v29  ;;  %3896 = vmatmul.msk.bf16.gmra.mxu2 %vm105_vm1, %v481_v25  ;;  %3909 = vmatmul.msk.bf16.gmra.mxu3 %vm105_vm1, %v681_v26  ;;  %v669_v20 = vld [vmem:[%s7896_s0 + $0x308] sm:$0xff]  ;;  %v85_v25 = vpack.c.bf16 %v72_v14, %v71_v13  ;;  %v483_v29 = vpack.c.bf16 %v470_v19, %v469_v18 }
  0xa4   :  { %v424_v34 = vmax.f32 %v224_v30, %v399_v31  ;;  %v683_v30 = vpack.c.bf16 %v670_v21, %v669_v20 }
  0xa5   :  { %v823_v35 = vmax.f32 %v623_v32, %v798_v33 }
  0xa6   :  { %v538_v36 = vpop.f32.mrf.mxu2  ;;  %v738_v37 = vpop.f32.mrf.mxu3 }
  0xa7   :  { %v5833_v39 = vpack.c.bf16 %v823_v35, %v822_v16  ;;  %v539_v40 = vadd.f32 %v5765_v38, %v538_v36  ;;  %v739_v41 = vadd.f32 %v5765_v38, %v738_v37  ;;  %v5837_v42 = vpop.f32.mrf.mxu0  ;;  %v5839_v43 = vpop.f32.mrf.mxu1  ;;  %v269_v16 = vld [vmem:[%s7896_s0 + $0x178] sm:$0xff] }
  0xa8   :  { %v283_v26 = vpack.c.bf16 %v270_v17, %v269_v16 }
  0xa9   :  { %v599_v44 = vmax.f32 %v539_v40, 0.0  ;;  %v799_v45 = vmax.f32 %v739_v41, 0.0 }
  0xab   :  { %v624_v48 = vmax.f32 %v424_v34, %v599_v44 }
  0xad   :  { %v5865_v55 = vmax.f32 %v624_v48, %v799_v45 }
  0xae   :  { %v5867_v56 = vpop.f32.mrf.mxu2  ;;  %v5869_v57 = vpop.f32.mrf.mxu3 }
  0xaf   :  { %v168_v60 = vpop.f32.mrf.mxu0  ;;  %v343_v61 = vpop.f32.mrf.mxu1 }
  0xb0   :  { %v169_v0 = vadd.f32 %v5765_v38, %v168_v60  ;;  %v344_v1 = vadd.f32 %v5765_v38, %v343_v61  ;;  %v284_v60 = vpack.c.bf16 %v271_v50, %v271_v50 }
  0xb2   :  { %v226_v2 = vmax.f32 %v169_v0, 0.0  ;;  %v401_v3 = vmax.f32 %v344_v1, 0.0  ;;  %3871 = vmatmul.msk.bf16.gmra.mxu0 %vm105_vm1, %v84_v58  ;;  %3884 = vmatmul.msk.bf16.gmra.mxu1 %vm105_vm1, %v282_v59  ;;  %v86_v59 = vpack.c.bf16 %v73_v49, %v73_v49  ;;  %v684_v0 = vpack.c.bf16 %v671_v52, %v671_v52 }
  0xb3   :  { %3897 = vmatmul.msk.bf16.gmra.mxu2 %vm105_vm1, %v482_v62  ;;  %3910 = vmatmul.msk.bf16.gmra.mxu3 %vm105_vm1, %v682_v63  ;;  %v484_v63 = vpack.c.bf16 %v471_v51, %v471_v51 }
  0xb4   :  { %v426_v4 = vmax.f32 %v226_v2, %v401_v3 }
  0xb6   :  { %v543_v5 = vpop.f32.mrf.mxu2  ;;  %v743_v6 = vpop.f32.mrf.mxu3 }
  0xb7   :  { %v544_v7 = vadd.f32 %v5765_v38, %v543_v5  ;;  %v744_v8 = vadd.f32 %v5765_v38, %v743_v6  ;;  %v5879_v9 = vpop.f32.mrf.mxu0  ;;  %v5881_v10 = vpop.f32.mrf.mxu1 }
  0xb9   :  { %v601_v11 = vmax.f32 %v544_v7, 0.0  ;;  %v801_v12 = vmax.f32 %v744_v8, 0.0 }
  0xbb   :  { %v626_v15 = vmax.f32 %v426_v4, %v601_v11 }
  0xbd   :  { %v5907_v22 = vmax.f32 %v626_v15, %v801_v12 }
  0xbe   :  { %v5909_v23 = vpop.f32.mrf.mxu2  ;;  %v5911_v24 = vpop.f32.mrf.mxu3 }
  0xbf   :  { %v173_v27 = vpop.f32.mrf.mxu0  ;;  %v348_v28 = vpop.f32.mrf.mxu1 }
  0xc0   :  { %v174_v31 = vadd.f32 %v5765_v38, %v173_v27  ;;  %v349_v32 = vadd.f32 %v5765_v38, %v348_v28 }
  0xc2   :  { %v228_v33 = vmax.f32 %v174_v31, 0.0  ;;  %v403_v34 = vmax.f32 %v349_v32, 0.0  ;;  %3872 = vmatmul.msk.bf16.gmra.mxu0 %vm105_vm1, %v85_v25  ;;  %3885 = vmatmul.msk.bf16.gmra.mxu1 %vm105_vm1, %v283_v26 }
  0xc3   :  { %3898 = vmatmul.msk.bf16.gmra.mxu2 %vm105_vm1, %v483_v29  ;;  %3911 = vmatmul.msk.bf16.gmra.mxu3 %vm105_vm1, %v683_v30 }
  0xc4   :  { %v428_v35 = vmax.f32 %v228_v33, %v403_v34 }
  0xc6   :  { %v548_v36 = vpop.f32.mrf.mxu2  ;;  %v748_v37 = vpop.f32.mrf.mxu3 }
  0xc7   :  { %v549_v40 = vadd.f32 %v5765_v38, %v548_v36  ;;  %v749_v41 = vadd.f32 %v5765_v38, %v748_v37  ;;  %v175_v44 = vpop.f32.mrf.mxu0  ;;  %v5921_v45 = vpop.f32.mrf.mxu1 }
  0xc9   :  { %v603_v46 = vmax.f32 %v549_v40, 0.0  ;;  %v803_v47 = vmax.f32 %v749_v41, 0.0 }
  0xcb   :  { %v628_v48 = vmax.f32 %v428_v35, %v603_v46 }
  0xcd   :  { %v5935_v53 = vmax.f32 %v628_v48, %v803_v47  ;;  %v5958_v47 = vadd.f32 %v5765_v38, %v175_v44 }
  0xce   :  { %v5937_v54 = vpop.f32.mrf.mxu2  ;;  %v5939_v58 = vpop.f32.mrf.mxu3 }
  0xcf   :  { %v178_v61 = vpop.f32.mrf.mxu0  ;;  %v353_v62 = vpop.f32.mrf.mxu1 }
  0xd0   :  { %v179_v1 = vadd.f32 %v5765_v38, %v178_v61  ;;  %v354_v2 = vadd.f32 %v5765_v38, %v353_v62  ;;  %v229_v61 = vmax.f32 %v5958_v47, 0.0  ;;  %v5981_v62 = vadd.f32 %v5765_v38, %v5921_v45 }
  0xd2   :  { %v230_v3 = vmax.f32 %v179_v1, 0.0  ;;  %v405_v4 = vmax.f32 %v354_v2, 0.0  ;;  %3873 = vmatmul.msk.bf16.gmra.mxu0 %vm105_vm1, %v86_v59  ;;  %3886 = vmatmul.msk.bf16.gmra.mxu1 %vm105_vm1, %v284_v60  ;;  %v5969_v59 = vadd.f32 %v5765_v38, %v5879_v9  ;;  %v5973_v60 = vadd.f32 %v5765_v38, %v5881_v10 }
  0xd3   :  { %3899 = vmatmul.msk.bf16.gmra.mxu2 %vm105_vm1, %v484_v63  ;;  %3912 = vmatmul.msk.bf16.gmra.mxu3 %vm105_vm1, %v684_v0 }
  0xd4   :  { %v430_v5 = vmax.f32 %v230_v3, %v405_v4 }
  0xd6   :  { %v553_v6 = vpop.f32.mrf.mxu2  ;;  %v753_v7 = vpop.f32.mrf.mxu3 }
  0xd7   :  { %v554_v8 = vadd.f32 %v5765_v38, %v553_v6  ;;  %v754_v11 = vadd.f32 %v5765_v38, %v753_v7  ;;  %v180_v12 = vpop.f32.mrf.mxu0  ;;  %v355_v13 = vpop.f32.mrf.mxu1 }
  0xd8   :  { %v5961_v48 = vadd.f32 %v5765_v38, %v180_v12  ;;  %v5976_v44 = vadd.f32 %v5765_v38, %v355_v13 }
  0xd9   :  { %v605_v14 = vmax.f32 %v554_v8, 0.0  ;;  %v805_v15 = vmax.f32 %v754_v11, 0.0 }
  0xda   :  { %v231_v2 = vmax.f32 %v5961_v48, 0.0  ;;  %v406_v12 = vmax.f32 %v5976_v44, 0.0  ;;  %v546_v48 = vadd.f32 %v5765_v38, %v5909_v23 }
  0xdb   :  { %v630_v16 = vmax.f32 %v430_v5, %v605_v14 }
  0xdc   :  { %v602_v47 = vmax.f32 %v546_v48, 0.0 }
  0xdd   :  { %v5949_v17 = vmax.f32 %v630_v16, %v805_v15 }
  0xde   :  { %v555_v18 = vpop.f32.mrf.mxu2  ;;  %v5951_v19 = vpop.f32.mrf.mxu3 }
  0xdf   :  { %v183_v20 = vpop.f32.mrf.mxu0  ;;  %v358_v21 = vpop.f32.mrf.mxu1  ;;  %v5994_v16 = vadd.f32 %v5765_v38, %v555_v18 }
  0xe0   :  { %v184_v49 = vadd.f32 %v5765_v38, %v183_v20  ;;  %v359_v50 = vadd.f32 %v5765_v38, %v358_v21 }
  0xe2   :  { %v232_v3 = vmax.f32 %v184_v49, 0.0  ;;  %v407_v10 = vmax.f32 %v359_v50, 0.0 }
  0xe6   :  { %v558_v25 = vpop.f32.mrf.mxu2  ;;  %v5953_v26 = vpop.f32.mrf.mxu3 }
  0xe7   :  { %v185_v27 = vpop.f32.mrf.mxu0  ;;  %v360_v28 = vpop.f32.mrf.mxu1 }
  0xe8   :  { %v186_v4 = vadd.f32 %v5765_v38, %v185_v27  ;;  %v361_v20 = vadd.f32 %v5765_v38, %v360_v28 }
  0xee   :  { %v560_v29 = vpop.f32.mrf.mxu2  ;;  %v5955_v30 = vpop.f32.mrf.mxu3 }
  0xef   :  { %v188_v31 = vpop.f32.mrf.mxu0  ;;  %v363_v32 = vpop.f32.mrf.mxu1  ;;  %v561_v28 = vadd.f32 %v5765_v38, %v560_v29 }
  0xf0   :  { %v189_v63 = vadd.f32 %v5765_v38, %v188_v31  ;;  %v364_v0 = vadd.f32 %v5765_v38, %v363_v32  ;;  %v432_v31 = vmax.f32 %v232_v3, %v407_v10  ;;  %v559_v32 = vadd.f32 %v5765_v38, %v558_v25 }
  0xf2   :  { %v234_v21 = vmax.f32 %v189_v63, 0.0  ;;  %v409_v27 = vmax.f32 %v364_v0, 0.0 }
  0xf4   :  { %v434_v63 = vmax.f32 %v234_v21, %v409_v27 }
  0xf6   :  { %v563_v33 = vpop.f32.mrf.mxu2  ;;  %v763_v34 = vpop.f32.mrf.mxu3 }
  0xf7   :  { %v190_v35 = vpop.f32.mrf.mxu0  ;;  %v365_v36 = vpop.f32.mrf.mxu1  ;;  %v764_v0 = vadd.f32 %v5765_v38, %v763_v34 }
  0xf8   :  { %v191_v7 = vadd.f32 %v5765_v38, %v190_v35  ;;  %v366_v8 = vadd.f32 %v5765_v38, %v365_v36  ;;  %v564_v35 = vadd.f32 %v5765_v38, %v563_v33 }
  0xfa   :  { %v410_v49 = vmax.f32 %v366_v8, 0.0  ;;  %v609_v33 = vmax.f32 %v564_v35, 0.0  ;;  %v607_v35 = vmax.f32 %v559_v32, 0.0  ;;  %v606_v32 = vmax.f32 %v5994_v16, 0.0 }
  0xfc   :  { %v632_v16 = vmax.f32 %v432_v31, %v607_v35 }
  0xfe   :  { %v565_v37 = vpop.f32.mrf.mxu2  ;;  %v765_v40 = vpop.f32.mrf.mxu3 }
  0xff   :  { %v193_v41 = vpop.f32.mrf.mxu0  ;;  %v368_v46 = vpop.f32.mrf.mxu1  ;;  %v566_v36 = vadd.f32 %v5765_v38, %v565_v37 }
 0x100   :  { %v194_v51 = vadd.f32 %v5765_v38, %v193_v41  ;;  %v369_v52 = vadd.f32 %v5765_v38, %v368_v46  ;;  %v233_v41 = vmax.f32 %v186_v4, 0.0  ;;  %v235_v46 = vmax.f32 %v191_v7, 0.0 }
 0x101   :  { %v610_v10 = vmax.f32 %v566_v36, 0.0 }
 0x102   :  { %v236_v45 = vmax.f32 %v194_v51, 0.0  ;;  %v411_v11 = vmax.f32 %v369_v52, 0.0  ;;  %v435_v8 = vmax.f32 %v235_v46, %v410_v49 }
 0x104   :  { %v436_v50 = vmax.f32 %v236_v45, %v411_v11  ;;  %v635_v36 = vmax.f32 %v435_v8, %v610_v10 }
 0x106   :  { %v568_v1 = vpop.f32.mrf.mxu2  ;;  %v768_v9 = vpop.f32.mrf.mxu3 }
 0x107   :  { %v195_v5 = vpop.f32.mrf.mxu0  ;;  %v370_v6 = vpop.f32.mrf.mxu1  ;;  %v569_v13 = vadd.f32 %v5765_v38, %v568_v1  ;;  %v769_v52 = vadd.f32 %v5765_v38, %v768_v9  ;;  %v766_v9 = vadd.f32 %v5765_v38, %v765_v40  ;;  %v761_v40 = vadd.f32 %v5765_v38, %v5955_v30 }
 0x108   :  { %v196_v14 = vadd.f32 %v5765_v38, %v195_v5  ;;  %v371_v15 = vadd.f32 %v5765_v38, %v370_v6  ;;  %v408_v5 = vmax.f32 %v361_v20, 0.0  ;;  %v608_v20 = vmax.f32 %v561_v28, 0.0 }
 0x109   :  { %v611_v51 = vmax.f32 %v569_v13, 0.0  ;;  %v811_v13 = vmax.f32 %v769_v52, 0.0 }
 0x10a   :  { %v237_v18 = vmax.f32 %v196_v14, 0.0  ;;  %v412_v1 = vmax.f32 %v371_v15, 0.0  ;;  %v759_v15 = vadd.f32 %v5765_v38, %v5953_v26  ;;  %v433_v49 = vmax.f32 %v233_v41, %v408_v5 }
 0x10b   :  { %v636_v11 = vmax.f32 %v436_v50, %v611_v51  ;;  %v634_v50 = vmax.f32 %v434_v63, %v609_v33  ;;  %v810_v51 = vmax.f32 %v766_v9, 0.0  ;;  %v551_v26 = vadd.f32 %v5765_v38, %v5937_v54 }
 0x10c   :  { %v437_v34 = vmax.f32 %v237_v18, %v412_v1  ;;  %v404_v1 = vmax.f32 %v5981_v62, 0.0  ;;  %v633_v28 = vmax.f32 %v433_v49, %v608_v20  ;;  %v431_v54 = vmax.f32 %v231_v2, %v406_v12 }
 0x10d   :  { %v836_v52 = vmax.f32 %v636_v11, %v811_v13  ;;  %v835_v41 = vmax.f32 %v635_v36, %v810_v51  ;;  %v756_v62 = vadd.f32 %v5765_v38, %v5951_v19  ;;  %v604_v44 = vmax.f32 %v551_v26, 0.0 }
 0x10e   :  { %v570_v25 = vpop.f32.mrf.mxu2  ;;  %v770_v3 = vpop.f32.mrf.mxu3  ;;  %v631_v2 = vmax.f32 %v431_v54, %v606_v32  ;;  %v341_v11 = vadd.f32 %v5765_v38, %v5839_v43  ;;  %v227_v13 = vmax.f32 %v5969_v59, 0.0  ;;  %v541_v43 = vadd.f32 %v5765_v38, %v5867_v56 }
 0x10f   :  { %v571_v37 = vadd.f32 %v5765_v38, %v570_v25  ;;  %v771_v4 = vadd.f32 %v5765_v38, %v770_v3  ;;  %v198_v6 = vpop.f32.mrf.mxu0  ;;  %v373_v7 = vpop.f32.mrf.mxu1  ;;  %v809_v3 = vmax.f32 %v764_v0, 0.0  ;;  %v806_v23 = vmax.f32 %v756_v62, 0.0 }
 0x110   :  { %v199_v45 = vadd.f32 %v5765_v38, %v198_v6  ;;  %v374_v29 = vadd.f32 %v5765_v38, %v373_v7  ;;  %v808_v7 = vmax.f32 %v761_v40, 0.0  ;;  %v400_v49 = vmax.f32 %v341_v11, 0.0 }
 0x111   :  { %v612_v14 = vmax.f32 %v571_v37, 0.0  ;;  %v812_v46 = vmax.f32 %v771_v4, 0.0  ;;  %v807_v4 = vmax.f32 %v759_v15, 0.0  ;;  %v834_v8 = vmax.f32 %v634_v50, %v809_v3 }
 0x112   :  { %v238_v21 = vmax.f32 %v199_v45, 0.0  ;;  %v413_v27 = vmax.f32 %v374_v29, 0.0  ;;  %v166_v29 = vadd.f32 %v5765_v38, %v5837_v42  ;;  %v833_v12 = vmax.f32 %v633_v28, %v808_v7 }
 0x113   :  { %v637_v25 = vmax.f32 %v437_v34, %v612_v14  ;;  %v6036_v19 = vpack.c.bf16 %v835_v41, %v834_v8  ;;  %v402_v34 = vmax.f32 %v5973_v60, 0.0  ;;  %v429_v14 = vmax.f32 %v229_v61, %v404_v1 }
 0x114   :  { %v438_v6 = vmax.f32 %v238_v21, %v413_v27  ;;  %v751_v42 = vadd.f32 %v5765_v38, %v5939_v58  ;;  %v832_v15 = vmax.f32 %v632_v16, %v807_v4  ;;  %v831_v21 = vmax.f32 %v631_v2, %v806_v23 }
 0x115   :  { %v837_v18 = vmax.f32 %v637_v25, %v812_v46  ;;  %v629_v61 = vmax.f32 %v429_v14, %v604_v44  ;;  %v225_v36 = vmax.f32 %v166_v29, 0.0  ;;  %v427_v40 = vmax.f32 %v227_v13, %v402_v34  ;;  %v3941_v34 = vld [vmem:[%s7899_s3 + $0x30] sm:$0xf]  ;;  %v5148_v14 = vld [vmem:[%s7899_s3 + $0x34] sm:$0xf0] }
 0x116   :  { %v573_v10 = vpop.f32.mrf.mxu2  ;;  %v773_v37 = vpop.f32.mrf.mxu3  ;;  %v6056_v27 = vpack.c.bf16 %v833_v12, %v832_v15  ;;  %v746_v56 = vadd.f32 %v5765_v38, %v5911_v24  ;;  %v804_v3 = vmax.f32 %v751_v42, 0.0  ;;  %v600_v51 = vmax.f32 %v541_v43, 0.0 }
 0x117   :  { %v6016_v5 = vpack.c.bf16 %v837_v18, %v836_v52  ;;  %v574_v30 = vadd.f32 %v5765_v38, %v573_v10  ;;  %v774_v63 = vadd.f32 %v5765_v38, %v773_v37  ;;  %v6020_v0 = vpop.f32.mrf.mxu0  ;;  %v6022_v33 = vpop.f32.mrf.mxu1  ;;  %v627_v52 = vmax.f32 %v427_v40, %v602_v47  ;;  %v4015_v40 = vld [vmem:[%s7899_s3 + $0x40] sm:$0xf] }
 0x118   :  { %v829_v18 = vmax.f32 %v629_v61, %v804_v3  ;;  %v6065_v1 = vpack.c.bf16 %v831_v21, %v5949_v17  ;;  %v425_v32 = vmax.f32 %v225_v36, %v400_v49  ;;  %v741_v28 = vadd.f32 %v5765_v38, %v5869_v57 }
 0x119   :  { %v613_v9 = vmax.f32 %v574_v30, 0.0  ;;  %v813_v45 = vmax.f32 %v774_v63, 0.0  ;;  %893 = vmatpush.bf16.msrb.mxu0 %v6016_v5  ;;  %977 = vmatpush.bf16.msrb.mxu2 %v6016_v5  ;;  %v802_v24 = vmax.f32 %v746_v56, 0.0  ;;  %v3942_v42 = vor.u32 %v5148_v14, %v3941_v34 }
 0x11a   :  { %v625_v41 = vmax.f32 %v425_v32, %v600_v51  ;;  %v6078_v17 = vpack.c.bf16 %v829_v18, %v5935_v53  ;;  %v800_v62 = vmax.f32 %v741_v28, 0.0  ;;  %v6130_v61 = vadd.f32 %v5765_v38, %v6020_v0  ;;  %v5134_v51 = vld [vmem:[%s7899_s3 + $0x4] sm:$0xf0] }
 0x11b   :  { %v638_v31 = vmax.f32 %v438_v6, %v613_v9  ;;  %v827_v30 = vmax.f32 %v627_v52, %v802_v24  ;;  %v6141_v0 = vadd.f32 %v5765_v38, %v6022_v33 }
 0x11c   :  { %v825_v57 = vmax.f32 %v625_v41, %v800_v62 }
 0x11d   :  { %v6046_v20 = vmax.f32 %v638_v31, %v813_v45  ;;  %894 = vmatpush.bf16.msrb.mxu0 %v6036_v19  ;;  %978 = vmatpush.bf16.msrb.mxu2 %v6036_v19  ;;  %v6087_v16 = vpack.c.bf16 %v827_v30, %v5907_v22  ;;  %v3933_v22 = vld [vmem:[%s7899_s3 + $0x20] sm:$0xf]  ;;  %v5146_v45 = vld [vmem:[%s7899_s3 + $0x24] sm:$0xf0] }
 0x11e   :  { %v6052_v59 = vpop.f32.mrf.mxu2  ;;  %v6054_v60 = vpop.f32.mrf.mxu3  ;;  %v6096_v7 = vpack.c.bf16 %v825_v57, %v5865_v55  ;;  %v3934_v29 = vor.u32 %v5146_v45, %v3933_v22 }
 0x11f   :  { %v203_v58 = vpop.f32.mrf.mxu0  ;;  %v378_v35 = vpop.f32.mrf.mxu1 }
 0x120   :  { %v204_v25 = vadd.f32 %v5765_v38, %v203_v58  ;;  %v379_v46 = vadd.f32 %v5765_v38, %v378_v35 }
 0x121   :  { %895 = vmatpush.bf16.msrb.mxu0 %v6056_v27  ;;  %979 = vmatpush.bf16.msrb.mxu2 %v6056_v27 }
 0x122   :  { %v240_v6 = vmax.f32 %v204_v25, 0.0  ;;  %v415_v50 = vmax.f32 %v379_v46, 0.0  ;;  %v239_v25 = vmax.f32 %v6130_v61, 0.0 }
 0x124   :  { %v6067_v26 = vmax.f32 %v240_v6, %v415_v50  ;;  %v5158_v6 = vld [vmem:[%s7899_s3 + $0x44] sm:$0xf0]  ;;  %v3915_v50 = vld [vmem:[%s7899_s3] sm:$0xf] }
 0x125   :  { %896 = vmatpush.bf16.msrb.mxu0 %v6065_v1  ;;  %980 = vmatpush.bf16.msrb.mxu2 %v6065_v1  ;;  %v3916_v32 = vor.u32 %v5134_v51, %v3915_v50  ;;  %v4016_v22 = vor.u32 %v5158_v6, %v4015_v40 }
 0x126   :  { %v6073_v10 = vpop.f32.mrf.mxu2  ;;  %v6075_v37 = vpop.f32.mrf.mxu3 }
 0x127   :  { %v6080_v63 = vpop.f32.mrf.mxu0  ;;  %v6082_v54 = vpop.f32.mrf.mxu1  ;;  %v6160_v28 = vadd.f32 %v5765_v38, %v6073_v10 }
 0x128   :  { %v6165_v62 = vadd.f32 %v5765_v38, %v6080_v63  ;;  %v381_v45 = vadd.f32 %v5765_v38, %v6082_v54 }
 0x129   :  { %897 = vmatpush.bf16.msrb.mxu0 %v6078_v17  ;;  %981 = vmatpush.bf16.msrb.mxu2 %v6078_v17 }
 0x12d   :  { %898 = vmatpush.bf16.msrb.mxu0 %v6087_v16  ;;  %982 = vmatpush.bf16.msrb.mxu2 %v6087_v16 }
 0x12e   :  { %v6091_v4 = vpop.f32.mrf.mxu2  ;;  %v6093_v53 = vpop.f32.mrf.mxu3 }
 0x12f   :  { %v208_v8 = vpop.f32.mrf.mxu0  ;;  %v383_v9 = vpop.f32.mrf.mxu1 }
 0x130   :  { %v209_v52 = vadd.f32 %v5765_v38, %v208_v8  ;;  %v384_v24 = vadd.f32 %v5765_v38, %v383_v9 }
 0x131   :  { %899 = vmatpush.bf16.msrb.mxu0 %v6096_v7  ;;  %983 = vmatpush.bf16.msrb.mxu2 %v6096_v7 }
 0x132   :  { %v242_v9 = vmax.f32 %v209_v52, 0.0 }
 0x135   :  { %900 = vmatpush.bf16.msrb.mxu0 %v5833_v39  ;;  %984 = vmatpush.bf16.msrb.mxu2 %v5833_v39 }
 0x136   :  { %v6108_v55 = vpop.f32.mrf.mxu2  ;;  %v6110_v48 = vpop.f32.mrf.mxu3 }
 0x137   :  { %v210_v44 = vpop.f32.mrf.mxu0  ;;  %v385_v2 = vpop.f32.mrf.mxu1  ;;  %v584_v54 = vadd.f32 %v5765_v38, %v6108_v55  ;;  %v581_v55 = vadd.f32 %v5765_v38, %v6091_v4  ;;  %v414_v4 = vmax.f32 %v6141_v0, 0.0  ;;  %v5160_v0 = vld [vmem:[%s7899_s3 + $0x54] sm:$0xf0] }
 0x138   :  { %985 = vmatmul.bf16.vlgmr.msrb.gmra.mxu2 %v3934_v29  ;;  %v211_v57 = vadd.f32 %v5765_v38, %v210_v44  ;;  %901 = vmatmul.bf16.vlgmr.msrb.gmra.mxu0 %v3916_v32  ;;  %v386_v10 = vadd.f32 %v5765_v38, %v385_v2 }
 0x139   :  { %1195 = vmatpush.bf16.msra.mxu2 %v6016_v5 }
 0x13a   :  { %v243_v2 = vmax.f32 %v211_v57, 0.0  ;;  %v617_v57 = vmax.f32 %v584_v54, 0.0 }
 0x13d   :  { %1196 = vmatpush.bf16.msra.mxu2 %v6036_v19 }
 0x13e   :  { %v6114_v12 = vpop.f32.mrf.mxu2  ;;  %v6116_v31 = vpop.f32.mrf.mxu3 }
 0x13f   :  { %v213_v11 = vpop.f32.mrf.mxu0  ;;  %v388_v13 = vpop.f32.mrf.mxu1 }
 0x140   :  { %v214_v56 = vadd.f32 %v5765_v38, %v213_v11  ;;  %v389_v3 = vadd.f32 %v5765_v38, %v388_v13 }
 0x141   :  { %1197 = vmatpush.bf16.msra.mxu2 %v6056_v27 }
 0x142   :  { %v244_v29 = vmax.f32 %v214_v56, 0.0  ;;  %v419_v11 = vmax.f32 %v389_v3, 0.0 }
 0x144   :  { %v444_v40 = vmax.f32 %v244_v29, %v419_v11  ;;  %v576_v11 = vadd.f32 %v5765_v38, %v6052_v59  ;;  %v781_v59 = vadd.f32 %v5765_v38, %v6093_v53 }
 0x145   :  { %1198 = vmatpush.bf16.msra.mxu2 %v6065_v1 }
 0x146   :  { %v588_v23 = vpop.f32.mrf.mxu2  ;;  %v788_v15 = vpop.f32.mrf.mxu3 }
 0x147   :  { %v215_v43 = vpop.f32.mrf.mxu0  ;;  %v390_v47 = vpop.f32.mrf.mxu1  ;;  %v589_v13 = vadd.f32 %v5765_v38, %v588_v23  ;;  %v789_v50 = vadd.f32 %v5765_v38, %v788_v15  ;;  %v786_v15 = vadd.f32 %v5765_v38, %v6116_v31 }
 0x148   :  { %990 = vmatmul.bf16.gmra.mxu2 %v3942_v42  ;;  %v216_v33 = vadd.f32 %v5765_v38, %v215_v43  ;;  %v391_v18 = vadd.f32 %v5765_v38, %v390_v47  ;;  %v417_v43 = vmax.f32 %v384_v24, 0.0  ;;  %v784_v24 = vadd.f32 %v5765_v38, %v6110_v48 }
 0x149   :  { %1199 = vmatpush.bf16.msra.mxu2 %v6078_v17  ;;  %v619_v6 = vmax.f32 %v589_v13, 0.0  ;;  %v779_v48 = vadd.f32 %v5765_v38, %v6075_v37  ;;  %v615_v13 = vmax.f32 %v6160_v28, 0.0  ;;  %v3923_v28 = vld [vmem:[%s7899_s3 + $0x10] sm:$0xf] }
 0x14a   :  { %v245_v34 = vmax.f32 %v216_v33, 0.0  ;;  %v420_v14 = vmax.f32 %v391_v18, 0.0  ;;  %v241_v33 = vmax.f32 %v6165_v62, 0.0  ;;  %v416_v18 = vmax.f32 %v381_v45, 0.0 }
 0x14c   :  { %v445_v51 = vmax.f32 %v245_v34, %v420_v14  ;;  %v616_v34 = vmax.f32 %v581_v55, 0.0  ;;  %v5145_v55 = vld [vmem:[%s7899_s3 + $0x24] sm:$0xf] }
 0x14d   :  { %1200 = vmatpush.bf16.msra.mxu2 %v6087_v16 }
 0x14e   :  { %v590_v21 = vpop.f32.mrf.mxu2  ;;  %v790_v58 = vpop.f32.mrf.mxu3 }
 0x14f   :  { %v218_v35 = vpop.f32.mrf.mxu0  ;;  %v393_v36 = vpop.f32.mrf.mxu1  ;;  %v591_v8 = vadd.f32 %v5765_v38, %v590_v21  ;;  %v791_v52 = vadd.f32 %v5765_v38, %v790_v58  ;;  %v644_v58 = vmax.f32 %v444_v40, %v619_v6  ;;  %v776_v40 = vadd.f32 %v5765_v38, %v6054_v60 }
 0x150   :  { %v219_v46 = vadd.f32 %v5765_v38, %v218_v35  ;;  %v394_v49 = vadd.f32 %v5765_v38, %v393_v36  ;;  %v816_v6 = vmax.f32 %v781_v59, 0.0  ;;  %v5179_v59 = vld [vmem:[%s7900_s4 + $0xf0] sm:$0xff] }
 0x151   :  { %1201 = vmatpush.bf16.msra.mxu2 %v6096_v7  ;;  %v620_v23 = vmax.f32 %v591_v8, 0.0  ;;  %v820_v62 = vmax.f32 %v791_v52, 0.0  ;;  %v814_v61 = vmax.f32 %v776_v40, 0.0  ;;  %v5173_v40 = vld [vmem:[%s7900_s4 + $0xc0] sm:$0xff] }
 0x152   :  { %v246_v41 = vmax.f32 %v219_v46, 0.0  ;;  %v421_v30 = vmax.f32 %v394_v49, 0.0  ;;  %v586_v46 = vadd.f32 %v5765_v38, %v6114_v12  ;;  %v418_v49 = vmax.f32 %v386_v10, 0.0 }
 0x153   :  { %v442_v12 = vmax.f32 %v242_v9, %v417_v43  ;;  %v819_v10 = vmax.f32 %v789_v50, 0.0  ;;  %v817_v43 = vmax.f32 %v784_v24, 0.0 }
 0x154   :  { %v446_v44 = vmax.f32 %v246_v41, %v421_v30  ;;  %v618_v41 = vmax.f32 %v586_v46, 0.0  ;;  %v645_v30 = vmax.f32 %v445_v51, %v620_v23  ;;  %v443_v8 = vmax.f32 %v243_v2, %v418_v49 }
 0x155   :  { %1202 = vmatpush.bf16.msra.mxu2 %v5833_v39  ;;  %v439_v49 = vmax.f32 %v239_v25, %v414_v4  ;;  %v5135_v4 = vld [vmem:[%s7899_s3 + $0x14] sm:$0xf] }
 0x156   :  { %v593_v63 = vpop.f32.mrf.mxu2  ;;  %v793_v42 = vpop.f32.mrf.mxu3  ;;  %v643_v31 = vmax.f32 %v443_v8, %v618_v41  ;;  %v845_v14 = vmax.f32 %v645_v30, %v820_v62  ;;  %v5192_v41 = vld [vmem:[%s7900_s4 + $0x138] sm:$0xff]  ;;  %v5169_v8 = vld [vmem:[%s7899_s3 + $0x64] sm:$0xf]  ;;  %v5190_v62 = vld [vmem:[%s7900_s4 + $0x128] sm:$0xff] }
 0x157   :  { %v594_v47 = vadd.f32 %v5765_v38, %v593_v63  ;;  %v794_v21 = vadd.f32 %v5765_v38, %v793_v42  ;;  %v220_v35 = vpop.f32.mrf.mxu0  ;;  %v395_v36 = vpop.f32.mrf.mxu1  ;;  %v4023_v63 = vld [vmem:[%s7899_s3 + $0x50] sm:$0xf]  ;;  %v441_v42 = vmax.f32 %v241_v33, %v416_v18  ;;  %v3917_v18 = vld [vmem:[%s7899_s3 + $0x8] sm:$0xf0] }
 0x158   :  { %1203 = vmatmul.bf16.vlgmr.msra.gmra.mxu2 %v4016_v22  ;;  %v844_v35 = vmax.f32 %v644_v58, %v819_v10  ;;  %v614_v36 = vmax.f32 %v576_v11, 0.0  ;;  %v4024_v23 = vor.u32 %v5160_v0, %v4023_v63  ;;  %v5142_v10 = vld [vmem:[%s7900_s4 + $0x28] sm:$0xff]  ;;  %v3925_v11 = vld [vmem:[%s7899_s3 + $0x18] sm:$0xf0]  ;;  %v5139_v0 = vld [vmem:[%s7900_s4 + $0x10] sm:$0xff] }
 0x159   :  { %v621_v56 = vmax.f32 %v594_v47, 0.0  ;;  %v821_v3 = vmax.f32 %v794_v21, 0.0  ;;  %v642_v47 = vmax.f32 %v442_v12, %v617_v57  ;;  %v818_v21 = vmax.f32 %v786_v15, 0.0  ;;  %v5144_v12 = vld [vmem:[%s7900_s4 + $0x38] sm:$0xff]  ;;  %v5143_v15 = vld [vmem:[%s7900_s4 + $0x30] sm:$0xff] }
 0x15a   :  { %v641_v54 = vmax.f32 %v441_v42, %v616_v34  ;;  %v6214_v46 = vpack.c.bf16 %v845_v14, %v844_v35  ;;  %v639_v51 = vmax.f32 %v439_v49, %v614_v36  ;;  %v5188_v34 = vld [vmem:[%s7900_s4 + $0x118] sm:$0xff]  ;;  %v3928_v14 = vor.u32 %v5135_v4, %v3925_v11  ;;  %v5187_v42 = vld [vmem:[%s7900_s4 + $0x110] sm:$0xff]  ;;  %v5177_v35 = vld [vmem:[%s7900_s4 + $0xe0] sm:$0xff] }
 0x15b   :  { %v646_v32 = vmax.f32 %v446_v44, %v621_v56  ;;  %v5136_v44 = vld [vmem:[%s7899_s3 + $0x14] sm:$0xf0]  ;;  %v843_v2 = vmax.f32 %v643_v31, %v818_v21  ;;  %v640_v56 = vmax.f32 %v6067_v26, %v615_v13  ;;  %v842_v50 = vmax.f32 %v642_v47, %v817_v43  ;;  %v5133_v26 = vld [vmem:[%s7899_s3 + $0x4] sm:$0xf]  ;;  %v3943_v13 = vld [vmem:[%s7899_s3 + $0x38] sm:$0xf0] }
 0x15c   :  { %v3924_v53 = vor.u32 %v5136_v44, %v3923_v28  ;;  %v841_v52 = vmax.f32 %v641_v54, %v816_v6  ;;  %v839_v38 = vmax.f32 %v639_v51, %v814_v61  ;;  %v3920_v30 = vor.u32 %v5133_v26, %v3917_v18  ;;  %v5180_v31 = vld [vmem:[%s7900_s4 + $0xf8] sm:$0xff]  ;;  %v5138_v43 = vld [vmem:[%s7900_s4 + $0x8] sm:$0xff]  ;;  %v5137_v47 = vld [vmem:[%s7900_s4] sm:$0xff] }
 0x15d   :  { %v846_v22 = vmax.f32 %v646_v32, %v821_v3  ;;  %v815_v3 = vmax.f32 %v779_v48, 0.0  ;;  %v6224_v33 = vpack.c.bf16 %v843_v2, %v842_v50  ;;  %v3935_v32 = vld [vmem:[%s7899_s3 + $0x28] sm:$0xf0]  ;;  %v5140_v48 = vld [vmem:[%s7900_s4 + $0x18] sm:$0xff]  ;;  %v5185_v21 = vld [vmem:[%s7900_s4 + $0x100] sm:$0xff] }
 0x15e   :  { %v595_v45 = vpop.f32.mrf.mxu2  ;;  %v795_v29 = vpop.f32.mrf.mxu3  ;;  %906 = vmatmul.bf16.gmra.mxu0 %v3924_v53  ;;  %v6250_v24 = vpack.c.bf16 %v839_v38, %v6046_v20  ;;  %v3938_v57 = vor.u32 %v5145_v55, %v3935_v32  ;;  %v4067_v20 = vld [vmem:[%s7899_s3 + $0x68] sm:$0xf0]  ;;  %v5157_v53 = vld [vmem:[%s7899_s3 + $0x44] sm:$0xf]  ;;  %v5176_v54 = vld [vmem:[%s7900_s4 + $0xd8] sm:$0xff] }
 0x15f   :  { %v859_v9 = vpack.c.bf16 %v846_v22, %v846_v22  ;;  %v840_v25 = vmax.f32 %v640_v56, %v815_v3  ;;  %v5191_v22 = vld [vmem:[%s7900_s4 + $0x130] sm:$0xff]  ;;  %v4070_v58 = vor.u32 %v5169_v8, %v4067_v20  ;;  %v5141_v45 = vld [vmem:[%s7900_s4 + $0x20] sm:$0xff]  ;;  %v5186_v28 = vld [vmem:[%s7900_s4 + $0x108] sm:$0xff] }
 0x160   :  { %v5189_v29 = vld [vmem:[%s7900_s4 + $0x120] sm:$0xff]  ;;  %v5178_v44 = vld [vmem:[%s7900_s4 + $0xe8] sm:$0xff]  ;;  %v5159_v56 = vld [vmem:[%s7899_s3 + $0x54] sm:$0xf] }
 0x161   :  { %v6203_v37 = vsel %vm889_vm2, %v859_v9, 0  ;;  %v6229_v60 = vpack.c.bf16 %v841_v52, %v840_v25  ;;  %v5147_v9 = vld [vmem:[%s7899_s3 + $0x34] sm:$0xf]  ;;  %v4017_v36 = vld [vmem:[%s7899_s3 + $0x48] sm:$0xf0]  ;;  %v5156_v6 = vld [vmem:[%s7900_s4 + $0x78] sm:$0xff] }
 0x162   :  { %915 = vmatpush.bf16.msrb.mxu1 %v6203_v37  ;;  %999 = vmatpush.bf16.msrb.mxu3 %v6203_v37  ;;  %v3946_v63 = vor.u32 %v5147_v9, %v3943_v13  ;;  %v4020_v2 = vor.u32 %v5157_v53, %v4017_v36  ;;  %v5174_v49 = vld [vmem:[%s7900_s4 + $0xc8] sm:$0xff]  ;;  %v4025_v3 = vld [vmem:[%s7899_s3 + $0x58] sm:$0xf0]  ;;  %v5155_v51 = vld [vmem:[%s7900_s4 + $0x70] sm:$0xff] }
 0x163   :  { %1372 = vmatpush.bf16.msrb.mxu2 %v6203_v37  ;;  %v4028_v50 = vor.u32 %v5159_v56, %v4025_v3  ;;  %1081 = vmatpush.bf16.msra.mxu0 %v5156_v6  ;;  %v5154_v52 = vld [vmem:[%s7900_s4 + $0x68] sm:$0xff]  ;;  %v5153_v61 = vld [vmem:[%s7900_s4 + $0x60] sm:$0xff]  ;;  %v5152_v25 = vld [vmem:[%s7900_s4 + $0x58] sm:$0xff] }
 0x164   :  { %v5151_v38 = vld [vmem:[%s7900_s4 + $0x50] sm:$0xff]  ;;  %v5150_v26 = vld [vmem:[%s7900_s4 + $0x48] sm:$0xff]  ;;  %v5149_v18 = vld [vmem:[%s7900_s4 + $0x40] sm:$0xff] }
 0x165   :  { %v5168_v55 = vld [vmem:[%s7900_s4 + $0xb8] sm:$0xff]  ;;  %v5167_v32 = vld [vmem:[%s7900_s4 + $0xb0] sm:$0xff]  ;;  %v5162_v8 = vld [vmem:[%s7900_s4 + $0x88] sm:$0xff] }
 0x166   :  { %916 = vmatpush.bf16.msrb.mxu1 %v6214_v46  ;;  %1000 = vmatpush.bf16.msrb.mxu3 %v6214_v46  ;;  %v5161_v20 = vld [vmem:[%s7900_s4 + $0x80] sm:$0xff]  ;;  %v5170_v3 = vld [vmem:[%s7899_s3 + $0x64] sm:$0xf0] }
 0x167   :  { %1373 = vmatpush.bf16.msrb.mxu2 %v6214_v46  ;;  %1082 = vmatpush.bf16.msra.mxu0 %v5155_v51  ;;  %v4065_v56 = vld [vmem:[%s7899_s3 + $0x60] sm:$0xf]  ;;  %v5204_v51 = vld [vmem:[%s7900_s4 + $0x178] sm:$0xff] }
 0x168   :  { %1208 = vmatmul.bf16.gmra.mxu2 %v4024_v23  ;;  %v5175_v23 = vld [vmem:[%s7900_s4 + $0xd0] sm:$0xff] }
 0x16a   :  { %917 = vmatpush.bf16.msrb.mxu1 %v6224_v33  ;;  %1001 = vmatpush.bf16.msrb.mxu3 %v6224_v33 }
 0x16b   :  { %1374 = vmatpush.bf16.msrb.mxu2 %v6224_v33  ;;  %1083 = vmatpush.bf16.msra.mxu0 %v5154_v52 }
 0x16e   :  { %918 = vmatpush.bf16.msrb.mxu1 %v6229_v60  ;;  %1002 = vmatpush.bf16.msrb.mxu3 %v6229_v60 }
 0x16f   :  { %1375 = vmatpush.bf16.msrb.mxu2 %v6229_v60  ;;  %1084 = vmatpush.bf16.msra.mxu0 %v5153_v61  ;;  %v5203_v61 = vld [vmem:[%s7900_s4 + $0x170] sm:$0xff] }
 0x172   :  { %919 = vmatpush.bf16.msrb.mxu1 %v6250_v24  ;;  %1003 = vmatpush.bf16.msrb.mxu3 %v6250_v24 }
 0x173   :  { %1376 = vmatpush.bf16.msrb.mxu2 %v6250_v24  ;;  %1085 = vmatpush.bf16.msra.mxu0 %v5152_v25 }
 0x175   :  { %3929 = vmatmul.msk.bf16.vlgmr.msrb.gmra.mxu1 %vm882_vm3, %v3920_v30  ;;  %3947 = vmatmul.msk.bf16.vlgmr.msrb.gmra.mxu3 %vm882_vm3, %v3938_v57  ;;  %v5164_v30 = vld [vmem:[%s7900_s4 + $0x98] sm:$0xff]  ;;  %v5163_v57 = vld [vmem:[%s7900_s4 + $0x90] sm:$0xff] }
 0x176   :  { %1148 = vmatpush.bf16.msra.mxu1 %v5144_v12  ;;  %1217 = vmatpush.bf16.msra.mxu3 %v6203_v37  ;;  %v5166_v12 = vld [vmem:[%s7900_s4 + $0xa8] sm:$0xff] }
 0x177   :  { %1609 = vmatpush.bf16.msra.mxu2 %v5192_v41  ;;  %1086 = vmatpush.bf16.msra.mxu0 %v5151_v38  ;;  %v5165_v41 = vld [vmem:[%s7900_s4 + $0xa0] sm:$0xff] }
 0x178   :  { %4079 = vmatmul.msk.bf16.vlgmr.msrb.gmra.mxu2 %vm882_vm3, %v4070_v58 }
 0x17a   :  { %1149 = vmatpush.bf16.msra.mxu1 %v5143_v15  ;;  %1218 = vmatpush.bf16.msra.mxu3 %v6214_v46 }
 0x17b   :  { %1610 = vmatpush.bf16.msra.mxu2 %v5191_v22  ;;  %1087 = vmatpush.bf16.msra.mxu0 %v5150_v26 }
 0x17e   :  { %1150 = vmatpush.bf16.msra.mxu1 %v5142_v10  ;;  %1219 = vmatpush.bf16.msra.mxu3 %v6224_v33 }
 0x17f   :  { %1611 = vmatpush.bf16.msra.mxu2 %v5190_v62  ;;  %1088 = vmatpush.bf16.msra.mxu0 %v5149_v18 }
 0x182   :  { %1151 = vmatpush.bf16.msra.mxu1 %v5141_v45  ;;  %1220 = vmatpush.bf16.msra.mxu3 %v6229_v60 }
 0x183   :  { %1612 = vmatpush.bf16.msra.mxu2 %v5189_v29  ;;  %1299 = vmatpush.bf16.msrb.mxu0 %v5168_v55  ;;  %v5202_v55 = vld [vmem:[%s7900_s4 + $0x168] sm:$0xff] }
 0x185   :  { %3930 = vmatmul.msk.bf16.gmra.mxu1 %vm882_vm3, %v3928_v14  ;;  %3948 = vmatmul.msk.bf16.gmra.mxu3 %vm882_vm3, %v3946_v63 }
 0x186   :  { %1152 = vmatpush.bf16.msra.mxu1 %v5140_v48  ;;  %1221 = vmatpush.bf16.msra.mxu3 %v6250_v24 }
 0x187   :  { %1613 = vmatpush.bf16.msra.mxu2 %v5188_v34  ;;  %1300 = vmatpush.bf16.msrb.mxu0 %v5167_v32 }
 0x18a   :  { %1454 = vmatpush.bf16.msrb.mxu3 %v5180_v31  ;;  %1153 = vmatpush.bf16.msra.mxu1 %v5139_v0 }
 0x18b   :  { %1614 = vmatpush.bf16.msra.mxu2 %v5187_v42  ;;  %1301 = vmatpush.bf16.msrb.mxu0 %v5166_v12  ;;  %v5171_v42 = vld [vmem:[%s7899_s3 + $0x74] sm:$0xf]  ;;  %v5201_v12 = vld [vmem:[%s7900_s4 + $0x160] sm:$0xff] }
 0x18e   :  { %1455 = vmatpush.bf16.msrb.mxu3 %v5179_v59  ;;  %1154 = vmatpush.bf16.msra.mxu1 %v5138_v43  ;;  %v4075_v59 = vld [vmem:[%s7899_s3 + $0x78] sm:$0xf0] }
 0x18f   :  { %1615 = vmatpush.bf16.msra.mxu2 %v5186_v28  ;;  %1302 = vmatpush.bf16.msrb.mxu0 %v5165_v41  ;;  %v4078_v43 = vor.u32 %v5171_v42, %v4075_v59  ;;  %v4073_v41 = vld [vmem:[%s7899_s3 + $0x70] sm:$0xf]  ;;  %v4125_v42 = vld [vmem:[%s7899_s3 + $0x98] sm:$0xf0]  ;;  %v5214_v59 = vld [vmem:[%s7900_s4 + $0x1a8] sm:$0xff] }
 0x191   :  { %4080 = vmatmul.msk.bf16.gmra.mxu2 %vm882_vm3, %v4078_v43 }
 0x192   :  { %1456 = vmatpush.bf16.msrb.mxu3 %v5178_v44  ;;  %1155 = vmatpush.bf16.msra.mxu1 %v5137_v47 }
 0x193   :  { %1616 = vmatpush.bf16.msra.mxu2 %v5185_v21  ;;  %1303 = vmatpush.bf16.msrb.mxu0 %v5164_v30  ;;  %v5172_v30 = vld [vmem:[%s7899_s3 + $0x74] sm:$0xf0] }
 0x195   :  { %4029 = vmatmul.msk.bf16.vlgmr.msra.gmra.mxu3 %vm882_vm3, %v4020_v2 }
 0x196   :  { %1350 = vmatpush.bf16.msrb.mxu1 %v6016_v5  ;;  %1457 = vmatpush.bf16.msrb.mxu3 %v5177_v35 }
 0x197   :  { %1815 = vmatpush.bf16.msrb.mxu2 %v6016_v5  ;;  %1304 = vmatpush.bf16.msrb.mxu0 %v5163_v57 }
 0x19a   :  { %1351 = vmatpush.bf16.msrb.mxu1 %v6036_v19  ;;  %1458 = vmatpush.bf16.msrb.mxu3 %v5176_v54 }
 0x19b   :  { %1816 = vmatpush.bf16.msrb.mxu2 %v6036_v19  ;;  %1305 = vmatpush.bf16.msrb.mxu0 %v5162_v8  ;;  %v4074_v8 = vor.u32 %v5172_v30, %v4073_v41 }
 0x19e   :  { %1352 = vmatpush.bf16.msrb.mxu1 %v6056_v27  ;;  %1459 = vmatpush.bf16.msrb.mxu3 %v5175_v23 }
 0x19f   :  { %1817 = vmatpush.bf16.msrb.mxu2 %v6056_v27  ;;  %1306 = vmatpush.bf16.msrb.mxu0 %v5161_v20  ;;  %v5200_v20 = vld [vmem:[%s7900_s4 + $0x158] sm:$0xff] }
 0x1a2   :  { %1353 = vmatpush.bf16.msrb.mxu1 %v6065_v1  ;;  %1460 = vmatpush.bf16.msrb.mxu3 %v5174_v49 }
 0x1a3   :  { %1818 = vmatpush.bf16.msrb.mxu2 %v6065_v1 }
 0x1a5   :  { %4030 = vmatmul.msk.bf16.gmra.mxu3 %vm882_vm3, %v4028_v50  ;;  %v4066_v50 = vor.u32 %v5170_v3, %v4065_v56 }
 0x1a6   :  { %1354 = vmatpush.bf16.msrb.mxu1 %v6078_v17  ;;  %1461 = vmatpush.bf16.msrb.mxu3 %v5173_v40 }
 0x1a7   :  { %1819 = vmatpush.bf16.msrb.mxu2 %v6078_v17 }
 0x1aa   :  { %1660 = vmatpush.bf16.msra.mxu3 %v6016_v5  ;;  %1355 = vmatpush.bf16.msrb.mxu1 %v6087_v16 }
 0x1ab   :  { %1820 = vmatpush.bf16.msrb.mxu2 %v6087_v16 }
 0x1ae   :  { %1661 = vmatpush.bf16.msra.mxu3 %v6036_v19  ;;  %1356 = vmatpush.bf16.msrb.mxu1 %v6096_v7 }
 0x1af   :  { %1821 = vmatpush.bf16.msrb.mxu2 %v6096_v7 }
 0x1b2   :  { %1662 = vmatpush.bf16.msra.mxu3 %v6056_v27  ;;  %1357 = vmatpush.bf16.msrb.mxu1 %v5833_v39 }
 0x1b3   :  { %1822 = vmatpush.bf16.msrb.mxu2 %v5833_v39 }
 0x1b5   :  { %v902_v22 = vpop.f32.mrf.mxu0 }
 0x1b6   :  { %1663 = vmatpush.bf16.msra.mxu3 %v6065_v1 }
 0x1ba   :  { %1664 = vmatpush.bf16.msra.mxu3 %v6078_v17 }
 0x1bb   :  { %v986_v15 = vpop.f32.mrf.mxu2 }
 0x1bd   :  { %v904_v62 = vpop.f32.mrf.mxu0 }
 0x1be   :  { %1665 = vmatpush.bf16.msra.mxu3 %v6087_v16 }
 0x1c2   :  { %1666 = vmatpush.bf16.msra.mxu3 %v6096_v7 }
 0x1c3   :  { %v988_v10 = vpop.f32.mrf.mxu2 }
 0x1c6   :  { %1667 = vmatpush.bf16.msra.mxu3 %v5833_v39 }
 0x1cb   :  { %v991_v9 = vpop.f32.mrf.mxu2 }
 0x1d3   :  { %v993_v44 = vpop.f32.mrf.mxu2 }
 0x1db   :  { %v907_v34 = vpop.f32.mrf.mxu0  ;;  %v1204_v49 = vpop.f32.mrf.mxu2 }
 0x1e3   :  { %v909_v47 = vpop.f32.mrf.mxu0  ;;  %v1206_v52 = vpop.f32.mrf.mxu2 }
 0x1eb   :  { %v1209_v32 = vpop.f32.mrf.mxu2 }
 0x1f2   :  { %v921_v58 = vpop.f32.mrf.mxu1 }
 0x1f3   :  { %v922_v4 = vadd.f32 %v921_v58, %v902_v22  ;;  %v1211_v22 = vpop.f32.mrf.mxu2 }
 0x1f8   :  { %v1005_v45 = vpop.f32.mrf.mxu3 }
 0x1f9   :  { %v1006_v31 = vadd.f32 %v1005_v45, %v986_v15  ;;  %v5199_v15 = vld [vmem:[%s7900_s4 + $0x150] sm:$0xff] }
 0x1fa   :  { %v923_v29 = vpop.f32.mrf.mxu1 }
 0x1fb   :  { %v924_v11 = vadd.f32 %v923_v29, %v904_v62  ;;  %v5198_v29 = vld [vmem:[%s7900_s4 + $0x148] sm:$0xff] }
 0x1fd   :  { %v947_v48 = vpack.c.bf16 %v924_v11, %v922_v4  ;;  %v5197_v4 = vld [vmem:[%s7900_s4 + $0x140] sm:$0xff] }
 0x1fe   :  { %v5181_v11 = vld [vmem:[%s7899_s3 + $0x84] sm:$0xf] }
 0x1ff   :  { %1156 = vmatmul.bf16.vlgmr.msra.gmra.mxu1 %v947_v48  ;;  %v4117_v48 = vld [vmem:[%s7899_s3 + $0x88] sm:$0xf0] }
 0x200   :  { %1527 = vmatpush.bf16.msra.mxu1 %v6203_v37  ;;  %v1007_v13 = vpop.f32.mrf.mxu3 }
 0x201   :  { %v1008_v14 = vadd.f32 %v1007_v13, %v988_v10  ;;  %v4115_v13 = vld [vmem:[%s7899_s3 + $0x80] sm:$0xf] }
 0x202   :  { %v926_v63 = vpop.f32.mrf.mxu1 }
 0x203   :  { %v1031_v0 = vpack.c.bf16 %v1008_v14, %v1006_v31  ;;  %v927_v35 = vadd.f32 %v926_v63, %v907_v34  ;;  %v5182_v34 = vld [vmem:[%s7899_s3 + $0x84] sm:$0xf0]  ;;  %v5216_v14 = vld [vmem:[%s7900_s4 + $0x1b8] sm:$0xff]  ;;  %v5215_v63 = vld [vmem:[%s7900_s4 + $0x1b0] sm:$0xff] }
 0x204   :  { %1528 = vmatpush.bf16.msra.mxu1 %v6214_v46  ;;  %v4116_v31 = vor.u32 %v5182_v34, %v4115_v13 }
 0x205   :  { %1089 = vmatmul.bf16.vlgmr.msra.gmra.mxu0 %v1031_v0  ;;  %v5183_v0 = vld [vmem:[%s7899_s3 + $0x94] sm:$0xf] }
 0x206   :  { %1505 = vmatpush.bf16.msra.mxu0 %v6016_v5  ;;  %v4128_v43 = vor.u32 %v5183_v0, %v4125_v42  ;;  %v4173_v0 = vld [vmem:[%s7899_s3 + $0xb0] sm:$0xf]  ;;  %v5196_v42 = vld [vmem:[%s7899_s3 + $0xb4] sm:$0xf0] }
 0x208   :  { %1529 = vmatpush.bf16.msra.mxu1 %v6224_v33  ;;  %v1010_v28 = vpop.f32.mrf.mxu3 }
 0x209   :  { %v1011_v2 = vadd.f32 %v1010_v28, %v991_v9  ;;  %v4120_v9 = vor.u32 %v5181_v11, %v4117_v48  ;;  %v5213_v28 = vld [vmem:[%s7900_s4 + $0x1a0] sm:$0xff] }
 0x20a   :  { %1506 = vmatpush.bf16.msra.mxu0 %v6036_v19  ;;  %v928_v21 = vpop.f32.mrf.mxu1 }
 0x20b   :  { %v929_v53 = vadd.f32 %v928_v21, %v909_v47  ;;  %v5184_v47 = vld [vmem:[%s7899_s3 + $0x94] sm:$0xf0] }
 0x20c   :  { %1530 = vmatpush.bf16.msra.mxu1 %v6229_v60 }
 0x20d   :  { %v948_v36 = vpack.c.bf16 %v929_v53, %v927_v35  ;;  %v5212_v35 = vld [vmem:[%s7900_s4 + $0x198] sm:$0xff]  ;;  %v5211_v53 = vld [vmem:[%s7900_s4 + $0x190] sm:$0xff] }
 0x20e   :  { %1507 = vmatpush.bf16.msra.mxu0 %v6056_v27 }
 0x20f   :  { %1161 = vmatmul.bf16.gmra.mxu1 %v948_v36  ;;  %v5210_v36 = vld [vmem:[%s7900_s4 + $0x188] sm:$0xff] }
 0x210   :  { %1531 = vmatpush.bf16.msra.mxu1 %v6250_v24  ;;  %v1012_v54 = vpop.f32.mrf.mxu3 }
 0x211   :  { %v1013_v23 = vadd.f32 %v1012_v54, %v993_v44  ;;  %v4123_v44 = vld [vmem:[%s7899_s3 + $0x90] sm:$0xf]  ;;  %v5209_v54 = vld [vmem:[%s7900_s4 + $0x180] sm:$0xff] }
 0x212   :  { %1508 = vmatpush.bf16.msra.mxu0 %v6065_v1  ;;  %v4124_v21 = vor.u32 %v5184_v47, %v4123_v44 }
 0x213   :  { %v1032_v40 = vpack.c.bf16 %v1013_v23, %v1011_v2  ;;  %v5193_v2 = vld [vmem:[%s7899_s3 + $0xa4] sm:$0xf]  ;;  %v4167_v23 = vld [vmem:[%s7899_s3 + $0xa8] sm:$0xf0] }
 0x215   :  { %1094 = vmatmul.bf16.gmra.mxu0 %v1032_v40 }
 0x216   :  { %1509 = vmatpush.bf16.msra.mxu0 %v6078_v17 }
 0x218   :  { %v1223_v6 = vpop.f32.mrf.mxu3 }
 0x219   :  { %v1224_v38 = vadd.f32 %v1223_v6, %v1204_v49  ;;  %v4170_v49 = vor.u32 %v5193_v2, %v4167_v23  ;;  %v4215_v2 = vld [vmem:[%s7899_s3 + $0xc0] sm:$0xf]  ;;  %v5206_v23 = vld [vmem:[%s7899_s3 + $0xc4] sm:$0xf0] }
 0x21a   :  { %1510 = vmatpush.bf16.msra.mxu0 %v6087_v16 }
 0x21e   :  { %1511 = vmatpush.bf16.msra.mxu0 %v6096_v7 }
 0x21f   :  { %1358 = vmatmul.bf16.vlgmr.msrb.gmra.mxu1 %v4066_v50 }
 0x220   :  { %1764 = vmatpush.bf16.msrb.mxu1 %v5204_v51  ;;  %v1225_v25 = vpop.f32.mrf.mxu3 }
 0x221   :  { %v1226_v26 = vadd.f32 %v1225_v25, %v1206_v52 }
 0x222   :  { %1512 = vmatpush.bf16.msra.mxu0 %v5833_v39 }
 0x223   :  { %v1249_v18 = vpack.c.bf16 %v1226_v26, %v1224_v38 }
 0x224   :  { %1765 = vmatpush.bf16.msrb.mxu1 %v5203_v61 }
 0x225   :  { %1307 = vmatmul.bf16.vlgmr.msrb.gmra.mxu0 %v1249_v18 }
 0x226   :  { %1682 = vmatpush.bf16.msrb.mxu0 %v6203_v37 }
 0x228   :  { %1766 = vmatpush.bf16.msrb.mxu1 %v5202_v55  ;;  %v1228_v57 = vpop.f32.mrf.mxu3 }
 0x229   :  { %v1229_v10 = vadd.f32 %v1228_v57, %v1209_v32 }
 0x22a   :  { %1683 = vmatpush.bf16.msrb.mxu0 %v6214_v46 }
 0x22c   :  { %1767 = vmatpush.bf16.msrb.mxu1 %v5201_v12 }
 0x22e   :  { %1684 = vmatpush.bf16.msrb.mxu0 %v6224_v33 }
 0x22f   :  { %1363 = vmatmul.bf16.gmra.mxu1 %v4074_v8 }
 0x230   :  { %1768 = vmatpush.bf16.msrb.mxu1 %v5200_v20  ;;  %v1230_v58 = vpop.f32.mrf.mxu3 }
 0x231   :  { %v1231_v62 = vadd.f32 %v1230_v58, %v1211_v22  ;;  %v5195_v58 = vld [vmem:[%s7899_s3 + $0xb4] sm:$0xf] }
 0x232   :  { %1685 = vmatpush.bf16.msrb.mxu0 %v6229_v60 }
 0x233   :  { %v1250_v45 = vpack.c.bf16 %v1231_v62, %v1229_v10  ;;  %v4175_v10 = vld [vmem:[%s7899_s3 + $0xb8] sm:$0xf0] }
 0x234   :  { %1769 = vmatpush.bf16.msrb.mxu1 %v5199_v15 }
 0x235   :  { %1312 = vmatmul.bf16.gmra.mxu0 %v1250_v45  ;;  %v4178_v45 = vor.u32 %v5195_v58, %v4175_v10 }
 0x236   :  { %1686 = vmatpush.bf16.msrb.mxu0 %v6250_v24 }
 0x238   :  { %1770 = vmatpush.bf16.msrb.mxu1 %v5198_v29  ;;  %v4165_v29 = vld [vmem:[%s7899_s3 + $0xa0] sm:$0xf] }
 0x23c   :  { %1771 = vmatpush.bf16.msrb.mxu1 %v5197_v4  ;;  %v5194_v4 = vld [vmem:[%s7899_s3 + $0xa4] sm:$0xf0] }
 0x23d   :  { %v4166_v48 = vor.u32 %v5194_v4, %v4165_v29  ;;  %v4275_v29 = vld [vmem:[%s7899_s3 + $0xf8] sm:$0xf0] }
 0x23f   :  { %4129 = vmatmul.msk.bf16.vlgmr.msra.gmra.mxu1 %vm882_vm3, %v4120_v9 }
 0x240   :  { %1970 = vmatpush.bf16.msra.mxu1 %v6016_v5 }
 0x244   :  { %1971 = vmatpush.bf16.msra.mxu1 %v6036_v19 }
 0x245   :  { %1513 = vmatmul.bf16.vlgmr.msra.gmra.mxu0 %v4116_v31 }
 0x246   :  { %1919 = vmatpush.bf16.msra.mxu0 %v5216_v14 }
 0x248   :  { %1972 = vmatpush.bf16.msra.mxu1 %v6056_v27 }
 0x24a   :  { %1920 = vmatpush.bf16.msra.mxu0 %v5215_v63 }
 0x24c   :  { %1973 = vmatpush.bf16.msra.mxu1 %v6065_v1 }
 0x24e   :  { %1921 = vmatpush.bf16.msra.mxu0 %v5214_v59 }
 0x24f   :  { %4130 = vmatmul.msk.bf16.gmra.mxu1 %vm882_vm3, %v4128_v43  ;;  %v4174_v43 = vor.u32 %v5196_v42, %v4173_v0 }
 0x250   :  { %1974 = vmatpush.bf16.msra.mxu1 %v6078_v17 }
 0x252   :  { %1922 = vmatpush.bf16.msra.mxu0 %v5213_v28 }
 0x254   :  { %1975 = vmatpush.bf16.msra.mxu1 %v6087_v16 }
 0x255   :  { %1518 = vmatmul.bf16.gmra.mxu0 %v4124_v21 }
 0x256   :  { %1923 = vmatpush.bf16.msra.mxu0 %v5212_v35 }
 0x258   :  { %1976 = vmatpush.bf16.msra.mxu1 %v6096_v7 }
 0x25a   :  { %1924 = vmatpush.bf16.msra.mxu0 %v5211_v53  ;;  %v5205_v53 = vld [vmem:[%s7899_s3 + $0xc4] sm:$0xf] }
 0x25c   :  { %1977 = vmatpush.bf16.msra.mxu1 %v5833_v39 }
 0x25e   :  { %1925 = vmatpush.bf16.msra.mxu0 %v5210_v36  ;;  %v4217_v36 = vld [vmem:[%s7899_s3 + $0xc8] sm:$0xf0] }
 0x262   :  { %1926 = vmatpush.bf16.msra.mxu0 %v5209_v54  ;;  %v4220_v54 = vor.u32 %v5205_v53, %v4217_v36 }
 0x265   :  { %4179 = vmatmul.msk.bf16.vlgmr.msrb.gmra.mxu0 %vm882_vm3, %v4170_v49  ;;  %v4216_v49 = vor.u32 %v5206_v23, %v4215_v2 }
 0x266   :  { %2125 = vmatpush.bf16.msrb.mxu0 %v6016_v5 }
 0x26a   :  { %2126 = vmatpush.bf16.msrb.mxu0 %v6036_v19 }
 0x26e   :  { %2127 = vmatpush.bf16.msrb.mxu0 %v6056_v27 }
 0x272   :  { %2128 = vmatpush.bf16.msrb.mxu0 %v6065_v1  ;;  %v1378_v1 = vpop.f32.mrf.mxu2 }
 0x275   :  { %4180 = vmatmul.msk.bf16.gmra.mxu0 %vm882_vm3, %v4178_v45  ;;  %v5219_v45 = vld [vmem:[%s7899_s3 + $0xf4] sm:$0xf] }
 0x276   :  { %2129 = vmatpush.bf16.msrb.mxu0 %v6078_v17 }
 0x27a   :  { %2130 = vmatpush.bf16.msrb.mxu0 %v6087_v16  ;;  %v1380_v52 = vpop.f32.mrf.mxu2 }
 0x27c   :  { %v1157_v40 = vpop.f32.mrf.mxu1 }
 0x27e   :  { %2131 = vmatpush.bf16.msrb.mxu0 %v6096_v7 }
 0x282   :  { %v1090_v56 = vpop.f32.mrf.mxu0  ;;  %2132 = vmatpush.bf16.msrb.mxu0 %v5833_v39  ;;  %v1383_v18 = vpop.f32.mrf.mxu2 }
 0x283   :  { %v1158_v3 = vadd.f32 %v1157_v40, %v1090_v56  ;;  %v5207_v40 = vld [vmem:[%s7899_s3 + $0xd4] sm:$0xf]  ;;  %v4225_v56 = vld [vmem:[%s7899_s3 + $0xd8] sm:$0xf0] }
 0x284   :  { %v6572_v6 = vpop.f32.mrf.mxu1 }
 0x28a   :  { %v6574_v5 = vpop.f32.mrf.mxu0  ;;  %v1385_v57 = vpop.f32.mrf.mxu2 }
 0x28c   :  { %v1162_v19 = vpop.f32.mrf.mxu1 }
 0x292   :  { %v1095_v50 = vpop.f32.mrf.mxu0 }
 0x293   :  { %v1163_v27 = vadd.f32 %v1162_v19, %v1095_v50  ;;  %v4223_v19 = vld [vmem:[%s7899_s3 + $0xd0] sm:$0xf]  ;;  %v5208_v50 = vld [vmem:[%s7899_s3 + $0xd4] sm:$0xf0] }
 0x294   :  { %v6576_v51 = vpop.f32.mrf.mxu1 }
 0x29a   :  { %v6578_v17 = vpop.f32.mrf.mxu0 }
 0x29c   :  { %v1359_v16 = vpop.f32.mrf.mxu1 }
 0x29d   :  { %v1379_v39 = vadd.f32 %v1378_v1, %v1359_v16 }
 0x2a2   :  { %v1308_v61 = vpop.f32.mrf.mxu0 }
 0x2a3   :  { %v6580_v7 = vadd.f32 %v1308_v61, %v1158_v3  ;;  %v4228_v3 = vor.u32 %v5207_v40, %v4225_v56  ;;  %v5229_v40 = vld [vmem:[%s7899_s3 + $0x104] sm:$0xf]  ;;  %v4317_v56 = vld [vmem:[%s7899_s3 + $0x108] sm:$0xf0] }
 0x2a4   :  { %v1361_v25 = vpop.f32.mrf.mxu1 }
 0x2a5   :  { %v1381_v38 = vadd.f32 %v1380_v52, %v1361_v25 }
 0x2a7   :  { %v1404_v26 = vpack.c.bf16 %v1381_v38, %v1379_v39 }
 0x2a9   :  { %1462 = vmatmul.bf16.vlgmr.msrb.gmra.mxu3 %v1404_v26 }
 0x2aa   :  { %1837 = vmatpush.bf16.msrb.mxu3 %v6203_v37  ;;  %v6583_v55 = vpop.f32.mrf.mxu0 }
 0x2ac   :  { %v1364_v32 = vpop.f32.mrf.mxu1 }
 0x2ad   :  { %v1384_v8 = vadd.f32 %v1383_v18, %v1364_v32  ;;  %v5217_v32 = vld [vmem:[%s7899_s3 + $0xe4] sm:$0xf] }
 0x2ae   :  { %1838 = vmatpush.bf16.msrb.mxu3 %v6214_v46 }
 0x2b2   :  { %1839 = vmatpush.bf16.msrb.mxu3 %v6224_v33  ;;  %v1313_v12 = vpop.f32.mrf.mxu0 }
 0x2b3   :  { %v6587_v41 = vadd.f32 %v1313_v12, %v1163_v27  ;;  %v4224_v27 = vor.u32 %v5208_v50, %v4223_v19  ;;  %v4267_v12 = vld [vmem:[%s7899_s3 + $0xe8] sm:$0xf0]  ;;  %v4315_v19 = vld [vmem:[%s7899_s3 + $0x100] sm:$0xf]  ;;  %v5230_v50 = vld [vmem:[%s7899_s3 + $0x104] sm:$0xf0] }
 0x2b4   :  { %v1366_v30 = vpop.f32.mrf.mxu1 }
 0x2b5   :  { %v1386_v20 = vadd.f32 %v1385_v57, %v1366_v30 }
 0x2b6   :  { %1840 = vmatpush.bf16.msrb.mxu3 %v6229_v60 }
 0x2b7   :  { %v1405_v15 = vpack.c.bf16 %v1386_v20, %v1384_v8 }
 0x2b9   :  { %1467 = vmatmul.bf16.gmra.mxu3 %v1405_v15 }
 0x2ba   :  { %1841 = vmatpush.bf16.msrb.mxu3 %v6250_v24  ;;  %v6591_v22 = vpop.f32.mrf.mxu0 }
 0x2bc   :  { %v1533_v62 = vpop.f32.mrf.mxu1 }
 0x2c2   :  { %v1514_v11 = vpop.f32.mrf.mxu0 }
 0x2c3   :  { %v1534_v34 = vadd.f32 %v1533_v62, %v1514_v11  ;;  %v4278_v11 = vor.u32 %v5219_v45, %v4275_v29 }
 0x2c4   :  { %v1535_v9 = vpop.f32.mrf.mxu1 }
 0x2c9   :  { %1668 = vmatmul.bf16.vlgmr.msra.gmra.mxu3 %v4166_v48 }
 0x2ca   :  { %v1516_v13 = vpop.f32.mrf.mxu0 }
 0x2cb   :  { %v1536_v31 = vadd.f32 %v1535_v9, %v1516_v13 }
 0x2cc   :  { %v1538_v63 = vpop.f32.mrf.mxu1 }
 0x2cd   :  { %v1559_v14 = vpack.c.bf16 %v1536_v31, %v1534_v34 }
 0x2cf   :  { %1617 = vmatmul.bf16.vlgmr.msra.gmra.mxu2 %v1559_v14  ;;  %v4265_v14 = vld [vmem:[%s7899_s3 + $0xe0] sm:$0xf] }
 0x2d0   :  { %1992 = vmatpush.bf16.msra.mxu2 %v6203_v37 }
 0x2d2   :  { %v1519_v59 = vpop.f32.mrf.mxu0 }
 0x2d3   :  { %v1539_v47 = vadd.f32 %v1538_v63, %v1519_v59  ;;  %v5218_v63 = vld [vmem:[%s7899_s3 + $0xe4] sm:$0xf0] }
 0x2d4   :  { %1993 = vmatpush.bf16.msra.mxu2 %v6214_v46  ;;  %v1540_v44 = vpop.f32.mrf.mxu1  ;;  %v4266_v42 = vor.u32 %v5218_v63, %v4265_v14 }
 0x2d8   :  { %1994 = vmatpush.bf16.msra.mxu2 %v6224_v33 }
 0x2d9   :  { %1673 = vmatmul.bf16.gmra.mxu3 %v4174_v43 }
 0x2da   :  { %v1521_v28 = vpop.f32.mrf.mxu0 }
 0x2db   :  { %v1541_v21 = vadd.f32 %v1540_v44, %v1521_v28 }
 0x2dc   :  { %1995 = vmatpush.bf16.msra.mxu2 %v6229_v60 }
 0x2dd   :  { %v1560_v35 = vpack.c.bf16 %v1541_v21, %v1539_v47  ;;  %v4273_v47 = vld [vmem:[%s7899_s3 + $0xf0] sm:$0xf]  ;;  %v5220_v21 = vld [vmem:[%s7899_s3 + $0xf4] sm:$0xf0] }
 0x2de   :  { %v4274_v53 = vor.u32 %v5220_v21, %v4273_v47 }
 0x2df   :  { %1622 = vmatmul.bf16.gmra.mxu2 %v1560_v35 }
 0x2e0   :  { %1996 = vmatpush.bf16.msra.mxu2 %v6250_v24 }
 0x2e2   :  { %v1688_v38 = vpop.f32.mrf.mxu0 }
 0x2e9   :  { %4229 = vmatmul.msk.bf16.vlgmr.msrb.gmra.mxu3 %vm882_vm3, %v4220_v54 }
 0x2ea   :  { %v1690_v18 = vpop.f32.mrf.mxu0 }
 0x2ef   :  { %1823 = vmatmul.bf16.vlgmr.msrb.gmra.mxu2 %v4216_v49 }
 0x2f2   :  { %v1693_v58 = vpop.f32.mrf.mxu0 }
 0x2f9   :  { %4230 = vmatmul.msk.bf16.gmra.mxu3 %vm882_vm3, %v4228_v3  ;;  %v4320_v3 = vor.u32 %v5229_v40, %v4317_v56 }
 0x2fa   :  { %v1695_v9 = vpop.f32.mrf.mxu0 }
 0x2ff   :  { %1828 = vmatmul.bf16.gmra.mxu2 %v4224_v27  ;;  %v4316_v27 = vor.u32 %v5230_v50, %v4315_v19 }
 0x32c   :  { %v1463_v1 = vpop.f32.mrf.mxu3 }
 0x32d   :  { %v1473_v16 = vadd.f32 %v1463_v1, %v6580_v7  ;;  %v4270_v7 = vor.u32 %v5217_v32, %v4267_v12  ;;  %v5231_v1 = vld [vmem:[%s7899_s3 + $0x114] sm:$0xf]  ;;  %v5226_v12 = vld [vmem:[%s7900_s4 + $0x1e8] sm:$0xff] }
 0x32e   :  { %v5227_v32 = vld [vmem:[%s7900_s4 + $0x1f0] sm:$0xff] }
 0x32f   :  { %4279 = vmatmul.msk.bf16.vlgmr.msra.gmra.mxu2 %vm882_vm3, %v4270_v7  ;;  %v5224_v7 = vld [vmem:[%s7900_s4 + $0x1d8] sm:$0xff] }
 0x334   :  { %v6644_v52 = vpop.f32.mrf.mxu3 }
 0x33c   :  { %v1468_v61 = vpop.f32.mrf.mxu3 }
 0x33d   :  { %v1475_v25 = vadd.f32 %v1468_v61, %v6587_v41 }
 0x33f   :  { %4280 = vmatmul.msk.bf16.gmra.mxu2 %vm882_vm3, %v4278_v11 }
 0x344   :  { %v6647_v39 = vpop.f32.mrf.mxu3 }
 0x34c   :  { %v1669_v26 = vpop.f32.mrf.mxu3 }
 0x34d   :  { %v1689_v20 = vadd.f32 %v1688_v38, %v1669_v26  ;;  %v5232_v38 = vld [vmem:[%s7899_s3 + $0x114] sm:$0xf0] }
 0x352   :  { %v1618_v30 = vpop.f32.mrf.mxu2 }
 0x353   :  { %v6655_v57 = vadd.f32 %v1618_v30, %v1473_v16  ;;  %v4325_v16 = vld [vmem:[%s7899_s3 + $0x118] sm:$0xf0]  ;;  %v5225_v30 = vld [vmem:[%s7900_s4 + $0x1e0] sm:$0xff] }
 0x354   :  { %v1671_v8 = vpop.f32.mrf.mxu3  ;;  %v4328_v61 = vor.u32 %v5231_v1, %v4325_v16 }
 0x355   :  { %v1691_v41 = vadd.f32 %v1690_v18, %v1671_v8  ;;  %v5228_v18 = vld [vmem:[%s7900_s4 + $0x1f8] sm:$0xff] }
 0x356   :  { %2074 = vmatpush.bf16.msra.mxu3 %v5228_v18 }
 0x357   :  { %v1714_v15 = vpack.c.bf16 %v1691_v41, %v1689_v20  ;;  %v5223_v41 = vld [vmem:[%s7900_s4 + $0x1d0] sm:$0xff] }
 0x359   :  { %1772 = vmatmul.bf16.vlgmr.msrb.gmra.mxu1 %v1714_v15  ;;  %v5222_v15 = vld [vmem:[%s7900_s4 + $0x1c8] sm:$0xff] }
 0x35a   :  { %2147 = vmatpush.bf16.msrb.mxu1 %v6203_v37  ;;  %v6659_v10 = vpop.f32.mrf.mxu2  ;;  %2075 = vmatpush.bf16.msra.mxu3 %v5227_v32 }
 0x35c   :  { %v1674_v62 = vpop.f32.mrf.mxu3 }
 0x35d   :  { %v1694_v13 = vadd.f32 %v1693_v58, %v1674_v62  ;;  %v5221_v62 = vld [vmem:[%s7900_s4 + $0x1c0] sm:$0xff] }
 0x35e   :  { %2148 = vmatpush.bf16.msrb.mxu1 %v6214_v46  ;;  %2076 = vmatpush.bf16.msra.mxu3 %v5226_v12 }
 0x362   :  { %2149 = vmatpush.bf16.msrb.mxu1 %v6224_v33  ;;  %v1623_v4 = vpop.f32.mrf.mxu2  ;;  %2077 = vmatpush.bf16.msra.mxu3 %v5225_v30 }
 0x363   :  { %v6669_v48 = vadd.f32 %v1623_v4, %v1475_v25  ;;  %v4323_v25 = vld [vmem:[%s7899_s3 + $0x110] sm:$0xf] }
 0x364   :  { %v1676_v37 = vpop.f32.mrf.mxu3  ;;  %v4324_v26 = vor.u32 %v5232_v38, %v4323_v25 }
 0x365   :  { %v1696_v34 = vadd.f32 %v1695_v9, %v1676_v37  ;;  %v5239_v37 = vld [vmem:[%s7900_s4 + $0x230] sm:$0xff]  ;;  %v5238_v9 = vld [vmem:[%s7900_s4 + $0x228] sm:$0xff] }
 0x366   :  { %2150 = vmatpush.bf16.msrb.mxu1 %v6229_v60  ;;  %2078 = vmatpush.bf16.msra.mxu3 %v5224_v7  ;;  %v4477_v7 = vld [vmem:[%s7902_s6 + $0xe0] sm:$0xf] }
 0x367   :  { %v1715_v46 = vpack.c.bf16 %v1696_v34, %v1694_v13 }
 0x369   :  { %1777 = vmatmul.bf16.gmra.mxu1 %v1715_v46  ;;  %v5236_v46 = vld [vmem:[%s7900_s4 + $0x218] sm:$0xff] }
 0x36a   :  { %2151 = vmatpush.bf16.msrb.mxu1 %v6250_v24  ;;  %v6674_v33 = vpop.f32.mrf.mxu2  ;;  %2079 = vmatpush.bf16.msra.mxu3 %v5223_v41 }
 0x36c   :  { %v1843_v31 = vpop.f32.mrf.mxu3 }
 0x36e   :  { %2080 = vmatpush.bf16.msra.mxu3 %v5222_v15  ;;  %v4479_v15 = vld [vmem:[%s7902_s6 + $0xf0] sm:$0xf0] }
 0x372   :  { %v1824_v0 = vpop.f32.mrf.mxu2  ;;  %2081 = vmatpush.bf16.msra.mxu3 %v5221_v62  ;;  %v5272_v62 = vld [vmem:[%s7902_s6 + $0xf4] sm:$0xf0] }
 0x373   :  { %v1844_v43 = vadd.f32 %v1843_v31, %v1824_v0  ;;  %v1160_v31 = vadd.f32 %v6572_v6, %v6574_v5  ;;  %v5234_v6 = vld [vmem:[%s7900_s4 + $0x208] sm:$0xff] }
 0x374   :  { %v1845_v59 = vpop.f32.mrf.mxu3 }
 0x375   :  { %v1319_v63 = vadd.f32 %v6583_v55, %v1160_v31  ;;  %v5268_v31 = vld [vmem:[%s7902_s6 + $0xd4] sm:$0xf0] }
 0x379   :  { %1978 = vmatmul.bf16.vlgmr.msra.gmra.mxu1 %v4266_v42 }
 0x37a   :  { %v1826_v60 = vpop.f32.mrf.mxu2 }
 0x37b   :  { %v1846_v28 = vadd.f32 %v1845_v59, %v1826_v60  ;;  %v5235_v59 = vld [vmem:[%s7900_s4 + $0x210] sm:$0xff] }
 0x37c   :  { %v1848_v24 = vpop.f32.mrf.mxu3 }
 0x37d   :  { %v1869_v44 = vpack.c.bf16 %v1846_v28, %v1844_v43  ;;  %v1474_v28 = vadd.f32 %v6644_v52, %v1319_v63  ;;  %v5233_v52 = vld [vmem:[%s7900_s4 + $0x200] sm:$0xff] }
 0x37f   :  { %1927 = vmatmul.bf16.vlgmr.msra.gmra.mxu0 %v1869_v44  ;;  %v1629_v44 = vadd.f32 %v6659_v10, %v1474_v28  ;;  %v5263_v28 = vld [vmem:[%s7902_s6 + $0xac] sm:$0xf0] }
 0x382   :  { %v1829_v35 = vpop.f32.mrf.mxu2 }
 0x383   :  { %v1849_v2 = vadd.f32 %v1848_v24, %v1829_v35 }
 0x384   :  { %v1850_v54 = vpop.f32.mrf.mxu3 }
 0x389   :  { %1983 = vmatmul.bf16.gmra.mxu1 %v4274_v53  ;;  %v1165_v53 = vadd.f32 %v6576_v51, %v6578_v17 }
 0x38a   :  { %v1831_v36 = vpop.f32.mrf.mxu2 }
 0x38b   :  { %v1851_v23 = vadd.f32 %v1850_v54, %v1831_v36  ;;  %v1321_v10 = vadd.f32 %v6591_v22, %v1165_v53  ;;  %v4455_v53 = vld [vmem:[%s7902_s6 + $0xb8] sm:$0xf0] }
 0x38d   :  { %v1870_v49 = vpack.c.bf16 %v1851_v23, %v1849_v2  ;;  %v1476_v56 = vadd.f32 %v6647_v39, %v1321_v10  ;;  %v5259_v10 = vld [vmem:[%s7902_s6 + $0x8c] sm:$0xf0] }
 0x38f   :  { %1932 = vmatmul.bf16.gmra.mxu0 %v1870_v49  ;;  %v1631_v19 = vadd.f32 %v6674_v33, %v1476_v56  ;;  %v4437_v56 = vld [vmem:[%s7902_s6 + $0x88] sm:$0xf] }
 0x399   :  { %4329 = vmatmul.msk.bf16.vlgmr.msrb.gmra.mxu1 %vm882_vm3, %v4320_v3 }
 0x39f   :  { %2133 = vmatmul.bf16.vlgmr.msrb.gmra.mxu0 %v4316_v27 }
 0x3a9   :  { %4330 = vmatmul.msk.bf16.gmra.mxu1 %vm882_vm3, %v4328_v61 }
 0x3af   :  { %2138 = vmatmul.bf16.gmra.mxu0 %v4324_v26 }
 0x3b2   :  { %v1998_v11 = vpop.f32.mrf.mxu2 }
 0x3ba   :  { %v2000_v34 = vpop.f32.mrf.mxu2 }
 0x3c2   :  { %v2003_v55 = vpop.f32.mrf.mxu2 }
 0x3ca   :  { %v2005_v36 = vpop.f32.mrf.mxu2 }
 0x3d6   :  { %v1773_v8 = vpop.f32.mrf.mxu1 }
 0x3d7   :  { %v1783_v20 = vadd.f32 %v1773_v8, %v6655_v57  ;;  %v5240_v57 = vld [vmem:[%s7900_s4 + $0x238] sm:$0xff]  ;;  %v5271_v8 = vld [vmem:[%s7902_s6 + $0xec] sm:$0xf0] }
 0x3d8   :  { %2229 = vmatpush.bf16.msrb.mxu2 %v5240_v57  ;;  %v4478_v41 = vor.u32 %v5271_v8, %v4477_v7  ;;  %v5270_v57 = vld [vmem:[%s7902_s6 + $0xec] sm:$0xf]  ;;  %v4397_v8 = vld [vmem:[%s7902_s6 + $0x40] sm:$0xf] }
 0x3da   :  { %2470 = vmatpush.bf16.msrb.mxu3 %v4478_v41  ;;  %v5249_v41 = vld [vmem:[%s7902_s6 + $0x44] sm:$0xf] }
 0x3dc   :  { %2230 = vmatpush.bf16.msrb.mxu2 %v5239_v37  ;;  %v4461_v37 = vld [vmem:[%s7902_s6 + $0xc0] sm:$0xf] }
 0x3de   :  { %v1775_v58 = vpop.f32.mrf.mxu1 }
 0x3df   :  { %v1784_v24 = vadd.f32 %v1775_v58, %v1629_v44  ;;  %v4485_v58 = vld [vmem:[%s7902_s6 + $0xe8] sm:$0xf]  ;;  %v4447_v44 = vld [vmem:[%s7902_s6 + $0xb0] sm:$0xf0] }
 0x3e0   :  { %2231 = vmatpush.bf16.msrb.mxu2 %v5238_v9  ;;  %v5267_v9 = vld [vmem:[%s7902_s6 + $0xcc] sm:$0xf0] }
 0x3e6   :  { %v1778_v45 = vpop.f32.mrf.mxu1 }
 0x3e7   :  { %v1785_v29 = vadd.f32 %v1778_v45, %v6669_v48  ;;  %v5237_v48 = vld [vmem:[%s7900_s4 + $0x220] sm:$0xff] }
 0x3e8   :  { %2232 = vmatpush.bf16.msrb.mxu2 %v5237_v48  ;;  %v4462_v48 = vor.u32 %v5267_v9, %v4461_v37  ;;  %v4381_v9 = vld [vmem:[%s7902_s6 + $0x20] sm:$0xf] }
 0x3ea   :  { %2471 = vmatpush.bf16.msrb.mxu3 %v4462_v48  ;;  %v5245_v48 = vld [vmem:[%s7902_s6 + $0x24] sm:$0xf] }
 0x3ec   :  { %2233 = vmatpush.bf16.msrb.mxu2 %v5236_v46  ;;  %v4469_v46 = vld [vmem:[%s7902_s6 + $0xc8] sm:$0xf] }
 0x3ed   :  { %v4470_v63 = vor.u32 %v5268_v31, %v4469_v46  ;;  %v4383_v46 = vld [vmem:[%s7902_s6 + $0x30] sm:$0xf0]  ;;  %v4389_v31 = vld [vmem:[%s7902_s6 + $0x28] sm:$0xf] }
 0x3ee   :  { %v1780_v4 = vpop.f32.mrf.mxu1 }
 0x3ef   :  { %v1786_v50 = vadd.f32 %v1780_v4, %v1631_v19  ;;  %v4487_v4 = vld [vmem:[%s7902_s6 + $0xf8] sm:$0xf0] }
 0x3f0   :  { %2234 = vmatpush.bf16.msrb.mxu2 %v5235_v59  ;;  %v4471_v59 = vld [vmem:[%s7902_s6 + $0xd8] sm:$0xf0] }
 0x3f4   :  { %2235 = vmatpush.bf16.msrb.mxu2 %v5234_v6  ;;  %v5261_v6 = vld [vmem:[%s7902_s6 + $0xa4] sm:$0xf] }
 0x3f6   :  { %v1979_v13 = vpop.f32.mrf.mxu1 }
 0x3f7   :  { %v1999_v60 = vadd.f32 %v1998_v11, %v1979_v13  ;;  %v4490_v11 = vor.u32 %v5270_v57, %v4487_v4  ;;  %v5265_v13 = vld [vmem:[%s7902_s6 + $0xc4] sm:$0xf]  ;;  %v5250_v4 = vld [vmem:[%s7902_s6 + $0x4c] sm:$0xf] }
 0x3f8   :  { %2236 = vmatpush.bf16.msrb.mxu2 %v5233_v52  ;;  %v5262_v52 = vld [vmem:[%s7902_s6 + $0xac] sm:$0xf] }
 0x3fc   :  { %v1928_v14 = vpop.f32.mrf.mxu0  ;;  %2509 = vmatpush.bf16.msra.mxu2 %v4490_v11  ;;  %v4407_v11 = vld [vmem:[%s7902_s6 + $0x58] sm:$0xf0] }
 0x3fd   :  { %v6758_v0 = vadd.f32 %v1928_v14, %v1783_v20  ;;  %v5269_v20 = vld [vmem:[%s7902_s6 + $0xe4] sm:$0xf]  ;;  %v4410_v37 = vor.u32 %v5250_v4, %v4407_v11  ;;  %v4973_v11 = vld [vmem:[%s7904_s8 + $0x3c0] sm:$0xf] }
 0x3fe   :  { %v1981_v42 = vpop.f32.mrf.mxu1  ;;  %v4482_v45 = vor.u32 %v5269_v20, %v4479_v15  ;;  %v5251_v20 = vld [vmem:[%s7902_s6 + $0x4c] sm:$0xf0] }
 0x3ff   :  { %v2001_v43 = vadd.f32 %v2000_v34, %v1981_v42  ;;  %v4463_v34 = vld [vmem:[%s7902_s6 + $0xd0] sm:$0xf0]  ;;  %v5266_v42 = vld [vmem:[%s7902_s6 + $0xcc] sm:$0xf]  ;;  %v4398_v15 = vor.u32 %v5251_v20, %v4397_v8 }
 0x400   :  { %2483 = vmatpush.bf16.msra.mxu0 %v4482_v45  ;;  %v4466_v14 = vor.u32 %v5265_v13, %v4463_v34  ;;  %v5252_v45 = vld [vmem:[%s7902_s6 + $0x54] sm:$0xf0]  ;;  %v5247_v13 = vld [vmem:[%s7902_s6 + $0x2c] sm:$0xf0] }
 0x401   :  { %v2024_v5 = vpack.c.bf16 %v2001_v43, %v1999_v60  ;;  %v4474_v60 = vor.u32 %v5266_v42, %v4471_v59  ;;  %v4445_v43 = vld [vmem:[%s7902_s6 + $0xa0] sm:$0xf]  ;;  %v4382_v34 = vor.u32 %v5247_v13, %v4381_v9  ;;  %v5246_v59 = vld [vmem:[%s7902_s6 + $0x2c] sm:$0xf] }
 0x403   :  { %2082 = vmatmul.bf16.vlgmr.msra.gmra.mxu3 %v2024_v5  ;;  %2510 = vmatpush.bf16.msra.mxu2 %v4474_v60  ;;  %v4446_v5 = vor.u32 %v5263_v28, %v4445_v43  ;;  %v4391_v60 = vld [vmem:[%s7902_s6 + $0x38] sm:$0xf0] }
 0x404   :  { %v1930_v47 = vpop.f32.mrf.mxu0  ;;  %2484 = vmatpush.bf16.msra.mxu0 %v4466_v14  ;;  %v5248_v14 = vld [vmem:[%s7902_s6 + $0x34] sm:$0xf0]  ;;  %v4394_v43 = vor.u32 %v5246_v59, %v4391_v60  ;;  %v5295_v59 = vld [vmem:[%s7904_s8 + $0xac] sm:$0xf0] }
 0x405   :  { %v6768_v21 = vadd.f32 %v1930_v47, %v1784_v24  ;;  %v5264_v24 = vld [vmem:[%s7902_s6 + $0xb4] sm:$0xf0]  ;;  %v4450_v47 = vor.u32 %v5261_v6, %v4447_v44  ;;  %2472 = vmatpush.bf16.msrb.mxu3 %v4446_v5  ;;  %v4390_v42 = vor.u32 %v5248_v14, %v4389_v31  ;;  %v4365_v5 = vld [vmem:[%s7902_s6] sm:$0xf]  ;;  %v5243_v44 = vld [vmem:[%s7902_s6 + $0xc] sm:$0xf0] }
 0x406   :  { %v1984_v35 = vpop.f32.mrf.mxu1  ;;  %v5323_v31 = vld [vmem:[%s7904_s8 + $0x18c] sm:$0xf0] }
 0x407   :  { %v2004_v49 = vadd.f32 %v2003_v55, %v1984_v35  ;;  %v4453_v55 = vld [vmem:[%s7902_s6 + $0xa8] sm:$0xf] }
 0x408   :  { %v4454_v35 = vor.u32 %v5264_v24, %v4453_v55  ;;  %2485 = vmatpush.bf16.msra.mxu0 %v4450_v47  ;;  %v5241_v55 = vld [vmem:[%s7902_s6 + $0x4] sm:$0xf]  ;;  %v4366_v24 = vor.u32 %v5243_v44, %v4365_v5  ;;  %v4367_v47 = vld [vmem:[%s7902_s6 + $0x10] sm:$0xf0] }
 0x40c   :  { %v1933_v54 = vpop.f32.mrf.mxu0 }
 0x40d   :  { %v6776_v2 = vadd.f32 %v1933_v54, %v1785_v29  ;;  %v4486_v29 = vor.u32 %v5272_v62, %v4485_v58  ;;  %v4429_v54 = vld [vmem:[%s7902_s6 + $0x80] sm:$0xf]  ;;  %v4399_v58 = vld [vmem:[%s7902_s6 + $0x50] sm:$0xf0]  ;;  %v4405_v62 = vld [vmem:[%s7902_s6 + $0x48] sm:$0xf] }
 0x40e   :  { %v1986_v23 = vpop.f32.mrf.mxu1  ;;  %v4406_v57 = vor.u32 %v5252_v45, %v4405_v62  ;;  %v5359_v45 = vld [vmem:[%s7904_s8 + $0x2ac] sm:$0xf0] }
 0x40f   :  { %v2006_v40 = vadd.f32 %v2005_v36, %v1986_v23  ;;  %2496 = vmatpush.bf16.msra.mxu1 %v4486_v29  ;;  %v4458_v36 = vor.u32 %v5262_v52, %v4455_v53  ;;  %v5257_v23 = vld [vmem:[%s7902_s6 + $0x84] sm:$0xf]  ;;  %v4402_v29 = vor.u32 %v5249_v41, %v4399_v58  ;;  %v5244_v52 = vld [vmem:[%s7902_s6 + $0x14] sm:$0xf0]  ;;  %v4370_v53 = vor.u32 %v5241_v55, %v4367_v47  ;;  %v4701_v41 = vld [vmem:[%s7904_s8 + $0x1a0] sm:$0xf] }
 0x410   :  { %v4829_v58 = vld [vmem:[%s7904_s8 + $0x2a0] sm:$0xf] }
 0x411   :  { %v2025_v3 = vpack.c.bf16 %v2006_v40, %v2004_v49  ;;  %2511 = vmatpush.bf16.msra.mxu2 %v4458_v36  ;;  %v4430_v49 = vor.u32 %v5259_v10, %v4429_v54  ;;  %v4431_v40 = vld [vmem:[%s7902_s6 + $0x90] sm:$0xf0]  ;;  %v5242_v54 = vld [vmem:[%s7902_s6 + $0xc] sm:$0xf]  ;;  %v4375_v10 = vld [vmem:[%s7902_s6 + $0x18] sm:$0xf0]  ;;  %v4830_v14 = vor.u32 %v5359_v45, %v4829_v58 }
 0x412   :  { %v4434_v19 = vor.u32 %v5257_v23, %v4431_v40  ;;  %v4557_v47 = vld [vmem:[%s7904_s8 + $0x80] sm:$0xf]  ;;  %v5311_v58 = vld [vmem:[%s7904_s8 + $0x12c] sm:$0xf0] }
 0x413   :  { %2087 = vmatmul.bf16.gmra.mxu3 %v2025_v3  ;;  %2497 = vmatpush.bf16.msra.mxu1 %v4470_v63  ;;  %v5260_v3 = vld [vmem:[%s7902_s6 + $0x94] sm:$0xf0]  ;;  %v4386_v63 = vor.u32 %v5245_v48, %v4383_v46  ;;  %v4685_v46 = vld [vmem:[%s7904_s8 + $0x180] sm:$0xf] }
 0x414   :  { %v1935_v27 = vpop.f32.mrf.mxu0  ;;  %2473 = vmatpush.bf16.msrb.mxu3 %v4430_v49  ;;  %2486 = vmatpush.bf16.msra.mxu0 %v4434_v19  ;;  %v4378_v49 = vor.u32 %v5242_v54, %v4375_v10  ;;  %v5335_v19 = vld [vmem:[%s7904_s8 + $0x1ec] sm:$0xf0]  ;;  %v4765_v45 = vld [vmem:[%s7904_s8 + $0x220] sm:$0xf] }
 0x415   :  { %v6780_v1 = vadd.f32 %v1935_v27, %v1786_v50  ;;  %v4438_v50 = vor.u32 %v5260_v3, %v4437_v56  ;;  %v5258_v27 = vld [vmem:[%s7902_s6 + $0x8c] sm:$0xf]  ;;  %v6978_v56 = vld [vmem:[%s7901_s5] ss:$0 sm:$0xff]  ;;  %v5319_v54 = vld [vmem:[%s7904_s8 + $0x16c] sm:$0xf0] }
 0x416   :  { %v2153_v51 = vpop.f32.mrf.mxu1  ;;  %v4733_v3 = vld [vmem:[%s7904_s8 + $0x1e0] sm:$0xf]  ;;  %v5387_v10 = vld [vmem:[%s7904_s8 + $0x38c] sm:$0xf0] }
 0x417   :  { %2498 = vmatpush.bf16.msra.mxu1 %v4454_v35  ;;  %v4373_v35 = vld [vmem:[%s7902_s6 + $0x8] sm:$0xf] }
 0x418   :  { %v4374_v36 = vor.u32 %v5244_v52, %v4373_v35  ;;  %v5291_v35 = vld [vmem:[%s7904_s8 + $0x8c] sm:$0xf0]  ;;  %v4941_v52 = vld [vmem:[%s7904_s8 + $0x380] sm:$0xf] }
 0x41b   :  { %2499 = vmatpush.bf16.msra.mxu1 %v4438_v50 }
 0x41c   :  { %v2134_v17 = vpop.f32.mrf.mxu0 }
 0x41d   :  { %v2154_v22 = vadd.f32 %v2153_v51, %v2134_v17  ;;  %v4439_v51 = vld [vmem:[%s7902_s6 + $0x98] sm:$0xf0] }
 0x41e   :  { %v2155_v16 = vpop.f32.mrf.mxu1  ;;  %v4442_v17 = vor.u32 %v5258_v27, %v4439_v51  ;;  %v4734_v27 = vor.u32 %v5335_v19, %v4733_v3  ;;  %v5367_v51 = vld [vmem:[%s7904_s8 + $0x2ec] sm:$0xf0]  ;;  %v4558_v19 = vor.u32 %v5291_v35, %v4557_v47  ;;  %v4493_v47 = vld [vmem:[%s7904_s8] sm:$0xf] }
 0x41f   :  { %v5275_v35 = vld [vmem:[%s7904_s8 + $0xc] sm:$0xf0] }
 0x420   :  { %2512 = vmatpush.bf16.msra.mxu2 %v4442_v17  ;;  %v4717_v17 = vld [vmem:[%s7904_s8 + $0x1c0] sm:$0xf] }
 0x424   :  { %v2136_v61 = vpop.f32.mrf.mxu0 }
 0x425   :  { %v2156_v25 = vadd.f32 %v2155_v16, %v2136_v61  ;;  %v4413_v16 = vld [vmem:[%s7902_s6 + $0x60] sm:$0xf]  ;;  %v5255_v61 = vld [vmem:[%s7902_s6 + $0x6c] sm:$0xf0] }
 0x426   :  { %v2158_v26 = vpop.f32.mrf.mxu1 }
 0x427   :  { %v2179_v38 = vpack.c.bf16 %v2156_v25, %v2154_v22  ;;  %v5253_v22 = vld [vmem:[%s7902_s6 + $0x64] sm:$0xf]  ;;  %v4414_v25 = vor.u32 %v5255_v61, %v4413_v16  ;;  %v5331_v16 = vld [vmem:[%s7904_s8 + $0x1cc] sm:$0xf0] }
 0x429   :  { %2237 = vmatmul.bf16.vlgmr.msrb.gmra.mxu2 %v2179_v38  ;;  %v4415_v38 = vld [vmem:[%s7902_s6 + $0x70] sm:$0xf0]  ;;  %2474 = vmatpush.bf16.msrb.mxu3 %v4414_v25  ;;  %v4845_v25 = vld [vmem:[%s7904_s8 + $0x2c0] sm:$0xf] }
 0x42c   :  { %v2139_v18 = vpop.f32.mrf.mxu0 }
 0x42d   :  { %v2159_v12 = vadd.f32 %v2158_v26, %v2139_v18  ;;  %v4421_v26 = vld [vmem:[%s7902_s6 + $0x68] sm:$0xf]  ;;  %v5256_v18 = vld [vmem:[%s7902_s6 + $0x74] sm:$0xf0]  ;;  %2475 = vmatpush.bf16.msrb.mxu3 %v4398_v15  ;;  %v5327_v15 = vld [vmem:[%s7904_s8 + $0x1ac] sm:$0xf0] }
 0x42e   :  { %v2160_v39 = vpop.f32.mrf.mxu1  ;;  %v4702_v48 = vor.u32 %v5327_v15, %v4701_v41  ;;  %v4637_v15 = vld [vmem:[%s7904_s8 + $0x120] sm:$0xf] }
 0x431   :  { %2476 = vmatpush.bf16.msrb.mxu3 %v4382_v34 }
 0x434   :  { %v2141_v32 = vpop.f32.mrf.mxu0 }
 0x435   :  { %v2161_v30 = vadd.f32 %v2160_v39, %v2141_v32  ;;  %v4418_v39 = vor.u32 %v5253_v22, %v4415_v38  ;;  %2477 = vmatpush.bf16.msrb.mxu3 %v4366_v24  ;;  %v4605_v38 = vld [vmem:[%s7904_s8 + $0xe0] sm:$0xf]  ;;  %v4686_v24 = vor.u32 %v5323_v31, %v4685_v46 }
 0x436   :  { %v4621_v31 = vld [vmem:[%s7904_s8 + $0x100] sm:$0xf] }
 0x437   :  { %v2180_v33 = vpack.c.bf16 %v2161_v30, %v2159_v12  ;;  %v4422_v12 = vor.u32 %v5256_v18, %v4421_v26  ;;  %v5254_v30 = vld [vmem:[%s7902_s6 + $0x6c] sm:$0xf]  ;;  %2487 = vmatpush.bf16.msra.mxu0 %v4418_v39  ;;  %v5303_v39 = vld [vmem:[%s7904_s8 + $0xec] sm:$0xf0] }
 0x438   :  { %v4606_v8 = vor.u32 %v5303_v39, %v4605_v38  ;;  %v4781_v38 = vld [vmem:[%s7904_s8 + $0x240] sm:$0xf] }
 0x439   :  { %2242 = vmatmul.bf16.gmra.mxu2 %v2180_v33  ;;  %v4423_v33 = vld [vmem:[%s7902_s6 + $0x78] sm:$0xf0]  ;;  %2500 = vmatpush.bf16.msra.mxu1 %v4422_v12  ;;  %v4989_v12 = vld [vmem:[%s7904_s8 + $0x3e0] sm:$0xf] }
 0x43a   :  { %v4426_v7 = vor.u32 %v5254_v30, %v4423_v33  ;;  %v5399_v30 = vld [vmem:[%s7904_s8 + $0x3ec] sm:$0xf0]  ;;  %3308 = vmatpush.bf16.msra.mxu3 %v4606_v8  ;;  %v4909_v8 = vld [vmem:[%s7904_s8 + $0x340] sm:$0xf] }
 0x43b   :  { %2488 = vmatpush.bf16.msra.mxu0 %v4402_v29  ;;  %v4990_v20 = vor.u32 %v5399_v30, %v4989_v12  ;;  %v4589_v29 = vld [vmem:[%s7904_s8 + $0xc0] sm:$0xf] }
 0x43c   :  { %2513 = vmatpush.bf16.msra.mxu2 %v4426_v7  ;;  %v4525_v12 = vld [vmem:[%s7904_s8 + $0x40] sm:$0xf] }
 0x43d   :  { %2501 = vmatpush.bf16.msra.mxu1 %v4406_v57  ;;  %v5299_v57 = vld [vmem:[%s7904_s8 + $0xcc] sm:$0xf0] }
 0x43e   :  { %v4590_v4 = vor.u32 %v5299_v57, %v4589_v29  ;;  %v5343_v29 = vld [vmem:[%s7904_s8 + $0x22c] sm:$0xf0] }
 0x43f   :  { %2489 = vmatpush.bf16.msra.mxu0 %v4386_v63  ;;  %v4813_v63 = vld [vmem:[%s7904_s8 + $0x280] sm:$0xf]  ;;  %v4766_v46 = vor.u32 %v5343_v29, %v4765_v45  ;;  %v4687_v45 = vld [vmem:[%s7904_s8 + $0x190] sm:$0xf0]  ;;  %v5353_v29 = vld [vmem:[%s7904_s8 + $0x284] sm:$0xf] }
 0x440   :  { %2514 = vmatpush.bf16.msra.mxu2 %v4410_v37  ;;  %v5395_v37 = vld [vmem:[%s7904_s8 + $0x3cc] sm:$0xf0]  ;;  %3309 = vmatpush.bf16.msra.mxu3 %v4590_v4 }
 0x441   :  { %2502 = vmatpush.bf16.msra.mxu1 %v4390_v42  ;;  %v4974_v34 = vor.u32 %v5395_v37, %v4973_v11  ;;  %v4573_v42 = vld [vmem:[%s7904_s8 + $0xa0] sm:$0xf] }
 0x442   :  { %v4574_v44 = vor.u32 %v5295_v59, %v4573_v42  ;;  %v4509_v11 = vld [vmem:[%s7904_s8 + $0x20] sm:$0xf]  ;;  %v5339_v59 = vld [vmem:[%s7904_s8 + $0x20c] sm:$0xf0] }
 0x443   :  { %2490 = vmatpush.bf16.msra.mxu0 %v4370_v53  ;;  %v4749_v42 = vld [vmem:[%s7904_s8 + $0x200] sm:$0xf] }
 0x444   :  { %2515 = vmatpush.bf16.msra.mxu2 %v4394_v43  ;;  %v5355_v43 = vld [vmem:[%s7904_s8 + $0x28c] sm:$0xf0]  ;;  %3310 = vmatpush.bf16.msra.mxu3 %v4574_v44 }
 0x445   :  { %2503 = vmatpush.bf16.msra.mxu1 %v4374_v36  ;;  %v4814_v53 = vor.u32 %v5355_v43, %v4813_v63  ;;  %v4669_v36 = vld [vmem:[%s7904_s8 + $0x160] sm:$0xf]  ;;  %v5307_v63 = vld [vmem:[%s7904_s8 + $0x10c] sm:$0xf0]  ;;  %v5333_v43 = vld [vmem:[%s7904_s8 + $0x1e4] sm:$0xf] }
 0x447   :  { %3321 = vmatpush.bf16.msrb.mxu0 %v4734_v27 }
 0x448   :  { %2516 = vmatpush.bf16.msra.mxu2 %v4378_v49  ;;  %v4797_v49 = vld [vmem:[%s7904_s8 + $0x260] sm:$0xf]  ;;  %3311 = vmatpush.bf16.msra.mxu3 %v4558_v19 }
 0x44c   :  { %3347 = vmatpush.bf16.msrb.mxu2 %v4990_v20  ;;  %v5379_v20 = vld [vmem:[%s7904_s8 + $0x34c] sm:$0xf0] }
 0x44d   :  { %v4910_v4 = vor.u32 %v5379_v20, %v4909_v8  ;;  %v4575_v8 = vld [vmem:[%s7904_s8 + $0xb0] sm:$0xf0]  ;;  %v5389_v20 = vld [vmem:[%s7904_s8 + $0x3a4] sm:$0xf] }
 0x450   :  { %3348 = vmatpush.bf16.msrb.mxu2 %v4974_v34  ;;  %v5375_v34 = vld [vmem:[%s7904_s8 + $0x32c] sm:$0xf0] }
 0x486   :  { %v2083_v32 = vpop.f32.mrf.mxu3 }
 0x487   :  { %v2093_v23 = vadd.f32 %v2083_v32, %v6758_v0  ;;  %v4861_v0 = vld [vmem:[%s7904_s8 + $0x2e0] sm:$0xf]  ;;  %v4718_v32 = vor.u32 %v5331_v16, %v4717_v17  ;;  %v5383_v16 = vld [vmem:[%s7904_s8 + $0x36c] sm:$0xf0] }
 0x488   :  { %v4862_v22 = vor.u32 %v5367_v51, %v4861_v0  ;;  %v4942_v0 = vor.u32 %v5387_v10, %v4941_v52  ;;  %v5287_v51 = vld [vmem:[%s7904_s8 + $0x6c] sm:$0xf0]  ;;  %v4925_v17 = vld [vmem:[%s7904_s8 + $0x360] sm:$0xf]  ;;  %v4750_v10 = vor.u32 %v5339_v59, %v4749_v42 }
 0x489   :  { %3322 = vmatpush.bf16.msrb.mxu0 %v4718_v32  ;;  %v4926_v39 = vor.u32 %v5383_v16, %v4925_v17  ;;  %v4877_v52 = vld [vmem:[%s7904_s8 + $0x300] sm:$0xf] }
 0x48a   :  { %3334 = vmatpush.bf16.msrb.mxu1 %v4862_v22  ;;  %v4653_v22 = vld [vmem:[%s7904_s8 + $0x140] sm:$0xf] }
 0x48d   :  { %3323 = vmatpush.bf16.msrb.mxu0 %v4702_v48  ;;  %v4893_v48 = vld [vmem:[%s7904_s8 + $0x320] sm:$0xf] }
 0x48e   :  { %v2085_v28 = vpop.f32.mrf.mxu3  ;;  %v4894_v44 = vor.u32 %v5375_v34, %v4893_v48 }
 0x48f   :  { %v2094_v50 = vadd.f32 %v2085_v28, %v6768_v21  ;;  %v5363_v21 = vld [vmem:[%s7904_s8 + $0x2cc] sm:$0xf0]  ;;  %v4957_v28 = vld [vmem:[%s7904_s8 + $0x3a0] sm:$0xf] }
 0x490   :  { %v4846_v7 = vor.u32 %v5363_v21, %v4845_v25  ;;  %v5315_v25 = vld [vmem:[%s7904_s8 + $0x14c] sm:$0xf0] }
 0x491   :  { %3324 = vmatpush.bf16.msrb.mxu0 %v4686_v24  ;;  %v4863_v24 = vld [vmem:[%s7904_s8 + $0x2f0] sm:$0xf0] }
 0x492   :  { %3335 = vmatpush.bf16.msrb.mxu1 %v4846_v7  ;;  %v5283_v7 = vld [vmem:[%s7904_s8 + $0x4c] sm:$0xf0] }
 0x493   :  { %v4526_v57 = vor.u32 %v5283_v7, %v4525_v12  ;;  %v5357_v12 = vld [vmem:[%s7904_s8 + $0x2a4] sm:$0xf] }
 0x494   :  { %v5293_v7 = vld [vmem:[%s7904_s8 + $0xa4] sm:$0xf] }
 0x496   :  { %v2088_v33 = vpop.f32.mrf.mxu3  ;;  %3336 = vmatpush.bf16.msrb.mxu1 %v4830_v14 }
 0x49a   :  { %3337 = vmatpush.bf16.msrb.mxu1 %v4814_v53  ;;  %v5301_v53 = vld [vmem:[%s7904_s8 + $0xe4] sm:$0xf] }
 0x49e   :  { %v2090_v3 = vpop.f32.mrf.mxu3 }
 0x49f   :  { %v2096_v21 = vadd.f32 %v2090_v3, %v6780_v1 }
 0x4ac   :  { %v2238_v6 = vpop.f32.mrf.mxu2 }
 0x4ad   :  { %v2248_v40 = vadd.f32 %v2238_v6, %v2093_v23  ;;  %v5391_v6 = vld [vmem:[%s7904_s8 + $0x3ac] sm:$0xf0]  ;;  %v2095_v23 = vadd.f32 %v2088_v33, %v6776_v2  ;;  %v4670_v2 = vor.u32 %v5319_v54, %v4669_v36  ;;  %v4654_v33 = vor.u32 %v5315_v25, %v4653_v22  ;;  %v5297_v22 = vld [vmem:[%s7904_s8 + $0xc4] sm:$0xf]  ;;  %v4591_v25 = vld [vmem:[%s7904_s8 + $0xd0] sm:$0xf0] }
 0x4ae   :  { %v4958_v55 = vor.u32 %v5391_v6, %v4957_v28  ;;  %v4735_v28 = vld [vmem:[%s7904_s8 + $0x1f0] sm:$0xf0]  ;;  %v5365_v6 = vld [vmem:[%s7904_s8 + $0x2e4] sm:$0xf]  ;;  %v4622_v54 = vor.u32 %v5307_v63, %v4621_v31 }
 0x4af   :  { %v2256_v26 = vadd.f32 %v6978_v56, %v2248_v40  ;;  %v5351_v40 = vld [vmem:[%s7904_s8 + $0x26c] sm:$0xf0]  ;;  %3325 = vmatpush.bf16.msrb.mxu0 %v4670_v2  ;;  %v4738_v3 = vor.u32 %v5333_v43, %v4735_v28  ;;  %v4866_v19 = vor.u32 %v5365_v6, %v4863_v24  ;;  %v4847_v2 = vld [vmem:[%s7904_s8 + $0x2d0] sm:$0xf0]  ;;  %v5313_v6 = vld [vmem:[%s7904_s8 + $0x144] sm:$0xf] }
 0x4b0   :  { %3349 = vmatpush.bf16.msrb.mxu2 %v4958_v55  ;;  %v4671_v31 = vld [vmem:[%s7904_s8 + $0x170] sm:$0xf0] }
 0x4b1   :  { %v2260_v9 = vmax.f32 %v2256_v26, 0.0  ;;  %v5347_v26 = vld [vmem:[%s7904_s8 + $0x24c] sm:$0xf0]  ;;  %v4799_v63 = vld [vmem:[%s7904_s8 + $0x270] sm:$0xf0] }
 0x4b2   :  { %v4782_v41 = vor.u32 %v5347_v26, %v4781_v38  ;;  %v4975_v38 = vld [vmem:[%s7904_s8 + $0x3d0] sm:$0xf0] }
 0x4b3   :  { %3326 = vmatpush.bf16.msrb.mxu0 %v4654_v33 }
 0x4b4   :  { %v2240_v61 = vpop.f32.mrf.mxu2  ;;  %3350 = vmatpush.bf16.msrb.mxu2 %v4942_v0  ;;  %v5329_v0 = vld [vmem:[%s7904_s8 + $0x1c4] sm:$0xf] }
 0x4b5   :  { %v2249_v18 = vadd.f32 %v2240_v61, %v2094_v50  ;;  %v4541_v50 = vld [vmem:[%s7904_s8 + $0x60] sm:$0xf]  ;;  %v4798_v61 = vor.u32 %v5351_v40, %v4797_v49  ;;  %v5397_v49 = vld [vmem:[%s7904_s8 + $0x3e4] sm:$0xf]  ;;  %v4991_v40 = vld [vmem:[%s7904_s8 + $0x3f0] sm:$0xf0] }
 0x4b6   :  { %v4542_v32 = vor.u32 %v5287_v51, %v4541_v50  ;;  %v4719_v50 = vld [vmem:[%s7904_s8 + $0x1d0] sm:$0xf0]  ;;  %v4494_v51 = vor.u32 %v5275_v35, %v4493_v47  ;;  %v5285_v35 = vld [vmem:[%s7904_s8 + $0x64] sm:$0xf] }
 0x4b7   :  { %v2257_v62 = vadd.f32 %v6978_v56, %v2249_v18  ;;  %3338 = vmatpush.bf16.msrb.mxu1 %v4798_v61  ;;  %v4994_v61 = vor.u32 %v5397_v49, %v4991_v40  ;;  %v4722_v26 = vor.u32 %v5329_v0, %v4719_v50  ;;  %v5341_v40 = vld [vmem:[%s7904_s8 + $0x224] sm:$0xf]  ;;  %v4527_v50 = vld [vmem:[%s7904_s8 + $0x50] sm:$0xf0] }
 0x4b8   :  { %3312 = vmatpush.bf16.msra.mxu3 %v4542_v32  ;;  %3351 = vmatpush.bf16.msrb.mxu2 %v4926_v39  ;;  %v5325_v32 = vld [vmem:[%s7904_s8 + $0x1a4] sm:$0xf]  ;;  %v4703_v39 = vld [vmem:[%s7904_s8 + $0x1b0] sm:$0xf0] }
 0x4b9   :  { %v2261_v13 = vmax.f32 %v2257_v62, 0.0  ;;  %v5281_v0 = vld [vmem:[%s7904_s8 + $0x44] sm:$0xf] }
 0x4bb   :  { %v7058_v60 = vmax.f32 %v2260_v9, %v2261_v13  ;;  %v4638_v13 = vor.u32 %v5311_v58, %v4637_v15  ;;  %3339 = vmatpush.bf16.msrb.mxu1 %v4782_v41  ;;  %v4959_v41 = vld [vmem:[%s7904_s8 + $0x3b0] sm:$0xf0]  ;;  %v4706_v15 = vor.u32 %v5325_v32, %v4703_v39  ;;  %v5373_v32 = vld [vmem:[%s7904_s8 + $0x324] sm:$0xf] }
 0x4bc   :  { %v2243_v5 = vpop.f32.mrf.mxu2  ;;  %3313 = vmatpush.bf16.msra.mxu3 %v4526_v57  ;;  %3352 = vmatpush.bf16.msrb.mxu2 %v4910_v4  ;;  %v4815_v57 = vld [vmem:[%s7904_s8 + $0x290] sm:$0xf0]  ;;  %v4578_v4 = vor.u32 %v5293_v7, %v4575_v8  ;;  %v5369_v8 = vld [vmem:[%s7904_s8 + $0x304] sm:$0xf] }
 0x4bd   :  { %v2250_v27 = vadd.f32 %v2243_v5, %v2095_v23  ;;  %3327 = vmatpush.bf16.msrb.mxu0 %v4638_v13  ;;  %v4607_v23 = vld [vmem:[%s7904_s8 + $0xf0] sm:$0xf0]  ;;  %v4818_v34 = vor.u32 %v5353_v29, %v4815_v57 }
 0x4be   :  { %v4610_v16 = vor.u32 %v5301_v53, %v4607_v23  ;;  %v4943_v13 = vld [vmem:[%s7904_s8 + $0x390] sm:$0xf0] }
 0x4bf   :  { %v2258_v30 = vadd.f32 %v6978_v56, %v2250_v27  ;;  %3340 = vmatpush.bf16.msrb.mxu1 %v4766_v46  ;;  %v5361_v27 = vld [vmem:[%s7904_s8 + $0x2c4] sm:$0xf]  ;;  %v4639_v23 = vld [vmem:[%s7904_s8 + $0x130] sm:$0xf0] }
 0x4c0   :  { %3353 = vmatpush.bf16.msrb.mxu2 %v4894_v44  ;;  %v5317_v46 = vld [vmem:[%s7904_s8 + $0x164] sm:$0xf] }
 0x4c1   :  { %v2262_v37 = vmax.f32 %v2258_v30, 0.0  ;;  %3328 = vmatpush.bf16.msrb.mxu0 %v4622_v54  ;;  %v4831_v30 = vld [vmem:[%s7904_s8 + $0x2b0] sm:$0xf0]  ;;  %v4674_v43 = vor.u32 %v5317_v46, %v4671_v31  ;;  %v5345_v44 = vld [vmem:[%s7904_s8 + $0x244] sm:$0xf] }
 0x4c2   :  { %v4834_v58 = vor.u32 %v5357_v12, %v4831_v30  ;;  %v4895_v12 = vld [vmem:[%s7904_s8 + $0x330] sm:$0xf0] }
 0x4c3   :  { %3341 = vmatpush.bf16.msrb.mxu1 %v4750_v10  ;;  %v5309_v10 = vld [vmem:[%s7904_s8 + $0x124] sm:$0xf]  ;;  %v4898_v30 = vor.u32 %v5373_v32, %v4895_v12  ;;  %v5356_v12 = vld [vmem:[%s7904_s8 + $0x294] sm:$0xf0] }
 0x4c4   :  { %v2245_v18 = vpop.f32.mrf.mxu2  ;;  %v4642_v49 = vor.u32 %v5309_v10, %v4639_v23 }
 0x4c5   :  { %v2251_v1 = vadd.f32 %v2245_v18, %v2096_v21  ;;  %v5393_v21 = vld [vmem:[%s7904_s8 + $0x3c4] sm:$0xf]  ;;  %v4850_v18 = vor.u32 %v5361_v27, %v4847_v2  ;;  %v4530_v2 = vor.u32 %v5281_v0, %v4527_v50  ;;  %v4837_v0 = vld [vmem:[%s7904_s8 + $0x2a8] sm:$0xf]  ;;  %v5360_v50 = vld [vmem:[%s7904_s8 + $0x2b4] sm:$0xf0] }
 0x4c6   :  { %v4978_v33 = vor.u32 %v5393_v21, %v4975_v38  ;;  %v5377_v27 = vld [vmem:[%s7904_s8 + $0x344] sm:$0xf]  ;;  %v4751_v21 = vld [vmem:[%s7904_s8 + $0x210] sm:$0xf0] }
 0x4c7   :  { %v2259_v62 = vadd.f32 %v6978_v56, %v2251_v1  ;;  %v5279_v56 = vld [vmem:[%s7904_s8 + $0x2c] sm:$0xf0]  ;;  %v4594_v1 = vor.u32 %v5297_v22, %v4591_v25  ;;  %v5337_v22 = vld [vmem:[%s7904_s8 + $0x204] sm:$0xf] }
 0x4c8   :  { %v4510_v5 = vor.u32 %v5279_v56, %v4509_v11  ;;  %v4962_v11 = vor.u32 %v5389_v20, %v4959_v41  ;;  %v5289_v56 = vld [vmem:[%s7904_s8 + $0x84] sm:$0xf]  ;;  %v4754_v38 = vor.u32 %v5337_v22, %v4751_v21  ;;  %v4879_v20 = vld [vmem:[%s7904_s8 + $0x310] sm:$0xf0]  ;;  %v4981_v22 = vld [vmem:[%s7904_s8 + $0x3c8] sm:$0xf]  ;;  %v4838_v21 = vor.u32 %v5360_v50, %v4837_v0 }
 0x4c9   :  { %v2263_v9 = vmax.f32 %v2259_v62, 0.0  ;;  %v5321_v62 = vld [vmem:[%s7904_s8 + $0x184] sm:$0xf]  ;;  %v4882_v41 = vor.u32 %v5369_v8, %v4879_v20  ;;  %v4965_v20 = vld [vmem:[%s7904_s8 + $0x3a8] sm:$0xf] }
 0x4ca   :  { %3314 = vmatpush.bf16.msra.mxu3 %v4510_v5  ;;  %v4690_v48 = vor.u32 %v5321_v62, %v4687_v45  ;;  %v4655_v5 = vld [vmem:[%s7904_s8 + $0x150] sm:$0xf0]  ;;  %v5308_v0 = vld [vmem:[%s7904_s8 + $0x114] sm:$0xf0]  ;;  %v4757_v50 = vld [vmem:[%s7904_s8 + $0x208] sm:$0xf] }
 0x4cb   :  { %v2265_v14 = vmax.f32 %v2262_v37, %v2263_v9  ;;  %v4559_v37 = vld [vmem:[%s7904_s8 + $0x90] sm:$0xf0]  ;;  %v5385_v9 = vld [vmem:[%s7904_s8 + $0x384] sm:$0xf]  ;;  %v4658_v24 = vor.u32 %v5313_v6, %v4655_v5  ;;  %v4853_v6 = vld [vmem:[%s7904_s8 + $0x2c8] sm:$0xf] }
 0x4cc   :  { %v4562_v42 = vor.u32 %v5289_v56, %v4559_v37  ;;  %v4946_v59 = vor.u32 %v5385_v9, %v4943_v13  ;;  %v4869_v37 = vld [vmem:[%s7904_s8 + $0x2e8] sm:$0xf]  ;;  %v5368_v9 = vld [vmem:[%s7904_s8 + $0x2f4] sm:$0xf0] }
 0x4cd   :  { %v2266_v55 = vmax.f32 %v7058_v60, %v2265_v14  ;;  %v5371_v60 = vld [vmem:[%s7904_s8 + $0x30c] sm:$0xf0]  ;;  %v5349_v14 = vld [vmem:[%s7904_s8 + $0x264] sm:$0xf]  ;;  %v5364_v5 = vld [vmem:[%s7904_s8 + $0x2d4] sm:$0xf0] }
 0x4ce   :  { %v4878_v17 = vor.u32 %v5371_v60, %v4877_v52  ;;  %3315 = vmatpush.bf16.msra.mxu3 %v4494_v51  ;;  %v4802_v28 = vor.u32 %v5349_v14, %v4799_v63  ;;  %v4543_v52 = vld [vmem:[%s7904_s8 + $0x70] sm:$0xf0]  ;;  %v5381_v60 = vld [vmem:[%s7904_s8 + $0x364] sm:$0xf]  ;;  %v4870_v63 = vor.u32 %v5368_v9, %v4869_v37  ;;  %v4854_v23 = vor.u32 %v5364_v5, %v4853_v6  ;;  %v4949_v9 = vld [vmem:[%s7904_s8 + $0x388] sm:$0xf] }
 0x4cf   :  { %v2267_v36 = vpack.c.bf16 %v2266_v55, %v2266_v55  ;;  %v4783_v55 = vld [vmem:[%s7904_s8 + $0x250] sm:$0xf0]  ;;  %v4546_v53 = vor.u32 %v5285_v35, %v4543_v52  ;;  %v5288_v6 = vld [vmem:[%s7904_s8 + $0x74] sm:$0xf0] }
 0x4d0   :  { %3354 = vmatpush.bf16.msrb.mxu2 %v4878_v17  ;;  %v4786_v47 = vor.u32 %v5345_v44, %v4783_v55  ;;  %v4911_v51 = vld [vmem:[%s7904_s8 + $0x350] sm:$0xf0] }
 0x4d1   :  { %2478 = vmatmul.bf16.vlgmr.msrb.gmra.mxu3 %v2267_v36  ;;  %2491 = vmatmul.bf16.vlgmr.msra.gmra.mxu0 %v2267_v36  ;;  %v4914_v17 = vor.u32 %v5377_v27, %v4911_v51  ;;  %v4597_v51 = vld [vmem:[%s7904_s8 + $0xc8] sm:$0xf] }
 0x4d2   :  { %2504 = vmatmul.bf16.vlgmr.msra.gmra.mxu1 %v2267_v36  ;;  %2517 = vmatmul.bf16.vlgmr.msra.gmra.mxu2 %v2267_v36  ;;  %v4927_v36 = vld [vmem:[%s7904_s8 + $0x370] sm:$0xf0] }
 0x4d3   :  { %3373 = vmatpush.bf16.msra.mxu0 %v4738_v3  ;;  %3386 = vmatpush.bf16.msra.mxu1 %v4866_v19  ;;  %v4930_v54 = vor.u32 %v5381_v60, %v4927_v36  ;;  %v4767_v3 = vld [vmem:[%s7904_s8 + $0x230] sm:$0xf0]  ;;  %v5400_v36 = vld [vmem:[%s7904_s8 + $0x3f4] sm:$0xf0] }
 0x4d4   :  { %3360 = vmatpush.bf16.msrb.mxu3 %v4610_v16  ;;  %3399 = vmatpush.bf16.msra.mxu2 %v4994_v61  ;;  %v4770_v19 = vor.u32 %v5341_v40, %v4767_v3  ;;  %v5305_v16 = vld [vmem:[%s7904_s8 + $0x104] sm:$0xf]  ;;  %v4623_v61 = vld [vmem:[%s7904_s8 + $0x110] sm:$0xf0]  ;;  %v5328_v40 = vld [vmem:[%s7904_s8 + $0x1b4] sm:$0xf0] }
 0x4d5   :  { %v4626_v25 = vor.u32 %v5305_v16, %v4623_v61 }
 0x4d7   :  { %3374 = vmatpush.bf16.msra.mxu0 %v4722_v26  ;;  %3387 = vmatpush.bf16.msra.mxu1 %v4850_v18  ;;  %v5277_v26 = vld [vmem:[%s7904_s8 + $0x24] sm:$0xf]  ;;  %v4511_v18 = vld [vmem:[%s7904_s8 + $0x30] sm:$0xf0] }
 0x4d8   :  { %3361 = vmatpush.bf16.msrb.mxu3 %v4594_v1  ;;  %3400 = vmatpush.bf16.msra.mxu2 %v4978_v33  ;;  %v4514_v39 = vor.u32 %v5277_v26, %v4511_v18  ;;  %v5273_v1 = vld [vmem:[%s7904_s8 + $0x4] sm:$0xf]  ;;  %v4495_v33 = vld [vmem:[%s7904_s8 + $0x10] sm:$0xf0]  ;;  %v5324_v26 = vld [vmem:[%s7904_s8 + $0x194] sm:$0xf0] }
 0x4d9   :  { %v4498_v7 = vor.u32 %v5273_v1, %v4495_v33  ;;  %v4581_v33 = vld [vmem:[%s7904_s8 + $0xa8] sm:$0xf] }
 0x4db   :  { %3375 = vmatpush.bf16.msra.mxu0 %v4706_v15  ;;  %3388 = vmatpush.bf16.msra.mxu1 %v4834_v58  ;;  %v2300_v15 = vld [vmem:[%s7903_s7] sm:$0xf]  ;;  %s5463_s7 = smov [#allocation2]  }
 0x4dc   :  { %3362 = vmatpush.bf16.msrb.mxu3 %v4578_v4  ;;  %3401 = vmatpush.bf16.msra.mxu2 %v4962_v11  ;;  %v2303_v58 = vperm.slane %v2300_v15, 1  ;;  %v2304_v62 = vperm.slane %v2300_v15, 2  ;;  %v4741_v4 = vld [vmem:[%s7904_s8 + $0x1e8] sm:$0xf]  ;;  %v5336_v11 = vld [vmem:[%s7904_s8 + $0x1f4] sm:$0xf0] }
 0x4dd   :  { %v2305_v46 = vperm.slane %v2300_v15, 3  ;;  %v4742_v31 = vor.u32 %v5336_v11, %v4741_v4  ;;  %v4565_v11 = vld [vmem:[%s7904_s8 + $0x88] sm:$0xf]  ;;  %s3842_s14 = sshll.u32 %s5463_s7, 4  ;;  %s3843_s14 = int_to_ptr.vmem [resolvable:$true] %s3842_s14 }
 0x4df   :  { %3376 = vmatpush.bf16.msra.mxu0 %v4690_v48  ;;  %3389 = vmatpush.bf16.msra.mxu1 %v4818_v34  ;;  %v2302_v48 = vperm.slane %v2300_v15, 0 }
 0x4e0   :  { %3363 = vmatpush.bf16.msrb.mxu3 %v4562_v42  ;;  %3402 = vmatpush.bf16.msra.mxu2 %v4946_v59  ;;  %v4725_v42 = vld [vmem:[%s7904_s8 + $0x1c8] sm:$0xf]  ;;  %v5332_v59 = vld [vmem:[%s7904_s8 + $0x1d4] sm:$0xf0] }
 0x4e1   :  { %v4726_v60 = vor.u32 %v5332_v59, %v4725_v42  ;;  %v5348_v42 = vld [vmem:[%s7904_s8 + $0x254] sm:$0xf0] }
 0x4e3   :  { %3377 = vmatpush.bf16.msra.mxu0 %v4674_v43  ;;  %3390 = vmatpush.bf16.msra.mxu1 %v4802_v28 }
 0x4e4   :  { %3364 = vmatpush.bf16.msrb.mxu3 %v4546_v53  ;;  %3403 = vmatpush.bf16.msra.mxu2 %v4930_v54  ;;  %v4997_v53 = vld [vmem:[%s7904_s8 + $0x3e8] sm:$0xf] }
 0x4e7   :  { %3378 = vmatpush.bf16.msra.mxu0 %v4658_v24  ;;  %3391 = vmatpush.bf16.msra.mxu1 %v4786_v47  ;;  %v4613_v24 = vld [vmem:[%s7904_s8 + $0xe8] sm:$0xf]  ;;  %v5304_v47 = vld [vmem:[%s7904_s8 + $0xf4] sm:$0xf0] }
 0x4e8   :  { %3365 = vmatpush.bf16.msrb.mxu3 %v4530_v2  ;;  %3404 = vmatpush.bf16.msra.mxu2 %v4914_v17  ;;  %v4998_v2 = vor.u32 %v5400_v36, %v4997_v53  ;;  %v5300_v17 = vld [vmem:[%s7904_s8 + $0xd4] sm:$0xf0] }
 0x4e9   :  { %v4598_v32 = vor.u32 %v5300_v17, %v4597_v51  ;;  %v5344_v53 = vld [vmem:[%s7904_s8 + $0x234] sm:$0xf0]  ;;  %v5334_v17 = vld [vmem:[%s7904_s8 + $0x1ec] sm:$0xf] }
 0x4eb   :  { %3379 = vmatpush.bf16.msra.mxu0 %v4642_v49  ;;  %3392 = vmatpush.bf16.msra.mxu1 %v4770_v19  ;;  %v4709_v49 = vld [vmem:[%s7904_s8 + $0x1a8] sm:$0xf]  ;;  %v4614_v19 = vor.u32 %v5304_v47, %v4613_v24 }
 0x4ec   :  { %3366 = vmatpush.bf16.msrb.mxu3 %v4514_v39  ;;  %3405 = vmatpush.bf16.msra.mxu2 %v4898_v30  ;;  %v4710_v61 = vor.u32 %v5328_v40, %v4709_v49  ;;  %v4821_v39 = vld [vmem:[%s7904_s8 + $0x288] sm:$0xf]  ;;  %v5380_v40 = vld [vmem:[%s7904_s8 + $0x354] sm:$0xf0] }
 0x4ed   :  { %v4822_v15 = vor.u32 %v5356_v12, %v4821_v39  ;;  %v4645_v47 = vld [vmem:[%s7904_s8 + $0x128] sm:$0xf]  ;;  %v5376_v39 = vld [vmem:[%s7904_s8 + $0x334] sm:$0xf0] }
 0x4ee   :  { %v4917_v49 = vld [vmem:[%s7904_s8 + $0x348] sm:$0xf] }
 0x4ef   :  { %3380 = vmatpush.bf16.msra.mxu0 %v4626_v25  ;;  %3393 = vmatpush.bf16.msra.mxu1 %v4754_v38  ;;  %v5396_v25 = vld [vmem:[%s7904_s8 + $0x3d4] sm:$0xf0]  ;;  %v4693_v38 = vld [vmem:[%s7904_s8 + $0x188] sm:$0xf] }
 0x4f0   :  { %3367 = vmatpush.bf16.msrb.mxu3 %v4498_v7  ;;  %3406 = vmatpush.bf16.msra.mxu2 %v4882_v41  ;;  %v4982_v1 = vor.u32 %v5396_v25, %v4981_v22  ;;  %v5296_v7 = vld [vmem:[%s7904_s8 + $0xb4] sm:$0xf0]  ;;  %v4694_v8 = vor.u32 %v5324_v26, %v4693_v38  ;;  %v5366_v22 = vld [vmem:[%s7904_s8 + $0x2ec] sm:$0xf]  ;;  %v4918_v25 = vor.u32 %v5380_v40, %v4917_v49  ;;  %v4517_v38 = vld [vmem:[%s7904_s8 + $0x28] sm:$0xf] }
 0x4f1   :  { %v5392_v41 = vld [vmem:[%s7904_s8 + $0x3b4] sm:$0xf0]  ;;  %v5390_v49 = vld [vmem:[%s7904_s8 + $0x3ac] sm:$0xf]  ;;  %v4967_v40 = vld [vmem:[%s7904_s8 + $0x3b8] sm:$0xf0] }
 0x4f2   :  { %v4966_v4 = vor.u32 %v5392_v41, %v4965_v20  ;;  %v5280_v26 = vld [vmem:[%s7904_s8 + $0x34] sm:$0xf0]  ;;  %v5362_v20 = vld [vmem:[%s7904_s8 + $0x2cc] sm:$0xf]  ;;  %v4855_v41 = vld [vmem:[%s7904_s8 + $0x2d8] sm:$0xf0] }
 0x54e   :  { %v2492_v45 = vpop.f32.mrf.mxu0 }
 0x54f   :  { %v2493_v29 = vadd.f32 %v2492_v45, %v2303_v58  ;;  %v2505_v57 = vpop.f32.mrf.mxu1  ;;  %v4677_v58 = vld [vmem:[%s7904_s8 + $0x168] sm:$0xf]  ;;  %v4582_v45 = vor.u32 %v5296_v7, %v4581_v33  ;;  %v4518_v7 = vor.u32 %v5280_v26, %v4517_v38  ;;  %v4951_v38 = vld [vmem:[%s7904_s8 + $0x398] sm:$0xf0] }
 0x550   :  { %v2506_v56 = vadd.f32 %v2505_v57, %v2304_v62  ;;  %v5320_v62 = vld [vmem:[%s7904_s8 + $0x174] sm:$0xf0] }
 0x551   :  { %v2523_v13 = vmax.f32 %v2493_v29, 0.0  ;;  %v4805_v29 = vld [vmem:[%s7904_s8 + $0x268] sm:$0xf]  ;;  %v5352_v57 = vld [vmem:[%s7904_s8 + $0x274] sm:$0xf0]  ;;  %v4678_v37 = vor.u32 %v5320_v62, %v4677_v58 }
 0x552   :  { %v2524_v34 = vmax.f32 %v2506_v56, 0.0  ;;  %v5292_v56 = vld [vmem:[%s7904_s8 + $0x94] sm:$0xf0]  ;;  %v4501_v58 = vld [vmem:[%s7904_s8 + $0x8] sm:$0xf] }
 0x553   :  { %v7389_v14 = vpack.c.bf16 %v2523_v13, %v2523_v13  ;;  %v5388_v13 = vld [vmem:[%s7904_s8 + $0x394] sm:$0xf0] }
 0x554   :  { %v7397_v43 = vpack.c.bf16 %v2524_v34, %v2524_v34  ;;  %v2479_v28 = vpop.f32.mrf.mxu3  ;;  %v4661_v34 = vld [vmem:[%s7904_s8 + $0x148] sm:$0xf]  ;;  %v4950_v59 = vor.u32 %v5388_v13, %v4949_v9  ;;  %v5276_v62 = vld [vmem:[%s7904_s8 + $0x14] sm:$0xf0]  ;;  %v4858_v9 = vor.u32 %v5362_v20, %v4855_v41  ;;  %v5382_v20 = vld [vmem:[%s7904_s8 + $0x36c] sm:$0xf] }
 0x555   :  { %v2480_v44 = vadd.f32 %v2479_v28, %v2302_v48  ;;  %v2518_v55 = vpop.f32.mrf.mxu2  ;;  %3329 = vmatmul.bf16.vlgmr.msrb.gmra.mxu0 %v7389_v14  ;;  %v4806_v48 = vor.u32 %v5352_v57, %v4805_v29  ;;  %v4549_v28 = vld [vmem:[%s7904_s8 + $0x68] sm:$0xf]  ;;  %v5372_v29 = vld [vmem:[%s7904_s8 + $0x314] sm:$0xf0]  ;;  %v5302_v57 = vld [vmem:[%s7904_s8 + $0xec] sm:$0xf]  ;;  %v4502_v13 = vor.u32 %v5276_v62, %v4501_v58 }
 0x556   :  { %v2519_v35 = vadd.f32 %v2518_v55, %v2305_v46  ;;  %3342 = vmatmul.bf16.vlgmr.msrb.gmra.mxu1 %v7397_v43  ;;  %3425 = vmatpush.bf16.msrb.mxu0 %v4742_v31  ;;  %v2494_v52 = vpop.f32.mrf.mxu0  ;;  %v5316_v46 = vld [vmem:[%s7904_s8 + $0x154] sm:$0xf0]  ;;  %v4566_v31 = vor.u32 %v5292_v56, %v4565_v11  ;;  %v5398_v56 = vld [vmem:[%s7904_s8 + $0x3ec] sm:$0xf]  ;;  %v4935_v41 = vld [vmem:[%s7904_s8 + $0x378] sm:$0xf0] }
 0x557   :  { %v2522_v54 = vmax.f32 %v2480_v44, 0.0  ;;  %3438 = vmatpush.bf16.msrb.mxu1 %v4870_v63  ;;  %v2507_v10 = vpop.f32.mrf.mxu1  ;;  %v4789_v63 = vld [vmem:[%s7904_s8 + $0x248] sm:$0xf]  ;;  %v4662_v5 = vor.u32 %v5316_v46, %v4661_v34  ;;  %v5384_v55 = vld [vmem:[%s7904_s8 + $0x374] sm:$0xf0]  ;;  %v4550_v52 = vor.u32 %v5288_v6, %v4549_v28 }
 0x558   :  { %v2525_v3 = vmax.f32 %v2519_v35, 0.0  ;;  %v4933_v44 = vld [vmem:[%s7904_s8 + $0x368] sm:$0xf]  ;;  %v4790_v24 = vor.u32 %v5348_v42, %v4789_v63  ;;  %v5312_v35 = vld [vmem:[%s7904_s8 + $0x134] sm:$0xf0] }
 0x559   :  { %v7431_v27 = vpack.c.bf16 %v2522_v54, %v2522_v54  ;;  %v4934_v36 = vor.u32 %v5384_v55, %v4933_v44  ;;  %v4533_v54 = vld [vmem:[%s7904_s8 + $0x48] sm:$0xf]  ;;  %v5284_v10 = vld [vmem:[%s7904_s8 + $0x54] sm:$0xf0]  ;;  %v4711_v34 = vld [vmem:[%s7904_s8 + $0x1b8] sm:$0xf0] }
 0x55a   :  { %v7439_v16 = vpack.c.bf16 %v2525_v3, %v2525_v3  ;;  %3426 = vmatpush.bf16.msrb.mxu0 %v4726_v60  ;;  %v4773_v60 = vld [vmem:[%s7904_s8 + $0x228] sm:$0xf]  ;;  %v4534_v51 = vor.u32 %v5284_v10, %v4533_v54  ;;  %v5358_v63 = vld [vmem:[%s7904_s8 + $0x2ac] sm:$0xf]  ;;  %v4839_v42 = vld [vmem:[%s7904_s8 + $0x2b8] sm:$0xf0] }
 0x55b   :  { %3439 = vmatpush.bf16.msrb.mxu1 %v4854_v23  ;;  %3316 = vmatmul.bf16.vlgmr.msra.gmra.mxu3 %v7431_v27  ;;  %v4646_v23 = vor.u32 %v5312_v35, %v4645_v47  ;;  %v4629_v3 = vld [vmem:[%s7904_s8 + $0x108] sm:$0xf]  ;;  %v5298_v28 = vld [vmem:[%s7904_s8 + $0xcc] sm:$0xf]  ;;  %v4599_v6 = vld [vmem:[%s7904_s8 + $0xd8] sm:$0xf0] }
 0x55c   :  { %3355 = vmatmul.bf16.vlgmr.msrb.gmra.mxu2 %v7439_v16  ;;  %3412 = vmatpush.bf16.msra.mxu3 %v4614_v19  ;;  %v2481_v18 = vpop.f32.mrf.mxu3  ;;  %v4774_v19 = vor.u32 %v5344_v53, %v4773_v60  ;;  %v5394_v44 = vld [vmem:[%s7904_s8 + $0x3cc] sm:$0xf]  ;;  %v4983_v55 = vld [vmem:[%s7904_s8 + $0x3d8] sm:$0xf0] }
 0x55d   :  { %3451 = vmatpush.bf16.msrb.mxu2 %v4998_v2  ;;  %v2520_v30 = vpop.f32.mrf.mxu2  ;;  %v5340_v2 = vld [vmem:[%s7904_s8 + $0x214] sm:$0xf0]  ;;  %v4630_v18 = vor.u32 %v5308_v0, %v4629_v3  ;;  %v5322_v47 = vld [vmem:[%s7904_s8 + $0x18c] sm:$0xf]  ;;  %v4695_v35 = vld [vmem:[%s7904_s8 + $0x198] sm:$0xf0] }
 0x55e   :  { %3427 = vmatpush.bf16.msrb.mxu0 %v4710_v61  ;;  %v4743_v61 = vld [vmem:[%s7904_s8 + $0x1f8] sm:$0xf0]  ;;  %v4758_v12 = vor.u32 %v5340_v2, %v4757_v50  ;;  %v5354_v60 = vld [vmem:[%s7904_s8 + $0x28c] sm:$0xf] }
 0x55f   :  { %3440 = vmatpush.bf16.msrb.mxu1 %v4838_v21  ;;  %v4871_v21 = vld [vmem:[%s7904_s8 + $0x2f8] sm:$0xf0]  ;;  %v4746_v30 = vor.u32 %v5334_v17, %v4743_v61  ;;  %v5294_v54 = vld [vmem:[%s7904_s8 + $0xac] sm:$0xf]  ;;  %v4970_v17 = vor.u32 %v5390_v49, %v4967_v40  ;;  %v5407_v49 = vld [vmem:[%s7906_s10 + $0x30] sm:$0xff] }
 0x560   :  { %3413 = vmatpush.bf16.msra.mxu3 %v4598_v32  ;;  %v4901_v32 = vld [vmem:[%s7904_s8 + $0x328] sm:$0xf]  ;;  %v4874_v33 = vor.u32 %v5366_v22, %v4871_v21  ;;  %v4823_v53 = vld [vmem:[%s7904_s8 + $0x298] sm:$0xf0]  ;;  %v5350_v2 = vld [vmem:[%s7904_s8 + $0x26c] sm:$0xf] }
 0x561   :  { %3452 = vmatpush.bf16.msrb.mxu2 %v4982_v1  ;;  %v5330_v1 = vld [vmem:[%s7904_s8 + $0x1cc] sm:$0xf]  ;;  %v4583_v10 = vld [vmem:[%s7904_s8 + $0xb8] sm:$0xf0]  ;;  %v4826_v3 = vor.u32 %v5354_v60, %v4823_v53 }
 0x562   :  { %3428 = vmatpush.bf16.msrb.mxu0 %v4694_v8  ;;  %v4727_v8 = vld [vmem:[%s7904_s8 + $0x1d8] sm:$0xf0]  ;;  %v4586_v50 = vor.u32 %v5294_v54, %v4583_v10  ;;  %v5290_v61 = vld [vmem:[%s7904_s8 + $0x8c] sm:$0xf] }
 0x563   :  { %3441 = vmatpush.bf16.msrb.mxu1 %v4822_v15  ;;  %v4902_v15 = vor.u32 %v5376_v39, %v4901_v32  ;;  %v4730_v11 = vor.u32 %v5330_v1, %v4727_v8  ;;  %v4679_v0 = vld [vmem:[%s7904_s8 + $0x178] sm:$0xf0]  ;;  %v5386_v21 = vld [vmem:[%s7904_s8 + $0x38c] sm:$0xf] }
 0x564   :  { %3414 = vmatpush.bf16.msra.mxu3 %v4582_v45  ;;  %v4885_v45 = vld [vmem:[%s7904_s8 + $0x308] sm:$0xf]  ;;  %v4567_v22 = vld [vmem:[%s7904_s8 + $0x98] sm:$0xf0]  ;;  %v4954_v1 = vor.u32 %v5386_v21, %v4951_v38  ;;  %v5310_v58 = vld [vmem:[%s7904_s8 + $0x12c] sm:$0xf] }
 0x565   :  { %3453 = vmatpush.bf16.msrb.mxu2 %v4966_v4  ;;  %3381 = vmatmul.bf16.vlgmr.msra.gmra.mxu0 %v7389_v14  ;;  %v4615_v4 = vld [vmem:[%s7904_s8 + $0xf8] sm:$0xf0]  ;;  %v4886_v46 = vor.u32 %v5372_v29, %v4885_v45  ;;  %v4570_v39 = vor.u32 %v5290_v61, %v4567_v22  ;;  %v5342_v29 = vld [vmem:[%s7904_s8 + $0x22c] sm:$0xf]  ;;  %v5411_v61 = vld [vmem:[%s7906_s10 + $0x50] sm:$0xff] }
 0x566   :  { %3394 = vmatmul.bf16.vlgmr.msra.gmra.mxu1 %v7397_v43  ;;  %3429 = vmatpush.bf16.msrb.mxu0 %v4678_v37  ;;  %v4999_v37 = vld [vmem:[%s7904_s8 + $0x3f8] sm:$0xf0]  ;;  %v5370_v53 = vld [vmem:[%s7904_s8 + $0x30c] sm:$0xf]  ;;  %v5423_v22 = vld [vmem:[%s7906_s10 + $0xb0] sm:$0xff] }
 0x567   :  { %3442 = vmatpush.bf16.msrb.mxu1 %v4806_v48  ;;  %v5326_v48 = vld [vmem:[%s7904_s8 + $0x1ac] sm:$0xf]  ;;  %v4663_v32 = vld [vmem:[%s7904_s8 + $0x158] sm:$0xf0] }
 0x568   :  { %3415 = vmatpush.bf16.msra.mxu3 %v4566_v31  ;;  %v4618_v31 = vor.u32 %v5302_v57, %v4615_v4  ;;  %v4647_v62 = vld [vmem:[%s7904_s8 + $0x138] sm:$0xf0]  ;;  %v4938_v4 = vor.u32 %v5382_v20, %v4935_v41  ;;  %v5410_v38 = vld [vmem:[%s7906_s10 + $0x48] sm:$0xff]  ;;  %v5419_v41 = vld [vmem:[%s7906_s10 + $0x90] sm:$0xff] }
 0x569   :  { %3454 = vmatpush.bf16.msrb.mxu2 %v4950_v59  ;;  %v5002_v59 = vor.u32 %v5398_v56, %v4999_v37  ;;  %v4775_v57 = vld [vmem:[%s7904_s8 + $0x238] sm:$0xf0]  ;;  %v4650_v37 = vor.u32 %v5310_v58, %v4647_v62 }
 0x56a   :  { %3430 = vmatpush.bf16.msrb.mxu0 %v4662_v5  ;;  %v4714_v5 = vor.u32 %v5326_v48, %v4711_v34  ;;  %v4535_v56 = vld [vmem:[%s7904_s8 + $0x58] sm:$0xf0]  ;;  %v4778_v48 = vor.u32 %v5342_v29, %v4775_v57  ;;  %v5306_v34 = vld [vmem:[%s7904_s8 + $0x10c] sm:$0xf] }
 0x56b   :  { %3443 = vmatpush.bf16.msrb.mxu1 %v4790_v24  ;;  %3368 = vmatmul.bf16.vlgmr.msrb.gmra.mxu3 %v7431_v27  ;;  %v4842_v24 = vor.u32 %v5358_v63, %v4839_v42  ;;  %v5338_v63 = vld [vmem:[%s7904_s8 + $0x20c] sm:$0xf]  ;;  %v4759_v42 = vld [vmem:[%s7904_s8 + $0x218] sm:$0xf0] }
 0x56c   :  { %3407 = vmatmul.bf16.vlgmr.msra.gmra.mxu2 %v7439_v16  ;;  %3416 = vmatpush.bf16.msra.mxu3 %v4550_v52  ;;  %v4602_v52 = vor.u32 %v5298_v28, %v4599_v6  ;;  %v5278_v28 = vld [vmem:[%s7904_s8 + $0x2c] sm:$0xf]  ;;  %v4519_v6 = vld [vmem:[%s7904_s8 + $0x38] sm:$0xf0] }
 0x56d   :  { %3455 = vmatpush.bf16.msrb.mxu2 %v4934_v36  ;;  %v4986_v36 = vor.u32 %v5394_v44, %v4983_v55  ;;  %v5374_v44 = vld [vmem:[%s7904_s8 + $0x32c] sm:$0xf]  ;;  %v4903_v55 = vld [vmem:[%s7904_s8 + $0x338] sm:$0xf0] }
 0x56e   :  { %3431 = vmatpush.bf16.msrb.mxu0 %v4646_v23  ;;  %v4698_v23 = vor.u32 %v5322_v47, %v4695_v35  ;;  %v4522_v47 = vor.u32 %v5278_v28, %v4519_v6  ;;  %v4906_v35 = vor.u32 %v5374_v44, %v4903_v55  ;;  %v4503_v60 = vld [vmem:[%s7904_s8 + $0x18] sm:$0xf0]  ;;  %v5418_v29 = vld [vmem:[%s7906_s10 + $0x88] sm:$0xff]  ;;  %v5429_v44 = vld [vmem:[%s7906_s10 + $0xe0] sm:$0xff] }
 0x56f   :  { %3444 = vmatpush.bf16.msrb.mxu1 %v4774_v19  ;;  %v5318_v19 = vld [vmem:[%s7904_s8 + $0x16c] sm:$0xf]  ;;  %v5404_v40 = vld [vmem:[%s7906_s10 + $0x18] sm:$0xff] }
 0x570   :  { %3417 = vmatpush.bf16.msra.mxu3 %v4534_v51  ;;  %v4807_v51 = vld [vmem:[%s7904_s8 + $0x278] sm:$0xf0]  ;;  %v5430_v28 = vld [vmem:[%s7906_s10 + $0xe8] sm:$0xff] }
 0x571   :  { %3456 = vmatpush.bf16.msrb.mxu2 %v4918_v25  ;;  %v4682_v25 = vor.u32 %v5318_v19, %v4679_v0  ;;  %v4810_v26 = vor.u32 %v5350_v2, %v4807_v51  ;;  %v5402_v19 = vld [vmem:[%s7906_s10 + $0x8] sm:$0xff]  ;;  %v5413_v2 = vld [vmem:[%s7906_s10 + $0x60] sm:$0xff]  ;;  %v5412_v51 = vld [vmem:[%s7906_s10 + $0x58] sm:$0xff] }
 0x572   :  { %3432 = vmatpush.bf16.msrb.mxu0 %v4630_v18  ;;  %v5314_v18 = vld [vmem:[%s7904_s8 + $0x14c] sm:$0xf] }
 0x573   :  { %3445 = vmatpush.bf16.msrb.mxu1 %v4758_v12  ;;  %v5346_v12 = vld [vmem:[%s7904_s8 + $0x24c] sm:$0xf]  ;;  %v4666_v8 = vor.u32 %v5314_v18, %v4663_v32  ;;  %v7842_v18 = vld [vmem:[%s7905_s9] sm:$0xf] }
 0x574   :  { %3418 = vmatpush.bf16.msra.mxu3 %v4518_v7  ;;  %v4551_v7 = vld [vmem:[%s7904_s8 + $0x78] sm:$0xf0]  ;;  %v5414_v0 = vld [vmem:[%s7906_s10 + $0x68] sm:$0xff]  ;;  %v5409_v32 = vld [vmem:[%s7906_s10 + $0x40] sm:$0xff] }
 0x575   :  { %3457 = vmatpush.bf16.msrb.mxu2 %v4902_v15  ;;  %3433 = vmatmul.bf16.vlgmr.msrb.gmra.mxu0 %v7389_v14 }
 0x576   :  { %3477 = vmatpush.bf16.msra.mxu0 %v4746_v30  ;;  %3446 = vmatmul.bf16.vlgmr.msrb.gmra.mxu1 %v7397_v43  ;;  %v4791_v30 = vld [vmem:[%s7904_s8 + $0x258] sm:$0xf0] }
 0x577   :  { %3490 = vmatpush.bf16.msra.mxu1 %v4874_v33  ;;  %v5286_v33 = vld [vmem:[%s7904_s8 + $0x6c] sm:$0xf]  ;;  %v4794_v15 = vor.u32 %v5346_v12, %v4791_v30 }
 0x578   :  { %3419 = vmatpush.bf16.msra.mxu3 %v4502_v13  ;;  %v4554_v45 = vor.u32 %v5286_v33, %v4551_v7  ;;  %v4919_v13 = vld [vmem:[%s7904_s8 + $0x358] sm:$0xf0] }
 0x579   :  { %3458 = vmatpush.bf16.msrb.mxu2 %v4886_v46  ;;  %v4631_v46 = vld [vmem:[%s7904_s8 + $0x118] sm:$0xf0] }
 0x57a   :  { %3478 = vmatpush.bf16.msra.mxu0 %v4730_v11  ;;  %v5282_v11 = vld [vmem:[%s7904_s8 + $0x4c] sm:$0xf]  ;;  %v5420_v33 = vld [vmem:[%s7906_s10 + $0x98] sm:$0xff] }
 0x57b   :  { %3491 = vmatpush.bf16.msra.mxu1 %v4858_v9  ;;  %3420 = vmatmul.bf16.vlgmr.msra.gmra.mxu3 %v7431_v27  ;;  %v5378_v9 = vld [vmem:[%s7904_s8 + $0x34c] sm:$0xf] }
 0x57c   :  { %3464 = vmatpush.bf16.msrb.mxu3 %v4618_v31  ;;  %3459 = vmatmul.bf16.vlgmr.msrb.gmra.mxu2 %v7439_v16  ;;  %v4538_v31 = vor.u32 %v5282_v11, %v4535_v56 }
 0x57d   :  { %3503 = vmatpush.bf16.msra.mxu2 %v5002_v59  ;;  %v4922_v59 = vor.u32 %v5378_v9, %v4919_v13  ;;  %v5432_v9 = vld [vmem:[%s7906_s10 + $0xf8] sm:$0xff] }
 0x57e   :  { %3479 = vmatpush.bf16.msra.mxu0 %v4714_v5  ;;  %v4634_v5 = vor.u32 %v5306_v34, %v4631_v46  ;;  %v2661_v46 = vperm.slane %v7842_v18, 1 }
 0x57f   :  { %3492 = vmatpush.bf16.msra.mxu1 %v4842_v24  ;;  %v4762_v24 = vor.u32 %v5338_v63, %v4759_v42 }
 0x580   :  { %3465 = vmatpush.bf16.msrb.mxu3 %v4602_v52  ;;  %v5274_v52 = vld [vmem:[%s7904_s8 + $0xc] sm:$0xf] }
 0x581   :  { %3504 = vmatpush.bf16.msra.mxu2 %v4986_v36  ;;  %v4887_v36 = vld [vmem:[%s7904_s8 + $0x318] sm:$0xf0]  ;;  %v4506_v54 = vor.u32 %v5274_v52, %v4503_v60 }
 0x582   :  { %3480 = vmatpush.bf16.msra.mxu0 %v4698_v23  ;;  %v4890_v10 = vor.u32 %v5370_v53, %v4887_v36  ;;  %v5408_v23 = vld [vmem:[%s7906_s10 + $0x38] sm:$0xff] }
 0x583   :  { %3493 = vmatpush.bf16.msra.mxu1 %v4826_v3  ;;  %v5415_v3 = vld [vmem:[%s7906_s10 + $0x70] sm:$0xff]  ;;  %v5428_v53 = vld [vmem:[%s7906_s10 + $0xd8] sm:$0xff] }
 0x584   :  { %3466 = vmatpush.bf16.msrb.mxu3 %v4586_v50  ;;  %v5401_v50 = vld [vmem:[%s7906_s10] sm:$0xff] }
 0x585   :  { %3505 = vmatpush.bf16.msra.mxu2 %v4970_v17  ;;  %v5424_v17 = vld [vmem:[%s7906_s10 + $0xb8] sm:$0xff] }
 0x586   :  { %3481 = vmatpush.bf16.msra.mxu0 %v4682_v25 }
 0x587   :  { %3494 = vmatpush.bf16.msra.mxu1 %v4810_v26  ;;  %v5422_v26 = vld [vmem:[%s7906_s10 + $0xa8] sm:$0xff] }
 0x588   :  { %3467 = vmatpush.bf16.msrb.mxu3 %v4570_v39  ;;  %v5421_v39 = vld [vmem:[%s7906_s10 + $0xa0] sm:$0xff] }
 0x589   :  { %3506 = vmatpush.bf16.msra.mxu2 %v4954_v1  ;;  %v2660_v1 = vperm.slane %v7842_v18, 0 }
 0x58a   :  { %3482 = vmatpush.bf16.msra.mxu0 %v4666_v8 }
 0x58b   :  { %3495 = vmatpush.bf16.msra.mxu1 %v4794_v15 }
 0x58c   :  { %3468 = vmatpush.bf16.msrb.mxu3 %v4554_v45 }
 0x58d   :  { %3507 = vmatpush.bf16.msra.mxu2 %v4938_v4 }
 0x58e   :  { %3483 = vmatpush.bf16.msra.mxu0 %v4650_v37  ;;  %v5417_v37 = vld [vmem:[%s7906_s10 + $0x80] sm:$0xff] }
 0x58f   :  { %3496 = vmatpush.bf16.msra.mxu1 %v4778_v48 }
 0x590   :  { %3469 = vmatpush.bf16.msrb.mxu3 %v4538_v31  ;;  %v5431_v31 = vld [vmem:[%s7906_s10 + $0xf0] sm:$0xff] }
 0x591   :  { %3508 = vmatpush.bf16.msra.mxu2 %v4922_v59 }
 0x592   :  { %3484 = vmatpush.bf16.msra.mxu0 %v4634_v5 }
 0x593   :  { %3497 = vmatpush.bf16.msra.mxu1 %v4762_v24 }
 0x594   :  { %3470 = vmatpush.bf16.msrb.mxu3 %v4522_v47 }
 0x595   :  { %3509 = vmatpush.bf16.msra.mxu2 %v4906_v35  ;;  %3485 = vmatmul.bf16.vlgmr.msra.gmra.mxu0 %v7389_v14  ;;  %v5406_v14 = vld [vmem:[%s7906_s10 + $0x28] sm:$0xff] }
 0x596   :  { %3498 = vmatmul.bf16.vlgmr.msra.gmra.mxu1 %v7397_v43  ;;  %v5405_v43 = vld [vmem:[%s7906_s10 + $0x20] sm:$0xff] }
 0x597   :  { %3810 = vmatpush.bf16.msrb.mxu1 %v5424_v17 }
 0x598   :  { %3471 = vmatpush.bf16.msrb.mxu3 %v4506_v54 }
 0x599   :  { %3510 = vmatpush.bf16.msra.mxu2 %v4890_v10 }
 0x59b   :  { %3472 = vmatmul.bf16.vlgmr.msrb.gmra.mxu3 %v7431_v27  ;;  %v5416_v27 = vld [vmem:[%s7906_s10 + $0x78] sm:$0xff]  ;;  %3811 = vmatpush.bf16.msrb.mxu1 %v5423_v22 }
 0x59c   :  { %3784 = vmatpush.bf16.msra.mxu3 %v5408_v23  ;;  %3511 = vmatmul.bf16.vlgmr.msra.gmra.mxu2 %v7439_v16  ;;  %v5403_v16 = vld [vmem:[%s7906_s10 + $0x10] sm:$0xff]  ;;  %v2662_v23 = vperm.slane %v7842_v18, 2 }
 0x59d   :  { %3797 = vmatpush.bf16.msrb.mxu0 %v5416_v27  ;;  %3823 = vmatpush.bf16.msrb.mxu2 %v5432_v9  ;;  %v5426_v27 = vld [vmem:[%s7906_s10 + $0xc8] sm:$0xff] }
 0x59f   :  { %3812 = vmatpush.bf16.msrb.mxu1 %v5422_v26 }
 0x5a0   :  { %3785 = vmatpush.bf16.msra.mxu3 %v5407_v49  ;;  %v5427_v49 = vld [vmem:[%s7906_s10 + $0xd0] sm:$0xff] }
 0x5a1   :  { %3798 = vmatpush.bf16.msrb.mxu0 %v5415_v3  ;;  %3824 = vmatpush.bf16.msrb.mxu2 %v5431_v31 }
 0x5a3   :  { %3813 = vmatpush.bf16.msrb.mxu1 %v5421_v39 }
 0x5a4   :  { %3786 = vmatpush.bf16.msra.mxu3 %v5406_v14 }
 0x5a5   :  { %3799 = vmatpush.bf16.msrb.mxu0 %v5414_v0  ;;  %3825 = vmatpush.bf16.msrb.mxu2 %v5430_v28 }
 0x5a7   :  { %3814 = vmatpush.bf16.msrb.mxu1 %v5420_v33 }
 0x5a8   :  { %3787 = vmatpush.bf16.msra.mxu3 %v5405_v43 }
 0x5a9   :  { %3800 = vmatpush.bf16.msrb.mxu0 %v5413_v2  ;;  %3826 = vmatpush.bf16.msrb.mxu2 %v5429_v44 }
 0x5ab   :  { %3815 = vmatpush.bf16.msrb.mxu1 %v5419_v41 }
 0x5ac   :  { %3788 = vmatpush.bf16.msra.mxu3 %v5404_v40 }
 0x5ad   :  { %3801 = vmatpush.bf16.msrb.mxu0 %v5412_v51  ;;  %3827 = vmatpush.bf16.msrb.mxu2 %v5428_v53 }
 0x5af   :  { %3816 = vmatpush.bf16.msrb.mxu1 %v5418_v29 }
 0x5b0   :  { %3789 = vmatpush.bf16.msra.mxu3 %v5403_v16 }
 0x5b1   :  { %3802 = vmatpush.bf16.msrb.mxu0 %v5411_v61  ;;  %3828 = vmatpush.bf16.msrb.mxu2 %v5427_v49 }
 0x5b3   :  { %3817 = vmatpush.bf16.msrb.mxu1 %v5417_v37 }
 0x5b4   :  { %3790 = vmatpush.bf16.msra.mxu3 %v5402_v19  ;;  %v5425_v19 = vld [vmem:[%s7906_s10 + $0xc0] sm:$0xff] }
 0x5b5   :  { %3803 = vmatpush.bf16.msrb.mxu0 %v5410_v38  ;;  %3829 = vmatpush.bf16.msrb.mxu2 %v5426_v27  ;;  %v2663_v38 = vperm.slane %v7842_v18, 3  ;;  %v5436_v18 = vld [vmem:[%s7907_s11] ss:$0 sm:$0xff] }
 0x5b8   :  { %3791 = vmatpush.bf16.msra.mxu3 %v5401_v50 }
 0x5b9   :  { %3804 = vmatpush.bf16.msrb.mxu0 %v5409_v32  ;;  %3830 = vmatpush.bf16.msrb.mxu2 %v5425_v19 }
 0x5d2   :  { %v3330_v25 = vpop.f32.mrf.mxu0 }
 0x5d3   :  { %v3343_v21 = vpop.f32.mrf.mxu1 }
 0x5da   :  { %v3332_v12 = vpop.f32.mrf.mxu0 }
 0x5db   :  { %v3345_v30 = vpop.f32.mrf.mxu1 }
 0x5de   :  { %v3317_v7 = vpop.f32.mrf.mxu3 }
 0x5df   :  { %v3318_v8 = vadd.f32 %v3317_v7, %v2660_v1  ;;  %v3356_v20 = vpop.f32.mrf.mxu2 }
 0x5e1   :  { %v3331_v15 = vadd.f32 %v3330_v25, %v3318_v8 }
 0x5e2   :  { %v3382_v58 = vpop.f32.mrf.mxu0 }
 0x5e3   :  { %v3344_v62 = vadd.f32 %v3343_v21, %v3331_v15  ;;  %v3395_v45 = vpop.f32.mrf.mxu1 }
 0x5e5   :  { %v3357_v57 = vadd.f32 %v3356_v20, %v3344_v62 }
 0x5e6   :  { %v3319_v4 = vpop.f32.mrf.mxu3 }
 0x5e7   :  { %v3516_v11 = vmax.f32 %v3357_v57, 0.0  ;;  %v3358_v56 = vpop.f32.mrf.mxu2 }
 0x5e9   :  { %v3520_v13 = vpack.c.bf16 %v3516_v11, %v3516_v11 }
 0x5ea   :  { %v3384_v48 = vpop.f32.mrf.mxu0 }
 0x5eb   :  { %v3397_v34 = vpop.f32.mrf.mxu1  ;;  %3792 = vmatmul.bf16.vlgmr.msra.gmra.mxu3 %v3520_v13 }
 0x5ee   :  { %v3369_v63 = vpop.f32.mrf.mxu3 }
 0x5ef   :  { %v3370_v42 = vadd.f32 %v3369_v63, %v2661_v46  ;;  %v3408_v59 = vpop.f32.mrf.mxu2 }
 0x5f1   :  { %v3383_v6 = vadd.f32 %v3382_v58, %v3370_v42 }
 0x5f2   :  { %v3434_v5 = vpop.f32.mrf.mxu0 }
 0x5f3   :  { %v3396_v55 = vadd.f32 %v3395_v45, %v3383_v6  ;;  %v3447_v24 = vpop.f32.mrf.mxu1 }
 0x5f5   :  { %v3409_v47 = vadd.f32 %v3408_v59, %v3396_v55 }
 0x5f6   :  { %v3371_v35 = vpop.f32.mrf.mxu3 }
 0x5f7   :  { %v3517_v52 = vmax.f32 %v3409_v47, 0.0  ;;  %v3410_v60 = vpop.f32.mrf.mxu2 }
 0x5f9   :  { %v3521_v36 = vpack.c.bf16 %v3517_v52, %v3517_v52 }
 0x5fa   :  { %v3436_v54 = vpop.f32.mrf.mxu0 }
 0x5fb   :  { %v3449_v10 = vpop.f32.mrf.mxu1  ;;  %3805 = vmatmul.bf16.vlgmr.msrb.gmra.mxu0 %v3521_v36 }
 0x5fe   :  { %v3421_v14 = vpop.f32.mrf.mxu3 }
 0x5ff   :  { %v3422_v43 = vadd.f32 %v3421_v14, %v2662_v23  ;;  %v3460_v40 = vpop.f32.mrf.mxu2 }
 0x601   :  { %v3435_v16 = vadd.f32 %v3434_v5, %v3422_v43 }
 0x603   :  { %v3448_v3 = vadd.f32 %v3447_v24, %v3435_v16 }
 0x605   :  { %v3461_v0 = vadd.f32 %v3460_v40, %v3448_v3 }
 0x606   :  { %v3423_v50 = vpop.f32.mrf.mxu3 }
 0x607   :  { %v3518_v2 = vmax.f32 %v3461_v0, 0.0  ;;  %v3462_v51 = vpop.f32.mrf.mxu2 }
 0x609   :  { %v3522_v17 = vpack.c.bf16 %v3518_v2, %v3518_v2 }
 0x60b   :  { %3818 = vmatmul.bf16.vlgmr.msrb.gmra.mxu1 %v3522_v17 }
 0x612   :  { %v3486_v61 = vpop.f32.mrf.mxu0 }
 0x613   :  { %v3499_v22 = vpop.f32.mrf.mxu1 }
 0x61a   :  { %v3488_v25 = vpop.f32.mrf.mxu0 }
 0x61b   :  { %v3501_v21 = vpop.f32.mrf.mxu1 }
 0x61e   :  { %v3473_v26 = vpop.f32.mrf.mxu3 }
 0x61f   :  { %v3474_v32 = vadd.f32 %v3473_v26, %v2663_v38  ;;  %v3512_v39 = vpop.f32.mrf.mxu2 }
 0x621   :  { %v3487_v12 = vadd.f32 %v3486_v61, %v3474_v32 }
 0x623   :  { %v3500_v30 = vadd.f32 %v3499_v22, %v3487_v12 }
 0x625   :  { %v3513_v1 = vadd.f32 %v3512_v39, %v3500_v30 }
 0x626   :  { %v3475_v33 = vpop.f32.mrf.mxu3 }
 0x627   :  { %v3519_v7 = vmax.f32 %v3513_v1, 0.0  ;;  %v3514_v8 = vpop.f32.mrf.mxu2 }
 0x629   :  { %v3523_v20 = vpack.c.bf16 %v3519_v7, %v3519_v7 }
 0x62b   :  { %3831 = vmatmul.bf16.vlgmr.msrb.gmra.mxu2 %v3523_v20 }
 0x66e   :  { %v3793_v41 = vpop.f32.mrf.mxu3 }
 0x66f   :  { %v3794_v57 = vadd.f32 %v5436_v18, %v3793_v41 }
 0x676   :  { %v3795_v15 = vpop.f32.mrf.mxu3 }
 0x678   :  { %v3806_v58 = vpop.f32.mrf.mxu0 }
 0x679   :  { %v3807_v4 = vadd.f32 %v3806_v58, %v3794_v57 }
 0x680   :  { %v3808_v62 = vpop.f32.mrf.mxu0 }
 0x688   :  { %v3819_v45 = vpop.f32.mrf.mxu1 }
 0x689   :  { %v3820_v11 = vadd.f32 %v3819_v45, %v3807_v4 }
 0x690   :  { %v3821_v29 = vpop.f32.mrf.mxu1 }
 0x6ae   :  { %v3832_v56 = vpop.f32.mrf.mxu2 }
 0x6af   :  { %v3833_v37 = vadd.f32 %v3832_v56, %v3820_v11 }
 0x6b1   :  { %3836 = vst [vmem:[#allocation2] sm:$0xff] %v3833_v37 }
 0x6b2   :  { %3847 = dma.vmem_to_hbm [thread:$0]  %s3843_s14, 128, %s3845_s16, [#allocation3]  }
 0x6b6   :  { %v3834_v9 = vpop.f32.mrf.mxu2 }
 0x6b7   :  { %5461 = dma.done.wait [#allocation3], 128  }
 0x6b8   :  { %5462 = vsyncadd [#allocation3], 4294967168 }
 0x6b9   :  { %3852 = vsyncpa [#allocation3], 1 }

</bundles_post_ra>
